<compile_context>
chip_gen: v7x
topology: tpu7x:2x2x1
jax: 0.10.0
libtpu: 0.0.40
codegen_flags: <defaults>
</compile_context>

<pallas_src>
import functools

import jax
import jax.numpy as jnp
from jax.experimental import pallas as pl
from jax.experimental.pallas import tpu as pltpu


def _round_up(x, m):
    return (x + m - 1) // m * m


def _vmem_limit_bytes():
    """Generation-aware scoped-VMEM limit.

    v5e/v6e have 128 MiB VMEM per TensorCore, v7x only 64 MiB, and v5e's
    default scoped limit (16 MiB) would not even hold the trunk weights, so
    always set an explicit limit of 3/4 of physical capacity capped at 96 MiB.
    Falls back to a conservative 48 MiB (valid on every generation) if the
    hardware query is unavailable.
    """
    try:
        cap = int(pltpu.get_tpu_info().vmem_capacity_bytes)
    except Exception:
        return 48 * 1024 * 1024
    return min(cap * 3 // 4, 96 * 1024 * 1024)


def _pick_tile_n(dout, n_tile_max):
    """Lane-dense (multiple of 128) output-feature tile.

    When dout is a multiple of 128, pick a divisor of dout so n_pad == dout
    and the final slice/reshape after the kernel is a view, not a copy.
    """
    cap = max(128, (n_tile_max // 128) * 128)
    if dout % 128 == 0:
        for t in range(cap, 127, -128):
            if dout % t == 0:
                return t
        return 128
    return min(cap, _round_up(dout, 128))


# ---------------------------------------------------------------------------
# Kernels
# ---------------------------------------------------------------------------
def _trunk_kernel(x_ref, w1_ref, b1_ref, w2_ref, b2_ref, w3_ref, b3_ref,
                  h3_ref):
    """Layers 1-3 for one batch tile: bf16 weights, f32 MXU accumulation."""
    x = x_ref[...].astype(jnp.bfloat16)
    h1 = jnp.dot(x, w1_ref[...], preferred_element_type=jnp.float32) + b1_ref[...]
    h1 = jnp.maximum(h1, 0.0).astype(jnp.bfloat16)                  # (tb, 512)
    h2 = jnp.dot(h1, w2_ref[...], preferred_element_type=jnp.float32) + b2_ref[...]
    h2 = jnp.maximum(h2, 0.0).astype(jnp.bfloat16)                  # (tb, 1024)
    h3 = jnp.dot(h2, w3_ref[...], preferred_element_type=jnp.float32) + b3_ref[...]
    h3_ref[...] = jnp.maximum(h3, 0.0).astype(jnp.bfloat16)         # (tb, 2048)


def _head_kernel(h3_ref, w4_ref, b4_ref, o_ref):
    """Layer 4 for one (batch tile, w4 column slab) pair + sigmoid epilogue."""
    h4 = jnp.dot(h3_ref[...], w4_ref[...],
                 preferred_element_type=jnp.float32) + b4_ref[...]
    # sigmoid = 1 / (1 + exp(-x)); exp + approx reciprocal both run on the EUP
    # slot.  Clamp so the approximate reciprocal cannot exceed the [0, 1]
    # range of an exact sigmoid.
    sig = pl.reciprocal(1.0 + jnp.exp(-h4), approx=True)
    o_ref[...] = jnp.clip(sig, 0.0, 1.0)                            # (tb, tile_n)


# ---------------------------------------------------------------------------
# Host-side wrappers
# ---------------------------------------------------------------------------
def prepare_decoder_params(params, *, img_size, n_tile=2048):
    """One-time weight prep (hoisted out of the per-call forward path).

    Casts all weights to bf16 (biases stay f32) and lane-pads w4/b4 to a
    multiple of the chosen output-feature tile.  Returns (prepped, tile_n);
    tile_n must be passed to `decoder_forward` as a static argument.
    """
    w1, b1, w2, b2, w3, b3, w4, b4 = params
    dout = 3 * img_size * img_size
    tile_n = _pick_tile_n(dout, n_tile)
    n_pad = _round_up(dout, tile_n)

    w1, w2, w3, w4 = (w.astype(jnp.bfloat16) for w in (w1, w2, w3, w4))
    if n_pad != dout:
        w4 = jnp.pad(w4, ((0, 0), (0, n_pad - dout)))
        b4 = jnp.pad(b4, ((0, 0), (0, n_pad - dout)))
    prepped = (w1, b1, w2, b2, w3, b3, w4, b4)
    return jax.tree_util.tree_map(jnp.asarray, prepped), tile_n


@functools.partial(jax.jit,
                   static_argnames=("img_size", "tile_n", "batch_tile"))
def decoder_forward(latent, prepped, *, img_size, tile_n, batch_tile=512):
    """latent: (B, 2*dim) f32 -> (B, 3, img_size, img_size) f32."""
    w1, b1, w2, b2, w3, b3, w4, b4 = prepped
    B, din = latent.shape
    dout = 3 * img_size * img_size
    n_pad = w4.shape[1]
    assert n_pad % tile_n == 0 and tile_n % 128 == 0

    # Batch tile: big tiles amortize per-grid-step overhead and h3 re-reads;
    # shrink for small batches (multiple of 16 for clean bf16 sublane packing).
    eff_bt = _round_up(min(batch_tile, _round_up(B, 16)), 16)
    b_pad = _round_up(B, eff_bt)
    x = latent if b_pad == B else jnp.pad(latent, ((0, b_pad - B), (0, 0)))

    nb = b_pad // eff_bt          # batch tiles
    ns = n_pad // tile_n          # output-feature slabs
    vmem = _vmem_limit_bytes()

    def pinned(shape):            # whole array resident in VMEM, constant index
        return pl.BlockSpec(shape, lambda i, _s=len(shape): (0,) * _s)

    # ---- call 1: trunk (layers 1-3) per batch tile --------------------------
    h3 = pl.pallas_call(
        _trunk_kernel,
        out_shape=jax.ShapeDtypeStruct((b_pad, 2048), jnp.bfloat16),
        grid_spec=pltpu.PrefetchScalarGridSpec(
            num_scalar_prefetch=0,
            grid=(nb,),
            in_specs=[
                pl.BlockSpec((eff_bt, din), lambda i: (i, 0)),   # latent tile
                pinned(w1.shape), pinned(b1.shape),
                pinned(w2.shape), pinned(b2.shape),
                pinned(w3.shape), pinned(b3.shape),
            ],
            out_specs=pl.BlockSpec((eff_bt, 2048), lambda i: (i, 0)),
        ),
        compiler_params=pltpu.CompilerParams(
            dimension_semantics=("parallel",),
            vmem_limit_bytes=vmem,
        ),
    )(x, w1, b1, w2, b2, w3, b3)

    # ---- call 2: layer 4 + sigmoid ------------------------------------------
    # Grid order: feature slab OUTER, batch tile INNER.  w4/b4 block indices
    # depend only on the outer axis, so each bf16 w4 column slab is DMA'd from
    # HBM exactly once (reused across all batch tiles).  No scratch carry, so
    # both axes are "parallel" (v7x megacore can split the feature slabs even
    # when B fits in a single batch tile).
    flat = pl.pallas_call(
        _head_kernel,
        out_shape=jax.ShapeDtypeStruct((b_pad, n_pad), jnp.float32),
        grid_spec=pltpu.PrefetchScalarGridSpec(
            num_scalar_prefetch=0,
            grid=(ns, nb),
            in_specs=[
                pl.BlockSpec((eff_bt, 2048), lambda j, i: (i, 0)),    # h3 tile
                pl.BlockSpec((2048, tile_n), lambda j, i: (0, j)),    # w4 slab
                pl.BlockSpec((1, tile_n), lambda j, i: (0, j)),       # b4 slab
            ],
            out_specs=pl.BlockSpec((eff_bt, tile_n), lambda j, i: (i, j)),
        ),
        compiler_params=pltpu.CompilerParams(
            dimension_semantics=("parallel", "parallel"),
            vmem_limit_bytes=vmem,
        ),
    )(h3, w4, b4)

    if b_pad == B and n_pad == dout:
        out = flat                       # reshape below is a view, no copy
    else:
        out = flat[:B, :dout]
    return out.reshape((B, 3, img_size, img_size))


def init_decoder_params(key, dim, img_size):
    """Deterministic parameter init matching the PyTorch module's shapes.

    PyTorch Linear weights are (out, in); we store the transposed (in, out)
    so the kernels compute x @ W.  Weights use xavier_uniform (as in
    `_reset_params`; symmetric in fan_in/fan_out so the bound is identical);
    biases use PyTorch's default U(-1/sqrt(fan_in), 1/sqrt(fan_in)).
    Parameters are created in f32; `prepare_decoder_params` casts to bf16.
    """
    d_in = dim * 2
    dims = [d_in, 512, 1024, 2048, 3 * img_size * img_size]
    params = []
    for fan_in, fan_out in zip(dims[:-1], dims[1:]):
        key, kw, kb = jax.random.split(key, 3)
        bound = (6.0 / (fan_in + fan_out)) ** 0.5
        w = jax.random.uniform(kw, (fan_in, fan_out), jnp.float32, -bound, bound)
        b_bound = 1.0 / (fan_in ** 0.5)
        b = jax.random.uniform(kb, (1, fan_out), jnp.float32, -b_bound, b_bound)
        params += [w, b]
    return tuple(params)


if __name__ == "__main__":
    dim = 16          # module input is dim * 2 = 32 features
    img_size = 16     # output (B, 3, 16, 16), dout = 768
    batch = 24        # not a multiple of the small test batch tile -> padding

    key = jax.random.PRNGKey(0)
    k_lat, k_par = jax.random.split(key)
    latent = jax.random.normal(k_lat, (batch, dim * 2), jnp.float32)
    params = init_decoder_params(k_par, dim, img_size)

    # Pure-JAX f32 reference (kernel uses bf16 weights -> ~1e-2 abs error).
    w1, b1, w2, b2, w3, b3, w4, b4 = params
    h = jnp.maximum(latent @ w1 + b1, 0.0)
    h = jnp.maximum(h @ w2 + b2, 0.0)
    h = jnp.maximum(h @ w3 + b3, 0.0)
    ref = jax.nn.sigmoid(h @ w4 + b4).reshape(batch, 3, img_size, img_size)

    def check(out):
        out = jax.block_until_ready(out)
        assert out.shape == (batch, 3, img_size, img_size), out.shape
        assert out.dtype == jnp.float32
        assert bool(jnp.all(out >= 0.0)) and bool(jnp.all(out <= 1.0))
        max_err = float(jnp.max(jnp.abs(out - ref)))
        assert max_err < 2e-2, f"max abs err {max_err}"

    # 1) Tiny tiles: forces several w4 slabs (ns=3) and several batch tiles
    #    (nb=2, with row padding) so the slab-reuse / multi-tile path is hit.
    prepped_s, tile_n_s = prepare_decoder_params(params, img_size=img_size,
                                                 n_tile=256)
    check(decoder_forward(latent, prepped_s, img_size=img_size,
                          tile_n=tile_n_s, batch_tile=16))

    # 2) Default (performance) configuration.
    prepped, tile_n = prepare_decoder_params(params, img_size=img_size)
    check(decoder_forward(latent, prepped, img_size=img_size, tile_n=tile_n))

    print("KERNEL_OK")
</pallas_src>

<mosaic_0001>
module attributes {stable_mosaic.version = 11 : i64} {
  func.func @_head_kernel(%arg0: i32, %arg1: i32, %arg2: memref<16x2048xbf16, #tpu.memory_space<vmem>>, %arg3: memref<2048x256xbf16, #tpu.memory_space<vmem>>, %arg4: memref<1x256xf32, #tpu.memory_space<vmem>>, %arg5: memref<16x256xf32, #tpu.memory_space<vmem>>) attributes {dimension_semantics = [#tpu.dimension_semantics<parallel>, #tpu.dimension_semantics<parallel>], iteration_bounds = array<i64: 3, 2>, scalar_prefetch = 0 : i64, scratch_operands = 0 : i64, tpu.core_type = #tpu.core_type<tc>, window_params = [{transform_indices = @transform_0, window_bounds = array<i64: 16, 2048>}, {transform_indices = @transform_1, window_bounds = array<i64: 2048, 256>}, {transform_indices = @transform_2, window_bounds = array<i64: 1, 256>}, {transform_indices = @transform_3, window_bounds = array<i64: 16, 256>}]} {
    %c0 = arith.constant 0 : index
    %c0_0 = arith.constant 0 : index
    %0 = vector.load %arg2[%c0, %c0_0] : memref<16x2048xbf16, #tpu.memory_space<vmem>>, vector<16x2048xbf16>
    %c0_1 = arith.constant 0 : index
    %c0_2 = arith.constant 0 : index
    %1 = vector.load %arg3[%c0_1, %c0_2] : memref<2048x256xbf16, #tpu.memory_space<vmem>>, vector<2048x256xbf16>
    %cst = arith.constant dense<0.000000e+00> : vector<16x256xf32>
    %2 = tpu.matmul %0, %1, %cst {dimension_numbers = #tpu.dot_dimension_numbers<[1], [0], [0], [1], [0, 0, 1, 1], [], []>} : vector<16x2048xbf16>, vector<2048x256xbf16>, vector<16x256xf32> -> vector<16x256xf32>
    %c0_3 = arith.constant 0 : index
    %c0_4 = arith.constant 0 : index
    %3 = vector.load %arg4[%c0_3, %c0_4] : memref<1x256xf32, #tpu.memory_space<vmem>>, vector<1x256xf32>
    %4 = vector.broadcast %3 : vector<1x256xf32> to vector<16x256xf32>
    %5 = arith.addf %2, %4 : vector<16x256xf32>
    %cst_5 = arith.constant 0.000000e+00 : f32
    %6 = vector.broadcast %cst_5 : f32 to vector<16x256xf32>
    %7 = arith.subf %6, %5 : vector<16x256xf32>
    %8 = math.exp %7 : vector<16x256xf32>
    %cst_6 = arith.constant 1.000000e+00 : f32
    %9 = vector.broadcast %cst_6 : f32 to vector<16x256xf32>
    %10 = arith.addf %9, %8 : vector<16x256xf32>
    %11 = tpu.reciprocal %10 {approx = true} : vector<16x256xf32> -> vector<16x256xf32>
    %cst_7 = arith.constant 0.000000e+00 : f32
    %cst_8 = arith.constant 1.000000e+00 : f32
    %12 = vector.broadcast %cst_7 : f32 to vector<16x256xf32>
    %13 = arith.maximumf %12, %11 : vector<16x256xf32>
    %14 = vector.broadcast %cst_8 : f32 to vector<16x256xf32>
    %15 = arith.minimumf %14, %13 : vector<16x256xf32>
    %c0_9 = arith.constant 0 : index
    %c0_10 = arith.constant 0 : index
    %16 = vector.load %arg5[%c0_9, %c0_10] : memref<16x256xf32, #tpu.memory_space<vmem>>, vector<16x256xf32>
    tpu.vector_store %arg5[%c0_9, %c0_10], %15 {strides = array<i32>} : memref<16x256xf32, #tpu.memory_space<vmem>>, vector<16x256xf32>,
    return
  }
  func.func @transform_0(%arg0: i32, %arg1: i32) -> (i32, i32) {
    %c0_i32 = arith.constant 0 : i32
    %c0_i32_0 = arith.constant 0 : i32
    return %arg1, %c0_i32 : i32, i32
  }
  func.func @transform_1(%arg0: i32, %arg1: i32) -> (i32, i32) {
    %c0_i32 = arith.constant 0 : i32
    %c0_i32_0 = arith.constant 0 : i32
    return %c0_i32, %arg0 : i32, i32
  }
  func.func @transform_2(%arg0: i32, %arg1: i32) -> (i32, i32) {
    %c0_i32 = arith.constant 0 : i32
    %c0_i32_0 = arith.constant 0 : i32
    return %c0_i32, %arg0 : i32, i32
  }
  func.func @transform_3(%arg0: i32, %arg1: i32) -> (i32, i32) {
    %c0_i32 = arith.constant 0 : i32
    return %arg1, %arg0 : i32, i32
  }
}

module attributes {stable_mosaic.version = 11 : i64} {
  func.func @_trunk_kernel(%arg0: i32, %arg1: memref<16x32xf32, #tpu.memory_space<vmem>>, %arg2: memref<32x512xbf16, #tpu.memory_space<vmem>>, %arg3: memref<1x512xf32, #tpu.memory_space<vmem>>, %arg4: memref<512x1024xbf16, #tpu.memory_space<vmem>>, %arg5: memref<1x1024xf32, #tpu.memory_space<vmem>>, %arg6: memref<1024x2048xbf16, #tpu.memory_space<vmem>>, %arg7: memref<1x2048xf32, #tpu.memory_space<vmem>>, %arg8: memref<16x2048xbf16, #tpu.memory_space<vmem>>) attributes {dimension_semantics = [#tpu.dimension_semantics<parallel>], iteration_bounds = array<i64: 2>, scalar_prefetch = 0 : i64, scratch_operands = 0 : i64, tpu.core_type = #tpu.core_type<tc>, window_params = [{transform_indices = @transform_0, window_bounds = array<i64: 16, 32>}, {pipeline_mode = #tpu.pipeline_mode<synchronous>, transform_indices = @transform_1, window_bounds = array<i64: 32, 512>}, {pipeline_mode = #tpu.pipeline_mode<synchronous>, transform_indices = @transform_2, window_bounds = array<i64: 1, 512>}, {pipeline_mode = #tpu.pipeline_mode<synchronous>, transform_indices = @transform_3, window_bounds = array<i64: 512, 1024>}, {pipeline_mode = #tpu.pipeline_mode<synchronous>, transform_indices = @transform_4, window_bounds = array<i64: 1, 1024>}, {pipeline_mode = #tpu.pipeline_mode<synchronous>, transform_indices = @transform_5, window_bounds = array<i64: 1024, 2048>}, {pipeline_mode = #tpu.pipeline_mode<synchronous>, transform_indices = @transform_6, window_bounds = array<i64: 1, 2048>}, {transform_indices = @transform_7, window_bounds = array<i64: 16, 2048>}]} {
    %c0 = arith.constant 0 : index
    %c0_0 = arith.constant 0 : index
    %0 = vector.load %arg1[%c0, %c0_0] : memref<16x32xf32, #tpu.memory_space<vmem>>, vector<16x32xf32>
    %1 = arith.truncf %0 : vector<16x32xf32> to vector<16x32xbf16>
    %c0_1 = arith.constant 0 : index
    %c0_2 = arith.constant 0 : index
    %2 = vector.load %arg2[%c0_1, %c0_2] : memref<32x512xbf16, #tpu.memory_space<vmem>>, vector<32x512xbf16>
    %cst = arith.constant dense<0.000000e+00> : vector<16x512xf32>
    %3 = tpu.matmul %1, %2, %cst {dimension_numbers = #tpu.dot_dimension_numbers<[1], [0], [0], [1], [0, 0, 1, 1], [], []>} : vector<16x32xbf16>, vector<32x512xbf16>, vector<16x512xf32> -> vector<16x512xf32>
    %c0_3 = arith.constant 0 : index
    %c0_4 = arith.constant 0 : index
    %4 = vector.load %arg3[%c0_3, %c0_4] : memref<1x512xf32, #tpu.memory_space<vmem>>, vector<1x512xf32>
    %5 = vector.broadcast %4 : vector<1x512xf32> to vector<16x512xf32>
    %6 = arith.addf %3, %5 : vector<16x512xf32>
    %cst_5 = arith.constant 0.000000e+00 : f32
    %7 = vector.broadcast %cst_5 : f32 to vector<16x512xf32>
    %8 = arith.maximumf %6, %7 : vector<16x512xf32>
    %9 = arith.truncf %8 : vector<16x512xf32> to vector<16x512xbf16>
    %c0_6 = arith.constant 0 : index
    %c0_7 = arith.constant 0 : index
    %10 = vector.load %arg4[%c0_6, %c0_7] : memref<512x1024xbf16, #tpu.memory_space<vmem>>, vector<512x1024xbf16>
    %cst_8 = arith.constant dense<0.000000e+00> : vector<16x1024xf32>
    %11 = tpu.matmul %9, %10, %cst_8 {dimension_numbers = #tpu.dot_dimension_numbers<[1], [0], [0], [1], [0, 0, 1, 1], [], []>} : vector<16x512xbf16>, vector<512x1024xbf16>, vector<16x1024xf32> -> vector<16x1024xf32>
    %c0_9 = arith.constant 0 : index
    %c0_10 = arith.constant 0 : index
    %12 = vector.load %arg5[%c0_9, %c0_10] : memref<1x1024xf32, #tpu.memory_space<vmem>>, vector<1x1024xf32>
    %13 = vector.broadcast %12 : vector<1x1024xf32> to vector<16x1024xf32>
    %14 = arith.addf %11, %13 : vector<16x1024xf32>
    %cst_11 = arith.constant 0.000000e+00 : f32
    %15 = vector.broadcast %cst_11 : f32 to vector<16x1024xf32>
    %16 = arith.maximumf %14, %15 : vector<16x1024xf32>
    %17 = arith.truncf %16 : vector<16x1024xf32> to vector<16x1024xbf16>
    %c0_12 = arith.constant 0 : index
    %c0_13 = arith.constant 0 : index
    %18 = vector.load %arg6[%c0_12, %c0_13] : memref<1024x2048xbf16, #tpu.memory_space<vmem>>, vector<1024x2048xbf16>
    %cst_14 = arith.constant dense<0.000000e+00> : vector<16x2048xf32>
    %19 = tpu.matmul %17, %18, %cst_14 {dimension_numbers = #tpu.dot_dimension_numbers<[1], [0], [0], [1], [0, 0, 1, 1], [], []>} : vector<16x1024xbf16>, vector<1024x2048xbf16>, vector<16x2048xf32> -> vector<16x2048xf32>
    %c0_15 = arith.constant 0 : index
    %c0_16 = arith.constant 0 : index
    %20 = vector.load %arg7[%c0_15, %c0_16] : memref<1x2048xf32, #tpu.memory_space<vmem>>, vector<1x2048xf32>
    %21 = vector.broadcast %20 : vector<1x2048xf32> to vector<16x2048xf32>
    %22 = arith.addf %19, %21 : vector<16x2048xf32>
    %cst_17 = arith.constant 0.000000e+00 : f32
    %23 = vector.broadcast %cst_17 : f32 to vector<16x2048xf32>
    %24 = arith.maximumf %22, %23 : vector<16x2048xf32>
    %25 = arith.truncf %24 : vector<16x2048xf32> to vector<16x2048xbf16>
    %c0_18 = arith.constant 0 : index
    %c0_19 = arith.constant 0 : index
    %26 = vector.load %arg8[%c0_18, %c0_19] : memref<16x2048xbf16, #tpu.memory_space<vmem>>, vector<16x2048xbf16>
    tpu.vector_store %arg8[%c0_18, %c0_19], %25 {strides = array<i32>} : memref<16x2048xbf16, #tpu.memory_space<vmem>>, vector<16x2048xbf16>,
    return
  }
  func.func @transform_0(%arg0: i32) -> (i32, i32) {
    %c0_i32 = arith.constant 0 : i32
    %c0_i32_0 = arith.constant 0 : i32
    return %arg0, %c0_i32 : i32, i32
  }
  func.func @transform_1(%arg0: i32) -> (i32, i32) {
    %c0_i32 = arith.constant 0 : i32
    %c0_i32_0 = arith.constant 0 : i32
    %c0_i32_1 = arith.constant 0 : i32
    return %c0_i32, %c0_i32_0 : i32, i32
  }
  func.func @transform_2(%arg0: i32) -> (i32, i32) {
    %c0_i32 = arith.constant 0 : i32
    %c0_i32_0 = arith.constant 0 : i32
    %c0_i32_1 = arith.constant 0 : i32
    return %c0_i32, %c0_i32_0 : i32, i32
  }
  func.func @transform_3(%arg0: i32) -> (i32, i32) {
    %c0_i32 = arith.constant 0 : i32
    %c0_i32_0 = arith.constant 0 : i32
    %c0_i32_1 = arith.constant 0 : i32
    return %c0_i32, %c0_i32_0 : i32, i32
  }
  func.func @transform_4(%arg0: i32) -> (i32, i32) {
    %c0_i32 = arith.constant 0 : i32
    %c0_i32_0 = arith.constant 0 : i32
    %c0_i32_1 = arith.constant 0 : i32
    return %c0_i32, %c0_i32_0 : i32, i32
  }
  func.func @transform_5(%arg0: i32) -> (i32, i32) {
    %c0_i32 = arith.constant 0 : i32
    %c0_i32_0 = arith.constant 0 : i32
    %c0_i32_1 = arith.constant 0 : i32
    return %c0_i32, %c0_i32_0 : i32, i32
  }
  func.func @transform_6(%arg0: i32) -> (i32, i32) {
    %c0_i32 = arith.constant 0 : i32
    %c0_i32_0 = arith.constant 0 : i32
    %c0_i32_1 = arith.constant 0 : i32
    return %c0_i32, %c0_i32_0 : i32, i32
  }
  func.func @transform_7(%arg0: i32) -> (i32, i32) {
    %c0_i32 = arith.constant 0 : i32
    %c0_i32_0 = arith.constant 0 : i32
    return %arg0, %c0_i32 : i32, i32
  }
}

</mosaic_0001>

<bundles_post_ra>
// kernel: decoder_forward.3
= control target key start
LH: loop header
LB: loop body
LE: loop exit
PB: predicated region body
PF: predicated region fallthrough
CT: control target
= control target key end

     0   :  { %s4321_s12 = smov 0   ;;  %s4323_s13 = smov 0   ;;  %s5297_s0 = inlined_call_operand.vmem [shape: bf16[32,2048], index: 0, kind: input, shape index: {}]   ;;  %s5298_s1 = inlined_call_operand.vmem [shape: bf16[2048,768], index: 1, kind: input, shape index: {}]   ;;  %s5299_s2 = inlined_call_operand.vmem [shape: f32[1,768], index: 2, kind: input, shape index: {}]   ;;  %s5300_s3 = inlined_call_operand.vmem [shape: f32[32,768], index: 3, kind: output, shape index: {}]  }
   0x1   :  { %s4325_s14 = smov 0   ;;  %s4327_s15 = smov 0  }
   0x2   :  { %s4329_s16 = smov 0   ;;  %s4331_s17 = smov 0  }
   0x3   :  { %s4333_s18 = smov 0   ;;  %s4335_s19 = smov 0  }
   0x4   :  { %s4337_s20 = smov 0  }
   0x5 LB: > { %s22_s21 = sadd.s32 1, %s4291_s18  ;;  %s25_s22 = sadd.s32 1, %s4295_s19  ;;  %s4299_s20 = sphi %s4337_s20, %s13_s20   ;;  %s4295_s19 = sphi %s4335_s19, %s5310_s19   ;;  %s4291_s18 = sphi %s4333_s18, %s5309_s18   ;;  %s4287_s17 = sphi %s4331_s17, %s5308_s17   ;;  %s4283_s16 = sphi %s4329_s16, %s5307_s16   ;;  %s4279_s15 = sphi %s4327_s15, %s5306_s15   ;;  %s4275_s14 = sphi %s4325_s14, %s5305_s14   ;;  %s4271_s13 = sphi %s4323_s13, %s5304_s13   ;;  %s4267_s12 = sphi %s4321_s12, %s5303_s12  }
   0x6   : > { %p23_p0 = scmp.ge.s32.totalorder %s22_s21, 2  ;;  %p65_p1 = scmp.ne.s32.totalorder %s4279_s15, %s4275_s14 }
   0x7   : > { %s3429_s23 = sadd.s32 4294967295, %s4299_s20   ;;  %p66_p2 = scmp.eq.s32.totalorder %s4299_s20, 0 }
   0x8   : > { %s5312_s21 = smov (%p23_p0, %s22_s21), 0  ;;  %s5314_s22 = smov (!%p23_p0, %s25_s22), %s4295_s19 }
   0x9   : > { %p27_p3 = scmp.ge.s32.totalorder %s5314_s22, 3  ;;  %s107_s24 = ssub.s32 %s4291_s18, %s5312_s21 }
   0xa   : > { %p4377_p4 = por %p66_p2, %p65_p1  ;;  %p122_p5 = scmp.ne.s32.totalorder %s4271_s13, %s4267_s12 }
   0xb   : > { %s5316_s22 = smov (%p27_p3, %s5314_s22), 0  ;;  %s58_s26 = sadd.s32 1, %s4279_s15 }
   0xc   : > { %p123_p6 = scmp.eq.s32.totalorder %s3429_s23, 5  ;;  %s55_s27 = ssub.s32 %s4295_s19, %s5316_s22 }
   0xd   : > { %s112_s28 = sadd.s32 1, %s4271_s13  ;;  %p56_p7 = scmp.eq.s32.totalorder %s55_s27, 0 }
   0xe   : > { %s109_s29 = sor.u32 %s107_s24, %s55_s27  ;;  %p4389_p9 = por %p123_p6, %p122_p5 }
   0xf   : > { %p110_p8 = scmp.eq.s32.totalorder %s109_s29, 0  ;;  %p3432_p10 = scmp.ge.s32.totalorder %s4299_s20, 6 }
  0x10   : > { %s4394_s4 = scalar_select %p56_p7, %s4279_s15, %s58_s26  }
  0x11   : > { %s4397_s5 = scalar_select %p110_p8, %s4271_s13, %s112_s28  }
  0x12   : > { %145 = sbr.rel (%p3432_p10) target bundleno = 157 (0x9d), region = 16 }
  0x19   : > { %158 = sbr.rel (!%p4377_p4) target bundleno = 157 (0x9d), region = 24  ;;  %s160_s6 = sand.u32 (%p4377_p4), 1, %s4279_s15  }
  0x1a   : > { %s3722_s7 = sshll.u32 (%p4377_p4), %s4295_s19, 3  ;;  %s3433_s8 = sshll.u32 (%p4377_p4), %s160_s6, 11 }
  0x1b   : > { %s4407_s11 = scalar_lea.vmem (%p4377_p4), %s5298_s1, %s3722_s7  ;;  %s4412_s23 = scalar_lea.vmem (%p4377_p4), [#allocation2], %s3433_s8 }
  0x1c   : > { %v703_v0 = vld [vmem:[%s4407_s11] sm:$0xff] (%p4377_p4)  ;;  %v705_v1 = vld [vmem:[%s4407_s11 + $0x18] sm:$0xff] (%p4377_p4)  ;;  %v707_v2 = vld [vmem:[%s4407_s11 + $0x30] sm:$0xff] (%p4377_p4) }
  0x1d   : > { %704 = vst [vmem:[%s4412_s23] sm:$0xff] (%p4377_p4), %v703_v0  ;;  %706 = vst [vmem:[%s4412_s23 + $0x8] sm:$0xff] (%p4377_p4), %v705_v1  ;;  %v709_v3 = vld [vmem:[%s4407_s11 + $0x48] sm:$0xff] (%p4377_p4)  ;;  %v711_v4 = vld [vmem:[%s4407_s11 + $0x60] sm:$0xff] (%p4377_p4) }
  0x1e   : > { %708 = vst [vmem:[%s4412_s23 + $0x10] sm:$0xff] (%p4377_p4), %v707_v2  ;;  %v713_v5 = vld [vmem:[%s4407_s11 + $0x78] sm:$0xff] (%p4377_p4)  ;;  %710 = vst [vmem:[%s4412_s23 + $0x18] sm:$0xff] (%p4377_p4), %v709_v3  ;;  %v715_v6 = vld [vmem:[%s4407_s11 + $0x90] sm:$0xff] (%p4377_p4) }
  0x1f   : > { %712 = vst [vmem:[%s4412_s23 + $0x20] sm:$0xff] (%p4377_p4), %v711_v4  ;;  %714 = vst [vmem:[%s4412_s23 + $0x28] sm:$0xff] (%p4377_p4), %v713_v5  ;;  %v717_v7 = vld [vmem:[%s4407_s11 + $0xa8] sm:$0xff] (%p4377_p4)  ;;  %v719_v8 = vld [vmem:[%s4407_s11 + $0xc0] sm:$0xff] (%p4377_p4) }
  0x20   : > { %716 = vst [vmem:[%s4412_s23 + $0x30] sm:$0xff] %v715_v6  ;;  %718 = vst [vmem:[%s4412_s23 + $0x38] sm:$0xff] %v717_v7  ;;  %v721_v9 = vld [vmem:[%s4407_s11 + $0xd8] sm:$0xff]  ;;  %v723_v10 = vld [vmem:[%s4407_s11 + $0xf0] sm:$0xff] }
  0x21   : > { %720 = vst [vmem:[%s4412_s23 + $0x40] sm:$0xff] %v719_v8  ;;  %v725_v11 = vld [vmem:[%s4407_s11 + $0x108] sm:$0xff]  ;;  %722 = vst [vmem:[%s4412_s23 + $0x48] sm:$0xff] %v721_v9  ;;  %v727_v12 = vld [vmem:[%s4407_s11 + $0x120] sm:$0xff] }
  0x22   : > { %724 = vst [vmem:[%s4412_s23 + $0x50] sm:$0xff] %v723_v10  ;;  %726 = vst [vmem:[%s4412_s23 + $0x58] sm:$0xff] %v725_v11  ;;  %v729_v13 = vld [vmem:[%s4407_s11 + $0x138] sm:$0xff]  ;;  %v731_v14 = vld [vmem:[%s4407_s11 + $0x150] sm:$0xff] }
  0x23   : > { %728 = vst [vmem:[%s4412_s23 + $0x60] sm:$0xff] %v727_v12  ;;  %730 = vst [vmem:[%s4412_s23 + $0x68] sm:$0xff] %v729_v13  ;;  %v733_v15 = vld [vmem:[%s4407_s11 + $0x168] sm:$0xff]  ;;  %v735_v16 = vld [vmem:[%s4407_s11 + $0x180] sm:$0xff] }
  0x24   : > { %732 = vst [vmem:[%s4412_s23 + $0x70] sm:$0xff] %v731_v14  ;;  %v737_v17 = vld [vmem:[%s4407_s11 + $0x198] sm:$0xff]  ;;  %734 = vst [vmem:[%s4412_s23 + $0x78] sm:$0xff] %v733_v15  ;;  %v739_v18 = vld [vmem:[%s4407_s11 + $0x1b0] sm:$0xff] }
  0x25   : > { %736 = vst [vmem:[%s4412_s23 + $0x80] sm:$0xff] %v735_v16  ;;  %738 = vst [vmem:[%s4412_s23 + $0x88] sm:$0xff] %v737_v17  ;;  %v741_v19 = vld [vmem:[%s4407_s11 + $0x1c8] sm:$0xff]  ;;  %v743_v20 = vld [vmem:[%s4407_s11 + $0x1e0] sm:$0xff] }
  0x26   : > { %740 = vst [vmem:[%s4412_s23 + $0x90] sm:$0xff] %v739_v18  ;;  %742 = vst [vmem:[%s4412_s23 + $0x98] sm:$0xff] %v741_v19  ;;  %v745_v21 = vld [vmem:[%s4407_s11 + $0x1f8] sm:$0xff]  ;;  %v747_v22 = vld [vmem:[%s4407_s11 + $0x210] sm:$0xff] }
  0x27   : > { %744 = vst [vmem:[%s4412_s23 + $0xa0] sm:$0xff] %v743_v20  ;;  %v749_v23 = vld [vmem:[%s4407_s11 + $0x228] sm:$0xff]  ;;  %746 = vst [vmem:[%s4412_s23 + $0xa8] sm:$0xff] %v745_v21  ;;  %v751_v24 = vld [vmem:[%s4407_s11 + $0x240] sm:$0xff] }
  0x28   : > { %748 = vst [vmem:[%s4412_s23 + $0xb0] sm:$0xff] %v747_v22  ;;  %750 = vst [vmem:[%s4412_s23 + $0xb8] sm:$0xff] %v749_v23  ;;  %v753_v25 = vld [vmem:[%s4407_s11 + $0x258] sm:$0xff]  ;;  %v755_v26 = vld [vmem:[%s4407_s11 + $0x270] sm:$0xff] }
  0x29   : > { %752 = vst [vmem:[%s4412_s23 + $0xc0] sm:$0xff] %v751_v24  ;;  %754 = vst [vmem:[%s4412_s23 + $0xc8] sm:$0xff] %v753_v25  ;;  %v757_v27 = vld [vmem:[%s4407_s11 + $0x288] sm:$0xff]  ;;  %v759_v28 = vld [vmem:[%s4407_s11 + $0x2a0] sm:$0xff] }
  0x2a   : > { %756 = vst [vmem:[%s4412_s23 + $0xd0] sm:$0xff] %v755_v26  ;;  %v761_v29 = vld [vmem:[%s4407_s11 + $0x2b8] sm:$0xff]  ;;  %758 = vst [vmem:[%s4412_s23 + $0xd8] sm:$0xff] %v757_v27  ;;  %v763_v30 = vld [vmem:[%s4407_s11 + $0x2d0] sm:$0xff] }
  0x2b   : > { %760 = vst [vmem:[%s4412_s23 + $0xe0] sm:$0xff] %v759_v28  ;;  %762 = vst [vmem:[%s4412_s23 + $0xe8] sm:$0xff] %v761_v29  ;;  %v765_v31 = vld [vmem:[%s4407_s11 + $0x2e8] sm:$0xff]  ;;  %v767_v32 = vld [vmem:[%s4407_s11 + $0x300] sm:$0xff] }
  0x2c   : > { %764 = vst [vmem:[%s4412_s23 + $0xf0] sm:$0xff] %v763_v30  ;;  %766 = vst [vmem:[%s4412_s23 + $0xf8] sm:$0xff] %v765_v31  ;;  %v769_v33 = vld [vmem:[%s4407_s11 + $0x318] sm:$0xff]  ;;  %v771_v34 = vld [vmem:[%s4407_s11 + $0x330] sm:$0xff] }
  0x2d   : > { %768 = vst [vmem:[%s4412_s23 + $0x100] sm:$0xff] %v767_v32  ;;  %v773_v35 = vld [vmem:[%s4407_s11 + $0x348] sm:$0xff]  ;;  %770 = vst [vmem:[%s4412_s23 + $0x108] sm:$0xff] %v769_v33  ;;  %v775_v36 = vld [vmem:[%s4407_s11 + $0x360] sm:$0xff] }
  0x2e   : > { %772 = vst [vmem:[%s4412_s23 + $0x110] sm:$0xff] %v771_v34  ;;  %774 = vst [vmem:[%s4412_s23 + $0x118] sm:$0xff] %v773_v35  ;;  %v777_v37 = vld [vmem:[%s4407_s11 + $0x378] sm:$0xff]  ;;  %v779_v38 = vld [vmem:[%s4407_s11 + $0x390] sm:$0xff] }
  0x2f   : > { %776 = vst [vmem:[%s4412_s23 + $0x120] sm:$0xff] %v775_v36  ;;  %778 = vst [vmem:[%s4412_s23 + $0x128] sm:$0xff] %v777_v37  ;;  %v781_v39 = vld [vmem:[%s4407_s11 + $0x3a8] sm:$0xff]  ;;  %v783_v40 = vld [vmem:[%s4407_s11 + $0x3c0] sm:$0xff] }
  0x30   : > { %780 = vst [vmem:[%s4412_s23 + $0x130] sm:$0xff] %v779_v38  ;;  %v785_v41 = vld [vmem:[%s4407_s11 + $0x3d8] sm:$0xff]  ;;  %782 = vst [vmem:[%s4412_s23 + $0x138] sm:$0xff] %v781_v39  ;;  %v787_v42 = vld [vmem:[%s4407_s11 + $0x3f0] sm:$0xff] }
  0x31   : > { %784 = vst [vmem:[%s4412_s23 + $0x140] sm:$0xff] %v783_v40  ;;  %786 = vst [vmem:[%s4412_s23 + $0x148] sm:$0xff] %v785_v41  ;;  %v789_v43 = vld [vmem:[%s4407_s11 + $0x408] sm:$0xff]  ;;  %v791_v44 = vld [vmem:[%s4407_s11 + $0x420] sm:$0xff] }
  0x32   : > { %788 = vst [vmem:[%s4412_s23 + $0x150] sm:$0xff] %v787_v42  ;;  %790 = vst [vmem:[%s4412_s23 + $0x158] sm:$0xff] %v789_v43  ;;  %v793_v45 = vld [vmem:[%s4407_s11 + $0x438] sm:$0xff]  ;;  %v795_v46 = vld [vmem:[%s4407_s11 + $0x450] sm:$0xff] }
  0x33   : > { %792 = vst [vmem:[%s4412_s23 + $0x160] sm:$0xff] %v791_v44  ;;  %v797_v47 = vld [vmem:[%s4407_s11 + $0x468] sm:$0xff]  ;;  %794 = vst [vmem:[%s4412_s23 + $0x168] sm:$0xff] %v793_v45  ;;  %v799_v48 = vld [vmem:[%s4407_s11 + $0x480] sm:$0xff] }
  0x34   : > { %796 = vst [vmem:[%s4412_s23 + $0x170] sm:$0xff] %v795_v46  ;;  %798 = vst [vmem:[%s4412_s23 + $0x178] sm:$0xff] %v797_v47  ;;  %v801_v49 = vld [vmem:[%s4407_s11 + $0x498] sm:$0xff]  ;;  %v803_v50 = vld [vmem:[%s4407_s11 + $0x4b0] sm:$0xff] }
  0x35   : > { %800 = vst [vmem:[%s4412_s23 + $0x180] sm:$0xff] %v799_v48  ;;  %802 = vst [vmem:[%s4412_s23 + $0x188] sm:$0xff] %v801_v49  ;;  %v805_v51 = vld [vmem:[%s4407_s11 + $0x4c8] sm:$0xff]  ;;  %v807_v52 = vld [vmem:[%s4407_s11 + $0x4e0] sm:$0xff] }
  0x36   : > { %804 = vst [vmem:[%s4412_s23 + $0x190] sm:$0xff] %v803_v50  ;;  %v809_v53 = vld [vmem:[%s4407_s11 + $0x4f8] sm:$0xff]  ;;  %806 = vst [vmem:[%s4412_s23 + $0x198] sm:$0xff] %v805_v51  ;;  %v811_v54 = vld [vmem:[%s4407_s11 + $0x510] sm:$0xff] }
  0x37   : > { %808 = vst [vmem:[%s4412_s23 + $0x1a0] sm:$0xff] %v807_v52  ;;  %810 = vst [vmem:[%s4412_s23 + $0x1a8] sm:$0xff] %v809_v53  ;;  %v813_v55 = vld [vmem:[%s4407_s11 + $0x528] sm:$0xff]  ;;  %v815_v56 = vld [vmem:[%s4407_s11 + $0x540] sm:$0xff] }
  0x38   : > { %812 = vst [vmem:[%s4412_s23 + $0x1b0] sm:$0xff] %v811_v54  ;;  %814 = vst [vmem:[%s4412_s23 + $0x1b8] sm:$0xff] %v813_v55  ;;  %v817_v57 = vld [vmem:[%s4407_s11 + $0x558] sm:$0xff]  ;;  %v819_v58 = vld [vmem:[%s4407_s11 + $0x570] sm:$0xff] }
  0x39   : > { %816 = vst [vmem:[%s4412_s23 + $0x1c0] sm:$0xff] %v815_v56  ;;  %v821_v59 = vld [vmem:[%s4407_s11 + $0x588] sm:$0xff]  ;;  %818 = vst [vmem:[%s4412_s23 + $0x1c8] sm:$0xff] %v817_v57  ;;  %v823_v60 = vld [vmem:[%s4407_s11 + $0x5a0] sm:$0xff] }
  0x3a   : > { %820 = vst [vmem:[%s4412_s23 + $0x1d0] sm:$0xff] %v819_v58  ;;  %822 = vst [vmem:[%s4412_s23 + $0x1d8] sm:$0xff] %v821_v59  ;;  %v825_v61 = vld [vmem:[%s4407_s11 + $0x5b8] sm:$0xff]  ;;  %v827_v62 = vld [vmem:[%s4407_s11 + $0x5d0] sm:$0xff] }
  0x3b   : > { %824 = vst [vmem:[%s4412_s23 + $0x1e0] sm:$0xff] %v823_v60  ;;  %826 = vst [vmem:[%s4412_s23 + $0x1e8] sm:$0xff] %v825_v61  ;;  %v829_v63 = vld [vmem:[%s4407_s11 + $0x5e8] sm:$0xff]  ;;  %v831_v0 = vld [vmem:[%s4407_s11 + $0x600] sm:$0xff] }
  0x3c   : > { %828 = vst [vmem:[%s4412_s23 + $0x1f0] sm:$0xff] %v827_v62  ;;  %v833_v1 = vld [vmem:[%s4407_s11 + $0x618] sm:$0xff]  ;;  %830 = vst [vmem:[%s4412_s23 + $0x1f8] sm:$0xff] %v829_v63  ;;  %v835_v2 = vld [vmem:[%s4407_s11 + $0x630] sm:$0xff] }
  0x3d   : > { %832 = vst [vmem:[%s4412_s23 + $0x200] sm:$0xff] %v831_v0  ;;  %834 = vst [vmem:[%s4412_s23 + $0x208] sm:$0xff] %v833_v1  ;;  %v837_v3 = vld [vmem:[%s4407_s11 + $0x648] sm:$0xff]  ;;  %v839_v4 = vld [vmem:[%s4407_s11 + $0x660] sm:$0xff] }
  0x3e   : > { %836 = vst [vmem:[%s4412_s23 + $0x210] sm:$0xff] %v835_v2  ;;  %838 = vst [vmem:[%s4412_s23 + $0x218] sm:$0xff] %v837_v3  ;;  %v841_v5 = vld [vmem:[%s4407_s11 + $0x678] sm:$0xff]  ;;  %v843_v6 = vld [vmem:[%s4407_s11 + $0x690] sm:$0xff] }
  0x3f   : > { %840 = vst [vmem:[%s4412_s23 + $0x220] sm:$0xff] %v839_v4  ;;  %v845_v7 = vld [vmem:[%s4407_s11 + $0x6a8] sm:$0xff]  ;;  %842 = vst [vmem:[%s4412_s23 + $0x228] sm:$0xff] %v841_v5  ;;  %v847_v8 = vld [vmem:[%s4407_s11 + $0x6c0] sm:$0xff] }
  0x40   : > { %844 = vst [vmem:[%s4412_s23 + $0x230] sm:$0xff] %v843_v6  ;;  %846 = vst [vmem:[%s4412_s23 + $0x238] sm:$0xff] %v845_v7  ;;  %v849_v9 = vld [vmem:[%s4407_s11 + $0x6d8] sm:$0xff]  ;;  %v851_v10 = vld [vmem:[%s4407_s11 + $0x6f0] sm:$0xff] }
  0x41   : > { %848 = vst [vmem:[%s4412_s23 + $0x240] sm:$0xff] %v847_v8  ;;  %850 = vst [vmem:[%s4412_s23 + $0x248] sm:$0xff] %v849_v9  ;;  %v853_v11 = vld [vmem:[%s4407_s11 + $0x708] sm:$0xff]  ;;  %v855_v12 = vld [vmem:[%s4407_s11 + $0x720] sm:$0xff] }
  0x42   : > { %852 = vst [vmem:[%s4412_s23 + $0x250] sm:$0xff] %v851_v10  ;;  %v857_v13 = vld [vmem:[%s4407_s11 + $0x738] sm:$0xff]  ;;  %854 = vst [vmem:[%s4412_s23 + $0x258] sm:$0xff] %v853_v11  ;;  %v859_v14 = vld [vmem:[%s4407_s11 + $0x750] sm:$0xff] }
  0x43   : > { %856 = vst [vmem:[%s4412_s23 + $0x260] sm:$0xff] %v855_v12  ;;  %858 = vst [vmem:[%s4412_s23 + $0x268] sm:$0xff] %v857_v13  ;;  %v861_v15 = vld [vmem:[%s4407_s11 + $0x768] sm:$0xff]  ;;  %v863_v16 = vld [vmem:[%s4407_s11 + $0x780] sm:$0xff] }
  0x44   : > { %860 = vst [vmem:[%s4412_s23 + $0x270] sm:$0xff] %v859_v14  ;;  %862 = vst [vmem:[%s4412_s23 + $0x278] sm:$0xff] %v861_v15  ;;  %v865_v17 = vld [vmem:[%s4407_s11 + $0x798] sm:$0xff]  ;;  %v867_v18 = vld [vmem:[%s4407_s11 + $0x7b0] sm:$0xff] }
  0x45   : > { %864 = vst [vmem:[%s4412_s23 + $0x280] sm:$0xff] %v863_v16  ;;  %v869_v19 = vld [vmem:[%s4407_s11 + $0x7c8] sm:$0xff]  ;;  %866 = vst [vmem:[%s4412_s23 + $0x288] sm:$0xff] %v865_v17  ;;  %v871_v20 = vld [vmem:[%s4407_s11 + $0x7e0] sm:$0xff] }
  0x46   : > { %868 = vst [vmem:[%s4412_s23 + $0x290] sm:$0xff] %v867_v18  ;;  %870 = vst [vmem:[%s4412_s23 + $0x298] sm:$0xff] %v869_v19  ;;  %v873_v21 = vld [vmem:[%s4407_s11 + $0x7f8] sm:$0xff]  ;;  %v875_v22 = vld [vmem:[%s4407_s11 + $0x810] sm:$0xff] }
  0x47   : > { %872 = vst [vmem:[%s4412_s23 + $0x2a0] sm:$0xff] %v871_v20  ;;  %874 = vst [vmem:[%s4412_s23 + $0x2a8] sm:$0xff] %v873_v21  ;;  %v877_v23 = vld [vmem:[%s4407_s11 + $0x828] sm:$0xff]  ;;  %v879_v24 = vld [vmem:[%s4407_s11 + $0x840] sm:$0xff] }
  0x48   : > { %876 = vst [vmem:[%s4412_s23 + $0x2b0] sm:$0xff] %v875_v22  ;;  %v881_v25 = vld [vmem:[%s4407_s11 + $0x858] sm:$0xff]  ;;  %878 = vst [vmem:[%s4412_s23 + $0x2b8] sm:$0xff] %v877_v23  ;;  %v883_v26 = vld [vmem:[%s4407_s11 + $0x870] sm:$0xff] }
  0x49   : > { %880 = vst [vmem:[%s4412_s23 + $0x2c0] sm:$0xff] %v879_v24  ;;  %882 = vst [vmem:[%s4412_s23 + $0x2c8] sm:$0xff] %v881_v25  ;;  %v885_v27 = vld [vmem:[%s4407_s11 + $0x888] sm:$0xff]  ;;  %v887_v28 = vld [vmem:[%s4407_s11 + $0x8a0] sm:$0xff] }
  0x4a   : > { %884 = vst [vmem:[%s4412_s23 + $0x2d0] sm:$0xff] %v883_v26  ;;  %886 = vst [vmem:[%s4412_s23 + $0x2d8] sm:$0xff] %v885_v27  ;;  %v889_v29 = vld [vmem:[%s4407_s11 + $0x8b8] sm:$0xff]  ;;  %v891_v30 = vld [vmem:[%s4407_s11 + $0x8d0] sm:$0xff] }
  0x4b   : > { %888 = vst [vmem:[%s4412_s23 + $0x2e0] sm:$0xff] %v887_v28  ;;  %v893_v31 = vld [vmem:[%s4407_s11 + $0x8e8] sm:$0xff]  ;;  %890 = vst [vmem:[%s4412_s23 + $0x2e8] sm:$0xff] %v889_v29  ;;  %v895_v32 = vld [vmem:[%s4407_s11 + $0x900] sm:$0xff] }
  0x4c   : > { %892 = vst [vmem:[%s4412_s23 + $0x2f0] sm:$0xff] %v891_v30  ;;  %894 = vst [vmem:[%s4412_s23 + $0x2f8] sm:$0xff] %v893_v31  ;;  %v897_v33 = vld [vmem:[%s4407_s11 + $0x918] sm:$0xff]  ;;  %v899_v34 = vld [vmem:[%s4407_s11 + $0x930] sm:$0xff] }
  0x4d   : > { %896 = vst [vmem:[%s4412_s23 + $0x300] sm:$0xff] %v895_v32  ;;  %898 = vst [vmem:[%s4412_s23 + $0x308] sm:$0xff] %v897_v33  ;;  %v901_v35 = vld [vmem:[%s4407_s11 + $0x948] sm:$0xff]  ;;  %v903_v36 = vld [vmem:[%s4407_s11 + $0x960] sm:$0xff] }
  0x4e   : > { %900 = vst [vmem:[%s4412_s23 + $0x310] sm:$0xff] %v899_v34  ;;  %v905_v37 = vld [vmem:[%s4407_s11 + $0x978] sm:$0xff]  ;;  %902 = vst [vmem:[%s4412_s23 + $0x318] sm:$0xff] %v901_v35  ;;  %v907_v38 = vld [vmem:[%s4407_s11 + $0x990] sm:$0xff] }
  0x4f   : > { %904 = vst [vmem:[%s4412_s23 + $0x320] sm:$0xff] %v903_v36  ;;  %906 = vst [vmem:[%s4412_s23 + $0x328] sm:$0xff] %v905_v37  ;;  %v909_v39 = vld [vmem:[%s4407_s11 + $0x9a8] sm:$0xff]  ;;  %v911_v40 = vld [vmem:[%s4407_s11 + $0x9c0] sm:$0xff] }
  0x50   : > { %908 = vst [vmem:[%s4412_s23 + $0x330] sm:$0xff] %v907_v38  ;;  %910 = vst [vmem:[%s4412_s23 + $0x338] sm:$0xff] %v909_v39  ;;  %v913_v41 = vld [vmem:[%s4407_s11 + $0x9d8] sm:$0xff]  ;;  %v915_v42 = vld [vmem:[%s4407_s11 + $0x9f0] sm:$0xff] }
  0x51   : > { %912 = vst [vmem:[%s4412_s23 + $0x340] sm:$0xff] %v911_v40  ;;  %v917_v43 = vld [vmem:[%s4407_s11 + $0xa08] sm:$0xff]  ;;  %914 = vst [vmem:[%s4412_s23 + $0x348] sm:$0xff] %v913_v41  ;;  %v919_v44 = vld [vmem:[%s4407_s11 + $0xa20] sm:$0xff] }
  0x52   : > { %916 = vst [vmem:[%s4412_s23 + $0x350] sm:$0xff] %v915_v42  ;;  %918 = vst [vmem:[%s4412_s23 + $0x358] sm:$0xff] %v917_v43  ;;  %v921_v45 = vld [vmem:[%s4407_s11 + $0xa38] sm:$0xff]  ;;  %v923_v46 = vld [vmem:[%s4407_s11 + $0xa50] sm:$0xff] }
  0x53   : > { %920 = vst [vmem:[%s4412_s23 + $0x360] sm:$0xff] %v919_v44  ;;  %922 = vst [vmem:[%s4412_s23 + $0x368] sm:$0xff] %v921_v45  ;;  %v925_v47 = vld [vmem:[%s4407_s11 + $0xa68] sm:$0xff]  ;;  %v927_v48 = vld [vmem:[%s4407_s11 + $0xa80] sm:$0xff] }
  0x54   : > { %924 = vst [vmem:[%s4412_s23 + $0x370] sm:$0xff] %v923_v46  ;;  %v929_v49 = vld [vmem:[%s4407_s11 + $0xa98] sm:$0xff]  ;;  %926 = vst [vmem:[%s4412_s23 + $0x378] sm:$0xff] %v925_v47  ;;  %v931_v50 = vld [vmem:[%s4407_s11 + $0xab0] sm:$0xff] }
  0x55   : > { %928 = vst [vmem:[%s4412_s23 + $0x380] sm:$0xff] %v927_v48  ;;  %930 = vst [vmem:[%s4412_s23 + $0x388] sm:$0xff] %v929_v49  ;;  %v933_v51 = vld [vmem:[%s4407_s11 + $0xac8] sm:$0xff]  ;;  %v935_v52 = vld [vmem:[%s4407_s11 + $0xae0] sm:$0xff] }
  0x56   : > { %932 = vst [vmem:[%s4412_s23 + $0x390] sm:$0xff] %v931_v50  ;;  %934 = vst [vmem:[%s4412_s23 + $0x398] sm:$0xff] %v933_v51  ;;  %v937_v53 = vld [vmem:[%s4407_s11 + $0xaf8] sm:$0xff]  ;;  %v939_v54 = vld [vmem:[%s4407_s11 + $0xb10] sm:$0xff] }
  0x57   : > { %936 = vst [vmem:[%s4412_s23 + $0x3a0] sm:$0xff] %v935_v52  ;;  %v941_v55 = vld [vmem:[%s4407_s11 + $0xb28] sm:$0xff]  ;;  %938 = vst [vmem:[%s4412_s23 + $0x3a8] sm:$0xff] %v937_v53  ;;  %v943_v56 = vld [vmem:[%s4407_s11 + $0xb40] sm:$0xff] }
  0x58   : > { %940 = vst [vmem:[%s4412_s23 + $0x3b0] sm:$0xff] %v939_v54  ;;  %942 = vst [vmem:[%s4412_s23 + $0x3b8] sm:$0xff] %v941_v55  ;;  %v945_v57 = vld [vmem:[%s4407_s11 + $0xb58] sm:$0xff]  ;;  %v947_v58 = vld [vmem:[%s4407_s11 + $0xb70] sm:$0xff] }
  0x59   : > { %944 = vst [vmem:[%s4412_s23 + $0x3c0] sm:$0xff] %v943_v56  ;;  %946 = vst [vmem:[%s4412_s23 + $0x3c8] sm:$0xff] %v945_v57  ;;  %v949_v59 = vld [vmem:[%s4407_s11 + $0xb88] sm:$0xff]  ;;  %v951_v60 = vld [vmem:[%s4407_s11 + $0xba0] sm:$0xff] }
  0x5a   : > { %948 = vst [vmem:[%s4412_s23 + $0x3d0] sm:$0xff] %v947_v58  ;;  %v953_v61 = vld [vmem:[%s4407_s11 + $0xbb8] sm:$0xff]  ;;  %950 = vst [vmem:[%s4412_s23 + $0x3d8] sm:$0xff] %v949_v59  ;;  %v955_v62 = vld [vmem:[%s4407_s11 + $0xbd0] sm:$0xff] }
  0x5b   : > { %952 = vst [vmem:[%s4412_s23 + $0x3e0] sm:$0xff] %v951_v60  ;;  %954 = vst [vmem:[%s4412_s23 + $0x3e8] sm:$0xff] %v953_v61  ;;  %v957_v63 = vld [vmem:[%s4407_s11 + $0xbe8] sm:$0xff]  ;;  %v959_v0 = vld [vmem:[%s4407_s11 + $0xc00] sm:$0xff] }
  0x5c   : > { %956 = vst [vmem:[%s4412_s23 + $0x3f0] sm:$0xff] %v955_v62  ;;  %958 = vst [vmem:[%s4412_s23 + $0x3f8] sm:$0xff] %v957_v63  ;;  %v961_v1 = vld [vmem:[%s4407_s11 + $0xc18] sm:$0xff]  ;;  %v963_v2 = vld [vmem:[%s4407_s11 + $0xc30] sm:$0xff] }
  0x5d   : > { %960 = vst [vmem:[%s4412_s23 + $0x400] sm:$0xff] %v959_v0  ;;  %v965_v3 = vld [vmem:[%s4407_s11 + $0xc48] sm:$0xff]  ;;  %962 = vst [vmem:[%s4412_s23 + $0x408] sm:$0xff] %v961_v1  ;;  %v967_v4 = vld [vmem:[%s4407_s11 + $0xc60] sm:$0xff] }
  0x5e   : > { %964 = vst [vmem:[%s4412_s23 + $0x410] sm:$0xff] %v963_v2  ;;  %966 = vst [vmem:[%s4412_s23 + $0x418] sm:$0xff] %v965_v3  ;;  %v969_v5 = vld [vmem:[%s4407_s11 + $0xc78] sm:$0xff]  ;;  %v971_v6 = vld [vmem:[%s4407_s11 + $0xc90] sm:$0xff] }
  0x5f   : > { %968 = vst [vmem:[%s4412_s23 + $0x420] sm:$0xff] %v967_v4  ;;  %970 = vst [vmem:[%s4412_s23 + $0x428] sm:$0xff] %v969_v5  ;;  %v973_v7 = vld [vmem:[%s4407_s11 + $0xca8] sm:$0xff]  ;;  %v975_v8 = vld [vmem:[%s4407_s11 + $0xcc0] sm:$0xff] }
  0x60   : > { %972 = vst [vmem:[%s4412_s23 + $0x430] sm:$0xff] %v971_v6  ;;  %v977_v9 = vld [vmem:[%s4407_s11 + $0xcd8] sm:$0xff]  ;;  %974 = vst [vmem:[%s4412_s23 + $0x438] sm:$0xff] %v973_v7  ;;  %v979_v10 = vld [vmem:[%s4407_s11 + $0xcf0] sm:$0xff] }
  0x61   : > { %976 = vst [vmem:[%s4412_s23 + $0x440] sm:$0xff] %v975_v8  ;;  %978 = vst [vmem:[%s4412_s23 + $0x448] sm:$0xff] %v977_v9  ;;  %v981_v11 = vld [vmem:[%s4407_s11 + $0xd08] sm:$0xff]  ;;  %v983_v12 = vld [vmem:[%s4407_s11 + $0xd20] sm:$0xff] }
  0x62   : > { %980 = vst [vmem:[%s4412_s23 + $0x450] sm:$0xff] %v979_v10  ;;  %982 = vst [vmem:[%s4412_s23 + $0x458] sm:$0xff] %v981_v11  ;;  %v985_v13 = vld [vmem:[%s4407_s11 + $0xd38] sm:$0xff]  ;;  %v987_v14 = vld [vmem:[%s4407_s11 + $0xd50] sm:$0xff] }
  0x63   : > { %984 = vst [vmem:[%s4412_s23 + $0x460] sm:$0xff] %v983_v12  ;;  %v989_v15 = vld [vmem:[%s4407_s11 + $0xd68] sm:$0xff]  ;;  %986 = vst [vmem:[%s4412_s23 + $0x468] sm:$0xff] %v985_v13  ;;  %v991_v16 = vld [vmem:[%s4407_s11 + $0xd80] sm:$0xff] }
  0x64   : > { %988 = vst [vmem:[%s4412_s23 + $0x470] sm:$0xff] %v987_v14  ;;  %990 = vst [vmem:[%s4412_s23 + $0x478] sm:$0xff] %v989_v15  ;;  %v993_v17 = vld [vmem:[%s4407_s11 + $0xd98] sm:$0xff]  ;;  %v995_v18 = vld [vmem:[%s4407_s11 + $0xdb0] sm:$0xff] }
  0x65   : > { %992 = vst [vmem:[%s4412_s23 + $0x480] sm:$0xff] %v991_v16  ;;  %994 = vst [vmem:[%s4412_s23 + $0x488] sm:$0xff] %v993_v17  ;;  %v997_v19 = vld [vmem:[%s4407_s11 + $0xdc8] sm:$0xff]  ;;  %v999_v20 = vld [vmem:[%s4407_s11 + $0xde0] sm:$0xff] }
  0x66   : > { %996 = vst [vmem:[%s4412_s23 + $0x490] sm:$0xff] %v995_v18  ;;  %v1001_v21 = vld [vmem:[%s4407_s11 + $0xdf8] sm:$0xff]  ;;  %998 = vst [vmem:[%s4412_s23 + $0x498] sm:$0xff] %v997_v19  ;;  %v1003_v22 = vld [vmem:[%s4407_s11 + $0xe10] sm:$0xff] }
  0x67   : > { %1000 = vst [vmem:[%s4412_s23 + $0x4a0] sm:$0xff] %v999_v20  ;;  %1002 = vst [vmem:[%s4412_s23 + $0x4a8] sm:$0xff] %v1001_v21  ;;  %v1005_v23 = vld [vmem:[%s4407_s11 + $0xe28] sm:$0xff]  ;;  %v1007_v24 = vld [vmem:[%s4407_s11 + $0xe40] sm:$0xff] }
  0x68   : > { %1004 = vst [vmem:[%s4412_s23 + $0x4b0] sm:$0xff] %v1003_v22  ;;  %1006 = vst [vmem:[%s4412_s23 + $0x4b8] sm:$0xff] %v1005_v23  ;;  %v1009_v25 = vld [vmem:[%s4407_s11 + $0xe58] sm:$0xff]  ;;  %v1011_v26 = vld [vmem:[%s4407_s11 + $0xe70] sm:$0xff] }
  0x69   : > { %1008 = vst [vmem:[%s4412_s23 + $0x4c0] sm:$0xff] %v1007_v24  ;;  %v1013_v27 = vld [vmem:[%s4407_s11 + $0xe88] sm:$0xff]  ;;  %1010 = vst [vmem:[%s4412_s23 + $0x4c8] sm:$0xff] %v1009_v25  ;;  %v1015_v28 = vld [vmem:[%s4407_s11 + $0xea0] sm:$0xff] }
  0x6a   : > { %1012 = vst [vmem:[%s4412_s23 + $0x4d0] sm:$0xff] %v1011_v26  ;;  %1014 = vst [vmem:[%s4412_s23 + $0x4d8] sm:$0xff] %v1013_v27  ;;  %v1017_v29 = vld [vmem:[%s4407_s11 + $0xeb8] sm:$0xff]  ;;  %v1019_v30 = vld [vmem:[%s4407_s11 + $0xed0] sm:$0xff] }
  0x6b   : > { %1016 = vst [vmem:[%s4412_s23 + $0x4e0] sm:$0xff] %v1015_v28  ;;  %1018 = vst [vmem:[%s4412_s23 + $0x4e8] sm:$0xff] %v1017_v29  ;;  %v1021_v31 = vld [vmem:[%s4407_s11 + $0xee8] sm:$0xff]  ;;  %v1023_v32 = vld [vmem:[%s4407_s11 + $0xf00] sm:$0xff] }
  0x6c   : > { %1020 = vst [vmem:[%s4412_s23 + $0x4f0] sm:$0xff] %v1019_v30  ;;  %v1025_v33 = vld [vmem:[%s4407_s11 + $0xf18] sm:$0xff]  ;;  %1022 = vst [vmem:[%s4412_s23 + $0x4f8] sm:$0xff] %v1021_v31  ;;  %v1027_v34 = vld [vmem:[%s4407_s11 + $0xf30] sm:$0xff] }
  0x6d   : > { %1024 = vst [vmem:[%s4412_s23 + $0x500] sm:$0xff] %v1023_v32  ;;  %1026 = vst [vmem:[%s4412_s23 + $0x508] sm:$0xff] %v1025_v33  ;;  %v1029_v35 = vld [vmem:[%s4407_s11 + $0xf48] sm:$0xff]  ;;  %v1031_v36 = vld [vmem:[%s4407_s11 + $0xf60] sm:$0xff] }
  0x6e   : > { %1028 = vst [vmem:[%s4412_s23 + $0x510] sm:$0xff] %v1027_v34  ;;  %1030 = vst [vmem:[%s4412_s23 + $0x518] sm:$0xff] %v1029_v35  ;;  %v1033_v37 = vld [vmem:[%s4407_s11 + $0xf78] sm:$0xff]  ;;  %v1035_v38 = vld [vmem:[%s4407_s11 + $0xf90] sm:$0xff] }
  0x6f   : > { %1032 = vst [vmem:[%s4412_s23 + $0x520] sm:$0xff] %v1031_v36  ;;  %v1037_v39 = vld [vmem:[%s4407_s11 + $0xfa8] sm:$0xff]  ;;  %1034 = vst [vmem:[%s4412_s23 + $0x528] sm:$0xff] %v1033_v37  ;;  %v1039_v40 = vld [vmem:[%s4407_s11 + $0xfc0] sm:$0xff] }
  0x70   : > { %1036 = vst [vmem:[%s4412_s23 + $0x530] sm:$0xff] %v1035_v38  ;;  %1038 = vst [vmem:[%s4412_s23 + $0x538] sm:$0xff] %v1037_v39  ;;  %v1041_v41 = vld [vmem:[%s4407_s11 + $0xfd8] sm:$0xff]  ;;  %v1043_v42 = vld [vmem:[%s4407_s11 + $0xff0] sm:$0xff] }
  0x71   : > { %1040 = vst [vmem:[%s4412_s23 + $0x540] sm:$0xff] %v1039_v40  ;;  %1042 = vst [vmem:[%s4412_s23 + $0x548] sm:$0xff] %v1041_v41  ;;  %v1045_v43 = vld [vmem:[%s4407_s11 + $0x1008] sm:$0xff]  ;;  %v1047_v44 = vld [vmem:[%s4407_s11 + $0x1020] sm:$0xff] }
  0x72   : > { %1044 = vst [vmem:[%s4412_s23 + $0x550] sm:$0xff] %v1043_v42  ;;  %v1049_v45 = vld [vmem:[%s4407_s11 + $0x1038] sm:$0xff]  ;;  %1046 = vst [vmem:[%s4412_s23 + $0x558] sm:$0xff] %v1045_v43  ;;  %v1051_v46 = vld [vmem:[%s4407_s11 + $0x1050] sm:$0xff] }
  0x73   : > { %1048 = vst [vmem:[%s4412_s23 + $0x560] sm:$0xff] %v1047_v44  ;;  %1050 = vst [vmem:[%s4412_s23 + $0x568] sm:$0xff] %v1049_v45  ;;  %v1053_v47 = vld [vmem:[%s4407_s11 + $0x1068] sm:$0xff]  ;;  %v1055_v48 = vld [vmem:[%s4407_s11 + $0x1080] sm:$0xff] }
  0x74   : > { %1052 = vst [vmem:[%s4412_s23 + $0x570] sm:$0xff] %v1051_v46  ;;  %1054 = vst [vmem:[%s4412_s23 + $0x578] sm:$0xff] %v1053_v47  ;;  %v1057_v49 = vld [vmem:[%s4407_s11 + $0x1098] sm:$0xff]  ;;  %v1059_v50 = vld [vmem:[%s4407_s11 + $0x10b0] sm:$0xff] }
  0x75   : > { %1056 = vst [vmem:[%s4412_s23 + $0x580] sm:$0xff] %v1055_v48  ;;  %v1061_v51 = vld [vmem:[%s4407_s11 + $0x10c8] sm:$0xff]  ;;  %1058 = vst [vmem:[%s4412_s23 + $0x588] sm:$0xff] %v1057_v49  ;;  %v1063_v52 = vld [vmem:[%s4407_s11 + $0x10e0] sm:$0xff] }
  0x76   : > { %1060 = vst [vmem:[%s4412_s23 + $0x590] sm:$0xff] %v1059_v50  ;;  %1062 = vst [vmem:[%s4412_s23 + $0x598] sm:$0xff] %v1061_v51  ;;  %v1065_v53 = vld [vmem:[%s4407_s11 + $0x10f8] sm:$0xff]  ;;  %v1067_v54 = vld [vmem:[%s4407_s11 + $0x1110] sm:$0xff] }
  0x77   : > { %1064 = vst [vmem:[%s4412_s23 + $0x5a0] sm:$0xff] %v1063_v52  ;;  %1066 = vst [vmem:[%s4412_s23 + $0x5a8] sm:$0xff] %v1065_v53  ;;  %v1069_v55 = vld [vmem:[%s4407_s11 + $0x1128] sm:$0xff]  ;;  %v1071_v56 = vld [vmem:[%s4407_s11 + $0x1140] sm:$0xff] }
  0x78   : > { %1068 = vst [vmem:[%s4412_s23 + $0x5b0] sm:$0xff] %v1067_v54  ;;  %v1073_v57 = vld [vmem:[%s4407_s11 + $0x1158] sm:$0xff]  ;;  %1070 = vst [vmem:[%s4412_s23 + $0x5b8] sm:$0xff] %v1069_v55  ;;  %v1075_v58 = vld [vmem:[%s4407_s11 + $0x1170] sm:$0xff] }
  0x79   : > { %1072 = vst [vmem:[%s4412_s23 + $0x5c0] sm:$0xff] %v1071_v56  ;;  %1074 = vst [vmem:[%s4412_s23 + $0x5c8] sm:$0xff] %v1073_v57  ;;  %v1077_v59 = vld [vmem:[%s4407_s11 + $0x1188] sm:$0xff]  ;;  %v1079_v60 = vld [vmem:[%s4407_s11 + $0x11a0] sm:$0xff] }
  0x7a   : > { %1076 = vst [vmem:[%s4412_s23 + $0x5d0] sm:$0xff] %v1075_v58  ;;  %1078 = vst [vmem:[%s4412_s23 + $0x5d8] sm:$0xff] %v1077_v59  ;;  %v1081_v61 = vld [vmem:[%s4407_s11 + $0x11b8] sm:$0xff]  ;;  %v1083_v62 = vld [vmem:[%s4407_s11 + $0x11d0] sm:$0xff] }
  0x7b   : > { %1080 = vst [vmem:[%s4412_s23 + $0x5e0] sm:$0xff] %v1079_v60  ;;  %v1085_v63 = vld [vmem:[%s4407_s11 + $0x11e8] sm:$0xff]  ;;  %1082 = vst [vmem:[%s4412_s23 + $0x5e8] sm:$0xff] %v1081_v61  ;;  %v1087_v0 = vld [vmem:[%s4407_s11 + $0x1200] sm:$0xff] }
  0x7c   : > { %1084 = vst [vmem:[%s4412_s23 + $0x5f0] sm:$0xff] %v1083_v62  ;;  %1086 = vst [vmem:[%s4412_s23 + $0x5f8] sm:$0xff] %v1085_v63  ;;  %v1089_v1 = vld [vmem:[%s4407_s11 + $0x1218] sm:$0xff]  ;;  %v1091_v2 = vld [vmem:[%s4407_s11 + $0x1230] sm:$0xff] }
  0x7d   : > { %1088 = vst [vmem:[%s4412_s23 + $0x600] sm:$0xff] %v1087_v0  ;;  %1090 = vst [vmem:[%s4412_s23 + $0x608] sm:$0xff] %v1089_v1  ;;  %v1093_v3 = vld [vmem:[%s4407_s11 + $0x1248] sm:$0xff]  ;;  %v1095_v4 = vld [vmem:[%s4407_s11 + $0x1260] sm:$0xff] }
  0x7e   : > { %1092 = vst [vmem:[%s4412_s23 + $0x610] sm:$0xff] %v1091_v2  ;;  %v1097_v5 = vld [vmem:[%s4407_s11 + $0x1278] sm:$0xff]  ;;  %1094 = vst [vmem:[%s4412_s23 + $0x618] sm:$0xff] %v1093_v3  ;;  %v1099_v6 = vld [vmem:[%s4407_s11 + $0x1290] sm:$0xff] }
  0x7f   : > { %1096 = vst [vmem:[%s4412_s23 + $0x620] sm:$0xff] %v1095_v4  ;;  %1098 = vst [vmem:[%s4412_s23 + $0x628] sm:$0xff] %v1097_v5  ;;  %v1101_v7 = vld [vmem:[%s4407_s11 + $0x12a8] sm:$0xff]  ;;  %v1103_v8 = vld [vmem:[%s4407_s11 + $0x12c0] sm:$0xff] }
  0x80   : > { %1100 = vst [vmem:[%s4412_s23 + $0x630] sm:$0xff] %v1099_v6  ;;  %1102 = vst [vmem:[%s4412_s23 + $0x638] sm:$0xff] %v1101_v7  ;;  %v1105_v9 = vld [vmem:[%s4407_s11 + $0x12d8] sm:$0xff]  ;;  %v1107_v10 = vld [vmem:[%s4407_s11 + $0x12f0] sm:$0xff] }
  0x81   : > { %1104 = vst [vmem:[%s4412_s23 + $0x640] sm:$0xff] %v1103_v8  ;;  %v1109_v11 = vld [vmem:[%s4407_s11 + $0x1308] sm:$0xff]  ;;  %1106 = vst [vmem:[%s4412_s23 + $0x648] sm:$0xff] %v1105_v9  ;;  %v1111_v12 = vld [vmem:[%s4407_s11 + $0x1320] sm:$0xff] }
  0x82   : > { %1108 = vst [vmem:[%s4412_s23 + $0x650] sm:$0xff] %v1107_v10  ;;  %1110 = vst [vmem:[%s4412_s23 + $0x658] sm:$0xff] %v1109_v11  ;;  %v1113_v13 = vld [vmem:[%s4407_s11 + $0x1338] sm:$0xff]  ;;  %v1115_v14 = vld [vmem:[%s4407_s11 + $0x1350] sm:$0xff] }
  0x83   : > { %1112 = vst [vmem:[%s4412_s23 + $0x660] sm:$0xff] %v1111_v12  ;;  %1114 = vst [vmem:[%s4412_s23 + $0x668] sm:$0xff] %v1113_v13  ;;  %v1117_v15 = vld [vmem:[%s4407_s11 + $0x1368] sm:$0xff]  ;;  %v1119_v16 = vld [vmem:[%s4407_s11 + $0x1380] sm:$0xff] }
  0x84   : > { %1116 = vst [vmem:[%s4412_s23 + $0x670] sm:$0xff] %v1115_v14  ;;  %v1121_v17 = vld [vmem:[%s4407_s11 + $0x1398] sm:$0xff]  ;;  %1118 = vst [vmem:[%s4412_s23 + $0x678] sm:$0xff] %v1117_v15  ;;  %v1123_v18 = vld [vmem:[%s4407_s11 + $0x13b0] sm:$0xff] }
  0x85   : > { %1120 = vst [vmem:[%s4412_s23 + $0x680] sm:$0xff] %v1119_v16  ;;  %1122 = vst [vmem:[%s4412_s23 + $0x688] sm:$0xff] %v1121_v17  ;;  %v1125_v19 = vld [vmem:[%s4407_s11 + $0x13c8] sm:$0xff]  ;;  %v1127_v20 = vld [vmem:[%s4407_s11 + $0x13e0] sm:$0xff] }
  0x86   : > { %1124 = vst [vmem:[%s4412_s23 + $0x690] sm:$0xff] %v1123_v18  ;;  %1126 = vst [vmem:[%s4412_s23 + $0x698] sm:$0xff] %v1125_v19  ;;  %v1129_v21 = vld [vmem:[%s4407_s11 + $0x13f8] sm:$0xff]  ;;  %v1131_v22 = vld [vmem:[%s4407_s11 + $0x1410] sm:$0xff] }
  0x87   : > { %1128 = vst [vmem:[%s4412_s23 + $0x6a0] sm:$0xff] %v1127_v20  ;;  %v1133_v23 = vld [vmem:[%s4407_s11 + $0x1428] sm:$0xff]  ;;  %1130 = vst [vmem:[%s4412_s23 + $0x6a8] sm:$0xff] %v1129_v21  ;;  %v1135_v24 = vld [vmem:[%s4407_s11 + $0x1440] sm:$0xff] }
  0x88   : > { %1132 = vst [vmem:[%s4412_s23 + $0x6b0] sm:$0xff] %v1131_v22  ;;  %1134 = vst [vmem:[%s4412_s23 + $0x6b8] sm:$0xff] %v1133_v23  ;;  %v1137_v25 = vld [vmem:[%s4407_s11 + $0x1458] sm:$0xff]  ;;  %v1139_v26 = vld [vmem:[%s4407_s11 + $0x1470] sm:$0xff] }
  0x89   : > { %1136 = vst [vmem:[%s4412_s23 + $0x6c0] sm:$0xff] %v1135_v24  ;;  %1138 = vst [vmem:[%s4412_s23 + $0x6c8] sm:$0xff] %v1137_v25  ;;  %v1141_v27 = vld [vmem:[%s4407_s11 + $0x1488] sm:$0xff]  ;;  %v1143_v28 = vld [vmem:[%s4407_s11 + $0x14a0] sm:$0xff] }
  0x8a   : > { %1140 = vst [vmem:[%s4412_s23 + $0x6d0] sm:$0xff] %v1139_v26  ;;  %v1145_v29 = vld [vmem:[%s4407_s11 + $0x14b8] sm:$0xff]  ;;  %1142 = vst [vmem:[%s4412_s23 + $0x6d8] sm:$0xff] %v1141_v27  ;;  %v1147_v30 = vld [vmem:[%s4407_s11 + $0x14d0] sm:$0xff] }
  0x8b   : > { %1144 = vst [vmem:[%s4412_s23 + $0x6e0] sm:$0xff] %v1143_v28  ;;  %1146 = vst [vmem:[%s4412_s23 + $0x6e8] sm:$0xff] %v1145_v29  ;;  %v1149_v31 = vld [vmem:[%s4407_s11 + $0x14e8] sm:$0xff]  ;;  %v1151_v32 = vld [vmem:[%s4407_s11 + $0x1500] sm:$0xff] }
  0x8c   : > { %1148 = vst [vmem:[%s4412_s23 + $0x6f0] sm:$0xff] %v1147_v30  ;;  %1150 = vst [vmem:[%s4412_s23 + $0x6f8] sm:$0xff] %v1149_v31  ;;  %v1153_v33 = vld [vmem:[%s4407_s11 + $0x1518] sm:$0xff]  ;;  %v1155_v34 = vld [vmem:[%s4407_s11 + $0x1530] sm:$0xff] }
  0x8d   : > { %1152 = vst [vmem:[%s4412_s23 + $0x700] sm:$0xff] %v1151_v32  ;;  %v1157_v35 = vld [vmem:[%s4407_s11 + $0x1548] sm:$0xff]  ;;  %1154 = vst [vmem:[%s4412_s23 + $0x708] sm:$0xff] %v1153_v33  ;;  %v1159_v36 = vld [vmem:[%s4407_s11 + $0x1560] sm:$0xff] }
  0x8e   : > { %1156 = vst [vmem:[%s4412_s23 + $0x710] sm:$0xff] %v1155_v34  ;;  %1158 = vst [vmem:[%s4412_s23 + $0x718] sm:$0xff] %v1157_v35  ;;  %v1161_v37 = vld [vmem:[%s4407_s11 + $0x1578] sm:$0xff]  ;;  %v1163_v38 = vld [vmem:[%s4407_s11 + $0x1590] sm:$0xff] }
  0x8f   : > { %1160 = vst [vmem:[%s4412_s23 + $0x720] sm:$0xff] %v1159_v36  ;;  %1162 = vst [vmem:[%s4412_s23 + $0x728] sm:$0xff] %v1161_v37  ;;  %v1165_v39 = vld [vmem:[%s4407_s11 + $0x15a8] sm:$0xff]  ;;  %v1167_v40 = vld [vmem:[%s4407_s11 + $0x15c0] sm:$0xff] }
  0x90   : > { %1164 = vst [vmem:[%s4412_s23 + $0x730] sm:$0xff] %v1163_v38  ;;  %v1169_v41 = vld [vmem:[%s4407_s11 + $0x15d8] sm:$0xff]  ;;  %1166 = vst [vmem:[%s4412_s23 + $0x738] sm:$0xff] %v1165_v39  ;;  %v1171_v42 = vld [vmem:[%s4407_s11 + $0x15f0] sm:$0xff] }
  0x91   : > { %1168 = vst [vmem:[%s4412_s23 + $0x740] sm:$0xff] %v1167_v40  ;;  %1170 = vst [vmem:[%s4412_s23 + $0x748] sm:$0xff] %v1169_v41  ;;  %v1173_v43 = vld [vmem:[%s4407_s11 + $0x1608] sm:$0xff]  ;;  %v1175_v44 = vld [vmem:[%s4407_s11 + $0x1620] sm:$0xff] }
  0x92   : > { %1172 = vst [vmem:[%s4412_s23 + $0x750] sm:$0xff] %v1171_v42  ;;  %1174 = vst [vmem:[%s4412_s23 + $0x758] sm:$0xff] %v1173_v43  ;;  %v1177_v45 = vld [vmem:[%s4407_s11 + $0x1638] sm:$0xff]  ;;  %v1179_v46 = vld [vmem:[%s4407_s11 + $0x1650] sm:$0xff] }
  0x93   : > { %1176 = vst [vmem:[%s4412_s23 + $0x760] sm:$0xff] %v1175_v44  ;;  %v1181_v47 = vld [vmem:[%s4407_s11 + $0x1668] sm:$0xff]  ;;  %1178 = vst [vmem:[%s4412_s23 + $0x768] sm:$0xff] %v1177_v45  ;;  %v1183_v48 = vld [vmem:[%s4407_s11 + $0x1680] sm:$0xff] }
  0x94   : > { %1180 = vst [vmem:[%s4412_s23 + $0x770] sm:$0xff] %v1179_v46  ;;  %1182 = vst [vmem:[%s4412_s23 + $0x778] sm:$0xff] %v1181_v47  ;;  %v1185_v49 = vld [vmem:[%s4407_s11 + $0x1698] sm:$0xff]  ;;  %v1187_v50 = vld [vmem:[%s4407_s11 + $0x16b0] sm:$0xff] }
  0x95   : > { %1184 = vst [vmem:[%s4412_s23 + $0x780] sm:$0xff] %v1183_v48  ;;  %1186 = vst [vmem:[%s4412_s23 + $0x788] sm:$0xff] %v1185_v49  ;;  %v1189_v51 = vld [vmem:[%s4407_s11 + $0x16c8] sm:$0xff]  ;;  %v1191_v52 = vld [vmem:[%s4407_s11 + $0x16e0] sm:$0xff] }
  0x96   : > { %1188 = vst [vmem:[%s4412_s23 + $0x790] sm:$0xff] %v1187_v50  ;;  %v1193_v53 = vld [vmem:[%s4407_s11 + $0x16f8] sm:$0xff]  ;;  %1190 = vst [vmem:[%s4412_s23 + $0x798] sm:$0xff] %v1189_v51  ;;  %v1195_v54 = vld [vmem:[%s4407_s11 + $0x1710] sm:$0xff] }
  0x97   : > { %1192 = vst [vmem:[%s4412_s23 + $0x7a0] sm:$0xff] %v1191_v52  ;;  %1194 = vst [vmem:[%s4412_s23 + $0x7a8] sm:$0xff] %v1193_v53  ;;  %v1197_v55 = vld [vmem:[%s4407_s11 + $0x1728] sm:$0xff]  ;;  %v1199_v56 = vld [vmem:[%s4407_s11 + $0x1740] sm:$0xff] }
  0x98   : > { %1196 = vst [vmem:[%s4412_s23 + $0x7b0] sm:$0xff] %v1195_v54  ;;  %1198 = vst [vmem:[%s4412_s23 + $0x7b8] sm:$0xff] %v1197_v55  ;;  %v1201_v57 = vld [vmem:[%s4407_s11 + $0x1758] sm:$0xff]  ;;  %v1203_v58 = vld [vmem:[%s4407_s11 + $0x1770] sm:$0xff] }
  0x99   : > { %1200 = vst [vmem:[%s4412_s23 + $0x7c0] sm:$0xff] %v1199_v56  ;;  %v1205_v59 = vld [vmem:[%s4407_s11 + $0x1788] sm:$0xff]  ;;  %1202 = vst [vmem:[%s4412_s23 + $0x7c8] sm:$0xff] %v1201_v57  ;;  %v1207_v60 = vld [vmem:[%s4407_s11 + $0x17a0] sm:$0xff] }
  0x9a   : > { %1204 = vst [vmem:[%s4412_s23 + $0x7d0] sm:$0xff] %v1203_v58  ;;  %1206 = vst [vmem:[%s4412_s23 + $0x7d8] sm:$0xff] %v1205_v59  ;;  %v1209_v61 = vld [vmem:[%s4407_s11 + $0x17b8] sm:$0xff]  ;;  %v1211_v62 = vld [vmem:[%s4407_s11 + $0x17d0] sm:$0xff] }
  0x9b   : > { %1208 = vst [vmem:[%s4412_s23 + $0x7e0] sm:$0xff] %v1207_v60  ;;  %1210 = vst [vmem:[%s4412_s23 + $0x7e8] sm:$0xff] %v1209_v61  ;;  %v1213_v63 = vld [vmem:[%s4407_s11 + $0x17e8] sm:$0xff] }
  0x9c   : > { %1212 = vst [vmem:[%s4412_s23 + $0x7f0] sm:$0xff] %v1211_v62  ;;  %1214 = vst [vmem:[%s4412_s23 + $0x7f8] sm:$0xff] %v1213_v63 }
  0x9d PF: > { %p3436_p11 = scmp.ge.s32.totalorder %s4299_s20, 1  ;;  %p1227_p12 = scmp.lt.s32.totalorder %s4299_s20, 7 }
  0x9f   : > { %p1228_p13 = pnand %p3436_p11, %p1227_p12 }
  0xa0   : > { %s1234_s24 = sand.u32 (!%p1228_p13), 1, %s4275_s14   ;;  %s3439_s14 = sshll.u32 (!%p1228_p13), %s4283_s16, 1 }
  0xa1   : > { %1231 = sbr.rel (%p1228_p13) target bundleno = 680 (0x2a8), region = 66  ;;  %s3437_s25 = sshll.u32 (!%p1228_p13), %s1234_s24, 11 }
  0xa2   : > { %s4926_s26 = scalar_lea.vmem (!%p1228_p13), [#allocation2], %s3437_s25  ;;  %p1267_p0 = scmp.lt.s32.totalorder (!%p1228_p13), %s3439_s14, 3 }
  0xa3   : > { %v3829_v0 = vld [vmem:[%s4926_s26 + $0x4] ss:$8 sps:$4 sm:$0xff] (!%p1228_p13)   ;;  %v3833_v2 = vld [vmem:[%s4926_s26] ss:$8 sps:$4 sm:$0xff] (!%p1228_p13)   ;;  %v3835_v4 = vld [vmem:[%s4926_s26 + $0x14] ss:$8 sps:$4 sm:$0xff] (!%p1228_p13)  }
  0xa4   : > { %v3831_v1 = vld [vmem:[%s4926_s26 + $0x404] ss:$8 sps:$4 sm:$0xff] (!%p1228_p13)   ;;  %2925 = vmatprep.subr.bf16.mxu1 (!%p1228_p13), %v3829_v0  ;;  %v3834_v3 = vld [vmem:[%s4926_s26 + $0x400] ss:$8 sps:$4 sm:$0xff] (!%p1228_p13)   ;;  %v3837_v5 = vld [vmem:[%s4926_s26 + $0x414] ss:$8 sps:$4 sm:$0xff] (!%p1228_p13)  }
  0xa5   : > { %3097 = vmatprep.subr.bf16.mxu0 (!%p1228_p13), %v3831_v1  ;;  %2926 = vmatpush1.bf16.msra.mxu1 (!%p1228_p13), %v3833_v2  ;;  %v3839_v6 = vld [vmem:[%s4926_s26 + $0x10] ss:$8 sps:$4 sm:$0xff] (!%p1228_p13)   ;;  %v3841_v8 = vld [vmem:[%s4926_s26 + $0x24] ss:$8 sps:$4 sm:$0xff] (!%p1228_p13)   ;;  %v3845_v10 = vld [vmem:[%s4926_s26 + $0x20] ss:$8 sps:$4 sm:$0xff] (!%p1228_p13)  }
  0xa6   : > { %3098 = vmatpush1.bf16.msra.mxu0 (!%p1228_p13), %v3834_v3  ;;  %2927 = vmatprep.subr.bf16.mxu1 (!%p1228_p13), %v3835_v4  ;;  %v3840_v7 = vld [vmem:[%s4926_s26 + $0x410] ss:$8 sps:$4 sm:$0xff] (!%p1228_p13)   ;;  %v3843_v9 = vld [vmem:[%s4926_s26 + $0x424] ss:$8 sps:$4 sm:$0xff] (!%p1228_p13)   ;;  %v3846_v11 = vld [vmem:[%s4926_s26 + $0x420] ss:$8 sps:$4 sm:$0xff] (!%p1228_p13)  }
  0xa7   : > { %3099 = vmatprep.subr.bf16.mxu0 (!%p1228_p13), %v3837_v5  ;;  %v3847_v12 = vld [vmem:[%s4926_s26 + $0x34] ss:$8 sps:$4 sm:$0xff] (!%p1228_p13)   ;;  %v3851_v14 = vld [vmem:[%s4926_s26 + $0x30] ss:$8 sps:$4 sm:$0xff] (!%p1228_p13)   ;;  %v3853_v16 = vld [vmem:[%s4926_s26 + $0x44] ss:$8 sps:$4 sm:$0xff] (!%p1228_p13)  }
  0xa8   : > { %v3849_v13 = vld [vmem:[%s4926_s26 + $0x434] ss:$8 sps:$4 sm:$0xff]   ;;  %v3852_v15 = vld [vmem:[%s4926_s26 + $0x430] ss:$8 sps:$4 sm:$0xff]   ;;  %v3855_v17 = vld [vmem:[%s4926_s26 + $0x444] ss:$8 sps:$4 sm:$0xff]  }
  0xa9   : > { %2928 = vmatpush1.bf16.msra.mxu1 %v3839_v6  ;;  %v3857_v18 = vld [vmem:[%s4926_s26 + $0x40] ss:$8 sps:$4 sm:$0xff]   ;;  %v3859_v20 = vld [vmem:[%s4926_s26 + $0x54] ss:$8 sps:$4 sm:$0xff]   ;;  %v3863_v22 = vld [vmem:[%s4926_s26 + $0x50] ss:$8 sps:$4 sm:$0xff]  }
  0xaa   : > { %3100 = vmatpush1.bf16.msra.mxu0 %v3840_v7  ;;  %2929 = vmatprep.subr.bf16.mxu1 %v3841_v8  ;;  %v3858_v19 = vld [vmem:[%s4926_s26 + $0x440] ss:$8 sps:$4 sm:$0xff]   ;;  %v3861_v21 = vld [vmem:[%s4926_s26 + $0x454] ss:$8 sps:$4 sm:$0xff]   ;;  %v3864_v23 = vld [vmem:[%s4926_s26 + $0x450] ss:$8 sps:$4 sm:$0xff]  }
  0xab   : > { %3101 = vmatprep.subr.bf16.mxu0 %v3843_v9  ;;  %v3865_v24 = vld [vmem:[%s4926_s26 + $0x64] ss:$8 sps:$4 sm:$0xff]   ;;  %v3869_v26 = vld [vmem:[%s4926_s26 + $0x60] ss:$8 sps:$4 sm:$0xff]   ;;  %v3871_v28 = vld [vmem:[%s4926_s26 + $0x74] ss:$8 sps:$4 sm:$0xff]  }
  0xac   : > { %v3867_v25 = vld [vmem:[%s4926_s26 + $0x464] ss:$8 sps:$4 sm:$0xff]   ;;  %v3870_v27 = vld [vmem:[%s4926_s26 + $0x460] ss:$8 sps:$4 sm:$0xff]   ;;  %v3873_v29 = vld [vmem:[%s4926_s26 + $0x474] ss:$8 sps:$4 sm:$0xff]  }
  0xad   : > { %2930 = vmatpush1.bf16.msra.mxu1 %v3845_v10  ;;  %v3875_v30 = vld [vmem:[%s4926_s26 + $0x70] ss:$8 sps:$4 sm:$0xff]   ;;  %v3877_v32 = vld [vmem:[%s4926_s26 + $0x84] ss:$8 sps:$4 sm:$0xff]   ;;  %v3881_v34 = vld [vmem:[%s4926_s26 + $0x80] ss:$8 sps:$4 sm:$0xff]  }
  0xae   : > { %3102 = vmatpush1.bf16.msra.mxu0 %v3846_v11  ;;  %2931 = vmatprep.subr.bf16.mxu1 %v3847_v12  ;;  %v3876_v31 = vld [vmem:[%s4926_s26 + $0x470] ss:$8 sps:$4 sm:$0xff]   ;;  %v3879_v33 = vld [vmem:[%s4926_s26 + $0x484] ss:$8 sps:$4 sm:$0xff]   ;;  %v3882_v35 = vld [vmem:[%s4926_s26 + $0x480] ss:$8 sps:$4 sm:$0xff]  }
  0xaf   : > { %3103 = vmatprep.subr.bf16.mxu0 %v3849_v13  ;;  %v3883_v36 = vld [vmem:[%s4926_s26 + $0x94] ss:$8 sps:$4 sm:$0xff]   ;;  %s5318_s14 = smov (!%p1267_p0, %s3439_s14), 3  ;;  %v3887_v38 = vld [vmem:[%s4926_s26 + $0x90] ss:$8 sps:$4 sm:$0xff]   ;;  %s5255_s7 = sshll.u32 %s4287_s17, 1 }
  0xb0   : > { %v3885_v37 = vld [vmem:[%s4926_s26 + $0x494] ss:$8 sps:$4 sm:$0xff]   ;;  %v3888_v39 = vld [vmem:[%s4926_s26 + $0x490] ss:$8 sps:$4 sm:$0xff]   ;;  %v3889_v40 = vld [vmem:[%s4926_s26 + $0xa4] ss:$8 sps:$4 sm:$0xff]  }
  0xb1   : > { %2932 = vmatpush1.bf16.msra.mxu1 %v3851_v14  ;;  %s3723_s27 = sshll.u32 %s5318_s14, 6  ;;  %v3891_v41 = vld [vmem:[%s4926_s26 + $0x4a4] ss:$8 sps:$4 sm:$0xff]   ;;  %v3893_v42 = vld [vmem:[%s4926_s26 + $0xa0] ss:$8 sps:$4 sm:$0xff]   ;;  %p1275_p1 = scmp.lt.s32.totalorder %s5255_s7, 5 }
  0xb2   : > { %3104 = vmatpush1.bf16.msra.mxu0 %v3852_v15  ;;  %2933 = vmatprep.subr.bf16.mxu1 %v3853_v16  ;;  %v3894_v43 = vld [vmem:[%s4926_s26 + $0x4a0] ss:$8 sps:$4 sm:$0xff]   ;;  %s4976_s6 = scalar_lea.vmem %s5297_s0, %s3723_s27  ;;  %v3895_v44 = vld [vmem:[%s4926_s26 + $0xb4] ss:$8 sps:$4 sm:$0xff]   ;;  %v3899_v46 = vld [vmem:[%s4926_s26 + $0xb0] ss:$8 sps:$4 sm:$0xff]  }
  0xb3   : > { %3105 = vmatprep.subr.bf16.mxu0 %v3855_v17  ;;  %v3897_v45 = vld [vmem:[%s4926_s26 + $0x4b4] ss:$8 sps:$4 sm:$0xff]   ;;  %v3900_v47 = vld [vmem:[%s4926_s26 + $0x4b0] ss:$8 sps:$4 sm:$0xff]   ;;  %v1281_v48 = vld [vmem:[%s4976_s6] sm:$0xff]  ;;  %s1276_s8 = scalar_select %p1275_p1, %s5255_s7, 5 }
  0xb4   : > { %v1289_v49 = vld [vmem:[%s4976_s6 + $0x40] sm:$0xff]  ;;  %v3907_v58 = vld [vmem:[%s4926_s26 + $0xd4] ss:$8 sps:$4 sm:$0xff]   ;;  %v3911_v60 = vld [vmem:[%s4926_s26 + $0xd0] ss:$8 sps:$4 sm:$0xff]   ;;  %s1263_s17 = sand.u32 1, %s4267_s12  }
  0xb5   : > { %2934 = vmatpush1.bf16.msra.mxu1 %v3857_v18  ;;  %v3901_v50 = vld [vmem:[%s4926_s26 + $0xc4] ss:$8 sps:$4 sm:$0xff]   ;;  %v3444_v52 = vcombine.high %v1281_v48, %v1289_v49  ;;  %v3905_v56 = vld [vmem:[%s4926_s26 + $0xc0] ss:$8 sps:$4 sm:$0xff]   ;;  %v3909_v59 = vld [vmem:[%s4926_s26 + $0x4d4] ss:$8 sps:$4 sm:$0xff]   ;;  %v3443_v8 = vcombine.low %v1281_v48, %v1289_v49  ;;  %s1277_s11 = scalar_lea.vmem %s5299_s2, %s1276_s8 }
  0xb6   : > { %3106 = vmatpush1.bf16.msra.mxu0 %v3858_v19  ;;  %2935 = vmatprep.subr.bf16.mxu1 %v3859_v20  ;;  %v3903_v51 = vld [vmem:[%s4926_s26 + $0x4c4] ss:$8 sps:$4 sm:$0xff]   ;;  %v3906_v57 = vld [vmem:[%s4926_s26 + $0x4c0] ss:$8 sps:$4 sm:$0xff]   ;;  %v3912_v61 = vld [vmem:[%s4926_s26 + $0x4d0] ss:$8 sps:$4 sm:$0xff]  }
  0xb7   : > { %3107 = vmatprep.subr.bf16.mxu0 %v3861_v21  ;;  %v1285_v53 = vld [vmem:[%s4976_s6 + $0x20] sm:$0xff]  ;;  %2957 = vmatprep.mubr.bf16.mxu1 %v3444_v52  ;;  %v3919_v2 = vld [vmem:[%s4926_s26 + $0xf4] ss:$8 sps:$4 sm:$0xff]   ;;  %v3923_v4 = vld [vmem:[%s4926_s26 + $0xf0] ss:$8 sps:$4 sm:$0xff]   ;;  %s3438_s23 = sshll.u32 %s1263_s17, 5 }
  0xb8   : > { %v1293_v54 = vld [vmem:[%s4976_s6 + $0x60] sm:$0xff]  ;;  %v3921_v3 = vld [vmem:[%s4926_s26 + $0x4f4] ss:$8 sps:$4 sm:$0xff]   ;;  %v3924_v5 = vld [vmem:[%s4926_s26 + $0x4f0] ss:$8 sps:$4 sm:$0xff]   ;;  %s1265_s24 = scalar_lea.vmem [#allocation3], %s3438_s23 }
  0xb9   : > { %2936 = vmatpush1.bf16.msra.mxu1 %v3863_v22  ;;  %v3452_v55 = vcombine.high %v1285_v53, %v1293_v54  ;;  %v3913_v62 = vld [vmem:[%s4926_s26 + $0xe4] ss:$8 sps:$4 sm:$0xff]   ;;  %v3917_v0 = vld [vmem:[%s4926_s26 + $0xe0] ss:$8 sps:$4 sm:$0xff]   ;;  %v3451_v10 = vcombine.low %v1285_v53, %v1293_v54  ;;  %v3933_v12 = vld [vmem:[%s4926_s26 + $0x114] ss:$8 sps:$4 sm:$0xff]  }
  0xba   : > { %3108 = vmatpush1.bf16.msra.mxu0 %v3864_v23  ;;  %2937 = vmatprep.subr.bf16.mxu1 %v3865_v24  ;;  %v3915_v63 = vld [vmem:[%s4926_s26 + $0x4e4] ss:$8 sps:$4 sm:$0xff]   ;;  %v3918_v1 = vld [vmem:[%s4926_s26 + $0x4e0] ss:$8 sps:$4 sm:$0xff]   ;;  %v3936_v13 = vld [vmem:[%s4926_s26 + $0x514] ss:$8 sps:$4 sm:$0xff]  }
  0xbb   : > { %3109 = vmatprep.subr.bf16.mxu0 %v3867_v25  ;;  %3129 = vmatprep.mubr.bf16.mxu0 %v3452_v55  ;;  %v3927_v6 = vld [vmem:[%s4926_s26 + $0x104] ss:$8 sps:$4 sm:$0xff]   ;;  %v3925_v9 = vld [vmem:[%s4926_s26 + $0x100] ss:$8 sps:$4 sm:$0xff]   ;;  %v3931_v14 = vld [vmem:[%s4926_s26 + $0x110] ss:$8 sps:$4 sm:$0xff]  }
  0xbc   : > { %v3930_v7 = vld [vmem:[%s4926_s26 + $0x504] ss:$8 sps:$4 sm:$0xff]   ;;  %v3928_v11 = vld [vmem:[%s4926_s26 + $0x500] ss:$8 sps:$4 sm:$0xff]   ;;  %v3934_v15 = vld [vmem:[%s4926_s26 + $0x510] ss:$8 sps:$4 sm:$0xff]  }
  0xbd   : > { %2938 = vmatpush1.bf16.msra.mxu1 %v3869_v26  ;;  %v3939_v16 = vld [vmem:[%s4926_s26 + $0x124] ss:$8 sps:$4 sm:$0xff]   ;;  %v3937_v18 = vld [vmem:[%s4926_s26 + $0x120] ss:$8 sps:$4 sm:$0xff]   ;;  %v3945_v20 = vld [vmem:[%s4926_s26 + $0x134] ss:$8 sps:$4 sm:$0xff]  }
  0xbe   : > { %3110 = vmatpush1.bf16.msra.mxu0 %v3870_v27  ;;  %2939 = vmatprep.subr.bf16.mxu1 %v3871_v28  ;;  %v3942_v17 = vld [vmem:[%s4926_s26 + $0x524] ss:$8 sps:$4 sm:$0xff]   ;;  %v3940_v19 = vld [vmem:[%s4926_s26 + $0x520] ss:$8 sps:$4 sm:$0xff]   ;;  %v3948_v21 = vld [vmem:[%s4926_s26 + $0x534] ss:$8 sps:$4 sm:$0xff]  }
  0xbf   : > { %3111 = vmatprep.subr.bf16.mxu0 %v3873_v29  ;;  %v3943_v22 = vld [vmem:[%s4926_s26 + $0x130] ss:$8 sps:$4 sm:$0xff]   ;;  %v3951_v24 = vld [vmem:[%s4926_s26 + $0x144] ss:$8 sps:$4 sm:$0xff]   ;;  %v3949_v26 = vld [vmem:[%s4926_s26 + $0x140] ss:$8 sps:$4 sm:$0xff]  }
  0xc0   : > { %v3946_v23 = vld [vmem:[%s4926_s26 + $0x530] ss:$8 sps:$4 sm:$0xff]   ;;  %v3954_v25 = vld [vmem:[%s4926_s26 + $0x544] ss:$8 sps:$4 sm:$0xff]   ;;  %v3952_v27 = vld [vmem:[%s4926_s26 + $0x540] ss:$8 sps:$4 sm:$0xff]  }
  0xc1   : > { %2940 = vmatpush1.bf16.msra.mxu1 %v3875_v30  ;;  %v3957_v28 = vld [vmem:[%s4926_s26 + $0x154] ss:$8 sps:$4 sm:$0xff]   ;;  %v3955_v30 = vld [vmem:[%s4926_s26 + $0x150] ss:$8 sps:$4 sm:$0xff]   ;;  %v3973_v48 = vld [vmem:[%s4926_s26 + $0x180] ss:$8 sps:$4 sm:$0xff]  }
  0xc2   : > { %3112 = vmatpush1.bf16.msra.mxu0 %v3876_v31  ;;  %2941 = vmatprep.subr.bf16.mxu1 %v3877_v32  ;;  %v3960_v29 = vld [vmem:[%s4926_s26 + $0x554] ss:$8 sps:$4 sm:$0xff]   ;;  %v3958_v31 = vld [vmem:[%s4926_s26 + $0x550] ss:$8 sps:$4 sm:$0xff]   ;;  %v3963_v32 = vld [vmem:[%s4926_s26 + $0x164] ss:$8 sps:$4 sm:$0xff]  }
  0xc3   : > { %3113 = vmatprep.subr.bf16.mxu0 %v3879_v33  ;;  %v3966_v33 = vld [vmem:[%s4926_s26 + $0x564] ss:$8 sps:$4 sm:$0xff]   ;;  %v3976_v49 = vld [vmem:[%s4926_s26 + $0x580] ss:$8 sps:$4 sm:$0xff]   ;;  %v3979_v52 = vld [vmem:[%s4926_s26 + $0x190] ss:$8 sps:$4 sm:$0xff]  }
  0xc4   : > { %v3982_v53 = vld [vmem:[%s4926_s26 + $0x590] ss:$8 sps:$4 sm:$0xff]   ;;  %v3987_v54 = vld [vmem:[%s4926_s26 + $0x1a4] ss:$8 sps:$4 sm:$0xff]   ;;  %s3756_s12 = smul.u32 (%p4389_p9), 12, %s4283_s16 }
  0xc5   : > { %2942 = vmatpush1.bf16.msra.mxu1 %v3881_v34  ;;  %v3961_v34 = vld [vmem:[%s4926_s26 + $0x160] ss:$8 sps:$4 sm:$0xff]   ;;  %v3990_v55 = vld [vmem:[%s4926_s26 + $0x5a4] ss:$8 sps:$4 sm:$0xff]  }
  0xc6   : > { %3114 = vmatpush1.bf16.msra.mxu0 %v3882_v35  ;;  %2943 = vmatprep.subr.bf16.mxu1 %v3883_v36  ;;  %v3964_v35 = vld [vmem:[%s4926_s26 + $0x560] ss:$8 sps:$4 sm:$0xff]   ;;  %s3311_s25 = sadd.s32 (%p4389_p9), %s3756_s12, %s5255_s7 }
  0xc7   : > { %3115 = vmatprep.subr.bf16.mxu0 %v3885_v37  ;;  %v5031_v36 = vld [vmem:[%s4976_s6 + $0x8] sm:$0xff] }
  0xc8   : > { %v5034_v37 = vld [vmem:[%s4976_s6 + $0x48] sm:$0xff] }
  0xc9   : > { %2944 = vmatpush1.bf16.msra.mxu1 %v3887_v38  ;;  %v3969_v38 = vld [vmem:[%s4926_s26 + $0x174] ss:$8 sps:$4 sm:$0xff]  }
  0xca   : > { %3116 = vmatpush1.bf16.msra.mxu0 %v3888_v39  ;;  %2945 = vmatprep.subr.bf16.mxu1 %v3889_v40  ;;  %v3972_v39 = vld [vmem:[%s4926_s26 + $0x574] ss:$8 sps:$4 sm:$0xff]   ;;  %v3446_v40 = vcombine.high %v5031_v36, %v5034_v37 }
  0xcb   : > { %3117 = vmatprep.subr.bf16.mxu0 %v3891_v41  ;;  %v5041_v41 = vld [vmem:[%s4976_s6 + $0x28] sm:$0xff] }
  0xcd   : > { %2946 = vmatpush1.bf16.msra.mxu1 %v3893_v42  ;;  %v5044_v42 = vld [vmem:[%s4976_s6 + $0x68] sm:$0xff] }
  0xce   : > { %3118 = vmatpush1.bf16.msra.mxu0 %v3894_v43  ;;  %2947 = vmatprep.subr.bf16.mxu1 %v3895_v44  ;;  %v3454_v43 = vcombine.high %v5041_v41, %v5044_v42  ;;  %v3967_v44 = vld [vmem:[%s4926_s26 + $0x170] ss:$8 sps:$4 sm:$0xff]  }
  0xcf   : > { %3119 = vmatprep.subr.bf16.mxu0 %v3897_v45  ;;  %v3970_v45 = vld [vmem:[%s4926_s26 + $0x570] ss:$8 sps:$4 sm:$0xff]  }
  0xd1   : > { %2948 = vmatpush1.bf16.msra.mxu1 %v3899_v46  ;;  %v3975_v46 = vld [vmem:[%s4926_s26 + $0x184] ss:$8 sps:$4 sm:$0xff]  }
  0xd2   : > { %3120 = vmatpush1.bf16.msra.mxu0 %v3900_v47  ;;  %2949 = vmatprep.subr.bf16.mxu1 %v3901_v50  ;;  %v3978_v47 = vld [vmem:[%s4926_s26 + $0x584] ss:$8 sps:$4 sm:$0xff]   ;;  %v3981_v50 = vld [vmem:[%s4926_s26 + $0x194] ss:$8 sps:$4 sm:$0xff]  }
  0xd3   : > { %3121 = vmatprep.subr.bf16.mxu0 %v3903_v51  ;;  %v3984_v51 = vld [vmem:[%s4926_s26 + $0x594] ss:$8 sps:$4 sm:$0xff]  }
  0xd5   : > { %2950 = vmatpush1.bf16.msra.mxu1 %v3905_v56  ;;  %v3985_v56 = vld [vmem:[%s4926_s26 + $0x1a0] ss:$8 sps:$4 sm:$0xff]  }
  0xd6   : > { %3122 = vmatpush1.bf16.msra.mxu0 %v3906_v57  ;;  %2951 = vmatprep.subr.bf16.mxu1 %v3907_v58  ;;  %v3988_v57 = vld [vmem:[%s4926_s26 + $0x5a0] ss:$8 sps:$4 sm:$0xff]   ;;  %v3993_v58 = vld [vmem:[%s4926_s26 + $0x1b4] ss:$8 sps:$4 sm:$0xff]  }
  0xd7   : > { %3123 = vmatprep.subr.bf16.mxu0 %v3909_v59  ;;  %v3996_v59 = vld [vmem:[%s4926_s26 + $0x5b4] ss:$8 sps:$4 sm:$0xff]  }
  0xd9   : > { %2952 = vmatpush1.bf16.msra.mxu1 %v3911_v60  ;;  %v3991_v60 = vld [vmem:[%s4926_s26 + $0x1b0] ss:$8 sps:$4 sm:$0xff]  }
  0xda   : > { %3124 = vmatpush1.bf16.msra.mxu0 %v3912_v61  ;;  %2953 = vmatprep.subr.bf16.mxu1 %v3913_v62  ;;  %v3994_v61 = vld [vmem:[%s4926_s26 + $0x5b0] ss:$8 sps:$4 sm:$0xff]   ;;  %v3999_v62 = vld [vmem:[%s4926_s26 + $0x1c4] ss:$8 sps:$4 sm:$0xff]  }
  0xdb   : > { %3125 = vmatprep.subr.bf16.mxu0 %v3915_v63  ;;  %v4002_v63 = vld [vmem:[%s4926_s26 + $0x5c4] ss:$8 sps:$4 sm:$0xff]  }
  0xdd   : > { %2954 = vmatpush1.bf16.msra.mxu1 %v3917_v0  ;;  %v3997_v0 = vld [vmem:[%s4926_s26 + $0x1c0] ss:$8 sps:$4 sm:$0xff]  }
  0xde   : > { %3126 = vmatpush1.bf16.msra.mxu0 %v3918_v1  ;;  %2955 = vmatprep.subr.bf16.mxu1 %v3919_v2  ;;  %v4000_v1 = vld [vmem:[%s4926_s26 + $0x5c0] ss:$8 sps:$4 sm:$0xff]   ;;  %v4005_v2 = vld [vmem:[%s4926_s26 + $0x1d4] ss:$8 sps:$4 sm:$0xff]  }
  0xdf   : > { %3127 = vmatprep.subr.bf16.mxu0 %v3921_v3  ;;  %v4008_v3 = vld [vmem:[%s4926_s26 + $0x5d4] ss:$8 sps:$4 sm:$0xff]  }
  0xe1   : > { %2956 = vmatpush1.bf16.msra.mxu1 %v3923_v4  ;;  %v4003_v4 = vld [vmem:[%s4926_s26 + $0x1d0] ss:$8 sps:$4 sm:$0xff]  }
  0xe2   : > { %3128 = vmatpush1.bf16.msra.mxu0 %v3924_v5  ;;  %2968 = vmatprep.subr.bf16.mxu1 %v3927_v6  ;;  %v4006_v5 = vld [vmem:[%s4926_s26 + $0x5d0] ss:$8 sps:$4 sm:$0xff]   ;;  %v4011_v6 = vld [vmem:[%s4926_s26 + $0x1e4] ss:$8 sps:$4 sm:$0xff]  }
  0xe3   : > { %3140 = vmatprep.subr.bf16.mxu0 %v3930_v7  ;;  %v4014_v7 = vld [vmem:[%s4926_s26 + $0x5e4] ss:$8 sps:$4 sm:$0xff]  }
  0xe4   : > { %2958 = vmatmul.mubr.bf16.vlgmr.msra.gmra.mrb[0].mxu1 %v3443_v8  ;;  %v4009_v8 = vld [vmem:[%s4926_s26 + $0x1e0] ss:$8 sps:$4 sm:$0xff]  }
  0xe5   : > { %3130 = vmatmul.mubr.bf16.vlgmr.msra.gmra.mrb[0].mxu0 %v3451_v10  ;;  %2969 = vmatpush1.bf16.msra.mxu1 %v3925_v9  ;;  %v4012_v9 = vld [vmem:[%s4926_s26 + $0x5e0] ss:$8 sps:$4 sm:$0xff]   ;;  %v4017_v10 = vld [vmem:[%s4926_s26 + $0x1f4] ss:$8 sps:$4 sm:$0xff]  }
  0xe6   : > { %3141 = vmatpush1.bf16.msra.mxu0 %v3928_v11  ;;  %2970 = vmatprep.subr.bf16.mxu1 %v3933_v12  ;;  %v4020_v11 = vld [vmem:[%s4926_s26 + $0x5f4] ss:$8 sps:$4 sm:$0xff]   ;;  %v4015_v12 = vld [vmem:[%s4926_s26 + $0x1f0] ss:$8 sps:$4 sm:$0xff]  }
  0xe7   : > { %3142 = vmatprep.subr.bf16.mxu0 %v3936_v13  ;;  %3000 = vmatprep.mubr.bf16.mxu1 %v3446_v40  ;;  %v4018_v13 = vld [vmem:[%s4926_s26 + $0x5f0] ss:$8 sps:$4 sm:$0xff]   ;;  %v4045_v40 = vld [vmem:[%s4926_s26 + $0x240] ss:$8 sps:$4 sm:$0xff]  }
  0xe8   : > { %3172 = vmatprep.mubr.bf16.mxu0 %v3454_v43  ;;  %v4056_v43 = vld [vmem:[%s4926_s26 + $0x654] ss:$8 sps:$4 sm:$0xff]  }
  0xe9   : > { %2971 = vmatpush1.bf16.msra.mxu1 %v3931_v14  ;;  %v4023_v14 = vld [vmem:[%s4926_s26 + $0x204] ss:$8 sps:$4 sm:$0xff]  }
  0xea   : > { %3143 = vmatpush1.bf16.msra.mxu0 %v3934_v15  ;;  %2972 = vmatprep.subr.bf16.mxu1 %v3939_v16  ;;  %v4026_v15 = vld [vmem:[%s4926_s26 + $0x604] ss:$8 sps:$4 sm:$0xff]   ;;  %v3445_v16 = vcombine.low %v5031_v36, %v5034_v37  ;;  %v4039_v36 = vld [vmem:[%s4926_s26 + $0x230] ss:$8 sps:$4 sm:$0xff]  }
  0xeb   : > { %3144 = vmatprep.subr.bf16.mxu0 %v3942_v17  ;;  %v4021_v17 = vld [vmem:[%s4926_s26 + $0x200] ss:$8 sps:$4 sm:$0xff]   ;;  %v4042_v37 = vld [vmem:[%s4926_s26 + $0x630] ss:$8 sps:$4 sm:$0xff]  }
  0xed   : > { %2973 = vmatpush1.bf16.msra.mxu1 %v3937_v18  ;;  %v3453_v18 = vcombine.low %v5041_v41, %v5044_v42  ;;  %v4048_v41 = vld [vmem:[%s4926_s26 + $0x640] ss:$8 sps:$4 sm:$0xff]   ;;  %v4053_v42 = vld [vmem:[%s4926_s26 + $0x254] ss:$8 sps:$4 sm:$0xff]  }
  0xee   : > { %3145 = vmatpush1.bf16.msra.mxu0 %v3940_v19  ;;  %2974 = vmatprep.subr.bf16.mxu1 %v3945_v20  ;;  %v4024_v19 = vld [vmem:[%s4926_s26 + $0x600] ss:$8 sps:$4 sm:$0xff]   ;;  %v4029_v20 = vld [vmem:[%s4926_s26 + $0x214] ss:$8 sps:$4 sm:$0xff]  }
  0xef   : > { %3146 = vmatprep.subr.bf16.mxu0 %v3948_v21  ;;  %v4032_v21 = vld [vmem:[%s4926_s26 + $0x614] ss:$8 sps:$4 sm:$0xff]  }
  0xf1   : > { %2975 = vmatpush1.bf16.msra.mxu1 %v3943_v22  ;;  %v4027_v22 = vld [vmem:[%s4926_s26 + $0x210] ss:$8 sps:$4 sm:$0xff]  }
  0xf2   : > { %3147 = vmatpush1.bf16.msra.mxu0 %v3946_v23  ;;  %2976 = vmatprep.subr.bf16.mxu1 %v3951_v24  ;;  %v4030_v23 = vld [vmem:[%s4926_s26 + $0x610] ss:$8 sps:$4 sm:$0xff]  }
  0xf3   : > { %3148 = vmatprep.subr.bf16.mxu0 %v3954_v25  ;;  %v5095_v24 = vld [vmem:[%s4976_s6 + $0x10] sm:$0xff] }
  0xf4   : > { %v5098_v25 = vld [vmem:[%s4976_s6 + $0x50] sm:$0xff] }
  0xf5   : > { %2977 = vmatpush1.bf16.msra.mxu1 %v3949_v26  ;;  %v4035_v26 = vld [vmem:[%s4926_s26 + $0x224] ss:$8 sps:$4 sm:$0xff]  }
  0xf6   : > { %3149 = vmatpush1.bf16.msra.mxu0 %v3952_v27  ;;  %2978 = vmatprep.subr.bf16.mxu1 %v3957_v28  ;;  %v4038_v27 = vld [vmem:[%s4926_s26 + $0x624] ss:$8 sps:$4 sm:$0xff]   ;;  %v3448_v28 = vcombine.high %v5095_v24, %v5098_v25 }
  0xf7   : > { %3150 = vmatprep.subr.bf16.mxu0 %v3960_v29  ;;  %v5105_v29 = vld [vmem:[%s4976_s6 + $0x30] sm:$0xff] }
  0xf9   : > { %2979 = vmatpush1.bf16.msra.mxu1 %v3955_v30  ;;  %v5108_v30 = vld [vmem:[%s4976_s6 + $0x70] sm:$0xff] }
  0xfa   : > { %3151 = vmatpush1.bf16.msra.mxu0 %v3958_v31  ;;  %2980 = vmatprep.subr.bf16.mxu1 %v3963_v32  ;;  %v3456_v31 = vcombine.high %v5105_v29, %v5108_v30  ;;  %v4033_v32 = vld [vmem:[%s4926_s26 + $0x220] ss:$8 sps:$4 sm:$0xff]  }
  0xfb   : > { %3152 = vmatprep.subr.bf16.mxu0 %v3966_v33  ;;  %v4036_v33 = vld [vmem:[%s4926_s26 + $0x620] ss:$8 sps:$4 sm:$0xff]  }
  0xfd   : > { %2981 = vmatpush1.bf16.msra.mxu1 %v3961_v34  ;;  %v4041_v34 = vld [vmem:[%s4926_s26 + $0x234] ss:$8 sps:$4 sm:$0xff]  }
  0xfe   : > { %3153 = vmatpush1.bf16.msra.mxu0 %v3964_v35  ;;  %2982 = vmatprep.subr.bf16.mxu1 %v3969_v38  ;;  %v4044_v35 = vld [vmem:[%s4926_s26 + $0x634] ss:$8 sps:$4 sm:$0xff]   ;;  %v4047_v38 = vld [vmem:[%s4926_s26 + $0x244] ss:$8 sps:$4 sm:$0xff]  }
  0xff   : > { %3154 = vmatprep.subr.bf16.mxu0 %v3972_v39  ;;  %v4050_v39 = vld [vmem:[%s4926_s26 + $0x644] ss:$8 sps:$4 sm:$0xff]  }
 0x101   : > { %2983 = vmatpush1.bf16.msra.mxu1 %v3967_v44  ;;  %v4051_v44 = vld [vmem:[%s4926_s26 + $0x250] ss:$8 sps:$4 sm:$0xff]  }
 0x102   : > { %3155 = vmatpush1.bf16.msra.mxu0 %v3970_v45  ;;  %2984 = vmatprep.subr.bf16.mxu1 %v3975_v46  ;;  %v4054_v45 = vld [vmem:[%s4926_s26 + $0x650] ss:$8 sps:$4 sm:$0xff]   ;;  %v4059_v46 = vld [vmem:[%s4926_s26 + $0x264] ss:$8 sps:$4 sm:$0xff]  }
 0x103   : > { %3156 = vmatprep.subr.bf16.mxu0 %v3978_v47  ;;  %v4062_v47 = vld [vmem:[%s4926_s26 + $0x664] ss:$8 sps:$4 sm:$0xff]  }
 0x105   : > { %2985 = vmatpush1.bf16.msra.mxu1 %v3973_v48  ;;  %v4057_v48 = vld [vmem:[%s4926_s26 + $0x260] ss:$8 sps:$4 sm:$0xff]  }
 0x106   : > { %3157 = vmatpush1.bf16.msra.mxu0 %v3976_v49  ;;  %2986 = vmatprep.subr.bf16.mxu1 %v3981_v50  ;;  %v4060_v49 = vld [vmem:[%s4926_s26 + $0x660] ss:$8 sps:$4 sm:$0xff]   ;;  %v4065_v50 = vld [vmem:[%s4926_s26 + $0x274] ss:$8 sps:$4 sm:$0xff]  }
 0x107   : > { %3158 = vmatprep.subr.bf16.mxu0 %v3984_v51  ;;  %v4068_v51 = vld [vmem:[%s4926_s26 + $0x674] ss:$8 sps:$4 sm:$0xff]  }
 0x109   : > { %2987 = vmatpush1.bf16.msra.mxu1 %v3979_v52  ;;  %v4063_v52 = vld [vmem:[%s4926_s26 + $0x270] ss:$8 sps:$4 sm:$0xff]  }
 0x10a   : > { %3159 = vmatpush1.bf16.msra.mxu0 %v3982_v53  ;;  %2988 = vmatprep.subr.bf16.mxu1 %v3987_v54  ;;  %v4066_v53 = vld [vmem:[%s4926_s26 + $0x670] ss:$8 sps:$4 sm:$0xff]   ;;  %v4071_v54 = vld [vmem:[%s4926_s26 + $0x284] ss:$8 sps:$4 sm:$0xff]  }
 0x10b   : > { %3160 = vmatprep.subr.bf16.mxu0 %v3990_v55  ;;  %v4074_v55 = vld [vmem:[%s4926_s26 + $0x684] ss:$8 sps:$4 sm:$0xff]  }
 0x10d   : > { %2989 = vmatpush1.bf16.msra.mxu1 %v3985_v56  ;;  %v4069_v56 = vld [vmem:[%s4926_s26 + $0x280] ss:$8 sps:$4 sm:$0xff]  }
 0x10e   : > { %3161 = vmatpush1.bf16.msra.mxu0 %v3988_v57  ;;  %2990 = vmatprep.subr.bf16.mxu1 %v3993_v58  ;;  %v4072_v57 = vld [vmem:[%s4926_s26 + $0x680] ss:$8 sps:$4 sm:$0xff]   ;;  %v4077_v58 = vld [vmem:[%s4926_s26 + $0x294] ss:$8 sps:$4 sm:$0xff]  }
 0x10f   : > { %3162 = vmatprep.subr.bf16.mxu0 %v3996_v59  ;;  %v4080_v59 = vld [vmem:[%s4926_s26 + $0x694] ss:$8 sps:$4 sm:$0xff]  }
 0x111   : > { %2991 = vmatpush1.bf16.msra.mxu1 %v3991_v60  ;;  %v4075_v60 = vld [vmem:[%s4926_s26 + $0x290] ss:$8 sps:$4 sm:$0xff]  }
 0x112   : > { %3163 = vmatpush1.bf16.msra.mxu0 %v3994_v61  ;;  %2992 = vmatprep.subr.bf16.mxu1 %v3999_v62  ;;  %v4078_v61 = vld [vmem:[%s4926_s26 + $0x690] ss:$8 sps:$4 sm:$0xff]   ;;  %v4083_v62 = vld [vmem:[%s4926_s26 + $0x2a4] ss:$8 sps:$4 sm:$0xff]  }
 0x113   : > { %3164 = vmatprep.subr.bf16.mxu0 %v4002_v63  ;;  %v4086_v63 = vld [vmem:[%s4926_s26 + $0x6a4] ss:$8 sps:$4 sm:$0xff]  }
 0x115   : > { %2993 = vmatpush1.bf16.msra.mxu1 %v3997_v0  ;;  %v4081_v0 = vld [vmem:[%s4926_s26 + $0x2a0] ss:$8 sps:$4 sm:$0xff]  }
 0x116   : > { %3165 = vmatpush1.bf16.msra.mxu0 %v4000_v1  ;;  %2994 = vmatprep.subr.bf16.mxu1 %v4005_v2  ;;  %v4084_v1 = vld [vmem:[%s4926_s26 + $0x6a0] ss:$8 sps:$4 sm:$0xff]   ;;  %v4089_v2 = vld [vmem:[%s4926_s26 + $0x2b4] ss:$8 sps:$4 sm:$0xff]  }
 0x117   : > { %3166 = vmatprep.subr.bf16.mxu0 %v4008_v3  ;;  %v4092_v3 = vld [vmem:[%s4926_s26 + $0x6b4] ss:$8 sps:$4 sm:$0xff]  }
 0x119   : > { %2995 = vmatpush1.bf16.msra.mxu1 %v4003_v4  ;;  %v4087_v4 = vld [vmem:[%s4926_s26 + $0x2b0] ss:$8 sps:$4 sm:$0xff]  }
 0x11a   : > { %3167 = vmatpush1.bf16.msra.mxu0 %v4006_v5  ;;  %2996 = vmatprep.subr.bf16.mxu1 %v4011_v6  ;;  %v4090_v5 = vld [vmem:[%s4926_s26 + $0x6b0] ss:$8 sps:$4 sm:$0xff]   ;;  %v4095_v6 = vld [vmem:[%s4926_s26 + $0x2c4] ss:$8 sps:$4 sm:$0xff]  }
 0x11b   : > { %3168 = vmatprep.subr.bf16.mxu0 %v4014_v7  ;;  %v4098_v7 = vld [vmem:[%s4926_s26 + $0x6c4] ss:$8 sps:$4 sm:$0xff]  }
 0x11d   : > { %2997 = vmatpush1.bf16.msra.mxu1 %v4009_v8  ;;  %v4093_v8 = vld [vmem:[%s4926_s26 + $0x2c0] ss:$8 sps:$4 sm:$0xff]  }
 0x11e   : > { %3169 = vmatpush1.bf16.msra.mxu0 %v4012_v9  ;;  %2998 = vmatprep.subr.bf16.mxu1 %v4017_v10  ;;  %v4096_v9 = vld [vmem:[%s4926_s26 + $0x6c0] ss:$8 sps:$4 sm:$0xff]   ;;  %v4101_v10 = vld [vmem:[%s4926_s26 + $0x2d4] ss:$8 sps:$4 sm:$0xff]  }
 0x11f   : > { %3170 = vmatprep.subr.bf16.mxu0 %v4020_v11  ;;  %v4104_v11 = vld [vmem:[%s4926_s26 + $0x6d4] ss:$8 sps:$4 sm:$0xff]  }
 0x121   : > { %2999 = vmatpush1.bf16.msra.mxu1 %v4015_v12  ;;  %v4099_v12 = vld [vmem:[%s4926_s26 + $0x2d0] ss:$8 sps:$4 sm:$0xff]  }
 0x122   : > { %3171 = vmatpush1.bf16.msra.mxu0 %v4018_v13  ;;  %3011 = vmatprep.subr.bf16.mxu1 %v4023_v14  ;;  %v4102_v13 = vld [vmem:[%s4926_s26 + $0x6d0] ss:$8 sps:$4 sm:$0xff]   ;;  %v4107_v14 = vld [vmem:[%s4926_s26 + $0x2e4] ss:$8 sps:$4 sm:$0xff]  }
 0x123   : > { %3183 = vmatprep.subr.bf16.mxu0 %v4026_v15  ;;  %v4110_v15 = vld [vmem:[%s4926_s26 + $0x6e4] ss:$8 sps:$4 sm:$0xff]  }
 0x124   : > { %3001 = vmatmul.mubr.bf16.vlgmr.msra.gmra.mrb[0].mxu1 %v3445_v16  ;;  %v4105_v16 = vld [vmem:[%s4926_s26 + $0x2e0] ss:$8 sps:$4 sm:$0xff]  }
 0x125   : > { %3173 = vmatmul.mubr.bf16.vlgmr.msra.gmra.mrb[0].mxu0 %v3453_v18  ;;  %3012 = vmatpush1.bf16.msra.mxu1 %v4021_v17  ;;  %v4108_v17 = vld [vmem:[%s4926_s26 + $0x6e0] ss:$8 sps:$4 sm:$0xff]   ;;  %v4113_v18 = vld [vmem:[%s4926_s26 + $0x2f4] ss:$8 sps:$4 sm:$0xff]  }
 0x126   : > { %3184 = vmatpush1.bf16.msra.mxu0 %v4024_v19  ;;  %3013 = vmatprep.subr.bf16.mxu1 %v4029_v20  ;;  %v4116_v19 = vld [vmem:[%s4926_s26 + $0x6f4] ss:$8 sps:$4 sm:$0xff]   ;;  %v4111_v20 = vld [vmem:[%s4926_s26 + $0x2f0] ss:$8 sps:$4 sm:$0xff]  }
 0x127   : > { %3185 = vmatprep.subr.bf16.mxu0 %v4032_v21  ;;  %3043 = vmatprep.mubr.bf16.mxu1 %v3448_v28  ;;  %v4114_v21 = vld [vmem:[%s4926_s26 + $0x6f0] ss:$8 sps:$4 sm:$0xff]   ;;  %v3455_v28 = vcombine.low %v5105_v29, %v5108_v30 }
 0x128   : > { %3215 = vmatprep.mubr.bf16.mxu0 %v3456_v31  ;;  %v5176_v31 = vld [vmem:[%s4976_s6 + $0x58] sm:$0xff] }
 0x129   : > { %3014 = vmatpush1.bf16.msra.mxu1 %v4027_v22  ;;  %v4119_v22 = vld [vmem:[%s4926_s26 + $0x304] ss:$8 sps:$4 sm:$0xff]  }
 0x12a   : > { %3186 = vmatpush1.bf16.msra.mxu0 %v4030_v23  ;;  %3015 = vmatprep.subr.bf16.mxu1 %v4035_v26  ;;  %v4122_v23 = vld [vmem:[%s4926_s26 + $0x704] ss:$8 sps:$4 sm:$0xff]   ;;  %v5169_v26 = vld [vmem:[%s4976_s6 + $0x18] sm:$0xff] }
 0x12b   : > { %3187 = vmatprep.subr.bf16.mxu0 %v4038_v27  ;;  %v3447_v27 = vcombine.low %v5095_v24, %v5098_v25  ;;  %v4125_v24 = vld [vmem:[%s4926_s26 + $0x314] ss:$8 sps:$4 sm:$0xff]   ;;  %v3450_v29 = vcombine.high %v5169_v26, %v5176_v31 }
 0x12c   : > { %v4128_v25 = vld [vmem:[%s4926_s26 + $0x714] ss:$8 sps:$4 sm:$0xff]  }
 0x12d   : > { %3016 = vmatpush1.bf16.msra.mxu1 %v4033_v32  ;;  %v5179_v32 = vld [vmem:[%s4976_s6 + $0x38] sm:$0xff] }
 0x12e   : > { %3188 = vmatpush1.bf16.msra.mxu0 %v4036_v33  ;;  %3017 = vmatprep.subr.bf16.mxu1 %v4041_v34  ;;  %v5182_v33 = vld [vmem:[%s4976_s6 + $0x78] sm:$0xff]  ;;  %v4117_v34 = vld [vmem:[%s4926_s26 + $0x300] ss:$8 sps:$4 sm:$0xff]  }
 0x12f   : > { %3189 = vmatprep.subr.bf16.mxu0 %v4044_v35  ;;  %v4120_v35 = vld [vmem:[%s4926_s26 + $0x700] ss:$8 sps:$4 sm:$0xff]   ;;  %v3458_v30 = vcombine.high %v5179_v32, %v5182_v33 }
 0x131   : > { %3018 = vmatpush1.bf16.msra.mxu1 %v4039_v36  ;;  %v4123_v36 = vld [vmem:[%s4926_s26 + $0x310] ss:$8 sps:$4 sm:$0xff]  }
 0x132   : > { %3190 = vmatpush1.bf16.msra.mxu0 %v4042_v37  ;;  %3019 = vmatprep.subr.bf16.mxu1 %v4047_v38  ;;  %v4126_v37 = vld [vmem:[%s4926_s26 + $0x710] ss:$8 sps:$4 sm:$0xff]   ;;  %v4131_v38 = vld [vmem:[%s4926_s26 + $0x324] ss:$8 sps:$4 sm:$0xff]  }
 0x133   : > { %3191 = vmatprep.subr.bf16.mxu0 %v4050_v39  ;;  %v4134_v39 = vld [vmem:[%s4926_s26 + $0x724] ss:$8 sps:$4 sm:$0xff]  }
 0x135   : > { %3020 = vmatpush1.bf16.msra.mxu1 %v4045_v40  ;;  %v4129_v40 = vld [vmem:[%s4926_s26 + $0x320] ss:$8 sps:$4 sm:$0xff]  }
 0x136   : > { %3192 = vmatpush1.bf16.msra.mxu0 %v4048_v41  ;;  %3021 = vmatprep.subr.bf16.mxu1 %v4053_v42  ;;  %v4132_v41 = vld [vmem:[%s4926_s26 + $0x720] ss:$8 sps:$4 sm:$0xff]   ;;  %v4137_v42 = vld [vmem:[%s4926_s26 + $0x334] ss:$8 sps:$4 sm:$0xff]  }
 0x137   : > { %3193 = vmatprep.subr.bf16.mxu0 %v4056_v43  ;;  %v4140_v43 = vld [vmem:[%s4926_s26 + $0x734] ss:$8 sps:$4 sm:$0xff]  }
 0x139   : > { %3022 = vmatpush1.bf16.msra.mxu1 %v4051_v44  ;;  %v4135_v44 = vld [vmem:[%s4926_s26 + $0x330] ss:$8 sps:$4 sm:$0xff]  }
 0x13a   : > { %3194 = vmatpush1.bf16.msra.mxu0 %v4054_v45  ;;  %3023 = vmatprep.subr.bf16.mxu1 %v4059_v46  ;;  %v4138_v45 = vld [vmem:[%s4926_s26 + $0x730] ss:$8 sps:$4 sm:$0xff]   ;;  %v4143_v46 = vld [vmem:[%s4926_s26 + $0x344] ss:$8 sps:$4 sm:$0xff]  }
 0x13b   : > { %3195 = vmatprep.subr.bf16.mxu0 %v4062_v47  ;;  %v4146_v47 = vld [vmem:[%s4926_s26 + $0x744] ss:$8 sps:$4 sm:$0xff]  }
 0x13d   : > { %3024 = vmatpush1.bf16.msra.mxu1 %v4057_v48  ;;  %v4141_v48 = vld [vmem:[%s4926_s26 + $0x340] ss:$8 sps:$4 sm:$0xff]  }
 0x13e   : > { %3196 = vmatpush1.bf16.msra.mxu0 %v4060_v49  ;;  %3025 = vmatprep.subr.bf16.mxu1 %v4065_v50  ;;  %v4144_v49 = vld [vmem:[%s4926_s26 + $0x740] ss:$8 sps:$4 sm:$0xff]   ;;  %v4149_v50 = vld [vmem:[%s4926_s26 + $0x354] ss:$8 sps:$4 sm:$0xff]  }
 0x13f   : > { %3197 = vmatprep.subr.bf16.mxu0 %v4068_v51  ;;  %v4152_v51 = vld [vmem:[%s4926_s26 + $0x754] ss:$8 sps:$4 sm:$0xff]  }
 0x141   : > { %3026 = vmatpush1.bf16.msra.mxu1 %v4063_v52  ;;  %v4147_v52 = vld [vmem:[%s4926_s26 + $0x350] ss:$8 sps:$4 sm:$0xff]  }
 0x142   : > { %3198 = vmatpush1.bf16.msra.mxu0 %v4066_v53  ;;  %3027 = vmatprep.subr.bf16.mxu1 %v4071_v54  ;;  %v4150_v53 = vld [vmem:[%s4926_s26 + $0x750] ss:$8 sps:$4 sm:$0xff]   ;;  %v4155_v54 = vld [vmem:[%s4926_s26 + $0x364] ss:$8 sps:$4 sm:$0xff]  }
 0x143   : > { %3199 = vmatprep.subr.bf16.mxu0 %v4074_v55  ;;  %v4158_v55 = vld [vmem:[%s4926_s26 + $0x764] ss:$8 sps:$4 sm:$0xff]  }
 0x145   : > { %3028 = vmatpush1.bf16.msra.mxu1 %v4069_v56  ;;  %v4153_v56 = vld [vmem:[%s4926_s26 + $0x360] ss:$8 sps:$4 sm:$0xff]  }
 0x146   : > { %3200 = vmatpush1.bf16.msra.mxu0 %v4072_v57  ;;  %3029 = vmatprep.subr.bf16.mxu1 %v4077_v58  ;;  %v4156_v57 = vld [vmem:[%s4926_s26 + $0x760] ss:$8 sps:$4 sm:$0xff]   ;;  %v4161_v58 = vld [vmem:[%s4926_s26 + $0x374] ss:$8 sps:$4 sm:$0xff]  }
 0x147   : > { %3201 = vmatprep.subr.bf16.mxu0 %v4080_v59  ;;  %v4164_v59 = vld [vmem:[%s4926_s26 + $0x774] ss:$8 sps:$4 sm:$0xff]  }
 0x149   : > { %3030 = vmatpush1.bf16.msra.mxu1 %v4075_v60  ;;  %v4159_v60 = vld [vmem:[%s4926_s26 + $0x370] ss:$8 sps:$4 sm:$0xff]  }
 0x14a   : > { %3202 = vmatpush1.bf16.msra.mxu0 %v4078_v61  ;;  %3031 = vmatprep.subr.bf16.mxu1 %v4083_v62  ;;  %v4162_v61 = vld [vmem:[%s4926_s26 + $0x770] ss:$8 sps:$4 sm:$0xff]   ;;  %v4167_v62 = vld [vmem:[%s4926_s26 + $0x384] ss:$8 sps:$4 sm:$0xff]  }
 0x14b   : > { %3203 = vmatprep.subr.bf16.mxu0 %v4086_v63  ;;  %v4170_v63 = vld [vmem:[%s4926_s26 + $0x784] ss:$8 sps:$4 sm:$0xff]  }
 0x14d   : > { %3032 = vmatpush1.bf16.msra.mxu1 %v4081_v0  ;;  %v4165_v0 = vld [vmem:[%s4926_s26 + $0x380] ss:$8 sps:$4 sm:$0xff]  }
 0x14e   : > { %3204 = vmatpush1.bf16.msra.mxu0 %v4084_v1  ;;  %3033 = vmatprep.subr.bf16.mxu1 %v4089_v2  ;;  %v4168_v1 = vld [vmem:[%s4926_s26 + $0x780] ss:$8 sps:$4 sm:$0xff]   ;;  %v4173_v2 = vld [vmem:[%s4926_s26 + $0x394] ss:$8 sps:$4 sm:$0xff]  }
 0x14f   : > { %3205 = vmatprep.subr.bf16.mxu0 %v4092_v3  ;;  %v4176_v3 = vld [vmem:[%s4926_s26 + $0x794] ss:$8 sps:$4 sm:$0xff]  }
 0x151   : > { %3034 = vmatpush1.bf16.msra.mxu1 %v4087_v4  ;;  %v4171_v4 = vld [vmem:[%s4926_s26 + $0x390] ss:$8 sps:$4 sm:$0xff]  }
 0x152   : > { %3206 = vmatpush1.bf16.msra.mxu0 %v4090_v5  ;;  %3035 = vmatprep.subr.bf16.mxu1 %v4095_v6  ;;  %v4174_v5 = vld [vmem:[%s4926_s26 + $0x790] ss:$8 sps:$4 sm:$0xff]   ;;  %v4179_v6 = vld [vmem:[%s4926_s26 + $0x3a4] ss:$8 sps:$4 sm:$0xff]  }
 0x153   : > { %3207 = vmatprep.subr.bf16.mxu0 %v4098_v7  ;;  %v4182_v7 = vld [vmem:[%s4926_s26 + $0x7a4] ss:$8 sps:$4 sm:$0xff]  }
 0x155   : > { %3036 = vmatpush1.bf16.msra.mxu1 %v4093_v8  ;;  %v4177_v8 = vld [vmem:[%s4926_s26 + $0x3a0] ss:$8 sps:$4 sm:$0xff]  }
 0x156   : > { %3208 = vmatpush1.bf16.msra.mxu0 %v4096_v9  ;;  %3037 = vmatprep.subr.bf16.mxu1 %v4101_v10  ;;  %v4180_v9 = vld [vmem:[%s4926_s26 + $0x7a0] ss:$8 sps:$4 sm:$0xff]   ;;  %v4185_v10 = vld [vmem:[%s4926_s26 + $0x3b4] ss:$8 sps:$4 sm:$0xff]  }
 0x157   : > { %3209 = vmatprep.subr.bf16.mxu0 %v4104_v11  ;;  %v4188_v11 = vld [vmem:[%s4926_s26 + $0x7b4] ss:$8 sps:$4 sm:$0xff]  }
 0x159   : > { %3038 = vmatpush1.bf16.msra.mxu1 %v4099_v12  ;;  %v4183_v12 = vld [vmem:[%s4926_s26 + $0x3b0] ss:$8 sps:$4 sm:$0xff]  }
 0x15a   : > { %3210 = vmatpush1.bf16.msra.mxu0 %v4102_v13  ;;  %3039 = vmatprep.subr.bf16.mxu1 %v4107_v14  ;;  %v4186_v13 = vld [vmem:[%s4926_s26 + $0x7b0] ss:$8 sps:$4 sm:$0xff]   ;;  %v4191_v14 = vld [vmem:[%s4926_s26 + $0x3c4] ss:$8 sps:$4 sm:$0xff]  }
 0x15b   : > { %3211 = vmatprep.subr.bf16.mxu0 %v4110_v15  ;;  %v4194_v15 = vld [vmem:[%s4926_s26 + $0x7c4] ss:$8 sps:$4 sm:$0xff]  }
 0x15d   : > { %3040 = vmatpush1.bf16.msra.mxu1 %v4105_v16  ;;  %v4189_v16 = vld [vmem:[%s4926_s26 + $0x3c0] ss:$8 sps:$4 sm:$0xff]  }
 0x15e   : > { %3212 = vmatpush1.bf16.msra.mxu0 %v4108_v17  ;;  %3041 = vmatprep.subr.bf16.mxu1 %v4113_v18  ;;  %v4192_v17 = vld [vmem:[%s4926_s26 + $0x7c0] ss:$8 sps:$4 sm:$0xff]   ;;  %v4197_v18 = vld [vmem:[%s4926_s26 + $0x3d4] ss:$8 sps:$4 sm:$0xff]  }
 0x15f   : > { %3213 = vmatprep.subr.bf16.mxu0 %v4116_v19  ;;  %v4200_v19 = vld [vmem:[%s4926_s26 + $0x7d4] ss:$8 sps:$4 sm:$0xff]  }
 0x161   : > { %3042 = vmatpush1.bf16.msra.mxu1 %v4111_v20  ;;  %v4195_v20 = vld [vmem:[%s4926_s26 + $0x3d0] ss:$8 sps:$4 sm:$0xff]  }
 0x162   : > { %3214 = vmatpush1.bf16.msra.mxu0 %v4114_v21  ;;  %3054 = vmatprep.subr.bf16.mxu1 %v4119_v22  ;;  %v4198_v21 = vld [vmem:[%s4926_s26 + $0x7d0] ss:$8 sps:$4 sm:$0xff]   ;;  %v4203_v22 = vld [vmem:[%s4926_s26 + $0x3e4] ss:$8 sps:$4 sm:$0xff]  }
 0x163   : > { %3226 = vmatprep.subr.bf16.mxu0 %v4122_v23  ;;  %v4206_v23 = vld [vmem:[%s4926_s26 + $0x7e4] ss:$8 sps:$4 sm:$0xff]  }
 0x164   : > { %3044 = vmatmul.mubr.bf16.vlgmr.msra.gmra.mrb[0].mxu1 %v3447_v27  ;;  %v4201_v27 = vld [vmem:[%s4926_s26 + $0x3e0] ss:$8 sps:$4 sm:$0xff]  }
 0x165   : > { %3216 = vmatmul.mubr.bf16.vlgmr.msra.gmra.mrb[0].mxu0 %v3455_v28  ;;  %3055 = vmatpush1.bf16.msra.mxu1 %v4117_v34  ;;  %v4204_v28 = vld [vmem:[%s4926_s26 + $0x7e0] ss:$8 sps:$4 sm:$0xff]   ;;  %v4209_v34 = vld [vmem:[%s4926_s26 + $0x3f4] ss:$8 sps:$4 sm:$0xff]  }
 0x166   : > { %3227 = vmatpush1.bf16.msra.mxu0 %v4120_v35  ;;  %3056 = vmatprep.subr.bf16.mxu1 %v4125_v24  ;;  %v4212_v35 = vld [vmem:[%s4926_s26 + $0x7f4] ss:$8 sps:$4 sm:$0xff]   ;;  %v4207_v24 = vld [vmem:[%s4926_s26 + $0x3f0] ss:$8 sps:$4 sm:$0xff]  }
 0x167   : > { %3228 = vmatprep.subr.bf16.mxu0 %v4128_v25  ;;  %3086 = vmatprep.mubr.bf16.mxu1 %v3450_v29  ;;  %v4210_v25 = vld [vmem:[%s4926_s26 + $0x7f0] ss:$8 sps:$4 sm:$0xff]   ;;  %v3449_v29 = vcombine.low %v5169_v26, %v5176_v31  ;;  %v1553_v31 = vld [vmem:[%s1277_s11] sm:$0x3]  ;;  %s3719_s26 = sshll.u32 (%p4389_p9), %s3311_s25, 3 }
 0x168   : > { %3258 = vmatprep.mubr.bf16.mxu0 %v3458_v30  ;;  %v3457_v30 = vcombine.low %v5179_v32, %v5182_v33  ;;  %s3313_s28 = scalar_lea.vmem (%p4389_p9), %s5300_s3, %s3719_s26 }
 0x169   : > { %3057 = vmatpush1.bf16.msra.mxu1 %v4123_v36  ;;  %v1555_v36 = vlaneseq }
 0x16a   : > { %3229 = vmatpush1.bf16.msra.mxu0 %v4126_v37  ;;  %3058 = vmatprep.subr.bf16.mxu1 %v4131_v38 }
 0x16b   : > { %3230 = vmatprep.subr.bf16.mxu0 %v4134_v39  ;;  %v1556_v37 = vshrl.u32 %v1555_v36, 7 }
 0x16d   : > { %3059 = vmatpush1.bf16.msra.mxu1 %v4129_v40  ;;  %v1557_v26 = vsub.s32 0, %v1556_v37  ;;  %v1561_v38 = vsub.s32 1, %v1556_v37 }
 0x16e   : > { %3231 = vmatpush1.bf16.msra.mxu0 %v4132_v41  ;;  %3060 = vmatprep.subr.bf16.mxu1 %v4137_v42 }
 0x16f   : > { %3232 = vmatprep.subr.bf16.mxu0 %v4140_v43  ;;  %v1558_v32 = vrot.slane %v1553_v31, %v1557_v26  ;;  %v1562_v33 = vrot.slane %v1553_v31, %v1561_v38 }
 0x171   : > { %3061 = vmatpush1.bf16.msra.mxu1 %v4135_v44 }
 0x172   : > { %3233 = vmatpush1.bf16.msra.mxu0 %v4138_v45  ;;  %3062 = vmatprep.subr.bf16.mxu1 %v4143_v46 }
 0x173   : > { %3234 = vmatprep.subr.bf16.mxu0 %v4146_v47 }
 0x175   : > { %3063 = vmatpush1.bf16.msra.mxu1 %v4141_v48 }
 0x176   : > { %3235 = vmatpush1.bf16.msra.mxu0 %v4144_v49  ;;  %3064 = vmatprep.subr.bf16.mxu1 %v4149_v50 }
 0x177   : > { %3236 = vmatprep.subr.bf16.mxu0 %v4152_v51 }
 0x179   : > { %3065 = vmatpush1.bf16.msra.mxu1 %v4147_v52 }
 0x17a   : > { %3237 = vmatpush1.bf16.msra.mxu0 %v4150_v53  ;;  %3066 = vmatprep.subr.bf16.mxu1 %v4155_v54 }
 0x17b   : > { %3238 = vmatprep.subr.bf16.mxu0 %v4158_v55 }
 0x17d   : > { %3067 = vmatpush1.bf16.msra.mxu1 %v4153_v56 }
 0x17e   : > { %3239 = vmatpush1.bf16.msra.mxu0 %v4156_v57  ;;  %3068 = vmatprep.subr.bf16.mxu1 %v4161_v58 }
 0x17f   : > { %3240 = vmatprep.subr.bf16.mxu0 %v4164_v59 }
 0x181   : > { %3069 = vmatpush1.bf16.msra.mxu1 %v4159_v60 }
 0x182   : > { %3241 = vmatpush1.bf16.msra.mxu0 %v4162_v61  ;;  %3070 = vmatprep.subr.bf16.mxu1 %v4167_v62 }
 0x183   : > { %3242 = vmatprep.subr.bf16.mxu0 %v4170_v63 }
 0x185   : > { %3071 = vmatpush1.bf16.msra.mxu1 %v4165_v0 }
 0x186   : > { %3243 = vmatpush1.bf16.msra.mxu0 %v4168_v1  ;;  %3072 = vmatprep.subr.bf16.mxu1 %v4173_v2 }
 0x187   : > { %3244 = vmatprep.subr.bf16.mxu0 %v4176_v3 }
 0x189   : > { %3073 = vmatpush1.bf16.msra.mxu1 %v4171_v4 }
 0x18a   : > { %3245 = vmatpush1.bf16.msra.mxu0 %v4174_v5  ;;  %3074 = vmatprep.subr.bf16.mxu1 %v4179_v6 }
 0x18b   : > { %3246 = vmatprep.subr.bf16.mxu0 %v4182_v7 }
 0x18d   : > { %3075 = vmatpush1.bf16.msra.mxu1 %v4177_v8 }
 0x18e   : > { %3247 = vmatpush1.bf16.msra.mxu0 %v4180_v9  ;;  %3076 = vmatprep.subr.bf16.mxu1 %v4185_v10 }
 0x18f   : > { %3248 = vmatprep.subr.bf16.mxu0 %v4188_v11 }
 0x191   : > { %3077 = vmatpush1.bf16.msra.mxu1 %v4183_v12 }
 0x192   : > { %3249 = vmatpush1.bf16.msra.mxu0 %v4186_v13  ;;  %3078 = vmatprep.subr.bf16.mxu1 %v4191_v14 }
 0x193   : > { %3250 = vmatprep.subr.bf16.mxu0 %v4194_v15 }
 0x195   : > { %3079 = vmatpush1.bf16.msra.mxu1 %v4189_v16 }
 0x196   : > { %3251 = vmatpush1.bf16.msra.mxu0 %v4192_v17  ;;  %3080 = vmatprep.subr.bf16.mxu1 %v4197_v18 }
 0x197   : > { %3252 = vmatprep.subr.bf16.mxu0 %v4200_v19 }
 0x199   : > { %3081 = vmatpush1.bf16.msra.mxu1 %v4195_v20 }
 0x19a   : > { %3253 = vmatpush1.bf16.msra.mxu0 %v4198_v21  ;;  %3082 = vmatprep.subr.bf16.mxu1 %v4203_v22 }
 0x19b   : > { %3254 = vmatprep.subr.bf16.mxu0 %v4206_v23 }
 0x19d   : > { %3083 = vmatpush1.bf16.msra.mxu1 %v4201_v27 }
 0x19e   : > { %3255 = vmatpush1.bf16.msra.mxu0 %v4204_v28  ;;  %3084 = vmatprep.subr.bf16.mxu1 %v4209_v34 }
 0x19f   : > { %3256 = vmatprep.subr.bf16.mxu0 %v4212_v35 }
 0x1a1   : > { %3085 = vmatpush1.bf16.msra.mxu1 %v4207_v24 }
 0x1a2   : > { %3257 = vmatpush1.bf16.msra.mxu0 %v4210_v25 }
 0x1a4   : > { %3087 = vmatmul.mubr.bf16.vlgmr.msra.gmra.mrb[0].mxu1 %v3449_v29 }
 0x1a5   : > { %3259 = vmatmul.mubr.bf16.vlgmr.msra.gmra.mrb[0].mxu0 %v3457_v30 }
 0x277   : > { %v3088_v39 = vpop.f32.mrb[0].mxu1 }
 0x278   : > { %v3260_v40 = vpop.f32.mrb[0].mxu0  ;;  %v3724_v41 = vadd.f32 %v3088_v39, %v1558_v32  ;;  %v3090_v42 = vpop.f32.mrb[1].mxu1 }
 0x279   : > { %v3262_v43 = vpop.f32.mrb[1].mxu0  ;;  %v3726_v44 = vadd.f32 %v3090_v42, %v1562_v33  ;;  %v3092_v45 = vpop.f32.mrb[2].mxu1 }
 0x27a   : > { %v3264_v46 = vpop.f32.mrb[2].mxu0  ;;  %v3725_v47 = vadd.f32 %v3724_v41, %v3260_v40  ;;  %v3728_v48 = vadd.f32 %v3092_v45, %v1558_v32  ;;  %v3094_v49 = vpop.f32.mrb[3].mxu1 }
 0x27b   : > { %v3266_v50 = vpop.f32.mrb[3].mxu0  ;;  %v3727_v51 = vadd.f32 %v3726_v44, %v3262_v43  ;;  %v3730_v52 = vadd.f32 %v3094_v49, %v1562_v33 }
 0x27c   : > { %v3269_v53 = vsub.f32 0.0, %v3725_v47  ;;  %v3729_v54 = vadd.f32 %v3728_v48, %v3264_v46 }
 0x27d   : > { %v3270_v55 = vsub.f32 0.0, %v3727_v51  ;;  %v3731_v56 = vadd.f32 %v3730_v52, %v3266_v50 }
 0x27e   : > { %v3273_v57 = vmul.f32 1.442695, %v3269_v53  ;;  %v3271_v58 = vsub.f32 0.0, %v3729_v54 }
 0x27f   : > { %v3275_v59 = vmul.f32 1.442695, %v3270_v55  ;;  %v3272_v60 = vsub.f32 0.0, %v3731_v56 }
 0x280   : > { %4213 = vpow2.f32 %v3273_v57  ;;  %v3277_v61 = vmul.f32 1.442695, %v3271_v58 }
 0x281   : > { %4215 = vpow2.f32 %v3275_v59  ;;  %v3279_v62 = vmul.f32 1.442695, %v3272_v60 }
 0x282   : > { %4217 = vpow2.f32 %v3277_v61 }
 0x283   : > { %4219 = vpow2.f32 %v3279_v62 }
 0x28a   : > { %v4214_v63 = vpop.eup %4213 }
 0x28b   : > { %v4216_v0 = vpop.eup %4215  ;;  %v3281_v1 = vadd.f32 1.0, %v4214_v63 }
 0x28c   : > { %v4218_v2 = vpop.eup %4217  ;;  %v3282_v3 = vadd.f32 1.0, %v4216_v0 }
 0x28d   : > { %v4220_v4 = vpop.eup %4219  ;;  %4221 = vrcp.f32 %v3281_v1  ;;  %v3283_v5 = vadd.f32 1.0, %v4218_v2 }
 0x28e   : > { %4223 = vrcp.f32 %v3282_v3  ;;  %v3284_v6 = vadd.f32 1.0, %v4220_v4 }
 0x28f   : > { %4225 = vrcp.f32 %v3283_v5 }
 0x290   : > { %4227 = vrcp.f32 %v3284_v6 }
 0x297   : > { %v4222_v7 = vpop.eup %4221 }
 0x298   : > { %v4224_v8 = vpop.eup %4223  ;;  %v3289_v9 = vmax.f32 %v4222_v7, 0.0 }
 0x299   : > { %v4226_v10 = vpop.eup %4225  ;;  %v3290_v11 = vmax.f32 %v4224_v8, 0.0  ;;  %3307 = sbr.rel (!%p4389_p9) target bundleno = 680 (0x2a8), region = 74 }
 0x29a   : > { %v4228_v12 = vpop.eup %4227  ;;  %v3293_v13 = vmin.f32 %v3289_v9, 1.0  ;;  %v3291_v14 = vmax.f32 %v4226_v10, 0.0 }
 0x29b   : > { %v3294_v15 = vmin.f32 %v3290_v11, 1.0  ;;  %v3292_v16 = vmax.f32 %v4228_v12, 0.0 }
 0x29c   : > { %3297 = vst [vmem:[%s1265_s24] sm:$0xff] %v3293_v13  ;;  %v3295_v17 = vmin.f32 %v3291_v14, 1.0 }
 0x29d   : > { %3298 = vst [vmem:[%s1265_s24 + $0x8] sm:$0xff] %v3294_v15  ;;  %v3296_v18 = vmin.f32 %v3292_v16, 1.0 }
 0x29e   : > { %3299 = vst [vmem:[%s1265_s24 + $0x10] sm:$0xff] %v3295_v17 }
 0x29f   : > { %3300 = vst [vmem:[%s1265_s24 + $0x18] sm:$0xff] %v3296_v18 }
 0x2a3   : > { %v3326_v19 = vld [vmem:[%s1265_s24] sm:$0xff] }
 0x2a4   : > { %v3328_v20 = vld [vmem:[%s1265_s24 + $0x8] sm:$0xff]  ;;  %3327 = vst [vmem:[%s3313_s28] sm:$0xff] %v3326_v19 }
 0x2a5   : > { %v3330_v21 = vld [vmem:[%s1265_s24 + $0x10] sm:$0xff]  ;;  %3329 = vst [vmem:[%s3313_s28 + $0x8] sm:$0xff] %v3328_v20 }
 0x2a6   : > { %v3332_v22 = vld [vmem:[%s1265_s24 + $0x18] sm:$0xff]  ;;  %3331 = vst [vmem:[%s3313_s28 + $0x30] sm:$0xff] %v3330_v21 }
 0x2a7   : > { %3333 = vst [vmem:[%s3313_s28 + $0x38] sm:$0xff] %v3332_v22 }
 0x2a8 PF: > { %s13_s20 = sadd.s32 1, %s4299_s20   ;;  %s5303_s12 = smov %s4271_s13 }
 0x2a9   : > { %p10_p2 = scmp.ge.s32.totalorder %s13_s20, 8   ;;  %s5304_s13 = smov %s4397_s5 }
 0x2aa   : > { %s5305_s14 = smov %s4279_s15  ;;  %s5306_s15 = smov %s4394_s4 }
 0x2ab   : > { %s5307_s16 = smov %s4291_s18  ;;  %s5308_s17 = smov %s4295_s19 }
 0x2ac   : > { %s5309_s18 = smov %s5312_s21  ;;  %s5310_s19 = smov %s5316_s22 }
 0x2ad   :  { %12 = sbr.rel (!%p10_p2) target bundleno = 5 (0x5), region = 134 }

// kernel: decoder_forward.2
= control target key start
LH: loop header
LB: loop body
LE: loop exit
PB: predicated region body
PF: predicated region fallthrough
CT: control target
= control target key end

     0   :  { %12 = vsyncpa [#allocation3], 0  ;;  %s12626_s0 = inlined_call_operand.vmem [shape: f32[32,32], index: 0, kind: input, shape index: {}]   ;;  %s12627_s1 = inlined_call_operand.hbm [shape: bf16[32,512], index: 1, kind: input, shape index: {}]   ;;  %s12628_s2 = inlined_call_operand.hbm [shape: f32[1,512], index: 2, kind: input, shape index: {}]   ;;  %s12629_s3 = inlined_call_operand.hbm [shape: bf16[512,1024], index: 3, kind: input, shape index: {}]   ;;  %s12630_s4 = inlined_call_operand.hbm [shape: f32[1,1024], index: 4, kind: input, shape index: {}]   ;;  %s12631_s5 = inlined_call_operand.hbm [shape: bf16[1024,2048], index: 5, kind: input, shape index: {}]   ;;  %s12632_s6 = inlined_call_operand.hbm [shape: f32[1,2048], index: 6, kind: input, shape index: {}]   ;;  %s12633_s7 = inlined_call_operand.vmem [shape: bf16[32,2048], index: 7, kind: output, shape index: {}]  }
   0x1   :  { %13 = vsyncpa [#allocation5], 0 }
   0x2   :  { %14 = vsyncpa [#allocation8], 0 }
   0x3   :  { %15 = vsyncpa [#allocation11], 0  ;;  %s12195_s24 = smov 0  }
   0x4 LB: > { %s12142_s25 = smov [#allocation4]   ;;  %s10354_s27 = sadd.s32 4294967295, %s12140_s24   ;;  %s12140_s24 = sphi %s12195_s24, %s21_s24  }
   0x5   : > { %s230_s26 = sshll.u32 %s12142_s25, 4  ;;  %p10356_p0 = scmp.ge.s32.totalorder %s12140_s24, 1  ;;  %s12209_s26 = int_to_ptr.vmem [resolvable:$true] %s230_s26 }
   0x6   : > { %p204_p1 = scmp.lt.s32.totalorder %s12140_s24, 3  ;;  %p12205_p2 = scmp.eq.s32.totalorder %s10354_s27, 0 }
   0x7   : > { %s12143_s30 = smov [#allocation7]   ;;  %s12144_s9 = smov [#allocation2]  }
   0x8   : > { %s12637_s28 = scalar_select %p12205_p2, 1, 0 }
   0x9   : > { %p12211_p3 = pnand %p10356_p0, %p204_p1  ;;  %s254_s8 = sshll.u32 %s12143_s30, 4  ;;  %s12217_s8 = int_to_ptr.vmem [resolvable:$true] %s254_s8 }
   0xa   : > { %s216_s10 = sshll.u32 %s12144_s9, 4  ;;  %s12145_s12 = smov [#allocation6]   ;;  %s12225_s10 = int_to_ptr.vmem [resolvable:$true] %s216_s10 }
   0xb   : > { %s12638_s29 = scalar_select %p12211_p3, 1, 0 }
   0xc   : > { %p11885_p4 = pneg %p12211_p3  ;;  %s12227_s13 = sshll.u32 %s12145_s12, 4  ;;  %s241_s13 = int_to_ptr.vmem [resolvable:$true] %s12227_s13 }
   0xd   : > { %s11950_s16 = scalar_lea.hbm %s12628_s2, 64 }
   0xe   : > { %p12221_p5 = pnand %p12205_p2, %p11885_p4  ;;  %p11951_p6 = scmp.ne.s32.totalorder %s12628_s2, %s11950_s16 }
   0xf   : > { %p11957_p10 = scmp.lt.u32.totalorder %s11950_s16, %s12628_s2 }
  0x10   : > { %p12237_p7 = pneg %p12221_p5 }
  0x12   : > { %p11953_p8 = pnand %p12237_p7, %p11951_p6 }
  0x14   : > { %p11954_p9 = pneg %p11953_p8 }
  0x16   : > { %p11959_p11 = pnand %p11957_p10, %p11954_p9 }
  0x18   : > { %11962 = shalt.err (!%p11959_p11)
}
  0x19   : > { %s11963_s22 = scalar_lea.vmem %s12209_s26, 64  ;;  %p11971_p1 = scmp.lt.s32.totalorder %s12209_s26, %s12209_s26 }
  0x1a   : > { %p11964_p12 = scmp.ne.s32.totalorder %s12209_s26, %s11963_s22  ;;  %p11972_p4 = scmp.lt.s32.totalorder %s11963_s22, %s11963_s22 }
  0x1c   : > { %p11966_p13 = pnand %p11964_p12, %p12237_p7  ;;  %p11973_p6 = por %p11972_p4, %p11971_p1 }
  0x1e   : > { %p11967_p0 = pneg %p11966_p13 }
  0x20   : > { %p11974_p8 = pnand %p11973_p6, %p11967_p0 }
  0x22   : > { %11977 = shalt.err (!%p11974_p8)
}
  0x23   : > { %11891 = dma.hbm_to_vmem [thread:$0]  (!%p12221_p5), %s12628_s2, 64, %s12209_s26, [#allocation5]  }
  0x24   : > { %s11978_s12 = scalar_lea.hbm %s12630_s4, 128 }
  0x25   : > { %p11979_p9 = scmp.ne.s32.totalorder %s12630_s4, %s11978_s12  ;;  %p11985_p12 = scmp.lt.u32.totalorder %s11978_s12, %s12630_s4 }
  0x27   : > { %p11981_p10 = pnand %p11979_p9, %p12237_p7 }
  0x29   : > { %p11982_p11 = pneg %p11981_p10 }
  0x2b   : > { %p11987_p13 = pnand %p11985_p12, %p11982_p11 }
  0x2d   : > { %11990 = shalt.err (!%p11987_p13)
}
  0x2e   : > { %s11991_s26 = scalar_lea.vmem %s12217_s8, 128  ;;  %p11999_p6 = scmp.lt.s32.totalorder %s12217_s8, %s12217_s8 }
  0x2f   : > { %p11992_p0 = scmp.ne.s32.totalorder %s12217_s8, %s11991_s26  ;;  %p12000_p8 = scmp.lt.s32.totalorder %s11991_s26, %s11991_s26 }
  0x31   : > { %p11994_p1 = pnand %p11992_p0, %p12237_p7  ;;  %p12001_p9 = por %p12000_p8, %p11999_p6 }
  0x33   : > { %p11995_p4 = pneg %p11994_p1 }
  0x35   : > { %p12002_p10 = pnand %p12001_p9, %p11995_p4 }
  0x37   : > { %12005 = shalt.err (!%p12002_p10)
}
  0x38   : > { %11897 = dma.hbm_to_vmem [thread:$0]  (!%p12221_p5), %s12630_s4, 128, %s12217_s8, [#allocation8]  }
  0x39   : > { %s12006_s23 = scalar_lea.hbm %s12627_s1, 1024 }
  0x3a   : > { %p12007_p11 = scmp.ne.s32.totalorder %s12627_s1, %s12006_s23  ;;  %p12013_p0 = scmp.lt.u32.totalorder %s12006_s23, %s12627_s1 }
  0x3c   : > { %p12009_p12 = pnand %p12007_p11, %p12237_p7 }
  0x3e   : > { %p12010_p13 = pneg %p12009_p12 }
  0x40   : > { %p12015_p1 = pnand %p12013_p0, %p12010_p13 }
  0x42   : > { %12018 = shalt.err (!%p12015_p1)
}
  0x43   : > { %s12019_s8 = scalar_lea.vmem %s12225_s10, 1024  ;;  %p12027_p9 = scmp.lt.s32.totalorder %s12225_s10, %s12225_s10 }
  0x44   : > { %p12020_p4 = scmp.ne.s32.totalorder %s12225_s10, %s12019_s8  ;;  %p12028_p10 = scmp.lt.s32.totalorder %s12019_s8, %s12019_s8 }
  0x46   : > { %p12022_p6 = pnand %p12020_p4, %p12237_p7  ;;  %p12029_p11 = por %p12028_p10, %p12027_p9 }
  0x48   : > { %p12023_p8 = pneg %p12022_p6 }
  0x4a   : > { %p12030_p12 = pnand %p12029_p11, %p12023_p8 }
  0x4c   : > { %12033 = shalt.err (!%p12030_p12)
}
  0x4d   : > { %s12146_s14 = smov 256   ;;  %s12147_s15 = smov 16  }
  0x4e   : > { %11888 = dma.hbm_to_vmem [thread:$0]  (!%p12221_p5), %s12627_s1, 1024, %s12225_s10, [#allocation3], %s12146_s14, %s12146_s14, %s12147_s15  }
  0x4f   : > { %s12034_s20 = scalar_lea.hbm %s12629_s3, 32768 }
  0x50   : > { %p12035_p13 = scmp.ne.s32.totalorder %s12629_s3, %s12034_s20  ;;  %p12041_p4 = scmp.lt.u32.totalorder %s12034_s20, %s12629_s3 }
  0x52   : > { %p12037_p0 = pnand %p12035_p13, %p12237_p7 }
  0x54   : > { %p12038_p1 = pneg %p12037_p0 }
  0x56   : > { %p12043_p6 = pnand %p12041_p4, %p12038_p1 }
  0x58   : > { %12046 = shalt.err (!%p12043_p6)
}
  0x59   : > { %s12047_s30 = scalar_lea.vmem %s241_s13, 32768  ;;  %p12055_p11 = scmp.lt.s32.totalorder %s241_s13, %s241_s13 }
  0x5a   : > { %p12048_p8 = scmp.ne.s32.totalorder %s241_s13, %s12047_s30  ;;  %p12056_p12 = scmp.lt.s32.totalorder %s12047_s30, %s12047_s30 }
  0x5c   : > { %p12050_p9 = pnand %p12048_p8, %p12237_p7  ;;  %p12057_p2 = por %p12056_p12, %p12055_p11 }
  0x5e   : > { %p12051_p10 = pneg %p12050_p9 }
  0x60   : > { %p12058_p3 = pnand %p12057_p2, %p12051_p10 }
  0x62   : > { %12061 = shalt.err (!%p12058_p3)
}
  0x63   : > { %s12148_s10 = smov 512   ;;  %s12149_s9 = smov 32  }
  0x64   : > { %11894 = dma.hbm_to_vmem [thread:$0]  (!%p12221_p5), %s12629_s3, 32768, %s241_s13, [#allocation5], %s12148_s10, %s12148_s10, %s12149_s9  }
  0x65   : > { %s12150_s14 = smov [#allocation9]   ;;  %s12062_s26 = scalar_lea.hbm %s12631_s5, 131072 }
  0x66   : > { %s264_s15 = sshll.u32 %s12150_s14, 4  ;;  %p12063_p2 = scmp.ne.s32.totalorder %s12631_s5, %s12062_s26  ;;  %s265_s15 = int_to_ptr.vmem [resolvable:$true] %s264_s15 }
  0x67   : > { %p12069_p0 = scmp.lt.u32.totalorder %s12062_s26, %s12631_s5 }
  0x68   : > { %p12065_p3 = pnand %p12063_p2, %p12237_p7 }
  0x6a   : > { %p12066_p13 = pneg %p12065_p3 }
  0x6c   : > { %p12071_p1 = pnand %p12069_p0, %p12066_p13 }
  0x6e   : > { %12074 = shalt.err (!%p12071_p1)
}
  0x6f   : > { %s12075_s13 = scalar_lea.vmem %s265_s15, 131072  ;;  %p12083_p9 = scmp.lt.s32.totalorder %s265_s15, %s265_s15 }
  0x70   : > { %p12076_p4 = scmp.ne.s32.totalorder %s265_s15, %s12075_s13  ;;  %p12084_p10 = scmp.lt.s32.totalorder %s12075_s13, %s12075_s13 }
  0x72   : > { %p12078_p6 = pnand %p12076_p4, %p12237_p7  ;;  %p12085_p11 = por %p12084_p10, %p12083_p9 }
  0x74   : > { %p12079_p8 = pneg %p12078_p6 }
  0x76   : > { %p12086_p12 = pnand %p12085_p11, %p12079_p8 }
  0x78   : > { %12089 = shalt.err (!%p12086_p12)
}
  0x79   : > { %s12151_s23 = smov 1024   ;;  %s12152_s25 = smov 64  }
  0x7a   : > { %11900 = dma.hbm_to_vmem [thread:$0]  (!%p12221_p5), %s12631_s5, 131072, %s265_s15, [#allocation8], %s12151_s23, %s12151_s23, %s12152_s25  }
  0x7b   : > { %s12153_s9 = smov [#allocation10]   ;;  %s12090_s16 = scalar_lea.hbm %s12632_s6, 256 }
  0x7c   : > { %s278_s12 = sshll.u32 %s12153_s9, 4  ;;  %p12091_p2 = scmp.ne.s32.totalorder %s12632_s6, %s12090_s16  ;;  %s279_s12 = int_to_ptr.vmem [resolvable:$true] %s278_s12 }
  0x7d   : > { %p12097_p0 = scmp.lt.u32.totalorder %s12090_s16, %s12632_s6 }
  0x7e   : > { %p12093_p3 = pnand %p12091_p2, %p12237_p7 }
  0x80   : > { %p12094_p13 = pneg %p12093_p3 }
  0x82   : > { %p12099_p1 = pnand %p12097_p0, %p12094_p13 }
  0x84   : > { %12102 = shalt.err (!%p12099_p1)
}
  0x85   : > { %s12103_s15 = scalar_lea.vmem %s279_s12, 256  ;;  %p12111_p9 = scmp.lt.s32.totalorder %s279_s12, %s279_s12 }
  0x86   : > { %p12104_p4 = scmp.ne.s32.totalorder %s279_s12, %s12103_s15  ;;  %p12112_p10 = scmp.lt.s32.totalorder %s12103_s15, %s12103_s15 }
  0x88   : > { %p12106_p6 = pnand %p12104_p4, %p12237_p7  ;;  %p12113_p11 = por %p12112_p10, %p12111_p9 }
  0x8a   : > { %p12107_p8 = pneg %p12106_p6 }
  0x8c   : > { %p12114_p12 = pnand %p12113_p11, %p12107_p8 }
  0x8e   : > { %12117 = shalt.err (!%p12114_p12)
}
  0x8f   : > { %11903 = dma.hbm_to_vmem [thread:$0]  (!%p12221_p5), %s12632_s6, 256, %s279_s12, [#allocation11]  }
  0x90   : > { %p12641_p2 = scmp.ne.s32.totalorder %s12638_s29, 0 }
  0x91   : > { %p12642_p3 = scmp.ne.s32.totalorder (!%p12641_p2), %s12637_s28, 0 }
  0x92   : > { %300 = sbr.rel (%p12641_p2) target bundleno = 1861 (0x745), region = 48 }
  0x99   : > { %12123 = dma.done.wait (%p12642_p3), [#allocation3], 1024  }
  0x9a   : > { %12125 = vsyncadd (%p12642_p3), [#allocation3], 4294966272 }
  0x9b   : > { %12127 = dma.done.wait (%p12642_p3), [#allocation5], 32832  }
  0x9c   : > { %12129 = vsyncadd (%p12642_p3), [#allocation5], 4294934464 }
  0x9d   : > { %12131 = dma.done.wait (%p12642_p3), [#allocation8], 131200  }
  0x9e   : > { %12133 = vsyncadd (%p12642_p3), [#allocation8], 4294836096 }
  0x9f   : > { %12135 = dma.done.wait (%p12642_p3), [#allocation11], 256  }
  0xa0   : > { %12137 = vsyncadd (%p12642_p3), [#allocation11], 4294967040  ;;  %s10371_s29 = sshll.u32 %s10354_s27, 1  ;;  %v12154_v0 = vmov 0   ;;  %v11937_v1 = vld [vmem:[#allocation2 + $0x4] ss:$16 sps:$4 sm:$0xff]  }
  0xa1   : > { %476 = vmatprep.mubr.bf16.mxu0 %v12154_v0  ;;  %p354_p5 = scmp.lt.s32.totalorder %s10371_s29, 3  ;;  %519 = vmatprep.mubr.bf16.mxu1 %v12154_v0  ;;  %v11939_v2 = vld [vmem:[#allocation2] ss:$16 sps:$4 sm:$0xff]   ;;  %v11940_v3 = vld [vmem:[#allocation2 + $0x24] ss:$16 sps:$4 sm:$0xff]   ;;  %vm440_vm0 = vcmask 261120  }
  0xa2   : > { %444 = vmatprep.subr.bf16.mxu0 %v11937_v1  ;;  %v11942_v4 = vld [vmem:[#allocation2 + $0x20] ss:$16 sps:$4 sm:$0xff]   ;;  %v11943_v7 = vld [vmem:[#allocation2 + $0xc] ss:$16 sps:$4 sm:$0xff]   ;;  %v11945_v8 = vld [vmem:[#allocation2 + $0x8] ss:$16 sps:$4 sm:$0xff]  }
  0xa3   : > { %s12644_s29 = smov (!%p354_p5, %s10371_s29), 3  ;;  %445 = vmatpush1.bf16.msra.mxu0 %v11939_v2  ;;  %v11946_v9 = vld [vmem:[#allocation2 + $0x2c] ss:$16 sps:$4 sm:$0xff]   ;;  %v11948_v10 = vld [vmem:[#allocation2 + $0x28] ss:$16 sps:$4 sm:$0xff]   ;;  %487 = vmatprep.subr.bf16.mxu1 %v11943_v7 }
  0xa4   : > { %s10372_s11 = sshll.u32 %s12644_s29, 3  ;;  %446 = vmatprep.subr.bf16.mxu0 %v11940_v3  ;;  %v542_v12 = vld [vmem:[#allocation6] sm:$0xff]  ;;  %v543_v14 = vld [vmem:[#allocation6 + $0x8] sm:$0xff]  ;;  %488 = vmatpush1.bf16.msra.mxu1 %v11945_v8  ;;  %s11684_s27 = sshll.u32 %s12644_s29, 6 }
  0xa5   : > { %s357_s23 = scalar_lea.vmem %s12626_s0, %s10372_s11  ;;  %v546_v13 = vld [vmem:[#allocation6 + $0x20] sm:$0xff]  ;;  %v547_v17 = vld [vmem:[#allocation6 + $0x28] sm:$0xff]  ;;  %489 = vmatprep.subr.bf16.mxu1 %v11946_v9  ;;  %s12545_s30 = scalar_lea.vmem %s12633_s7, %s11684_s27 }
  0xa6   : > { %v367_v5 = vld [vmem:[%s357_s23] sm:$0xff]  ;;  %v368_v6 = vld [vmem:[%s357_s23 + $0x8] sm:$0xff]  ;;  %v10386_v15 = vcombine.low %v542_v12, %v546_v13  ;;  %v10387_v16 = vcombine.high %v542_v12, %v546_v13  ;;  %v10389_v20 = vcombine.high %v543_v14, %v547_v17  ;;  %v10388_v26 = vcombine.low %v543_v14, %v547_v17 }
  0xa7   : > { %v369_v11 = vpack.c.bf16 %v368_v6, %v367_v5  ;;  %447 = vmatpush1.bf16.msra.mxu0 %v11942_v4  ;;  %v550_v18 = vld [vmem:[#allocation6 + $0x40] sm:$0xff]  ;;  %v551_v22 = vld [vmem:[#allocation6 + $0x48] sm:$0xff] }
  0xa8   : > { %v554_v19 = vld [vmem:[#allocation6 + $0x60] sm:$0xff]  ;;  %2120 = vmatprep.subr.bf16.mxu0 %v10387_v16  ;;  %v555_v23 = vld [vmem:[#allocation6 + $0x68] sm:$0xff]  ;;  %490 = vmatpush1.bf16.msra.mxu1 %v11948_v10 }
  0xa9   : > { %v10395_v21 = vcombine.high %v550_v18, %v554_v19  ;;  %v558_v24 = vld [vmem:[#allocation6 + $0x80] sm:$0xff]  ;;  %v10394_v27 = vcombine.low %v550_v18, %v554_v19  ;;  %2206 = vmatprep.subr.bf16.mxu1 %v10389_v20  ;;  %v10397_v28 = vcombine.high %v551_v22, %v555_v23  ;;  %v559_v30 = vld [vmem:[#allocation6 + $0x88] sm:$0xff]  ;;  %v10396_v34 = vcombine.low %v551_v22, %v555_v23 }
  0xaa   : > { %v562_v25 = vld [vmem:[#allocation6 + $0xa0] sm:$0xff]  ;;  %10384 = vmatmul.mubr.msk.bf16.vlgmr.msra.gmra.mrb[0].mxu0 %vm440_vm0, %v369_v11  ;;  %v563_v31 = vld [vmem:[#allocation6 + $0xa8] sm:$0xff] }
  0xab   : > { %2121 = vmatpush1.bf16.msra.mxu0 %v10386_v15  ;;  %v10403_v29 = vcombine.high %v558_v24, %v562_v25  ;;  %v566_v32 = vld [vmem:[#allocation6 + $0xc0] sm:$0xff]  ;;  %10385 = vmatmul.mubr.msk.bf16.vlgmr.msra.gmra.mrb[0].mxu1 %vm440_vm0, %v369_v11  ;;  %v10402_v35 = vcombine.low %v558_v24, %v562_v25  ;;  %v10405_v36 = vcombine.high %v559_v30, %v563_v31  ;;  %v567_v38 = vld [vmem:[#allocation6 + $0xc8] sm:$0xff] }
  0xac   : > { %2122 = vmatprep.subr.bf16.mxu0 %v10395_v21  ;;  %v570_v33 = vld [vmem:[#allocation6 + $0xe0] sm:$0xff]  ;;  %2207 = vmatpush1.bf16.msra.mxu1 %v10388_v26  ;;  %v571_v39 = vld [vmem:[#allocation6 + $0xe8] sm:$0xff]  ;;  %v10404_v42 = vcombine.low %v559_v30, %v563_v31 }
  0xad   : > { %2208 = vmatprep.subr.bf16.mxu1 %v10397_v28  ;;  %v10411_v37 = vcombine.high %v566_v32, %v570_v33  ;;  %v574_v40 = vld [vmem:[#allocation6 + $0x100] sm:$0xff]  ;;  %v10410_v43 = vcombine.low %v566_v32, %v570_v33  ;;  %v10413_v44 = vcombine.high %v567_v38, %v571_v39  ;;  %v575_v46 = vld [vmem:[#allocation6 + $0x108] sm:$0xff]  ;;  %v10412_v50 = vcombine.low %v567_v38, %v571_v39 }
  0xae   : > { %v578_v41 = vld [vmem:[#allocation6 + $0x120] sm:$0xff]  ;;  %v579_v47 = vld [vmem:[#allocation6 + $0x128] sm:$0xff] }
  0xaf   : > { %2123 = vmatpush1.bf16.msra.mxu0 %v10394_v27  ;;  %v10419_v45 = vcombine.high %v574_v40, %v578_v41  ;;  %v582_v48 = vld [vmem:[#allocation6 + $0x140] sm:$0xff]  ;;  %v10418_v51 = vcombine.low %v574_v40, %v578_v41  ;;  %v10421_v52 = vcombine.high %v575_v46, %v579_v47  ;;  %v583_v54 = vld [vmem:[#allocation6 + $0x148] sm:$0xff]  ;;  %v10420_v58 = vcombine.low %v575_v46, %v579_v47 }
  0xb0   : > { %2124 = vmatprep.subr.bf16.mxu0 %v10403_v29  ;;  %2209 = vmatpush1.bf16.msra.mxu1 %v10396_v34  ;;  %v586_v49 = vld [vmem:[#allocation6 + $0x160] sm:$0xff]  ;;  %v587_v55 = vld [vmem:[#allocation6 + $0x168] sm:$0xff] }
  0xb1   : > { %2210 = vmatprep.subr.bf16.mxu1 %v10405_v36  ;;  %v10427_v53 = vcombine.high %v582_v48, %v586_v49  ;;  %v590_v56 = vld [vmem:[#allocation6 + $0x180] sm:$0xff]  ;;  %v10426_v59 = vcombine.low %v582_v48, %v586_v49  ;;  %v10429_v60 = vcombine.high %v583_v54, %v587_v55  ;;  %v591_v62 = vld [vmem:[#allocation6 + $0x188] sm:$0xff]  ;;  %v10428_v2 = vcombine.low %v583_v54, %v587_v55 }
  0xb2   : > { %v594_v57 = vld [vmem:[#allocation6 + $0x1a0] sm:$0xff]  ;;  %v595_v63 = vld [vmem:[#allocation6 + $0x1a8] sm:$0xff] }
  0xb3   : > { %2125 = vmatpush1.bf16.msra.mxu0 %v10402_v35  ;;  %v10435_v61 = vcombine.high %v590_v56, %v594_v57  ;;  %v598_v0 = vld [vmem:[#allocation6 + $0x1c0] sm:$0xff]  ;;  %v10434_v3 = vcombine.low %v590_v56, %v594_v57  ;;  %v10437_v4 = vcombine.high %v591_v62, %v595_v63  ;;  %v599_v6 = vld [vmem:[#allocation6 + $0x1c8] sm:$0xff]  ;;  %v10436_v10 = vcombine.low %v591_v62, %v595_v63 }
  0xb4   : > { %2126 = vmatprep.subr.bf16.mxu0 %v10411_v37  ;;  %2211 = vmatpush1.bf16.msra.mxu1 %v10404_v42  ;;  %v602_v1 = vld [vmem:[#allocation6 + $0x1e0] sm:$0xff]  ;;  %v603_v7 = vld [vmem:[#allocation6 + $0x1e8] sm:$0xff] }
  0xb5   : > { %2212 = vmatprep.subr.bf16.mxu1 %v10413_v44  ;;  %v10443_v5 = vcombine.high %v598_v0, %v602_v1  ;;  %v606_v8 = vld [vmem:[#allocation6 + $0x200] sm:$0xff]  ;;  %v10442_v11 = vcombine.low %v598_v0, %v602_v1  ;;  %v10445_v12 = vcombine.high %v599_v6, %v603_v7  ;;  %v607_v14 = vld [vmem:[#allocation6 + $0x208] sm:$0xff]  ;;  %v10444_v18 = vcombine.low %v599_v6, %v603_v7 }
  0xb6   : > { %v610_v9 = vld [vmem:[#allocation6 + $0x220] sm:$0xff]  ;;  %v611_v15 = vld [vmem:[#allocation6 + $0x228] sm:$0xff] }
  0xb7   : > { %2127 = vmatpush1.bf16.msra.mxu0 %v10410_v43  ;;  %v10451_v13 = vcombine.high %v606_v8, %v610_v9  ;;  %v614_v16 = vld [vmem:[#allocation6 + $0x240] sm:$0xff]  ;;  %v10450_v19 = vcombine.low %v606_v8, %v610_v9  ;;  %v10453_v20 = vcombine.high %v607_v14, %v611_v15  ;;  %v615_v22 = vld [vmem:[#allocation6 + $0x248] sm:$0xff]  ;;  %v10452_v26 = vcombine.low %v607_v14, %v611_v15 }
  0xb8   : > { %2128 = vmatprep.subr.bf16.mxu0 %v10419_v45  ;;  %2213 = vmatpush1.bf16.msra.mxu1 %v10412_v50  ;;  %v618_v17 = vld [vmem:[#allocation6 + $0x260] sm:$0xff]  ;;  %v619_v23 = vld [vmem:[#allocation6 + $0x268] sm:$0xff] }
  0xb9   : > { %2214 = vmatprep.subr.bf16.mxu1 %v10421_v52  ;;  %v10459_v21 = vcombine.high %v614_v16, %v618_v17  ;;  %v622_v24 = vld [vmem:[#allocation6 + $0x280] sm:$0xff]  ;;  %v10458_v27 = vcombine.low %v614_v16, %v618_v17  ;;  %v10461_v28 = vcombine.high %v615_v22, %v619_v23  ;;  %v623_v30 = vld [vmem:[#allocation6 + $0x288] sm:$0xff]  ;;  %v10460_v34 = vcombine.low %v615_v22, %v619_v23  ;;  %v378_v23 = vld [vmem:[#allocation4] sm:$0xf] }
  0xba   : > { %v626_v25 = vld [vmem:[#allocation6 + $0x2a0] sm:$0xff]  ;;  %v627_v31 = vld [vmem:[#allocation6 + $0x2a8] sm:$0xff] }
  0xbb   : > { %2129 = vmatpush1.bf16.msra.mxu0 %v10418_v51  ;;  %v10467_v29 = vcombine.high %v622_v24, %v626_v25  ;;  %v630_v32 = vld [vmem:[#allocation6 + $0x2c0] sm:$0xff]  ;;  %v10466_v35 = vcombine.low %v622_v24, %v626_v25  ;;  %v10469_v36 = vcombine.high %v623_v30, %v627_v31  ;;  %v631_v38 = vld [vmem:[#allocation6 + $0x2c8] sm:$0xff]  ;;  %v10468_v42 = vcombine.low %v623_v30, %v627_v31 }
  0xbc   : > { %2130 = vmatprep.subr.bf16.mxu0 %v10427_v53  ;;  %2215 = vmatpush1.bf16.msra.mxu1 %v10420_v58  ;;  %v634_v33 = vld [vmem:[#allocation6 + $0x2e0] sm:$0xff]  ;;  %v635_v39 = vld [vmem:[#allocation6 + $0x2e8] sm:$0xff] }
  0xbd   : > { %2216 = vmatprep.subr.bf16.mxu1 %v10429_v60  ;;  %v10475_v37 = vcombine.high %v630_v32, %v634_v33  ;;  %v638_v40 = vld [vmem:[#allocation6 + $0x300] sm:$0xff]  ;;  %v10474_v43 = vcombine.low %v630_v32, %v634_v33  ;;  %v10477_v44 = vcombine.high %v631_v38, %v635_v39  ;;  %v639_v46 = vld [vmem:[#allocation6 + $0x308] sm:$0xff]  ;;  %v10476_v50 = vcombine.low %v631_v38, %v635_v39 }
  0xbe   : > { %v642_v41 = vld [vmem:[#allocation6 + $0x320] sm:$0xff]  ;;  %v643_v47 = vld [vmem:[#allocation6 + $0x328] sm:$0xff] }
  0xbf   : > { %2131 = vmatpush1.bf16.msra.mxu0 %v10426_v59  ;;  %v10483_v45 = vcombine.high %v638_v40, %v642_v41  ;;  %v646_v48 = vld [vmem:[#allocation6 + $0x340] sm:$0xff]  ;;  %v10482_v51 = vcombine.low %v638_v40, %v642_v41  ;;  %v10485_v52 = vcombine.high %v639_v46, %v643_v47  ;;  %v647_v54 = vld [vmem:[#allocation6 + $0x348] sm:$0xff]  ;;  %v10484_v56 = vcombine.low %v639_v46, %v643_v47 }
  0xc0   : > { %2132 = vmatprep.subr.bf16.mxu0 %v10435_v61  ;;  %2217 = vmatpush1.bf16.msra.mxu1 %v10428_v2  ;;  %v650_v49 = vld [vmem:[#allocation6 + $0x360] sm:$0xff]  ;;  %v651_v55 = vld [vmem:[#allocation6 + $0x368] sm:$0xff] }
  0xc1   : > { %2218 = vmatprep.subr.bf16.mxu1 %v10437_v4  ;;  %v10491_v53 = vcombine.high %v646_v48, %v650_v49  ;;  %v10490_v57 = vcombine.low %v646_v48, %v650_v49  ;;  %v10493_v58 = vcombine.high %v647_v54, %v651_v55  ;;  %v10492_v59 = vcombine.low %v647_v54, %v651_v55  ;;  %v654_v60 = vld [vmem:[#allocation6 + $0x380] sm:$0xff]  ;;  %v655_v62 = vld [vmem:[#allocation6 + $0x388] sm:$0xff] }
  0xc2   : > { %v658_v61 = vld [vmem:[#allocation6 + $0x3a0] sm:$0xff]  ;;  %v659_v0 = vld [vmem:[#allocation6 + $0x3a8] sm:$0xff] }
  0xc3   : > { %2133 = vmatpush1.bf16.msra.mxu0 %v10434_v3  ;;  %v10499_v63 = vcombine.high %v654_v60, %v658_v61  ;;  %v10498_v1 = vcombine.low %v654_v60, %v658_v61  ;;  %v10500_v2 = vcombine.low %v655_v62, %v659_v0  ;;  %v10501_v3 = vcombine.high %v655_v62, %v659_v0  ;;  %v662_v4 = vld [vmem:[#allocation6 + $0x3c0] sm:$0xff]  ;;  %v663_v6 = vld [vmem:[#allocation6 + $0x3c8] sm:$0xff] }
  0xc4   : > { %2134 = vmatprep.subr.bf16.mxu0 %v10443_v5  ;;  %2219 = vmatpush1.bf16.msra.mxu1 %v10436_v10  ;;  %v666_v5 = vld [vmem:[#allocation6 + $0x3e0] sm:$0xff]  ;;  %v667_v8 = vld [vmem:[#allocation6 + $0x3e8] sm:$0xff] }
  0xc5   : > { %2220 = vmatprep.subr.bf16.mxu1 %v10445_v12  ;;  %v10507_v7 = vcombine.high %v662_v4, %v666_v5  ;;  %v10506_v9 = vcombine.low %v662_v4, %v666_v5  ;;  %v10508_v10 = vcombine.low %v663_v6, %v667_v8  ;;  %v12387_v12 = vld [vmem:[#allocation6 + $0x400] sm:$0xff]  ;;  %v671_v14 = vld [vmem:[#allocation6 + $0x408] sm:$0xff] }
  0xc6   : > { %v675_v16 = vld [vmem:[#allocation6 + $0x428] sm:$0xff]  ;;  %v682_v47 = vld [vmem:[#allocation6 + $0x460] sm:$0xff] }
  0xc7   : > { %2135 = vmatpush1.bf16.msra.mxu0 %v10442_v11  ;;  %v10509_v11 = vcombine.high %v663_v6, %v667_v8  ;;  %v679_v48 = vld [vmem:[#allocation6 + $0x448] sm:$0xff]  ;;  %v686_v61 = vld [vmem:[#allocation6 + $0x480] sm:$0xff] }
  0xc8   : > { %2136 = vmatprep.subr.bf16.mxu0 %v10451_v13  ;;  %2221 = vmatpush1.bf16.msra.mxu1 %v10444_v18  ;;  %v674_v13 = vld [vmem:[#allocation6 + $0x420] sm:$0xff]  ;;  %v10516_v18 = vcombine.low %v671_v14, %v675_v16  ;;  %v683_v49 = vld [vmem:[#allocation6 + $0x468] sm:$0xff] }
  0xc9   : > { %2222 = vmatprep.subr.bf16.mxu1 %v10453_v20  ;;  %v10515_v15 = vcombine.high %v12387_v12, %v674_v13  ;;  %v10514_v17 = vcombine.low %v12387_v12, %v674_v13  ;;  %v380_v20 = vlaneseq  ;;  %v10525_v60 = vcombine.high %v679_v48, %v683_v49  ;;  %v687_v0 = vld [vmem:[#allocation6 + $0x488] sm:$0xff] }
  0xca   : > { %v10524_v5 = vcombine.low %v679_v48, %v683_v49  ;;  %v699_v12 = vld [vmem:[#allocation6 + $0x4e8] sm:$0xff] }
  0xcb   : > { %2137 = vmatpush1.bf16.msra.mxu0 %v10450_v19  ;;  %v10517_v19 = vcombine.high %v671_v14, %v675_v16  ;;  %v727_v48 = vld [vmem:[#allocation6 + $0x5c8] sm:$0xff] }
  0xcc   : > { %2138 = vmatprep.subr.bf16.mxu0 %v10459_v21  ;;  %2223 = vmatpush1.bf16.msra.mxu1 %v10452_v26  ;;  %v12391_v21 = vshrl.u32 %v380_v20, 7  ;;  %v707_v20 = vld [vmem:[#allocation6 + $0x528] sm:$0xff] }
  0xcd   : > { %2224 = vmatprep.subr.bf16.mxu1 %v10461_v28  ;;  %v731_v49 = vld [vmem:[#allocation6 + $0x5e8] sm:$0xff] }
  0xce   : > { %v12394_v22 = vsub.s32 0, %v12391_v21  ;;  %v12397_v24 = vsub.s32 1, %v12391_v21  ;;  %v12401_v26 = vsub.s32 2, %v12391_v21  ;;  %v12405_v28 = vsub.s32 3, %v12391_v21 }
  0xcf   : > { %2139 = vmatpush1.bf16.msra.mxu0 %v10458_v27 }
  0xd0   : > { %2140 = vmatprep.subr.bf16.mxu0 %v10467_v29  ;;  %2225 = vmatpush1.bf16.msra.mxu1 %v10460_v34  ;;  %v383_v25 = vrot.slane %v378_v23, %v12394_v22  ;;  %v387_v27 = vrot.slane %v378_v23, %v12397_v24  ;;  %v391_v32 = vrot.slane %v378_v23, %v12401_v26 }
  0xd1   : > { %2226 = vmatprep.subr.bf16.mxu1 %v10469_v36 }
  0xd3   : > { %2141 = vmatpush1.bf16.msra.mxu0 %v10466_v35  ;;  %v395_v35 = vrot.slane %v378_v23, %v12405_v28 }
  0xd4   : > { %2142 = vmatprep.subr.bf16.mxu0 %v10475_v37  ;;  %2227 = vmatpush1.bf16.msra.mxu1 %v10468_v42  ;;  %v678_v42 = vld [vmem:[#allocation6 + $0x440] sm:$0xff] }
  0xd5   : > { %2228 = vmatprep.subr.bf16.mxu1 %v10477_v44  ;;  %v10522_v4 = vcombine.low %v678_v42, %v682_v47 }
  0xd7   : > { %2143 = vmatpush1.bf16.msra.mxu0 %v10474_v43 }
  0xd8   : > { %2144 = vmatprep.subr.bf16.mxu0 %v10483_v45  ;;  %2229 = vmatpush1.bf16.msra.mxu1 %v10476_v50 }
  0xd9   : > { %2230 = vmatprep.subr.bf16.mxu1 %v10485_v52 }
  0xdb   : > { %2145 = vmatpush1.bf16.msra.mxu0 %v10482_v51 }
  0xdc   : > { %2146 = vmatprep.subr.bf16.mxu0 %v10491_v53  ;;  %2231 = vmatpush1.bf16.msra.mxu1 %v10484_v56 }
  0xdd   : > { %2232 = vmatprep.subr.bf16.mxu1 %v10493_v58 }
  0xdf   : > { %2147 = vmatpush1.bf16.msra.mxu0 %v10490_v57 }
  0xe0   : > { %2233 = vmatpush1.bf16.msra.mxu1 %v10492_v59  ;;  %2148 = vmatprep.subr.bf16.mxu0 %v10499_v63  ;;  %v10523_v59 = vcombine.high %v678_v42, %v682_v47  ;;  %v690_v63 = vld [vmem:[#allocation6 + $0x4a0] sm:$0xff] }
  0xe1   : > { %2234 = vmatprep.subr.bf16.mxu1 %v10501_v3  ;;  %v10530_v13 = vcombine.low %v686_v61, %v690_v63  ;;  %v730_v47 = vld [vmem:[#allocation6 + $0x5e0] sm:$0xff] }
  0xe3   : > { %2149 = vmatpush1.bf16.msra.mxu0 %v10498_v1  ;;  %v691_v1 = vld [vmem:[#allocation6 + $0x4a8] sm:$0xff] }
  0xe4   : > { %2235 = vmatpush1.bf16.msra.mxu1 %v10500_v2  ;;  %2150 = vmatprep.subr.bf16.mxu0 %v10507_v7  ;;  %v10531_v7 = vcombine.high %v686_v61, %v690_v63  ;;  %v10533_v8 = vcombine.high %v687_v0, %v691_v1  ;;  %v10532_v14 = vcombine.low %v687_v0, %v691_v1  ;;  %v742_v0 = vld [vmem:[#allocation6 + $0x640] sm:$0xff] }
  0xe5   : > { %2236 = vmatprep.subr.bf16.mxu1 %v10509_v11  ;;  %v695_v11 = vld [vmem:[#allocation6 + $0x4c8] sm:$0xff]  ;;  %v10572_v61 = vcombine.low %v727_v48, %v731_v49  ;;  %v746_v1 = vld [vmem:[#allocation6 + $0x660] sm:$0xff] }
  0xe6   : > { %v10541_v16 = vcombine.high %v695_v11, %v699_v12 }
  0xe7   : > { %2151 = vmatpush1.bf16.msra.mxu0 %v10506_v9  ;;  %v694_v9 = vld [vmem:[#allocation6 + $0x4c0] sm:$0xff] }
  0xe8   : > { %2237 = vmatpush1.bf16.msra.mxu1 %v10508_v10  ;;  %2163 = vmatprep.subr.bf16.mxu0 %v10515_v15  ;;  %v698_v10 = vld [vmem:[#allocation6 + $0x4e0] sm:$0xff] }
  0xe9   : > { %2249 = vmatprep.subr.bf16.mxu1 %v10517_v19  ;;  %v10539_v15 = vcombine.high %v694_v9, %v698_v10  ;;  %v703_v19 = vld [vmem:[#allocation6 + $0x508] sm:$0xff]  ;;  %v10538_v23 = vcombine.low %v694_v9, %v698_v10  ;;  %v750_v10 = vld [vmem:[#allocation6 + $0x680] sm:$0xff] }
 0x17d   : > { %v478_v29 = vpop.f32.mrb[0].mxu0 }
 0x17e   : > { %v479_v30 = vadd.f32 %v478_v29, %v383_v25  ;;  %v480_v31 = vpop.f32.mrb[1].mxu0  ;;  %v521_v39 = vpop.f32.mrb[0].mxu1  ;;  %v10549_v29 = vcombine.high %v703_v19, %v707_v20 }
 0x17f   : > { %v481_v33 = vadd.f32 %v480_v31, %v387_v27  ;;  %v482_v34 = vpop.f32.mrb[2].mxu0  ;;  %v522_v43 = vadd.f32 %v521_v39, %v391_v32  ;;  %v523_v44 = vpop.f32.mrb[1].mxu1  ;;  %v714_v31 = vld [vmem:[#allocation6 + $0x560] sm:$0xff] }
 0x180   : > { %v483_v36 = vadd.f32 %v482_v34, %v383_v25  ;;  %v484_v37 = vpop.f32.mrb[3].mxu0  ;;  %v530_v40 = vmax.f32 %v479_v30, 0.0  ;;  %v524_v50 = vadd.f32 %v523_v44, %v395_v35  ;;  %v525_v51 = vpop.f32.mrb[2].mxu1  ;;  %v10540_v25 = vcombine.low %v695_v11, %v699_v12  ;;  %v710_v30 = vld [vmem:[#allocation6 + $0x540] sm:$0xff]  ;;  %v751_v12 = vld [vmem:[#allocation6 + $0x688] sm:$0xff] }
 0x181   : > { %v485_v38 = vadd.f32 %v484_v37, %v387_v27  ;;  %v531_v45 = vmax.f32 %v481_v33, 0.0  ;;  %v532_v53 = vmax.f32 %v522_v43, 0.0  ;;  %v526_v54 = vadd.f32 %v525_v51, %v391_v32  ;;  %v527_v55 = vpop.f32.mrb[3].mxu1  ;;  %v711_v32 = vld [vmem:[#allocation6 + $0x548] sm:$0xff]  ;;  %v722_v39 = vld [vmem:[#allocation6 + $0x5a0] sm:$0xff] }
 0x182   : > { %v534_v41 = vmax.f32 %v483_v36, 0.0  ;;  %v533_v57 = vmax.f32 %v524_v50, 0.0  ;;  %v528_v58 = vadd.f32 %v527_v55, %v395_v35  ;;  %v715_v33 = vld [vmem:[#allocation6 + $0x568] sm:$0xff]  ;;  %v10548_v35 = vcombine.low %v703_v19, %v707_v20  ;;  %v734_v55 = vld [vmem:[#allocation6 + $0x600] sm:$0xff] }
 0x183   : > { %v535_v46 = vmax.f32 %v485_v38, 0.0  ;;  %v536_v62 = vmax.f32 %v526_v54, 0.0  ;;  %v10555_v36 = vcombine.high %v710_v30, %v714_v31  ;;  %v10557_v37 = vcombine.high %v711_v32, %v715_v33  ;;  %v718_v38 = vld [vmem:[#allocation6 + $0x580] sm:$0xff]  ;;  %v759_v20 = vld [vmem:[#allocation6 + $0x6c8] sm:$0xff] }
 0x184   : > { %v12409_v52 = vpack.c.bf16 %v534_v41, %v530_v40  ;;  %v537_v2 = vmax.f32 %v528_v58, 0.0  ;;  %v719_v40 = vld [vmem:[#allocation6 + $0x588] sm:$0xff]  ;;  %v10554_v42 = vcombine.low %v710_v30, %v714_v31  ;;  %v10556_v43 = vcombine.low %v711_v32, %v715_v33  ;;  %v754_v11 = vld [vmem:[#allocation6 + $0x6a0] sm:$0xff] }
 0x185   : > { %v12411_v56 = vpack.c.bf16 %v535_v46, %v531_v45  ;;  %v12417_v3 = vpack.c.bf16 %v536_v62, %v532_v53  ;;  %v723_v41 = vld [vmem:[#allocation6 + $0x5a8] sm:$0xff]  ;;  %v10563_v44 = vcombine.high %v718_v38, %v722_v39  ;;  %v726_v46 = vld [vmem:[#allocation6 + $0x5c0] sm:$0xff]  ;;  %v10562_v50 = vcombine.low %v718_v38, %v722_v39 }
 0x186   : > { %v12419_v6 = vpack.c.bf16 %v537_v2, %v533_v57  ;;  %v10565_v45 = vcombine.high %v719_v40, %v723_v41  ;;  %v10564_v51 = vcombine.low %v719_v40, %v723_v41  ;;  %v10571_v53 = vcombine.high %v726_v46, %v730_v47  ;;  %v738_v57 = vld [vmem:[#allocation6 + $0x620] sm:$0xff]  ;;  %v735_v58 = vld [vmem:[#allocation6 + $0x608] sm:$0xff] }
 0x187   : > { %2152 = vmatprep.mubr.bf16.mxu0 %v12411_v56  ;;  %2238 = vmatprep.mubr.bf16.mxu1 %v12411_v56  ;;  %v10573_v54 = vcombine.high %v727_v48, %v731_v49  ;;  %v10579_v62 = vcombine.high %v734_v55, %v738_v57  ;;  %v743_v2 = vld [vmem:[#allocation6 + $0x648] sm:$0xff]  ;;  %v762_v19 = vld [vmem:[#allocation6 + $0x6e0] sm:$0xff] }
 0x188   : > { %2153 = vmatmul.mubr.bf16.vlgmr.msra.gmra.mrb[4].mxu0 %v12409_v52  ;;  %2239 = vmatmul.mubr.bf16.vlgmr.msra.gmra.mrb[4].mxu1 %v12409_v52  ;;  %v766_v31 = vld [vmem:[#allocation6 + $0x700] sm:$0xff]  ;;  %v767_v33 = vld [vmem:[#allocation6 + $0x708] sm:$0xff] }
 0x189   : > { %2164 = vmatpush1.bf16.msra.mxu0 %v10514_v17  ;;  %2250 = vmatpush1.bf16.msra.mxu1 %v10516_v18  ;;  %v702_v17 = vld [vmem:[#allocation6 + $0x500] sm:$0xff]  ;;  %v775_v41 = vld [vmem:[#allocation6 + $0x748] sm:$0xff] }
 0x18a   : > { %2165 = vmatprep.subr.bf16.mxu0 %v10523_v59  ;;  %2251 = vmatprep.subr.bf16.mxu1 %v10525_v60  ;;  %v706_v18 = vld [vmem:[#allocation6 + $0x520] sm:$0xff]  ;;  %v739_v59 = vld [vmem:[#allocation6 + $0x628] sm:$0xff]  ;;  %v10570_v60 = vcombine.low %v726_v46, %v730_v47 }
 0x18b   : > { %2195 = vmatprep.mubr.bf16.mxu0 %v12419_v6  ;;  %2281 = vmatprep.mubr.bf16.mxu1 %v12419_v6  ;;  %v10547_v27 = vcombine.high %v702_v17, %v706_v18  ;;  %v10546_v34 = vcombine.low %v702_v17, %v706_v18  ;;  %v10581_v63 = vcombine.high %v735_v58, %v739_v59  ;;  %v758_v18 = vld [vmem:[#allocation6 + $0x6c0] sm:$0xff]  ;;  %v783_v49 = vld [vmem:[#allocation6 + $0x788] sm:$0xff] }
 0x18c   : > { %v770_v32 = vld [vmem:[#allocation6 + $0x720] sm:$0xff] }
 0x18d   : > { %2166 = vmatpush1.bf16.msra.mxu0 %v10522_v4  ;;  %2252 = vmatpush1.bf16.msra.mxu1 %v10524_v5  ;;  %v747_v4 = vld [vmem:[#allocation6 + $0x668] sm:$0xff]  ;;  %v10578_v5 = vcombine.low %v734_v55, %v738_v57  ;;  %v774_v39 = vld [vmem:[#allocation6 + $0x740] sm:$0xff] }
 0x18e   : > { %2167 = vmatprep.subr.bf16.mxu0 %v10531_v7  ;;  %2253 = vmatprep.subr.bf16.mxu1 %v10533_v8  ;;  %v10580_v7 = vcombine.low %v735_v58, %v739_v59  ;;  %v10587_v8 = vcombine.high %v742_v0, %v746_v1  ;;  %v10589_v9 = vcombine.high %v743_v2, %v747_v4  ;;  %v778_v40 = vld [vmem:[#allocation6 + $0x760] sm:$0xff]  ;;  %v791_v59 = vld [vmem:[#allocation6 + $0x7c8] sm:$0xff] }
 0x18f   : > { %v782_v47 = vld [vmem:[#allocation6 + $0x780] sm:$0xff] }
 0x190   : > { %v786_v48 = vld [vmem:[#allocation6 + $0x7a0] sm:$0xff] }
 0x191   : > { %2168 = vmatpush1.bf16.msra.mxu0 %v10530_v13  ;;  %2254 = vmatpush1.bf16.msra.mxu1 %v10532_v14  ;;  %v755_v13 = vld [vmem:[#allocation6 + $0x6a8] sm:$0xff]  ;;  %v10586_v14 = vcombine.low %v742_v0, %v746_v1  ;;  %v790_v57 = vld [vmem:[#allocation6 + $0x7c0] sm:$0xff]  ;;  %v544_v1 = vld [vmem:[#allocation6 + $0x10] sm:$0xff] }
 0x192   : > { %2169 = vmatprep.subr.bf16.mxu0 %v10539_v15  ;;  %2255 = vmatprep.subr.bf16.mxu1 %v10541_v16  ;;  %v10588_v15 = vcombine.low %v743_v2, %v747_v4  ;;  %v10595_v16 = vcombine.high %v750_v10, %v754_v11  ;;  %v10597_v17 = vcombine.high %v751_v12, %v755_v13  ;;  %v794_v58 = vld [vmem:[#allocation6 + $0x7e0] sm:$0xff]  ;;  %v548_v2 = vld [vmem:[#allocation6 + $0x30] sm:$0xff]  ;;  %v545_v4 = vld [vmem:[#allocation6 + $0x18] sm:$0xff] }
 0x195   : > { %2170 = vmatpush1.bf16.msra.mxu0 %v10538_v23  ;;  %2256 = vmatpush1.bf16.msra.mxu1 %v10540_v25  ;;  %v763_v23 = vld [vmem:[#allocation6 + $0x6e8] sm:$0xff]  ;;  %v10594_v25 = vcombine.low %v750_v10, %v754_v11  ;;  %v552_v11 = vld [vmem:[#allocation6 + $0x50] sm:$0xff] }
 0x196   : > { %2171 = vmatprep.subr.bf16.mxu0 %v10547_v27  ;;  %2257 = vmatprep.subr.bf16.mxu1 %v10549_v29  ;;  %v10596_v27 = vcombine.low %v751_v12, %v755_v13  ;;  %v10603_v29 = vcombine.high %v758_v18, %v762_v19  ;;  %v10605_v30 = vcombine.high %v759_v20, %v763_v23  ;;  %v556_v12 = vld [vmem:[#allocation6 + $0x70] sm:$0xff]  ;;  %v553_v13 = vld [vmem:[#allocation6 + $0x58] sm:$0xff] }
 0x199   : > { %2172 = vmatpush1.bf16.msra.mxu0 %v10546_v34  ;;  %2258 = vmatpush1.bf16.msra.mxu1 %v10548_v35  ;;  %v771_v34 = vld [vmem:[#allocation6 + $0x728] sm:$0xff]  ;;  %v10602_v35 = vcombine.low %v758_v18, %v762_v19  ;;  %v560_v19 = vld [vmem:[#allocation6 + $0x90] sm:$0xff] }
 0x19a   : > { %2173 = vmatprep.subr.bf16.mxu0 %v10555_v36  ;;  %2259 = vmatprep.subr.bf16.mxu1 %v10557_v37  ;;  %v10604_v36 = vcombine.low %v759_v20, %v763_v23  ;;  %v10611_v37 = vcombine.high %v766_v31, %v770_v32  ;;  %v10613_v38 = vcombine.high %v767_v33, %v771_v34  ;;  %v564_v20 = vld [vmem:[#allocation6 + $0xb0] sm:$0xff]  ;;  %v561_v23 = vld [vmem:[#allocation6 + $0x98] sm:$0xff] }
 0x19d   : > { %2174 = vmatpush1.bf16.msra.mxu0 %v10554_v42  ;;  %2260 = vmatpush1.bf16.msra.mxu1 %v10556_v43  ;;  %v779_v42 = vld [vmem:[#allocation6 + $0x768] sm:$0xff]  ;;  %v10610_v43 = vcombine.low %v766_v31, %v770_v32  ;;  %v568_v32 = vld [vmem:[#allocation6 + $0xd0] sm:$0xff] }
 0x19e   : > { %2175 = vmatprep.subr.bf16.mxu0 %v10563_v44  ;;  %2261 = vmatprep.subr.bf16.mxu1 %v10565_v45  ;;  %v10612_v44 = vcombine.low %v767_v33, %v771_v34  ;;  %v10619_v45 = vcombine.high %v774_v39, %v778_v40  ;;  %v10621_v46 = vcombine.high %v775_v41, %v779_v42  ;;  %v572_v33 = vld [vmem:[#allocation6 + $0xf0] sm:$0xff]  ;;  %v569_v34 = vld [vmem:[#allocation6 + $0xd8] sm:$0xff] }
 0x1a1   : > { %2176 = vmatpush1.bf16.msra.mxu0 %v10562_v50  ;;  %2262 = vmatpush1.bf16.msra.mxu1 %v10564_v51  ;;  %v787_v50 = vld [vmem:[#allocation6 + $0x7a8] sm:$0xff]  ;;  %v10618_v51 = vcombine.low %v774_v39, %v778_v40  ;;  %v576_v40 = vld [vmem:[#allocation6 + $0x110] sm:$0xff] }
 0x1a2   : > { %2177 = vmatprep.subr.bf16.mxu0 %v10571_v53  ;;  %2263 = vmatprep.subr.bf16.mxu1 %v10573_v54  ;;  %v10620_v53 = vcombine.low %v775_v41, %v779_v42  ;;  %v10627_v54 = vcombine.high %v782_v47, %v786_v48  ;;  %v10629_v55 = vcombine.high %v783_v49, %v787_v50  ;;  %v580_v41 = vld [vmem:[#allocation6 + $0x130] sm:$0xff]  ;;  %v581_v42 = vld [vmem:[#allocation6 + $0x138] sm:$0xff] }
 0x1a5   : > { %2178 = vmatpush1.bf16.msra.mxu0 %v10570_v60  ;;  %2264 = vmatpush1.bf16.msra.mxu1 %v10572_v61  ;;  %v795_v60 = vld [vmem:[#allocation6 + $0x7e8] sm:$0xff]  ;;  %v10626_v61 = vcombine.low %v782_v47, %v786_v48  ;;  %v584_v47 = vld [vmem:[#allocation6 + $0x150] sm:$0xff] }
 0x1a6   : > { %2179 = vmatprep.subr.bf16.mxu0 %v10579_v62  ;;  %2265 = vmatprep.subr.bf16.mxu1 %v10581_v63  ;;  %v10628_v62 = vcombine.low %v783_v49, %v787_v50  ;;  %v10635_v63 = vcombine.high %v790_v57, %v794_v58  ;;  %v10637_v0 = vcombine.high %v791_v59, %v795_v60  ;;  %v588_v48 = vld [vmem:[#allocation6 + $0x170] sm:$0xff]  ;;  %v585_v49 = vld [vmem:[#allocation6 + $0x158] sm:$0xff] }
 0x1a7   : > { %v589_v50 = vld [vmem:[#allocation6 + $0x178] sm:$0xff] }
 0x1a9   : > { %2180 = vmatpush1.bf16.msra.mxu0 %v10578_v5  ;;  %2266 = vmatpush1.bf16.msra.mxu1 %v10580_v7  ;;  %v549_v5 = vld [vmem:[#allocation6 + $0x38] sm:$0xff]  ;;  %v10634_v7 = vcombine.low %v790_v57, %v794_v58  ;;  %v592_v57 = vld [vmem:[#allocation6 + $0x190] sm:$0xff] }
 0x1aa   : > { %2181 = vmatprep.subr.bf16.mxu0 %v10587_v8  ;;  %2267 = vmatprep.subr.bf16.mxu1 %v10589_v9  ;;  %v10636_v8 = vcombine.low %v791_v59, %v795_v60  ;;  %v10391_v9 = vcombine.high %v544_v1, %v548_v2  ;;  %v10393_v10 = vcombine.high %v545_v4, %v549_v5  ;;  %v596_v58 = vld [vmem:[#allocation6 + $0x1b0] sm:$0xff]  ;;  %v593_v59 = vld [vmem:[#allocation6 + $0x198] sm:$0xff] }
 0x1ab   : > { %v597_v60 = vld [vmem:[#allocation6 + $0x1b8] sm:$0xff] }
 0x1ad   : > { %2182 = vmatpush1.bf16.msra.mxu0 %v10586_v14  ;;  %2268 = vmatpush1.bf16.msra.mxu1 %v10588_v15  ;;  %v557_v14 = vld [vmem:[#allocation6 + $0x78] sm:$0xff]  ;;  %v10390_v15 = vcombine.low %v544_v1, %v548_v2  ;;  %v600_v1 = vld [vmem:[#allocation6 + $0x1d0] sm:$0xff] }
 0x1ae   : > { %2183 = vmatprep.subr.bf16.mxu0 %v10595_v16  ;;  %2269 = vmatprep.subr.bf16.mxu1 %v10597_v17  ;;  %v10392_v16 = vcombine.low %v545_v4, %v549_v5  ;;  %v10399_v17 = vcombine.high %v552_v11, %v556_v12  ;;  %v10401_v18 = vcombine.high %v553_v13, %v557_v14  ;;  %v604_v2 = vld [vmem:[#allocation6 + $0x1f0] sm:$0xff]  ;;  %v601_v4 = vld [vmem:[#allocation6 + $0x1d8] sm:$0xff] }
 0x1af   : > { %v605_v5 = vld [vmem:[#allocation6 + $0x1f8] sm:$0xff] }
 0x1b1   : > { %2184 = vmatpush1.bf16.msra.mxu0 %v10594_v25  ;;  %2270 = vmatpush1.bf16.msra.mxu1 %v10596_v27  ;;  %v565_v25 = vld [vmem:[#allocation6 + $0xb8] sm:$0xff]  ;;  %v10398_v27 = vcombine.low %v552_v11, %v556_v12  ;;  %v608_v11 = vld [vmem:[#allocation6 + $0x210] sm:$0xff] }
 0x1b2   : > { %2185 = vmatprep.subr.bf16.mxu0 %v10603_v29  ;;  %2271 = vmatprep.subr.bf16.mxu1 %v10605_v30  ;;  %v10400_v29 = vcombine.low %v553_v13, %v557_v14  ;;  %v10407_v30 = vcombine.high %v560_v19, %v564_v20  ;;  %v10409_v31 = vcombine.high %v561_v23, %v565_v25  ;;  %v612_v12 = vld [vmem:[#allocation6 + $0x230] sm:$0xff]  ;;  %v609_v13 = vld [vmem:[#allocation6 + $0x218] sm:$0xff] }
 0x1b3   : > { %v613_v14 = vld [vmem:[#allocation6 + $0x238] sm:$0xff] }
 0x1b5   : > { %2186 = vmatpush1.bf16.msra.mxu0 %v10602_v35  ;;  %2272 = vmatpush1.bf16.msra.mxu1 %v10604_v36  ;;  %v573_v35 = vld [vmem:[#allocation6 + $0xf8] sm:$0xff]  ;;  %v10406_v36 = vcombine.low %v560_v19, %v564_v20  ;;  %v616_v19 = vld [vmem:[#allocation6 + $0x250] sm:$0xff] }
 0x1b6   : > { %2187 = vmatprep.subr.bf16.mxu0 %v10611_v37  ;;  %2273 = vmatprep.subr.bf16.mxu1 %v10613_v38  ;;  %v10408_v37 = vcombine.low %v561_v23, %v565_v25  ;;  %v10415_v38 = vcombine.high %v568_v32, %v572_v33  ;;  %v10417_v39 = vcombine.high %v569_v34, %v573_v35  ;;  %v620_v20 = vld [vmem:[#allocation6 + $0x270] sm:$0xff]  ;;  %v617_v23 = vld [vmem:[#allocation6 + $0x258] sm:$0xff] }
 0x1b7   : > { %v621_v25 = vld [vmem:[#allocation6 + $0x278] sm:$0xff] }
 0x1b9   : > { %2188 = vmatpush1.bf16.msra.mxu0 %v10610_v43  ;;  %2274 = vmatpush1.bf16.msra.mxu1 %v10612_v44  ;;  %v10414_v43 = vcombine.low %v568_v32, %v572_v33  ;;  %v10416_v44 = vcombine.low %v569_v34, %v573_v35  ;;  %v624_v32 = vld [vmem:[#allocation6 + $0x290] sm:$0xff]  ;;  %v625_v34 = vld [vmem:[#allocation6 + $0x298] sm:$0xff] }
 0x1ba   : > { %2189 = vmatprep.subr.bf16.mxu0 %v10619_v45  ;;  %2275 = vmatprep.subr.bf16.mxu1 %v10621_v46  ;;  %v10423_v45 = vcombine.high %v576_v40, %v580_v41  ;;  %v628_v33 = vld [vmem:[#allocation6 + $0x2b0] sm:$0xff]  ;;  %v629_v35 = vld [vmem:[#allocation6 + $0x2b8] sm:$0xff] }
 0x1bd   : > { %2190 = vmatpush1.bf16.msra.mxu0 %v10618_v51  ;;  %2276 = vmatpush1.bf16.msra.mxu1 %v10620_v53  ;;  %v10422_v51 = vcombine.low %v576_v40, %v580_v41  ;;  %v632_v40 = vld [vmem:[#allocation6 + $0x2d0] sm:$0xff] }
 0x1be   : > { %2191 = vmatprep.subr.bf16.mxu0 %v10627_v54  ;;  %2277 = vmatprep.subr.bf16.mxu1 %v10629_v55  ;;  %v10431_v54 = vcombine.high %v584_v47, %v588_v48  ;;  %v10433_v55 = vcombine.high %v585_v49, %v589_v50  ;;  %v636_v41 = vld [vmem:[#allocation6 + $0x2f0] sm:$0xff] }
 0x1c1   : > { %2192 = vmatpush1.bf16.msra.mxu0 %v10626_v61  ;;  %2278 = vmatpush1.bf16.msra.mxu1 %v10628_v62  ;;  %v10430_v61 = vcombine.low %v584_v47, %v588_v48  ;;  %v10432_v62 = vcombine.low %v585_v49, %v589_v50  ;;  %v640_v47 = vld [vmem:[#allocation6 + $0x310] sm:$0xff]  ;;  %v641_v49 = vld [vmem:[#allocation6 + $0x318] sm:$0xff] }
 0x1c2   : > { %2193 = vmatprep.subr.bf16.mxu0 %v10635_v63  ;;  %2279 = vmatprep.subr.bf16.mxu1 %v10637_v0  ;;  %v10439_v63 = vcombine.high %v592_v57, %v596_v58  ;;  %v10441_v0 = vcombine.high %v593_v59, %v597_v60  ;;  %v644_v48 = vld [vmem:[#allocation6 + $0x330] sm:$0xff]  ;;  %v645_v50 = vld [vmem:[#allocation6 + $0x338] sm:$0xff] }
 0x1c5   : > { %2194 = vmatpush1.bf16.msra.mxu0 %v10634_v7  ;;  %2280 = vmatpush1.bf16.msra.mxu1 %v10636_v8  ;;  %v10438_v7 = vcombine.low %v592_v57, %v596_v58  ;;  %v10440_v8 = vcombine.low %v593_v59, %v597_v60  ;;  %v648_v57 = vld [vmem:[#allocation6 + $0x350] sm:$0xff]  ;;  %v649_v59 = vld [vmem:[#allocation6 + $0x358] sm:$0xff] }
 0x1c6   : > { %2292 = vmatprep.subr.bf16.mxu0 %v10391_v9  ;;  %2378 = vmatprep.subr.bf16.mxu1 %v10393_v10  ;;  %v10447_v9 = vcombine.high %v600_v1, %v604_v2  ;;  %v10449_v10 = vcombine.high %v601_v4, %v605_v5  ;;  %v652_v58 = vld [vmem:[#allocation6 + $0x370] sm:$0xff]  ;;  %v653_v60 = vld [vmem:[#allocation6 + $0x378] sm:$0xff] }
 0x1c8   : > { %2196 = vmatmul.mubr.bf16.vlgmr.msra.gmra.mrb[4].mxu0 %v12417_v3  ;;  %2282 = vmatmul.mubr.bf16.vlgmr.msra.gmra.mrb[4].mxu1 %v12417_v3 }
 0x1c9   : > { %2293 = vmatpush1.bf16.msra.mxu0 %v10390_v15  ;;  %2324 = vmatprep.mubr.bf16.mxu0 %v12411_v56  ;;  %v10446_v15 = vcombine.low %v600_v1, %v604_v2  ;;  %v656_v1 = vld [vmem:[#allocation6 + $0x390] sm:$0xff] }
 0x1ca   : > { %2379 = vmatpush1.bf16.msra.mxu1 %v10392_v16  ;;  %2410 = vmatprep.mubr.bf16.mxu1 %v12411_v56  ;;  %v577_v56 = vld [vmem:[#allocation6 + $0x118] sm:$0xff]  ;;  %v10448_v16 = vcombine.low %v601_v4, %v605_v5  ;;  %v660_v2 = vld [vmem:[#allocation6 + $0x3b0] sm:$0xff] }
 0x1cb   : > { %2294 = vmatprep.subr.bf16.mxu0 %v10399_v17  ;;  %2380 = vmatprep.subr.bf16.mxu1 %v10401_v18  ;;  %v10425_v46 = vcombine.high %v577_v56, %v581_v42  ;;  %v10424_v53 = vcombine.low %v577_v56, %v581_v42  ;;  %v10455_v17 = vcombine.high %v608_v11, %v612_v12  ;;  %v633_v56 = vld [vmem:[#allocation6 + $0x2d8] sm:$0xff] }
 0x1cc   : > { %v10457_v18 = vcombine.high %v609_v13, %v613_v14  ;;  %v637_v42 = vld [vmem:[#allocation6 + $0x2f8] sm:$0xff] }
 0x1cd   : > { %2295 = vmatpush1.bf16.msra.mxu0 %v10398_v27  ;;  %v10454_v27 = vcombine.low %v608_v11, %v612_v12  ;;  %v657_v4 = vld [vmem:[#allocation6 + $0x398] sm:$0xff]  ;;  %v664_v11 = vld [vmem:[#allocation6 + $0x3d0] sm:$0xff] }
 0x1ce   : > { %2381 = vmatpush1.bf16.msra.mxu1 %v10400_v29  ;;  %2296 = vmatprep.subr.bf16.mxu0 %v10407_v30  ;;  %v10456_v29 = vcombine.low %v609_v13, %v613_v14  ;;  %v10463_v30 = vcombine.high %v616_v19, %v620_v20  ;;  %v661_v5 = vld [vmem:[#allocation6 + $0x3b8] sm:$0xff]  ;;  %v668_v12 = vld [vmem:[#allocation6 + $0x3f0] sm:$0xff] }
 0x1cf   : > { %2382 = vmatprep.subr.bf16.mxu1 %v10409_v31  ;;  %v10465_v31 = vcombine.high %v617_v23, %v621_v25  ;;  %v665_v13 = vld [vmem:[#allocation6 + $0x3d8] sm:$0xff] }
 0x1d0   : > { %v669_v14 = vld [vmem:[#allocation6 + $0x3f8] sm:$0xff] }
 0x1d1   : > { %2297 = vmatpush1.bf16.msra.mxu0 %v10406_v36  ;;  %v10462_v36 = vcombine.low %v616_v19, %v620_v20  ;;  %v672_v19 = vld [vmem:[#allocation6 + $0x410] sm:$0xff] }
 0x1d2   : > { %2383 = vmatpush1.bf16.msra.mxu1 %v10408_v37  ;;  %2298 = vmatprep.subr.bf16.mxu0 %v10415_v38  ;;  %v10464_v37 = vcombine.low %v617_v23, %v621_v25  ;;  %v10471_v38 = vcombine.high %v624_v32, %v628_v33  ;;  %v676_v20 = vld [vmem:[#allocation6 + $0x430] sm:$0xff]  ;;  %v673_v23 = vld [vmem:[#allocation6 + $0x418] sm:$0xff] }
 0x1d3   : > { %2384 = vmatprep.subr.bf16.mxu1 %v10417_v39  ;;  %v10473_v39 = vcombine.high %v625_v34, %v629_v35  ;;  %v677_v25 = vld [vmem:[#allocation6 + $0x438] sm:$0xff] }
 0x1d5   : > { %2299 = vmatpush1.bf16.msra.mxu0 %v10414_v43  ;;  %v10470_v43 = vcombine.low %v624_v32, %v628_v33  ;;  %v680_v32 = vld [vmem:[#allocation6 + $0x450] sm:$0xff] }
 0x1d6   : > { %2385 = vmatpush1.bf16.msra.mxu1 %v10416_v44  ;;  %2300 = vmatprep.subr.bf16.mxu0 %v10423_v45  ;;  %v10472_v44 = vcombine.low %v625_v34, %v629_v35  ;;  %v10479_v45 = vcombine.high %v632_v40, %v636_v41  ;;  %v684_v33 = vld [vmem:[#allocation6 + $0x470] sm:$0xff]  ;;  %v10518_v34 = vcombine.low %v672_v19, %v676_v20  ;;  %v681_v35 = vld [vmem:[#allocation6 + $0x458] sm:$0xff] }
 0x1d7   : > { %2386 = vmatprep.subr.bf16.mxu1 %v10425_v46  ;;  %v10481_v46 = vcombine.high %v633_v56, %v637_v42 }
 0x1d9   : > { %2301 = vmatpush1.bf16.msra.mxu0 %v10422_v51  ;;  %v10478_v51 = vcombine.low %v632_v40, %v636_v41  ;;  %v692_v40 = vld [vmem:[#allocation6 + $0x4b0] sm:$0xff] }
 0x1da   : > { %2387 = vmatpush1.bf16.msra.mxu1 %v10424_v53  ;;  %2302 = vmatprep.subr.bf16.mxu0 %v10431_v54  ;;  %v10480_v53 = vcombine.low %v633_v56, %v637_v42  ;;  %v10487_v54 = vcombine.high %v640_v47, %v644_v48  ;;  %v689_v56 = vld [vmem:[#allocation6 + $0x498] sm:$0xff] }
 0x1db   : > { %2388 = vmatprep.subr.bf16.mxu1 %v10433_v55  ;;  %v10489_v55 = vcombine.high %v641_v49, %v645_v50  ;;  %v693_v42 = vld [vmem:[#allocation6 + $0x4b8] sm:$0xff] }
 0x1dd   : > { %2303 = vmatpush1.bf16.msra.mxu0 %v10430_v61  ;;  %v10486_v61 = vcombine.low %v640_v47, %v644_v48  ;;  %v696_v47 = vld [vmem:[#allocation6 + $0x4d0] sm:$0xff] }
 0x1de   : > { %2389 = vmatpush1.bf16.msra.mxu1 %v10432_v62  ;;  %2304 = vmatprep.subr.bf16.mxu0 %v10439_v63  ;;  %v10488_v62 = vcombine.low %v641_v49, %v645_v50  ;;  %v10495_v63 = vcombine.high %v648_v57, %v652_v58  ;;  %v700_v48 = vld [vmem:[#allocation6 + $0x4f0] sm:$0xff]  ;;  %v697_v49 = vld [vmem:[#allocation6 + $0x4d8] sm:$0xff] }
 0x1df   : > { %2390 = vmatprep.subr.bf16.mxu1 %v10441_v0  ;;  %v10497_v0 = vcombine.high %v649_v59, %v653_v60  ;;  %v701_v50 = vld [vmem:[#allocation6 + $0x4f8] sm:$0xff] }
 0x1e1   : > { %2305 = vmatpush1.bf16.msra.mxu0 %v10438_v7  ;;  %v10494_v7 = vcombine.low %v648_v57, %v652_v58  ;;  %v708_v57 = vld [vmem:[#allocation6 + $0x530] sm:$0xff]  ;;  %v705_v58 = vld [vmem:[#allocation6 + $0x518] sm:$0xff] }
 0x1e2   : > { %2391 = vmatpush1.bf16.msra.mxu1 %v10440_v8  ;;  %2306 = vmatprep.subr.bf16.mxu0 %v10447_v9  ;;  %v10496_v8 = vcombine.low %v649_v59, %v653_v60  ;;  %v10503_v9 = vcombine.high %v656_v1, %v660_v2  ;;  %v709_v59 = vld [vmem:[#allocation6 + $0x538] sm:$0xff]  ;;  %v10544_v60 = vcombine.low %v697_v49, %v701_v50 }
 0x1e3   : > { %2392 = vmatprep.subr.bf16.mxu1 %v10449_v10  ;;  %v10505_v10 = vcombine.high %v657_v4, %v661_v5 }
 0x1e5   : > { %2307 = vmatpush1.bf16.msra.mxu0 %v10446_v15  ;;  %v10502_v15 = vcombine.low %v656_v1, %v660_v2  ;;  %v713_v1 = vld [vmem:[#allocation6 + $0x558] sm:$0xff] }
 0x1e6   : > { %2393 = vmatpush1.bf16.msra.mxu1 %v10448_v16  ;;  %2308 = vmatprep.subr.bf16.mxu0 %v10455_v17  ;;  %v10504_v16 = vcombine.low %v657_v4, %v661_v5  ;;  %v10511_v17 = vcombine.high %v664_v11, %v668_v12  ;;  %v717_v2 = vld [vmem:[#allocation6 + $0x578] sm:$0xff]  ;;  %v10552_v5 = vcombine.low %v705_v58, %v709_v59 }
 0x1e7   : > { %2394 = vmatprep.subr.bf16.mxu1 %v10457_v18  ;;  %v10513_v18 = vcombine.high %v665_v13, %v669_v14 }
 0x1e9   : > { %2309 = vmatpush1.bf16.msra.mxu0 %v10454_v27  ;;  %v10510_v27 = vcombine.low %v664_v11, %v668_v12  ;;  %v721_v11 = vld [vmem:[#allocation6 + $0x598] sm:$0xff] }
 0x1ea   : > { %2395 = vmatpush1.bf16.msra.mxu1 %v10456_v29  ;;  %2310 = vmatprep.subr.bf16.mxu0 %v10463_v30  ;;  %v10512_v29 = vcombine.low %v665_v13, %v669_v14  ;;  %v10519_v30 = vcombine.high %v672_v19, %v676_v20  ;;  %v725_v12 = vld [vmem:[#allocation6 + $0x5b8] sm:$0xff]  ;;  %v10560_v14 = vcombine.low %v713_v1, %v717_v2 }
 0x1eb   : > { %2396 = vmatprep.subr.bf16.mxu1 %v10465_v31  ;;  %v10521_v31 = vcombine.high %v673_v23, %v677_v25  ;;  %v729_v19 = vld [vmem:[#allocation6 + $0x5d8] sm:$0xff] }
 0x1ec   : > { %v733_v20 = vld [vmem:[#allocation6 + $0x5f8] sm:$0xff] }
 0x1ed   : > { %2311 = vmatpush1.bf16.msra.mxu0 %v10462_v36  ;;  %v685_v36 = vld [vmem:[#allocation6 + $0x478] sm:$0xff] }
 0x1ee   : > { %2397 = vmatpush1.bf16.msra.mxu1 %v10464_v37  ;;  %2312 = vmatprep.subr.bf16.mxu0 %v10471_v38  ;;  %v10520_v37 = vcombine.low %v673_v23, %v677_v25  ;;  %v10527_v38 = vcombine.high %v680_v32, %v684_v33  ;;  %v10529_v41 = vcombine.high %v681_v35, %v685_v36 }
 0x1ef   : > { %2398 = vmatprep.subr.bf16.mxu1 %v10473_v39  ;;  %v688_v39 = vld [vmem:[#allocation6 + $0x490] sm:$0xff]  ;;  %v10568_v25 = vcombine.low %v721_v11, %v725_v12 }
 0x1f1   : > { %2313 = vmatpush1.bf16.msra.mxu0 %v10470_v43  ;;  %v10526_v43 = vcombine.low %v680_v32, %v684_v33  ;;  %v737_v32 = vld [vmem:[#allocation6 + $0x618] sm:$0xff] }
 0x1f2   : > { %2399 = vmatpush1.bf16.msra.mxu1 %v10472_v44  ;;  %2314 = vmatprep.subr.bf16.mxu0 %v10479_v45  ;;  %v10528_v44 = vcombine.low %v681_v35, %v685_v36  ;;  %v10535_v45 = vcombine.high %v688_v39, %v692_v40  ;;  %v741_v33 = vld [vmem:[#allocation6 + $0x638] sm:$0xff]  ;;  %v10576_v35 = vcombine.low %v729_v19, %v733_v20 }
 0x1f3   : > { %2400 = vmatprep.subr.bf16.mxu1 %v10481_v46  ;;  %v10537_v46 = vcombine.high %v689_v56, %v693_v42 }
 0x1f5   : > { %2315 = vmatpush1.bf16.msra.mxu0 %v10478_v51  ;;  %v10534_v51 = vcombine.low %v688_v39, %v692_v40  ;;  %v748_v39 = vld [vmem:[#allocation6 + $0x670] sm:$0xff]  ;;  %v745_v40 = vld [vmem:[#allocation6 + $0x658] sm:$0xff] }
 0x1f6   : > { %2401 = vmatpush1.bf16.msra.mxu1 %v10480_v53  ;;  %2316 = vmatprep.subr.bf16.mxu0 %v10487_v54  ;;  %v10543_v53 = vcombine.high %v696_v47, %v700_v48  ;;  %v10545_v54 = vcombine.high %v697_v49, %v701_v50 }
 0x1f7   : > { %2402 = vmatprep.subr.bf16.mxu1 %v10489_v55  ;;  %v704_v55 = vld [vmem:[#allocation6 + $0x510] sm:$0xff] }
 0x1f8   : > { %v10550_v4 = vcombine.low %v704_v55, %v708_v57 }
 0x1f9   : > { %2317 = vmatpush1.bf16.msra.mxu0 %v10486_v61  ;;  %v10551_v61 = vcombine.high %v704_v55, %v708_v57  ;;  %v761_v55 = vld [vmem:[#allocation6 + $0x6d8] sm:$0xff] }
 0x1fa   : > { %2403 = vmatpush1.bf16.msra.mxu1 %v10488_v62  ;;  %2318 = vmatprep.subr.bf16.mxu0 %v10495_v63  ;;  %v10553_v62 = vcombine.high %v705_v58, %v709_v59  ;;  %v712_v63 = vld [vmem:[#allocation6 + $0x550] sm:$0xff]  ;;  %v765_v57 = vld [vmem:[#allocation6 + $0x6f8] sm:$0xff] }
 0x1fb   : > { %2404 = vmatprep.subr.bf16.mxu1 %v10497_v0  ;;  %v716_v0 = vld [vmem:[#allocation6 + $0x570] sm:$0xff] }
 0x1fc   : > { %v10558_v13 = vcombine.low %v712_v63, %v716_v0 }
 0x1fd   : > { %2319 = vmatpush1.bf16.msra.mxu0 %v10494_v7  ;;  %v10559_v7 = vcombine.high %v712_v63, %v716_v0  ;;  %v769_v63 = vld [vmem:[#allocation6 + $0x718] sm:$0xff] }
 0x1fe   : > { %2405 = vmatpush1.bf16.msra.mxu1 %v10496_v8  ;;  %2320 = vmatprep.subr.bf16.mxu0 %v10503_v9  ;;  %v10561_v8 = vcombine.high %v713_v1, %v717_v2  ;;  %v720_v9 = vld [vmem:[#allocation6 + $0x590] sm:$0xff]  ;;  %v773_v0 = vld [vmem:[#allocation6 + $0x738] sm:$0xff]  ;;  %v10608_v2 = vcombine.low %v761_v55, %v765_v57 }
 0x1ff   : > { %2406 = vmatprep.subr.bf16.mxu1 %v10505_v10  ;;  %v724_v10 = vld [vmem:[#allocation6 + $0x5b0] sm:$0xff] }
 0x200   : > { %v10566_v23 = vcombine.low %v720_v9, %v724_v10 }
 0x201   : > { %2321 = vmatpush1.bf16.msra.mxu0 %v10502_v15  ;;  %v10567_v15 = vcombine.high %v720_v9, %v724_v10  ;;  %v777_v9 = vld [vmem:[#allocation6 + $0x758] sm:$0xff] }
 0x202   : > { %2407 = vmatpush1.bf16.msra.mxu1 %v10504_v16  ;;  %2322 = vmatprep.subr.bf16.mxu0 %v10511_v17  ;;  %v10569_v16 = vcombine.high %v721_v11, %v725_v12  ;;  %v728_v17 = vld [vmem:[#allocation6 + $0x5d0] sm:$0xff]  ;;  %v781_v10 = vld [vmem:[#allocation6 + $0x778] sm:$0xff]  ;;  %v10616_v12 = vcombine.low %v769_v63, %v773_v0 }
 0x203   : > { %2408 = vmatprep.subr.bf16.mxu1 %v10513_v18  ;;  %v732_v18 = vld [vmem:[#allocation6 + $0x5f0] sm:$0xff] }
 0x205   : > { %2323 = vmatpush1.bf16.msra.mxu0 %v10510_v27  ;;  %v10575_v27 = vcombine.high %v728_v17, %v732_v18 }
 0x206   : > { %2409 = vmatpush1.bf16.msra.mxu1 %v10512_v29  ;;  %2335 = vmatprep.subr.bf16.mxu0 %v10519_v30  ;;  %v10577_v29 = vcombine.high %v729_v19, %v733_v20  ;;  %v736_v30 = vld [vmem:[#allocation6 + $0x610] sm:$0xff]  ;;  %v10624_v20 = vcombine.low %v777_v9, %v781_v10 }
 0x207   : > { %2421 = vmatprep.subr.bf16.mxu1 %v10521_v31  ;;  %v740_v31 = vld [vmem:[#allocation6 + $0x630] sm:$0xff] }
 0x208   : > { %2325 = vmatmul.mubr.bf16.vlgmr.msra.gmra.mrb[8].mxu0 %v12409_v52  ;;  %v10583_v36 = vcombine.high %v736_v30, %v740_v31 }
 0x209   : > { %2411 = vmatmul.mubr.bf16.vlgmr.msra.gmra.mrb[8].mxu1 %v12409_v52  ;;  %2336 = vmatpush1.bf16.msra.mxu0 %v10518_v34  ;;  %v10536_v52 = vcombine.low %v689_v56, %v693_v42  ;;  %v10574_v34 = vcombine.low %v728_v17, %v732_v18  ;;  %v10582_v56 = vcombine.low %v736_v30, %v740_v31  ;;  %v785_v17 = vld [vmem:[#allocation6 + $0x798] sm:$0xff] }
 0x20a   : > { %2367 = vmatprep.mubr.bf16.mxu0 %v12419_v6  ;;  %2422 = vmatpush1.bf16.msra.mxu1 %v10520_v37  ;;  %v10585_v37 = vcombine.high %v737_v32, %v741_v33  ;;  %v10584_v42 = vcombine.low %v737_v32, %v741_v33  ;;  %v789_v18 = vld [vmem:[#allocation6 + $0x7b8] sm:$0xff] }
 0x20b   : > { %2453 = vmatprep.mubr.bf16.mxu1 %v12419_v6  ;;  %2337 = vmatprep.subr.bf16.mxu0 %v10527_v38  ;;  %v10542_v6 = vcombine.low %v696_v47, %v700_v48  ;;  %v744_v38 = vld [vmem:[#allocation6 + $0x650] sm:$0xff]  ;;  %v753_v47 = vld [vmem:[#allocation6 + $0x698] sm:$0xff]  ;;  %v10632_v33 = vcombine.low %v785_v17, %v789_v18 }
 0x20c   : > { %2423 = vmatprep.subr.bf16.mxu1 %v10529_v41  ;;  %v749_v41 = vld [vmem:[#allocation6 + $0x678] sm:$0xff]  ;;  %v10590_v49 = vcombine.low %v744_v38, %v748_v39 }
 0x20d   : > { %2338 = vmatpush1.bf16.msra.mxu0 %v10526_v43  ;;  %v10591_v43 = vcombine.high %v744_v38, %v748_v39  ;;  %v757_v48 = vld [vmem:[#allocation6 + $0x6b8] sm:$0xff]  ;;  %v10592_v50 = vcombine.low %v745_v40, %v749_v41  ;;  %v2489_v38 = vld [vmem:[#allocation9 + $0x8] sm:$0xff] }
 0x20e   : > { %2424 = vmatpush1.bf16.msra.mxu1 %v10528_v44  ;;  %2339 = vmatprep.subr.bf16.mxu0 %v10535_v45  ;;  %v10593_v44 = vcombine.high %v745_v40, %v749_v41  ;;  %v752_v45 = vld [vmem:[#allocation6 + $0x690] sm:$0xff]  ;;  %v10600_v59 = vcombine.low %v753_v47, %v757_v48  ;;  %v793_v30 = vld [vmem:[#allocation6 + $0x7d8] sm:$0xff] }
 0x20f   : > { %2425 = vmatprep.subr.bf16.mxu1 %v10537_v46  ;;  %v756_v46 = vld [vmem:[#allocation6 + $0x6b0] sm:$0xff]  ;;  %v797_v31 = vld [vmem:[#allocation6 + $0x7f8] sm:$0xff] }
 0x210   : > { %v10598_v58 = vcombine.low %v752_v45, %v756_v46  ;;  %v2497_v39 = vld [vmem:[#allocation9 + $0x48] sm:$0xff]  ;;  %v10640_v41 = vcombine.low %v793_v30, %v797_v31 }
 0x211   : > { %2340 = vmatpush1.bf16.msra.mxu0 %v10534_v51  ;;  %v10599_v51 = vcombine.high %v752_v45, %v756_v46  ;;  %v2505_v45 = vld [vmem:[#allocation9 + $0x88] sm:$0xff] }
 0x212   : > { %2426 = vmatpush1.bf16.msra.mxu1 %v10536_v52  ;;  %2341 = vmatprep.subr.bf16.mxu0 %v10543_v53  ;;  %v10601_v52 = vcombine.high %v753_v47, %v757_v48  ;;  %v760_v53 = vld [vmem:[#allocation6 + $0x6d0] sm:$0xff]  ;;  %v10644_v48 = vcombine.low %v2489_v38, %v2497_v39 }
 0x213   : > { %2427 = vmatprep.subr.bf16.mxu1 %v10545_v54  ;;  %v764_v54 = vld [vmem:[#allocation6 + $0x6f0] sm:$0xff] }
 0x214   : > { %v10606_v1 = vcombine.low %v760_v53, %v764_v54  ;;  %v2513_v46 = vld [vmem:[#allocation9 + $0xc8] sm:$0xff] }
 0x215   : > { %2342 = vmatpush1.bf16.msra.mxu0 %v10542_v6  ;;  %v10607_v6 = vcombine.high %v760_v53, %v764_v54  ;;  %v2521_v53 = vld [vmem:[#allocation9 + $0x108] sm:$0xff] }
 0x216   : > { %2428 = vmatpush1.bf16.msra.mxu1 %v10544_v60  ;;  %2343 = vmatprep.subr.bf16.mxu0 %v10551_v61  ;;  %v10609_v60 = vcombine.high %v761_v55, %v765_v57  ;;  %v768_v61 = vld [vmem:[#allocation6 + $0x710] sm:$0xff]  ;;  %v10660_v57 = vcombine.low %v2505_v45, %v2513_v46 }
 0x217   : > { %2429 = vmatprep.subr.bf16.mxu1 %v10553_v62  ;;  %v772_v62 = vld [vmem:[#allocation6 + $0x730] sm:$0xff] }
 0x218   : > { %v10614_v11 = vcombine.low %v768_v61, %v772_v62  ;;  %v2529_v54 = vld [vmem:[#allocation9 + $0x148] sm:$0xff] }
 0x219   : > { %2344 = vmatpush1.bf16.msra.mxu0 %v10550_v4  ;;  %v10615_v4 = vcombine.high %v768_v61, %v772_v62  ;;  %v2537_v61 = vld [vmem:[#allocation9 + $0x188] sm:$0xff] }
 0x21a   : > { %2430 = vmatpush1.bf16.msra.mxu1 %v10552_v5  ;;  %2345 = vmatprep.subr.bf16.mxu0 %v10559_v7  ;;  %v10617_v5 = vcombine.high %v769_v63, %v773_v0  ;;  %v776_v7 = vld [vmem:[#allocation6 + $0x750] sm:$0xff]  ;;  %v10676_v0 = vcombine.low %v2521_v53, %v2529_v54 }
 0x21b   : > { %2431 = vmatprep.subr.bf16.mxu1 %v10561_v8  ;;  %v780_v8 = vld [vmem:[#allocation6 + $0x770] sm:$0xff] }
 0x21c   : > { %v10622_v19 = vcombine.low %v776_v7, %v780_v8  ;;  %v2545_v62 = vld [vmem:[#allocation9 + $0x1c8] sm:$0xff] }
 0x21d   : > { %2346 = vmatpush1.bf16.msra.mxu0 %v10558_v13  ;;  %v10623_v13 = vcombine.high %v776_v7, %v780_v8  ;;  %v2561_v7 = vld [vmem:[#allocation9 + $0x248] sm:$0xff] }
 0x21e   : > { %2432 = vmatpush1.bf16.msra.mxu1 %v10560_v14  ;;  %2347 = vmatprep.subr.bf16.mxu0 %v10567_v15  ;;  %v10625_v14 = vcombine.high %v777_v9, %v781_v10  ;;  %v784_v15 = vld [vmem:[#allocation6 + $0x790] sm:$0xff]  ;;  %v10692_v9 = vcombine.low %v2537_v61, %v2545_v62 }
 0x21f   : > { %2433 = vmatprep.subr.bf16.mxu1 %v10569_v16  ;;  %v788_v16 = vld [vmem:[#allocation6 + $0x7b0] sm:$0xff] }
 0x220   : > { %v10630_v32 = vcombine.low %v784_v15, %v788_v16 }
 0x221   : > { %2348 = vmatpush1.bf16.msra.mxu0 %v10566_v23  ;;  %v10631_v23 = vcombine.high %v784_v15, %v788_v16  ;;  %v2577_v15 = vld [vmem:[#allocation9 + $0x2c8] sm:$0xff] }
 0x222   : > { %2434 = vmatpush1.bf16.msra.mxu1 %v10568_v25  ;;  %2349 = vmatprep.subr.bf16.mxu0 %v10575_v27  ;;  %v10633_v25 = vcombine.high %v785_v17, %v789_v18  ;;  %v792_v27 = vld [vmem:[#allocation6 + $0x7d0] sm:$0xff] }
 0x223   : > { %2435 = vmatprep.subr.bf16.mxu1 %v10577_v29  ;;  %v796_v29 = vld [vmem:[#allocation6 + $0x7f0] sm:$0xff] }
 0x224   : > { %v10638_v40 = vcombine.low %v792_v27, %v796_v29 }
 0x225   : > { %2350 = vmatpush1.bf16.msra.mxu0 %v10574_v34  ;;  %v10639_v34 = vcombine.high %v792_v27, %v796_v29  ;;  %v2593_v27 = vld [vmem:[#allocation9 + $0x348] sm:$0xff] }
 0x226   : > { %2436 = vmatpush1.bf16.msra.mxu1 %v10576_v35  ;;  %2351 = vmatprep.subr.bf16.mxu0 %v10583_v36  ;;  %v10641_v35 = vcombine.high %v793_v30, %v797_v31  ;;  %v2488_v36 = vld [vmem:[#allocation9] sm:$0xff] }
 0x227   : > { %2437 = vmatprep.subr.bf16.mxu1 %v10585_v37  ;;  %v2496_v37 = vld [vmem:[#allocation9 + $0x40] sm:$0xff] }
 0x228   : > { %v10642_v47 = vcombine.low %v2488_v36, %v2496_v37 }
 0x229   : > { %2352 = vmatpush1.bf16.msra.mxu0 %v10582_v56  ;;  %v10643_v56 = vcombine.high %v2488_v36, %v2496_v37  ;;  %v2609_v36 = vld [vmem:[#allocation9 + $0x3c8] sm:$0xff] }
 0x22a   : > { %2438 = vmatpush1.bf16.msra.mxu1 %v10584_v42  ;;  %2353 = vmatprep.subr.bf16.mxu0 %v10591_v43  ;;  %v10645_v42 = vcombine.high %v2489_v38, %v2497_v39  ;;  %v2504_v43 = vld [vmem:[#allocation9 + $0x80] sm:$0xff] }
 0x22b   : > { %2439 = vmatprep.subr.bf16.mxu1 %v10593_v44  ;;  %v2512_v44 = vld [vmem:[#allocation9 + $0xc0] sm:$0xff] }
 0x22c   : > { %v10658_v55 = vcombine.low %v2504_v43, %v2512_v44 }
 0x22d   : > { %2354 = vmatpush1.bf16.msra.mxu0 %v10590_v49  ;;  %v10659_v49 = vcombine.high %v2504_v43, %v2512_v44  ;;  %v2625_v43 = vld [vmem:[#allocation9 + $0x448] sm:$0xff] }
 0x22e   : > { %2440 = vmatpush1.bf16.msra.mxu1 %v10592_v50  ;;  %2355 = vmatprep.subr.bf16.mxu0 %v10599_v51  ;;  %v10661_v50 = vcombine.high %v2505_v45, %v2513_v46  ;;  %v2520_v51 = vld [vmem:[#allocation9 + $0x100] sm:$0xff] }
 0x22f   : > { %2441 = vmatprep.subr.bf16.mxu1 %v10601_v52  ;;  %v2528_v52 = vld [vmem:[#allocation9 + $0x140] sm:$0xff] }
 0x230   : > { %v10674_v63 = vcombine.low %v2520_v51, %v2528_v52 }
 0x231   : > { %2356 = vmatpush1.bf16.msra.mxu0 %v10598_v58  ;;  %v10675_v58 = vcombine.high %v2520_v51, %v2528_v52  ;;  %v2641_v51 = vld [vmem:[#allocation9 + $0x4c8] sm:$0xff] }
 0x232   : > { %2442 = vmatpush1.bf16.msra.mxu1 %v10600_v59  ;;  %2357 = vmatprep.subr.bf16.mxu0 %v10607_v6  ;;  %v10677_v59 = vcombine.high %v2521_v53, %v2529_v54  ;;  %v2536_v6 = vld [vmem:[#allocation9 + $0x180] sm:$0xff] }
 0x233   : > { %2443 = vmatprep.subr.bf16.mxu1 %v10609_v60  ;;  %v2544_v60 = vld [vmem:[#allocation9 + $0x1c0] sm:$0xff] }
 0x234   : > { %v10690_v8 = vcombine.low %v2536_v6, %v2544_v60 }
 0x235   : > { %2358 = vmatpush1.bf16.msra.mxu0 %v10606_v1  ;;  %v10691_v1 = vcombine.high %v2536_v6, %v2544_v60  ;;  %v2657_v6 = vld [vmem:[#allocation9 + $0x548] sm:$0xff] }
 0x236   : > { %2444 = vmatpush1.bf16.msra.mxu1 %v10608_v2  ;;  %2359 = vmatprep.subr.bf16.mxu0 %v10615_v4  ;;  %v2552_v2 = vld [vmem:[#allocation9 + $0x200] sm:$0xff] }
 0x237   : > { %2445 = vmatprep.subr.bf16.mxu1 %v10617_v5  ;;  %v2560_v4 = vld [vmem:[#allocation9 + $0x240] sm:$0xff]  ;;  %v2553_v5 = vld [vmem:[#allocation9 + $0x208] sm:$0xff] }
 0x238   : > { %v10707_v10 = vcombine.high %v2552_v2, %v2560_v4  ;;  %v10706_v16 = vcombine.low %v2552_v2, %v2560_v4  ;;  %v10708_v17 = vcombine.low %v2553_v5, %v2561_v7  ;;  %v2673_v2 = vld [vmem:[#allocation9 + $0x5c8] sm:$0xff] }
 0x239   : > { %2360 = vmatpush1.bf16.msra.mxu0 %v10614_v11  ;;  %v10709_v11 = vcombine.high %v2553_v5, %v2561_v7 }
 0x23a   : > { %2446 = vmatpush1.bf16.msra.mxu1 %v10616_v12  ;;  %2361 = vmatprep.subr.bf16.mxu0 %v10623_v13  ;;  %v2568_v12 = vld [vmem:[#allocation9 + $0x280] sm:$0xff] }
 0x23b   : > { %2447 = vmatprep.subr.bf16.mxu1 %v10625_v14  ;;  %v2576_v13 = vld [vmem:[#allocation9 + $0x2c0] sm:$0xff]  ;;  %v2569_v14 = vld [vmem:[#allocation9 + $0x288] sm:$0xff] }
 0x23c   : > { %v10723_v18 = vcombine.high %v2568_v12, %v2576_v13  ;;  %v10722_v29 = vcombine.low %v2568_v12, %v2576_v13  ;;  %v10724_v30 = vcombine.low %v2569_v14, %v2577_v15  ;;  %v2689_v12 = vld [vmem:[#allocation9 + $0x648] sm:$0xff] }
 0x23d   : > { %2362 = vmatpush1.bf16.msra.mxu0 %v10622_v19  ;;  %v10725_v19 = vcombine.high %v2569_v14, %v2577_v15 }
 0x23e   : > { %2448 = vmatpush1.bf16.msra.mxu1 %v10624_v20  ;;  %2363 = vmatprep.subr.bf16.mxu0 %v10631_v23  ;;  %v2584_v20 = vld [vmem:[#allocation9 + $0x300] sm:$0xff] }
 0x23f   : > { %2449 = vmatprep.subr.bf16.mxu1 %v10633_v25  ;;  %v2592_v23 = vld [vmem:[#allocation9 + $0x340] sm:$0xff]  ;;  %v2585_v25 = vld [vmem:[#allocation9 + $0x308] sm:$0xff] }
 0x240   : > { %v10739_v31 = vcombine.high %v2584_v20, %v2592_v23  ;;  %v10738_v37 = vcombine.low %v2584_v20, %v2592_v23  ;;  %v10740_v38 = vcombine.low %v2585_v25, %v2593_v27  ;;  %v2705_v20 = vld [vmem:[#allocation9 + $0x6c8] sm:$0xff] }
 0x241   : > { %2364 = vmatpush1.bf16.msra.mxu0 %v10630_v32  ;;  %v10741_v32 = vcombine.high %v2585_v25, %v2593_v27 }
 0x242   : > { %2450 = vmatpush1.bf16.msra.mxu1 %v10632_v33  ;;  %2365 = vmatprep.subr.bf16.mxu0 %v10639_v34  ;;  %v2600_v33 = vld [vmem:[#allocation9 + $0x380] sm:$0xff] }
 0x243   : > { %2451 = vmatprep.subr.bf16.mxu1 %v10641_v35  ;;  %v2608_v34 = vld [vmem:[#allocation9 + $0x3c0] sm:$0xff]  ;;  %v2601_v35 = vld [vmem:[#allocation9 + $0x388] sm:$0xff] }
 0x244   : > { %v10755_v39 = vcombine.high %v2600_v33, %v2608_v34  ;;  %v10754_v44 = vcombine.low %v2600_v33, %v2608_v34  ;;  %v10756_v45 = vcombine.low %v2601_v35, %v2609_v36  ;;  %v2721_v33 = vld [vmem:[#allocation9 + $0x748] sm:$0xff] }
 0x245   : > { %2366 = vmatpush1.bf16.msra.mxu0 %v10638_v40  ;;  %v10757_v40 = vcombine.high %v2601_v35, %v2609_v36 }
 0x246   : > { %2452 = vmatpush1.bf16.msra.mxu1 %v10640_v41  ;;  %8716 = vmatprep.subr.bf16.mxu0 %v10643_v56  ;;  %v2616_v41 = vld [vmem:[#allocation9 + $0x400] sm:$0xff] }
 0x247   : > { %8888 = vmatprep.subr.bf16.mxu1 %v10645_v42  ;;  %v2624_v56 = vld [vmem:[#allocation9 + $0x440] sm:$0xff]  ;;  %v2617_v42 = vld [vmem:[#allocation9 + $0x408] sm:$0xff] }
 0x248   : > { %2368 = vmatmul.mubr.bf16.vlgmr.msra.gmra.mrb[8].mxu0 %v12417_v3  ;;  %v10771_v46 = vcombine.high %v2616_v41, %v2624_v56  ;;  %v10770_v52 = vcombine.low %v2616_v41, %v2624_v56  ;;  %v10772_v53 = vcombine.low %v2617_v42, %v2625_v43  ;;  %v2737_v41 = vld [vmem:[#allocation9 + $0x7c8] sm:$0xff] }
 0x249   : > { %2454 = vmatmul.mubr.bf16.vlgmr.msra.gmra.mrb[8].mxu1 %v12417_v3  ;;  %8717 = vmatpush1.bf16.msra.mxu0 %v10642_v47  ;;  %v10693_v3 = vcombine.high %v2537_v61, %v2545_v62  ;;  %v10773_v47 = vcombine.high %v2617_v42, %v2625_v43 }
 0x24a   : > { %8889 = vmatpush1.bf16.msra.mxu1 %v10644_v48  ;;  %8718 = vmatprep.subr.bf16.mxu0 %v10659_v49  ;;  %v2632_v48 = vld [vmem:[#allocation9 + $0x480] sm:$0xff] }
 0x24b   : > { %8890 = vmatprep.subr.bf16.mxu1 %v10661_v50  ;;  %v2640_v49 = vld [vmem:[#allocation9 + $0x4c0] sm:$0xff]  ;;  %v2633_v50 = vld [vmem:[#allocation9 + $0x488] sm:$0xff] }
 0x24c   : > { %v10787_v54 = vcombine.high %v2632_v48, %v2640_v49  ;;  %v10786_v60 = vcombine.low %v2632_v48, %v2640_v49  ;;  %v10788_v61 = vcombine.low %v2633_v50, %v2641_v51  ;;  %v12439_v48 = vld [vmem:[#allocation9 + $0x848] sm:$0xff] }
 0x24d   : > { %8719 = vmatpush1.bf16.msra.mxu0 %v10658_v55  ;;  %v10789_v55 = vcombine.high %v2633_v50, %v2641_v51 }
 0x24e   : > { %8891 = vmatpush1.bf16.msra.mxu1 %v10660_v57  ;;  %8720 = vmatprep.subr.bf16.mxu0 %v10675_v58  ;;  %v2648_v57 = vld [vmem:[#allocation9 + $0x500] sm:$0xff] }
 0x24f   : > { %8892 = vmatprep.subr.bf16.mxu1 %v10677_v59  ;;  %v2656_v58 = vld [vmem:[#allocation9 + $0x540] sm:$0xff]  ;;  %v2649_v59 = vld [vmem:[#allocation9 + $0x508] sm:$0xff] }
 0x250   : > { %v10803_v62 = vcombine.high %v2648_v57, %v2656_v58  ;;  %v10802_v4 = vcombine.low %v2648_v57, %v2656_v58  ;;  %v10804_v5 = vcombine.low %v2649_v59, %v2657_v6 }
 0x251   : > { %8721 = vmatpush1.bf16.msra.mxu0 %v10674_v63  ;;  %v10805_v63 = vcombine.high %v2649_v59, %v2657_v6 }
 0x252   : > { %8893 = vmatpush1.bf16.msra.mxu1 %v10676_v0  ;;  %8722 = vmatprep.subr.bf16.mxu0 %v10691_v1  ;;  %v2664_v0 = vld [vmem:[#allocation9 + $0x580] sm:$0xff] }
 0x253   : > { %8894 = vmatprep.subr.bf16.mxu1 %v10693_v3  ;;  %v2672_v1 = vld [vmem:[#allocation9 + $0x5c0] sm:$0xff]  ;;  %v2665_v3 = vld [vmem:[#allocation9 + $0x588] sm:$0xff] }
 0x254   : > { %v10819_v7 = vcombine.high %v2664_v0, %v2672_v1  ;;  %v10818_v13 = vcombine.low %v2664_v0, %v2672_v1  ;;  %v10820_v14 = vcombine.low %v2665_v3, %v2673_v2 }
 0x255   : > { %8723 = vmatpush1.bf16.msra.mxu0 %v10690_v8  ;;  %v10821_v8 = vcombine.high %v2665_v3, %v2673_v2 }
 0x256   : > { %8895 = vmatpush1.bf16.msra.mxu1 %v10692_v9  ;;  %8724 = vmatprep.subr.bf16.mxu0 %v10707_v10  ;;  %v2680_v9 = vld [vmem:[#allocation9 + $0x600] sm:$0xff] }
 0x257   : > { %8896 = vmatprep.subr.bf16.mxu1 %v10709_v11  ;;  %v2688_v10 = vld [vmem:[#allocation9 + $0x640] sm:$0xff]  ;;  %v2681_v11 = vld [vmem:[#allocation9 + $0x608] sm:$0xff] }
 0x258   : > { %v10835_v15 = vcombine.high %v2680_v9, %v2688_v10  ;;  %v10834_v23 = vcombine.low %v2680_v9, %v2688_v10  ;;  %v10836_v25 = vcombine.low %v2681_v11, %v2689_v12 }
 0x259   : > { %8725 = vmatpush1.bf16.msra.mxu0 %v10706_v16  ;;  %v10837_v16 = vcombine.high %v2681_v11, %v2689_v12 }
 0x25a   : > { %8897 = vmatpush1.bf16.msra.mxu1 %v10708_v17  ;;  %8726 = vmatprep.subr.bf16.mxu0 %v10723_v18  ;;  %v2696_v17 = vld [vmem:[#allocation9 + $0x680] sm:$0xff] }
 0x25b   : > { %8898 = vmatprep.subr.bf16.mxu1 %v10725_v19  ;;  %v2704_v18 = vld [vmem:[#allocation9 + $0x6c0] sm:$0xff]  ;;  %v2697_v19 = vld [vmem:[#allocation9 + $0x688] sm:$0xff] }
 0x25c   : > { %v10851_v27 = vcombine.high %v2696_v17, %v2704_v18  ;;  %v10850_v34 = vcombine.low %v2696_v17, %v2704_v18  ;;  %v10852_v35 = vcombine.low %v2697_v19, %v2705_v20 }
 0x25d   : > { %8727 = vmatpush1.bf16.msra.mxu0 %v10722_v29  ;;  %v10853_v29 = vcombine.high %v2697_v19, %v2705_v20  ;;  %v2760_v19 = vld [vmem:[#allocation9 + $0x880] sm:$0xff] }
 0x25e   : > { %8899 = vmatpush1.bf16.msra.mxu1 %v10724_v30  ;;  %8728 = vmatprep.subr.bf16.mxu0 %v10739_v31  ;;  %v2712_v30 = vld [vmem:[#allocation9 + $0x700] sm:$0xff] }
 0x25f   : > { %8900 = vmatprep.subr.bf16.mxu1 %v10741_v32  ;;  %v2720_v31 = vld [vmem:[#allocation9 + $0x740] sm:$0xff]  ;;  %v2713_v32 = vld [vmem:[#allocation9 + $0x708] sm:$0xff] }
 0x260   : > { %v10867_v36 = vcombine.high %v2712_v30, %v2720_v31  ;;  %v10866_v56 = vcombine.low %v2712_v30, %v2720_v31  ;;  %v10868_v42 = vcombine.low %v2713_v32, %v2721_v33 }
 0x261   : > { %8729 = vmatpush1.bf16.msra.mxu0 %v10738_v37  ;;  %v10869_v37 = vcombine.high %v2713_v32, %v2721_v33 }
 0x262   : > { %8901 = vmatpush1.bf16.msra.mxu1 %v10740_v38  ;;  %8730 = vmatprep.subr.bf16.mxu0 %v10755_v39  ;;  %v2728_v38 = vld [vmem:[#allocation9 + $0x780] sm:$0xff] }
 0x263   : > { %8902 = vmatprep.subr.bf16.mxu1 %v10757_v40  ;;  %v2736_v39 = vld [vmem:[#allocation9 + $0x7c0] sm:$0xff]  ;;  %v2729_v40 = vld [vmem:[#allocation9 + $0x788] sm:$0xff] }
 0x264   : > { %v10883_v43 = vcombine.high %v2728_v38, %v2736_v39  ;;  %v10882_v49 = vcombine.low %v2728_v38, %v2736_v39  ;;  %v10884_v50 = vcombine.low %v2729_v40, %v2737_v41  ;;  %v2777_v38 = vld [vmem:[#allocation9 + $0x908] sm:$0xff] }
 0x265   : > { %8731 = vmatpush1.bf16.msra.mxu0 %v10754_v44  ;;  %v10885_v44 = vcombine.high %v2729_v40, %v2737_v41  ;;  %v2785_v39 = vld [vmem:[#allocation9 + $0x948] sm:$0xff] }
 0x266   : > { %8903 = vmatpush1.bf16.msra.mxu1 %v10756_v45  ;;  %8732 = vmatprep.subr.bf16.mxu0 %v10771_v46  ;;  %v12433_v45 = vld [vmem:[#allocation9 + $0x800] sm:$0xff] }
 0x267   : > { %8904 = vmatprep.subr.bf16.mxu1 %v10773_v47  ;;  %v12435_v46 = vld [vmem:[#allocation9 + $0x840] sm:$0xff]  ;;  %v12437_v47 = vld [vmem:[#allocation9 + $0x808] sm:$0xff] }
 0x268   : > { %v10899_v51 = vcombine.high %v12433_v45, %v12435_v46  ;;  %v10898_v32 = vcombine.low %v12433_v45, %v12435_v46  ;;  %v10900_v33 = vcombine.low %v12437_v47, %v12439_v48  ;;  %v2793_v45 = vld [vmem:[#allocation9 + $0x988] sm:$0xff] }
 0x269   : > { %8733 = vmatpush1.bf16.msra.mxu0 %v10770_v52  ;;  %v10901_v52 = vcombine.high %v12437_v47, %v12439_v48  ;;  %v2801_v46 = vld [vmem:[#allocation9 + $0x9c8] sm:$0xff]  ;;  %v10932_v48 = vcombine.low %v2777_v38, %v2785_v39 }
 0x26a   : > { %8905 = vmatpush1.bf16.msra.mxu1 %v10772_v53  ;;  %8734 = vmatprep.subr.bf16.mxu0 %v10787_v54  ;;  %v12445_v53 = vld [vmem:[#allocation7] sm:$0xff] }
 0x26b   : > { %8906 = vmatprep.subr.bf16.mxu1 %v10789_v55  ;;  %v803_v54 = vrot.slane %v12445_v53, %v12394_v22  ;;  %v811_v55 = vrot.slane %v12445_v53, %v12401_v26  ;;  %v807_v57 = vrot.slane %v12445_v53, %v12397_v24  ;;  %v815_v58 = vrot.slane %v12445_v53, %v12405_v28 }
 0x26d   : > { %8735 = vmatpush1.bf16.msra.mxu0 %v10786_v60 }
 0x26e   : > { %8907 = vmatpush1.bf16.msra.mxu1 %v10788_v61  ;;  %8736 = vmatprep.subr.bf16.mxu0 %v10803_v62 }
 0x26f   : > { %8908 = vmatprep.subr.bf16.mxu1 %v10805_v63 }
 0x271   : > { %8737 = vmatpush1.bf16.msra.mxu0 %v10802_v4 }
 0x272   : > { %8909 = vmatpush1.bf16.msra.mxu1 %v10804_v5  ;;  %8738 = vmatprep.subr.bf16.mxu0 %v10819_v7 }
 0x273   : > { %8910 = vmatprep.subr.bf16.mxu1 %v10821_v8 }
 0x275   : > { %8739 = vmatpush1.bf16.msra.mxu0 %v10818_v13 }
 0x276   : > { %8911 = vmatpush1.bf16.msra.mxu1 %v10820_v14  ;;  %8740 = vmatprep.subr.bf16.mxu0 %v10835_v15 }
 0x277   : > { %8912 = vmatprep.subr.bf16.mxu1 %v10837_v16 }
 0x279   : > { %8741 = vmatpush1.bf16.msra.mxu0 %v10834_v23 }
 0x27a   : > { %8913 = vmatpush1.bf16.msra.mxu1 %v10836_v25  ;;  %8742 = vmatprep.subr.bf16.mxu0 %v10851_v27  ;;  %v2768_v25 = vld [vmem:[#allocation9 + $0x8c0] sm:$0xff]  ;;  %v2761_v27 = vld [vmem:[#allocation9 + $0x888] sm:$0xff] }
 0x27b   : > { %8914 = vmatprep.subr.bf16.mxu1 %v10853_v29  ;;  %v2769_v29 = vld [vmem:[#allocation9 + $0x8c8] sm:$0xff]  ;;  %v10914_v40 = vcombine.low %v2760_v19, %v2768_v25 }
 0x27c   : > { %v10916_v41 = vcombine.low %v2761_v27, %v2769_v29 }
 0x27d   : > { %8743 = vmatpush1.bf16.msra.mxu0 %v10850_v34  ;;  %v2776_v34 = vld [vmem:[#allocation9 + $0x900] sm:$0xff] }
 0x27e   : > { %8915 = vmatpush1.bf16.msra.mxu1 %v10852_v35  ;;  %8744 = vmatprep.subr.bf16.mxu0 %v10867_v36  ;;  %v10915_v35 = vcombine.high %v2760_v19, %v2768_v25  ;;  %v10917_v36 = vcombine.high %v2761_v27, %v2769_v29  ;;  %v2872_v27 = vld [vmem:[#allocation9 + $0xc00] sm:$0xff] }
 0x27f   : > { %8916 = vmatprep.subr.bf16.mxu1 %v10869_v37  ;;  %v2784_v37 = vld [vmem:[#allocation9 + $0x940] sm:$0xff] }
 0x280   : > { %v10930_v47 = vcombine.low %v2776_v34, %v2784_v37  ;;  %v2880_v29 = vld [vmem:[#allocation9 + $0xc40] sm:$0xff] }
 0x281   : > { %8745 = vmatpush1.bf16.msra.mxu0 %v10866_v56  ;;  %v10931_v56 = vcombine.high %v2776_v34, %v2784_v37 }
 0x282   : > { %8917 = vmatpush1.bf16.msra.mxu1 %v10868_v42  ;;  %8746 = vmatprep.subr.bf16.mxu0 %v10883_v43  ;;  %v10933_v42 = vcombine.high %v2777_v38, %v2785_v39  ;;  %v2792_v43 = vld [vmem:[#allocation9 + $0x980] sm:$0xff] }
 0x283   : > { %8918 = vmatprep.subr.bf16.mxu1 %v10885_v44  ;;  %v2800_v44 = vld [vmem:[#allocation9 + $0x9c0] sm:$0xff] }
 0x284   : > { %v2888_v38 = vld [vmem:[#allocation9 + $0xc80] sm:$0xff] }
 0x285   : > { %8747 = vmatpush1.bf16.msra.mxu0 %v10882_v49  ;;  %v10947_v49 = vcombine.high %v2792_v43, %v2800_v44  ;;  %v2896_v39 = vld [vmem:[#allocation9 + $0xcc0] sm:$0xff] }
 0x286   : > { %8919 = vmatpush1.bf16.msra.mxu1 %v10884_v50  ;;  %8759 = vmatprep.subr.bf16.mxu0 %v10899_v51  ;;  %v10949_v50 = vcombine.high %v2793_v45, %v2801_v46  ;;  %v2808_v51 = vld [vmem:[#allocation9 + $0xa00] sm:$0xff] }
 0x287   : > { %8931 = vmatprep.subr.bf16.mxu1 %v10901_v52  ;;  %v2816_v52 = vld [vmem:[#allocation9 + $0xa40] sm:$0xff] }
 0x29b   : > { %v2197_v59 = vpop.f32.mrb[4].mxu0  ;;  %v2283_v6 = vpop.f32.mrb[4].mxu1 }
 0x29c   : > { %v11701_v60 = vadd.f32 %v2197_v59, %v803_v54  ;;  %v11705_v61 = vadd.f32 %v2283_v6, %v811_v55  ;;  %v2199_v62 = vpop.f32.mrb[5].mxu0  ;;  %v2285_v63 = vpop.f32.mrb[5].mxu1  ;;  %v10963_v59 = vcombine.high %v2808_v51, %v2816_v52 }
 0x29d   : > { %v11702_v0 = vadd.f32 %v2199_v62, %v807_v57  ;;  %v11706_v1 = vadd.f32 %v2285_v63, %v815_v58  ;;  %v2201_v3 = vpop.f32.mrb[6].mxu0  ;;  %v2287_v2 = vpop.f32.mrb[6].mxu1  ;;  %v2825_v62 = vld [vmem:[#allocation9 + $0xa88] sm:$0xff] }
 0x29e   : > { %v11703_v4 = vadd.f32 %v2201_v3, %v803_v54  ;;  %v11707_v5 = vadd.f32 %v2287_v2, %v811_v55  ;;  %v2203_v7 = vpop.f32.mrb[7].mxu0  ;;  %v2289_v8 = vpop.f32.mrb[7].mxu1  ;;  %v2464_v11 = vmax.f32 %v11701_v60, 0.0  ;;  %v2466_v12 = vmax.f32 %v11705_v61, 0.0  ;;  %v2809_v54 = vld [vmem:[#allocation9 + $0xa08] sm:$0xff]  ;;  %v2824_v60 = vld [vmem:[#allocation9 + $0xa80] sm:$0xff] }
 0x29f   : > { %v11704_v9 = vadd.f32 %v2203_v7, %v807_v57  ;;  %v11708_v10 = vadd.f32 %v2289_v8, %v815_v58  ;;  %v2465_v15 = vmax.f32 %v11702_v0, 0.0  ;;  %v2467_v16 = vmax.f32 %v11706_v1, 0.0  ;;  %v2817_v55 = vld [vmem:[#allocation9 + $0xa48] sm:$0xff]  ;;  %v2832_v61 = vld [vmem:[#allocation9 + $0xac0] sm:$0xff] }
 0x2a0   : > { %v2472_v13 = vmax.f32 %v11703_v4, 0.0  ;;  %v2474_v14 = vmax.f32 %v11707_v5, 0.0  ;;  %v10946_v57 = vcombine.low %v2792_v43, %v2800_v44  ;;  %v10948_v58 = vcombine.low %v2793_v45, %v2801_v46  ;;  %v2833_v63 = vld [vmem:[#allocation9 + $0xac8] sm:$0xff]  ;;  %v2840_v4 = vld [vmem:[#allocation9 + $0xb00] sm:$0xff] }
 0x2a1   : > { %v2473_v17 = vmax.f32 %v11704_v9, 0.0  ;;  %v2475_v18 = vmax.f32 %v11708_v10, 0.0  ;;  %v10965_v6 = vcombine.high %v2809_v54, %v2817_v55  ;;  %v10962_v0 = vcombine.low %v2808_v51, %v2816_v52  ;;  %v2848_v5 = vld [vmem:[#allocation9 + $0xb40] sm:$0xff]  ;;  %v2841_v7 = vld [vmem:[#allocation9 + $0xb08] sm:$0xff] }
 0x2a2   : > { %v12455_v20 = vpack.c.bf16 %v2472_v13, %v2464_v11  ;;  %v12457_v23 = vpack.c.bf16 %v2474_v14, %v2466_v12  ;;  %v10964_v1 = vcombine.low %v2809_v54, %v2817_v55  ;;  %v10979_v3 = vcombine.high %v2824_v60, %v2832_v61  ;;  %v2849_v8 = vld [vmem:[#allocation9 + $0xb48] sm:$0xff]  ;;  %v2856_v13 = vld [vmem:[#allocation9 + $0xb80] sm:$0xff] }
 0x2a3   : > { %v12459_v30 = vpack.c.bf16 %v2473_v17, %v2465_v15  ;;  %v12461_v31 = vpack.c.bf16 %v2475_v18, %v2467_v16  ;;  %v10981_v2 = vcombine.high %v2825_v62, %v2833_v63  ;;  %v10978_v9 = vcombine.low %v2824_v60, %v2832_v61  ;;  %v2864_v14 = vld [vmem:[#allocation9 + $0xbc0] sm:$0xff]  ;;  %v2857_v15 = vld [vmem:[#allocation9 + $0xb88] sm:$0xff] }
 0x2a4   : > { %v10980_v10 = vcombine.low %v2825_v62, %v2833_v63  ;;  %v10995_v11 = vcombine.high %v2840_v4, %v2848_v5  ;;  %v10997_v12 = vcombine.high %v2841_v7, %v2849_v8  ;;  %v2865_v16 = vld [vmem:[#allocation9 + $0xbc8] sm:$0xff]  ;;  %v10994_v17 = vcombine.low %v2840_v4, %v2848_v5  ;;  %v2904_v45 = vld [vmem:[#allocation9 + $0xd00] sm:$0xff] }
 0x2a5   : > { %8748 = vmatprep.mubr.bf16.mxu0 %v12459_v30  ;;  %8920 = vmatprep.mubr.bf16.mxu1 %v12459_v30  ;;  %v10996_v18 = vcombine.low %v2841_v7, %v2849_v8  ;;  %v11011_v19 = vcombine.high %v2856_v13, %v2864_v14  ;;  %v11013_v25 = vcombine.high %v2857_v15, %v2865_v16  ;;  %v2912_v46 = vld [vmem:[#allocation9 + $0xd40] sm:$0xff] }
 0x2a6   : > { %8749 = vmatmul.mubr.bf16.vlgmr.msra.gmra.mrb[12].mxu0 %v12455_v20  ;;  %8921 = vmatmul.mubr.bf16.vlgmr.msra.gmra.mrb[12].mxu1 %v12455_v20  ;;  %v11010_v34 = vcombine.low %v2856_v13, %v2864_v14  ;;  %v11043_v43 = vcombine.high %v2888_v38, %v2896_v39  ;;  %v11059_v51 = vcombine.high %v2904_v45, %v2912_v46  ;;  %v2920_v54 = vld [vmem:[#allocation9 + $0xd80] sm:$0xff] }
 0x2a7   : > { %8760 = vmatpush1.bf16.msra.mxu0 %v10898_v32  ;;  %8932 = vmatpush1.bf16.msra.mxu1 %v10900_v33  ;;  %v2873_v32 = vld [vmem:[#allocation9 + $0xc08] sm:$0xff]  ;;  %v2928_v55 = vld [vmem:[#allocation9 + $0xdc0] sm:$0xff] }
 0x2a8   : > { %8791 = vmatprep.mubr.bf16.mxu0 %v12461_v31  ;;  %8963 = vmatprep.mubr.bf16.mxu1 %v12461_v31  ;;  %v2881_v33 = vld [vmem:[#allocation9 + $0xc48] sm:$0xff]  ;;  %v11075_v60 = vcombine.high %v2920_v54, %v2928_v55  ;;  %v2936_v62 = vld [vmem:[#allocation9 + $0xe00] sm:$0xff] }
 0x2a9   : > { %8761 = vmatprep.subr.bf16.mxu0 %v10915_v35  ;;  %8933 = vmatprep.subr.bf16.mxu1 %v10917_v36  ;;  %v11012_v35 = vcombine.low %v2857_v15, %v2865_v16  ;;  %v11027_v36 = vcombine.high %v2872_v27, %v2880_v29  ;;  %v11029_v37 = vcombine.high %v2873_v32, %v2881_v33  ;;  %v2944_v63 = vld [vmem:[#allocation9 + $0xe40] sm:$0xff] }
 0x2aa   : > { %v11091_v4 = vcombine.high %v2936_v62, %v2944_v63  ;;  %v2952_v7 = vld [vmem:[#allocation9 + $0xe80] sm:$0xff] }
 0x2ab   : > { %8762 = vmatpush1.bf16.msra.mxu0 %v10914_v40  ;;  %8934 = vmatpush1.bf16.msra.mxu1 %v10916_v41  ;;  %v2889_v40 = vld [vmem:[#allocation9 + $0xc88] sm:$0xff]  ;;  %v2960_v8 = vld [vmem:[#allocation9 + $0xec0] sm:$0xff] }
 0x2ac   : > { %8763 = vmatprep.subr.bf16.mxu0 %v10931_v56  ;;  %8935 = vmatprep.subr.bf16.mxu1 %v10933_v42  ;;  %v2897_v41 = vld [vmem:[#allocation9 + $0xcc8] sm:$0xff]  ;;  %v11026_v56 = vcombine.low %v2872_v27, %v2880_v29  ;;  %v11028_v42 = vcombine.low %v2873_v32, %v2881_v33  ;;  %v11107_v13 = vcombine.high %v2952_v7, %v2960_v8  ;;  %v2968_v15 = vld [vmem:[#allocation9 + $0xf00] sm:$0xff] }
 0x2ad   : > { %v11045_v44 = vcombine.high %v2889_v40, %v2897_v41  ;;  %v2976_v16 = vld [vmem:[#allocation9 + $0xf40] sm:$0xff] }
 0x2ae   : > { %v11123_v27 = vcombine.high %v2968_v15, %v2976_v16  ;;  %v2984_v32 = vld [vmem:[#allocation9 + $0xf80] sm:$0xff] }
 0x2af   : > { %8764 = vmatpush1.bf16.msra.mxu0 %v10930_v47  ;;  %8936 = vmatpush1.bf16.msra.mxu1 %v10932_v48  ;;  %v2905_v47 = vld [vmem:[#allocation9 + $0xd08] sm:$0xff]  ;;  %v2992_v33 = vld [vmem:[#allocation9 + $0xfc0] sm:$0xff] }
 0x2b0   : > { %8765 = vmatprep.subr.bf16.mxu0 %v10947_v49  ;;  %8937 = vmatprep.subr.bf16.mxu1 %v10949_v50  ;;  %v2913_v48 = vld [vmem:[#allocation9 + $0xd48] sm:$0xff]  ;;  %v11042_v49 = vcombine.low %v2888_v38, %v2896_v39  ;;  %v11044_v50 = vcombine.low %v2889_v40, %v2897_v41  ;;  %v11139_v38 = vcombine.high %v2984_v32, %v2992_v33  ;;  %v3000_v40 = vld [vmem:[#allocation9 + $0x1000] sm:$0xff] }
 0x2b1   : > { %v11061_v52 = vcombine.high %v2905_v47, %v2913_v48  ;;  %v3008_v41 = vld [vmem:[#allocation9 + $0x1040] sm:$0xff] }
 0x2b3   : > { %8766 = vmatpush1.bf16.msra.mxu0 %v10946_v57  ;;  %8938 = vmatpush1.bf16.msra.mxu1 %v10948_v58  ;;  %v2921_v57 = vld [vmem:[#allocation9 + $0xd88] sm:$0xff] }
 0x2b4   : > { %8767 = vmatprep.subr.bf16.mxu0 %v10963_v59  ;;  %8939 = vmatprep.subr.bf16.mxu1 %v10965_v6  ;;  %v2929_v58 = vld [vmem:[#allocation9 + $0xdc8] sm:$0xff]  ;;  %v11058_v59 = vcombine.low %v2904_v45, %v2912_v46  ;;  %v11060_v6 = vcombine.low %v2905_v47, %v2913_v48  ;;  %v11155_v45 = vcombine.high %v3000_v40, %v3008_v41  ;;  %v3016_v47 = vld [vmem:[#allocation9 + $0x1080] sm:$0xff] }
 0x2b5   : > { %v11077_v61 = vcombine.high %v2921_v57, %v2929_v58  ;;  %v3024_v48 = vld [vmem:[#allocation9 + $0x10c0] sm:$0xff] }
 0x2b7   : > { %8768 = vmatpush1.bf16.msra.mxu0 %v10962_v0  ;;  %8940 = vmatpush1.bf16.msra.mxu1 %v10964_v1  ;;  %v2937_v0 = vld [vmem:[#allocation9 + $0xe08] sm:$0xff] }
 0x2b8   : > { %8769 = vmatprep.subr.bf16.mxu0 %v10979_v3  ;;  %8941 = vmatprep.subr.bf16.mxu1 %v10981_v2  ;;  %v2945_v1 = vld [vmem:[#allocation9 + $0xe48] sm:$0xff]  ;;  %v11074_v3 = vcombine.low %v2920_v54, %v2928_v55  ;;  %v11076_v2 = vcombine.low %v2921_v57, %v2929_v58  ;;  %v11171_v54 = vcombine.high %v3016_v47, %v3024_v48  ;;  %v3032_v57 = vld [vmem:[#allocation9 + $0x1100] sm:$0xff] }
 0x2b9   : > { %v11093_v5 = vcombine.high %v2937_v0, %v2945_v1  ;;  %v3040_v58 = vld [vmem:[#allocation9 + $0x1140] sm:$0xff] }
 0x2bb   : > { %8770 = vmatpush1.bf16.msra.mxu0 %v10978_v9  ;;  %8942 = vmatpush1.bf16.msra.mxu1 %v10980_v10  ;;  %v2953_v9 = vld [vmem:[#allocation9 + $0xe88] sm:$0xff] }
 0x2bc   : > { %8771 = vmatprep.subr.bf16.mxu0 %v10995_v11  ;;  %8943 = vmatprep.subr.bf16.mxu1 %v10997_v12  ;;  %v2961_v10 = vld [vmem:[#allocation9 + $0xec8] sm:$0xff]  ;;  %v11090_v11 = vcombine.low %v2936_v62, %v2944_v63  ;;  %v11092_v12 = vcombine.low %v2937_v0, %v2945_v1  ;;  %v11187_v62 = vcombine.high %v3032_v57, %v3040_v58  ;;  %v3048_v0 = vld [vmem:[#allocation9 + $0x1180] sm:$0xff] }
 0x2bd   : > { %v11109_v14 = vcombine.high %v2953_v9, %v2961_v10  ;;  %v3056_v1 = vld [vmem:[#allocation9 + $0x11c0] sm:$0xff] }
 0x2bf   : > { %8772 = vmatpush1.bf16.msra.mxu0 %v10994_v17  ;;  %8944 = vmatpush1.bf16.msra.mxu1 %v10996_v18  ;;  %v2969_v17 = vld [vmem:[#allocation9 + $0xf08] sm:$0xff] }
 0x2c0   : > { %8773 = vmatprep.subr.bf16.mxu0 %v11011_v19  ;;  %8945 = vmatprep.subr.bf16.mxu1 %v11013_v25  ;;  %v2977_v18 = vld [vmem:[#allocation9 + $0xf48] sm:$0xff]  ;;  %v11106_v19 = vcombine.low %v2952_v7, %v2960_v8  ;;  %v11108_v25 = vcombine.low %v2953_v9, %v2961_v10  ;;  %v11203_v7 = vcombine.high %v3048_v0, %v3056_v1  ;;  %v3064_v9 = vld [vmem:[#allocation9 + $0x1200] sm:$0xff] }
 0x2c1   : > { %v11125_v29 = vcombine.high %v2969_v17, %v2977_v18  ;;  %v3072_v10 = vld [vmem:[#allocation9 + $0x1240] sm:$0xff] }
 0x2c3   : > { %8774 = vmatpush1.bf16.msra.mxu0 %v11010_v34  ;;  %8946 = vmatpush1.bf16.msra.mxu1 %v11012_v35  ;;  %v2985_v34 = vld [vmem:[#allocation9 + $0xf88] sm:$0xff] }
 0x2c4   : > { %8775 = vmatprep.subr.bf16.mxu0 %v11027_v36  ;;  %8947 = vmatprep.subr.bf16.mxu1 %v11029_v37  ;;  %v2993_v35 = vld [vmem:[#allocation9 + $0xfc8] sm:$0xff]  ;;  %v11122_v36 = vcombine.low %v2968_v15, %v2976_v16  ;;  %v11124_v37 = vcombine.low %v2969_v17, %v2977_v18  ;;  %v11219_v15 = vcombine.high %v3064_v9, %v3072_v10  ;;  %v3080_v17 = vld [vmem:[#allocation9 + $0x1280] sm:$0xff] }
 0x2c5   : > { %v11141_v39 = vcombine.high %v2985_v34, %v2993_v35  ;;  %v3088_v18 = vld [vmem:[#allocation9 + $0x12c0] sm:$0xff] }
 0x2c7   : > { %8776 = vmatpush1.bf16.msra.mxu0 %v11026_v56  ;;  %8948 = vmatpush1.bf16.msra.mxu1 %v11028_v42  ;;  %v3001_v56 = vld [vmem:[#allocation9 + $0x1008] sm:$0xff] }
 0x2c8   : > { %8777 = vmatprep.subr.bf16.mxu0 %v11043_v43  ;;  %8949 = vmatprep.subr.bf16.mxu1 %v11045_v44  ;;  %v3009_v42 = vld [vmem:[#allocation9 + $0x1048] sm:$0xff]  ;;  %v11138_v43 = vcombine.low %v2984_v32, %v2992_v33  ;;  %v11140_v44 = vcombine.low %v2985_v34, %v2993_v35  ;;  %v11235_v32 = vcombine.high %v3080_v17, %v3088_v18  ;;  %v3096_v34 = vld [vmem:[#allocation9 + $0x1300] sm:$0xff] }
 0x2c9   : > { %v11157_v46 = vcombine.high %v3001_v56, %v3009_v42  ;;  %v3104_v35 = vld [vmem:[#allocation9 + $0x1340] sm:$0xff] }
 0x2cb   : > { %8778 = vmatpush1.bf16.msra.mxu0 %v11042_v49  ;;  %8950 = vmatpush1.bf16.msra.mxu1 %v11044_v50  ;;  %v3017_v49 = vld [vmem:[#allocation9 + $0x1088] sm:$0xff] }
 0x2cc   : > { %8779 = vmatprep.subr.bf16.mxu0 %v11059_v51  ;;  %8951 = vmatprep.subr.bf16.mxu1 %v11061_v52  ;;  %v3025_v50 = vld [vmem:[#allocation9 + $0x10c8] sm:$0xff]  ;;  %v11154_v51 = vcombine.low %v3000_v40, %v3008_v41  ;;  %v11156_v52 = vcombine.low %v3001_v56, %v3009_v42  ;;  %v11251_v40 = vcombine.high %v3096_v34, %v3104_v35  ;;  %v3112_v56 = vld [vmem:[#allocation9 + $0x1380] sm:$0xff] }
 0x2cd   : > { %v11173_v55 = vcombine.high %v3017_v49, %v3025_v50  ;;  %v3120_v42 = vld [vmem:[#allocation9 + $0x13c0] sm:$0xff] }
 0x2cf   : > { %8780 = vmatpush1.bf16.msra.mxu0 %v11058_v59  ;;  %8952 = vmatpush1.bf16.msra.mxu1 %v11060_v6  ;;  %v3033_v59 = vld [vmem:[#allocation9 + $0x1108] sm:$0xff] }
 0x2d0   : > { %8781 = vmatprep.subr.bf16.mxu0 %v11075_v60  ;;  %8953 = vmatprep.subr.bf16.mxu1 %v11077_v61  ;;  %v3041_v6 = vld [vmem:[#allocation9 + $0x1148] sm:$0xff]  ;;  %v11170_v60 = vcombine.low %v3016_v47, %v3024_v48  ;;  %v11172_v61 = vcombine.low %v3017_v49, %v3025_v50  ;;  %v11267_v47 = vcombine.high %v3112_v56, %v3120_v42  ;;  %v3128_v49 = vld [vmem:[#allocation9 + $0x1400] sm:$0xff] }
 0x2d1   : > { %v11189_v63 = vcombine.high %v3033_v59, %v3041_v6  ;;  %v3136_v50 = vld [vmem:[#allocation9 + $0x1440] sm:$0xff] }
 0x2d3   : > { %8782 = vmatpush1.bf16.msra.mxu0 %v11074_v3  ;;  %8954 = vmatpush1.bf16.msra.mxu1 %v11076_v2  ;;  %v3049_v3 = vld [vmem:[#allocation9 + $0x1188] sm:$0xff] }
 0x2d4   : > { %8783 = vmatprep.subr.bf16.mxu0 %v11091_v4  ;;  %8955 = vmatprep.subr.bf16.mxu1 %v11093_v5  ;;  %v3057_v2 = vld [vmem:[#allocation9 + $0x11c8] sm:$0xff]  ;;  %v11186_v4 = vcombine.low %v3032_v57, %v3040_v58  ;;  %v11188_v5 = vcombine.low %v3033_v59, %v3041_v6  ;;  %v11283_v57 = vcombine.high %v3128_v49, %v3136_v50  ;;  %v3144_v59 = vld [vmem:[#allocation9 + $0x1480] sm:$0xff] }
 0x2d5   : > { %v11205_v8 = vcombine.high %v3049_v3, %v3057_v2  ;;  %v3152_v6 = vld [vmem:[#allocation9 + $0x14c0] sm:$0xff] }
 0x2d7   : > { %8784 = vmatpush1.bf16.msra.mxu0 %v11090_v11  ;;  %8956 = vmatpush1.bf16.msra.mxu1 %v11092_v12  ;;  %v3065_v11 = vld [vmem:[#allocation9 + $0x1208] sm:$0xff] }
 0x2d8   : > { %8785 = vmatprep.subr.bf16.mxu0 %v11107_v13  ;;  %8957 = vmatprep.subr.bf16.mxu1 %v11109_v14  ;;  %v3073_v12 = vld [vmem:[#allocation9 + $0x1248] sm:$0xff]  ;;  %v11202_v13 = vcombine.low %v3048_v0, %v3056_v1  ;;  %v11204_v14 = vcombine.low %v3049_v3, %v3057_v2  ;;  %v11299_v0 = vcombine.high %v3144_v59, %v3152_v6  ;;  %v3160_v3 = vld [vmem:[#allocation9 + $0x1500] sm:$0xff] }
 0x2d9   : > { %v11221_v16 = vcombine.high %v3065_v11, %v3073_v12  ;;  %v3168_v2 = vld [vmem:[#allocation9 + $0x1540] sm:$0xff] }
 0x2db   : > { %8786 = vmatpush1.bf16.msra.mxu0 %v11106_v19  ;;  %8958 = vmatpush1.bf16.msra.mxu1 %v11108_v25  ;;  %v3081_v19 = vld [vmem:[#allocation9 + $0x1288] sm:$0xff] }
 0x2dc   : > { %8787 = vmatprep.subr.bf16.mxu0 %v11123_v27  ;;  %8959 = vmatprep.subr.bf16.mxu1 %v11125_v29  ;;  %v3089_v25 = vld [vmem:[#allocation9 + $0x12c8] sm:$0xff]  ;;  %v11218_v27 = vcombine.low %v3064_v9, %v3072_v10  ;;  %v11220_v29 = vcombine.low %v3065_v11, %v3073_v12  ;;  %v11315_v9 = vcombine.high %v3160_v3, %v3168_v2  ;;  %v3176_v11 = vld [vmem:[#allocation9 + $0x1580] sm:$0xff] }
 0x2dd   : > { %v11237_v33 = vcombine.high %v3081_v19, %v3089_v25  ;;  %v3184_v12 = vld [vmem:[#allocation9 + $0x15c0] sm:$0xff] }
 0x2df   : > { %8788 = vmatpush1.bf16.msra.mxu0 %v11122_v36  ;;  %8960 = vmatpush1.bf16.msra.mxu1 %v11124_v37  ;;  %v3097_v36 = vld [vmem:[#allocation9 + $0x1308] sm:$0xff] }
 0x2e0   : > { %8789 = vmatprep.subr.bf16.mxu0 %v11139_v38  ;;  %8961 = vmatprep.subr.bf16.mxu1 %v11141_v39  ;;  %v3105_v37 = vld [vmem:[#allocation9 + $0x1348] sm:$0xff]  ;;  %v11234_v38 = vcombine.low %v3080_v17, %v3088_v18  ;;  %v11236_v39 = vcombine.low %v3081_v19, %v3089_v25  ;;  %v11331_v17 = vcombine.high %v3176_v11, %v3184_v12  ;;  %v3192_v19 = vld [vmem:[#allocation9 + $0x1600] sm:$0xff] }
 0x2e1   : > { %v11253_v41 = vcombine.high %v3097_v36, %v3105_v37  ;;  %v3200_v25 = vld [vmem:[#allocation9 + $0x1640] sm:$0xff] }
 0x2e3   : > { %8790 = vmatpush1.bf16.msra.mxu0 %v11138_v43  ;;  %8962 = vmatpush1.bf16.msra.mxu1 %v11140_v44  ;;  %v3113_v43 = vld [vmem:[#allocation9 + $0x1388] sm:$0xff] }
 0x2e4   : > { %8802 = vmatprep.subr.bf16.mxu0 %v11155_v45  ;;  %8974 = vmatprep.subr.bf16.mxu1 %v11157_v46  ;;  %v3121_v44 = vld [vmem:[#allocation9 + $0x13c8] sm:$0xff]  ;;  %v11250_v45 = vcombine.low %v3096_v34, %v3104_v35  ;;  %v11252_v46 = vcombine.low %v3097_v36, %v3105_v37  ;;  %v11347_v34 = vcombine.high %v3192_v19, %v3200_v25  ;;  %v3208_v36 = vld [vmem:[#allocation9 + $0x1680] sm:$0xff] }
 0x2e5   : > { %v11269_v48 = vcombine.high %v3113_v43, %v3121_v44  ;;  %v3216_v37 = vld [vmem:[#allocation9 + $0x16c0] sm:$0xff] }
 0x2e6   : > { %8792 = vmatmul.mubr.bf16.vlgmr.msra.gmra.mrb[12].mxu0 %v12457_v23  ;;  %8964 = vmatmul.mubr.bf16.vlgmr.msra.gmra.mrb[12].mxu1 %v12457_v23 }
 0x2e7   : > { %8803 = vmatpush1.bf16.msra.mxu0 %v11154_v51  ;;  %8975 = vmatpush1.bf16.msra.mxu1 %v11156_v52  ;;  %v3129_v51 = vld [vmem:[#allocation9 + $0x1408] sm:$0xff] }
 0x2e8   : > { %8804 = vmatprep.subr.bf16.mxu0 %v11171_v54  ;;  %8976 = vmatprep.subr.bf16.mxu1 %v11173_v55  ;;  %v3137_v52 = vld [vmem:[#allocation9 + $0x1448] sm:$0xff]  ;;  %v11266_v54 = vcombine.low %v3112_v56, %v3120_v42  ;;  %v11268_v55 = vcombine.low %v3113_v43, %v3121_v44  ;;  %v11363_v56 = vcombine.high %v3208_v36, %v3216_v37  ;;  %v12476_v43 = vsub.s32 4, %v12391_v21  ;;  %v3224_v44 = vld [vmem:[#allocation9 + $0x1700] sm:$0xff] }
 0x2e9   : > { %v11285_v58 = vcombine.high %v3129_v51, %v3137_v52 }
 0x2eb   : > { %8805 = vmatpush1.bf16.msra.mxu0 %v11170_v60  ;;  %8977 = vmatpush1.bf16.msra.mxu1 %v11172_v61  ;;  %v3145_v60 = vld [vmem:[#allocation9 + $0x1488] sm:$0xff] }
 0x2ec   : > { %8806 = vmatprep.subr.bf16.mxu0 %v11187_v62  ;;  %8978 = vmatprep.subr.bf16.mxu1 %v11189_v63  ;;  %v3153_v61 = vld [vmem:[#allocation9 + $0x14c8] sm:$0xff]  ;;  %v11282_v62 = vcombine.low %v3128_v49, %v3136_v50  ;;  %v11284_v63 = vcombine.low %v3129_v51, %v3137_v52  ;;  %v12485_v50 = vsub.s32 7, %v12391_v21  ;;  %v11362_v51 = vcombine.low %v3208_v36, %v3216_v37 }
 0x2ed   : > { %v11301_v1 = vcombine.high %v3145_v60, %v3153_v61  ;;  %v3233_v49 = vld [vmem:[#allocation9 + $0x1748] sm:$0xff] }
 0x2ef   : > { %8807 = vmatpush1.bf16.msra.mxu0 %v11186_v4  ;;  %8979 = vmatpush1.bf16.msra.mxu1 %v11188_v5  ;;  %v3161_v4 = vld [vmem:[#allocation9 + $0x1508] sm:$0xff] }
 0x2f0   : > { %8808 = vmatprep.subr.bf16.mxu0 %v11203_v7  ;;  %8980 = vmatprep.subr.bf16.mxu1 %v11205_v8  ;;  %v3169_v5 = vld [vmem:[#allocation9 + $0x1548] sm:$0xff]  ;;  %v11298_v7 = vcombine.low %v3144_v59, %v3152_v6  ;;  %v11300_v8 = vcombine.low %v3145_v60, %v3153_v61 }
 0x2f1   : > { %v11317_v10 = vcombine.high %v3161_v4, %v3169_v5  ;;  %v3241_v60 = vld [vmem:[#allocation9 + $0x1788] sm:$0xff] }
 0x2f2   : > { %v3249_v61 = vld [vmem:[#allocation9 + $0x17c8] sm:$0xff] }
 0x2f3   : > { %8809 = vmatpush1.bf16.msra.mxu0 %v11202_v13  ;;  %8981 = vmatpush1.bf16.msra.mxu1 %v11204_v14  ;;  %v3177_v13 = vld [vmem:[#allocation9 + $0x1588] sm:$0xff] }
 0x2f4   : > { %8810 = vmatprep.subr.bf16.mxu0 %v11219_v15  ;;  %8982 = vmatprep.subr.bf16.mxu1 %v11221_v16  ;;  %v3185_v14 = vld [vmem:[#allocation9 + $0x15c8] sm:$0xff]  ;;  %v11314_v15 = vcombine.low %v3160_v3, %v3168_v2  ;;  %v11316_v16 = vcombine.low %v3161_v4, %v3169_v5 }
 0x2f5   : > { %v11333_v18 = vcombine.high %v3177_v13, %v3185_v14 }
 0x2f7   : > { %8811 = vmatpush1.bf16.msra.mxu0 %v11218_v27  ;;  %8983 = vmatpush1.bf16.msra.mxu1 %v11220_v29  ;;  %v3193_v27 = vld [vmem:[#allocation9 + $0x1608] sm:$0xff] }
 0x2f8   : > { %8812 = vmatprep.subr.bf16.mxu0 %v11235_v32  ;;  %8984 = vmatprep.subr.bf16.mxu1 %v11237_v33  ;;  %v3201_v29 = vld [vmem:[#allocation9 + $0x1648] sm:$0xff]  ;;  %v11330_v32 = vcombine.low %v3176_v11, %v3184_v12  ;;  %v11332_v33 = vcombine.low %v3177_v13, %v3185_v14 }
 0x2f9   : > { %v11349_v35 = vcombine.high %v3193_v27, %v3201_v29  ;;  %v3257_v14 = vld [vmem:[#allocation9 + $0x1808] sm:$0xff] }
 0x2fb   : > { %8813 = vmatpush1.bf16.msra.mxu0 %v11234_v38  ;;  %8985 = vmatpush1.bf16.msra.mxu1 %v11236_v39  ;;  %v3209_v38 = vld [vmem:[#allocation9 + $0x1688] sm:$0xff] }
 0x2fc   : > { %8814 = vmatprep.subr.bf16.mxu0 %v11251_v40  ;;  %8986 = vmatprep.subr.bf16.mxu1 %v11253_v41  ;;  %v3217_v39 = vld [vmem:[#allocation9 + $0x16c8] sm:$0xff]  ;;  %v11346_v40 = vcombine.low %v3192_v19, %v3200_v25  ;;  %v11348_v41 = vcombine.low %v3193_v27, %v3201_v29  ;;  %v11396_v25 = vcombine.low %v3241_v60, %v3249_v61 }
 0x2fd   : > { %v11365_v42 = vcombine.high %v3209_v38, %v3217_v39  ;;  %v11364_v52 = vcombine.low %v3209_v38, %v3217_v39 }
 0x2ff   : > { %8815 = vmatpush1.bf16.msra.mxu0 %v11250_v45  ;;  %8987 = vmatpush1.bf16.msra.mxu1 %v11252_v46  ;;  %v12479_v45 = vsub.s32 6, %v12391_v21  ;;  %v12482_v46 = vsub.s32 5, %v12391_v21  ;;  %v3248_v21 = vld [vmem:[#allocation9 + $0x17c0] sm:$0xff] }
 0x300   : > { %8816 = vmatprep.subr.bf16.mxu0 %v11267_v47  ;;  %8988 = vmatprep.subr.bf16.mxu1 %v11269_v48  ;;  %v3232_v47 = vld [vmem:[#allocation9 + $0x1740] sm:$0xff]  ;;  %v3225_v48 = vld [vmem:[#allocation9 + $0x1708] sm:$0xff] }
 0x301   : > { %v827_v59 = vrot.slane %v12445_v53, %v12479_v45  ;;  %v823_v6 = vrot.slane %v12445_v53, %v12482_v46 }
 0x303   : > { %8817 = vmatpush1.bf16.msra.mxu0 %v11266_v54  ;;  %8989 = vmatpush1.bf16.msra.mxu1 %v11268_v55  ;;  %v819_v54 = vrot.slane %v12445_v53, %v12476_v43  ;;  %v11379_v55 = vcombine.high %v3224_v44, %v3232_v47 }
 0x304   : > { %8818 = vmatprep.subr.bf16.mxu0 %v11283_v57  ;;  %8990 = vmatprep.subr.bf16.mxu1 %v11285_v58  ;;  %v11381_v57 = vcombine.high %v3225_v48, %v3233_v49  ;;  %v3240_v58 = vld [vmem:[#allocation9 + $0x1780] sm:$0xff] }
 0x305   : > { %v11395_v5 = vcombine.high %v3240_v58, %v3248_v21  ;;  %v11394_v19 = vcombine.low %v3240_v58, %v3248_v21 }
 0x307   : > { %8819 = vmatpush1.bf16.msra.mxu0 %v11282_v62  ;;  %8991 = vmatpush1.bf16.msra.mxu1 %v11284_v63  ;;  %v831_v62 = vrot.slane %v12445_v53, %v12485_v50  ;;  %v3265_v53 = vld [vmem:[#allocation9 + $0x1848] sm:$0xff] }
 0x308   : > { %8820 = vmatprep.subr.bf16.mxu0 %v11299_v0  ;;  %8992 = vmatprep.subr.bf16.mxu1 %v11301_v1  ;;  %v11378_v0 = vcombine.low %v3224_v44, %v3232_v47  ;;  %v11380_v1 = vcombine.low %v3225_v48, %v3233_v49  ;;  %v11413_v37 = vcombine.high %v3257_v14, %v3265_v53  ;;  %v3280_v49 = vld [vmem:[#allocation9 + $0x18c0] sm:$0xff] }
 0x30b   : > { %8821 = vmatpush1.bf16.msra.mxu0 %v11298_v7  ;;  %8993 = vmatpush1.bf16.msra.mxu1 %v11300_v8  ;;  %v11397_v7 = vcombine.high %v3241_v60, %v3249_v61  ;;  %v3256_v8 = vld [vmem:[#allocation9 + $0x1800] sm:$0xff]  ;;  %v3289_v61 = vld [vmem:[#allocation9 + $0x1908] sm:$0xff] }
 0x30c   : > { %8822 = vmatprep.subr.bf16.mxu0 %v11315_v9  ;;  %8994 = vmatprep.subr.bf16.mxu1 %v11317_v10  ;;  %v3264_v9 = vld [vmem:[#allocation9 + $0x1840] sm:$0xff] }
 0x30d   : > { %v11410_v48 = vcombine.low %v3256_v8, %v3264_v9  ;;  %v3296_v60 = vld [vmem:[#allocation9 + $0x1940] sm:$0xff] }
 0x30f   : > { %8823 = vmatpush1.bf16.msra.mxu0 %v11314_v15  ;;  %8995 = vmatpush1.bf16.msra.mxu1 %v11316_v16 }
 0x310   : > { %8824 = vmatprep.subr.bf16.mxu0 %v11331_v17  ;;  %8996 = vmatprep.subr.bf16.mxu1 %v11333_v18 }
 0x313   : > { %8825 = vmatpush1.bf16.msra.mxu0 %v11330_v32  ;;  %8997 = vmatpush1.bf16.msra.mxu1 %v11332_v33  ;;  %v11411_v33 = vcombine.high %v3256_v8, %v3264_v9 }
 0x314   : > { %8826 = vmatprep.subr.bf16.mxu0 %v11347_v34  ;;  %8998 = vmatprep.subr.bf16.mxu1 %v11349_v35 }
 0x317   : > { %8827 = vmatpush1.bf16.msra.mxu0 %v11346_v40  ;;  %8999 = vmatpush1.bf16.msra.mxu1 %v11348_v41 }
 0x318   : > { %8828 = vmatprep.subr.bf16.mxu0 %v11363_v56  ;;  %9000 = vmatprep.subr.bf16.mxu1 %v11365_v42  ;;  %v3272_v56 = vld [vmem:[#allocation9 + $0x1880] sm:$0xff] }
 0x31b   : > { %8829 = vmatpush1.bf16.msra.mxu0 %v11362_v51  ;;  %9001 = vmatpush1.bf16.msra.mxu1 %v11364_v52  ;;  %v2369_v63 = vpop.f32.mrb[8].mxu0  ;;  %v3273_v51 = vld [vmem:[#allocation9 + $0x1888] sm:$0xff] }
 0x31c   : > { %v11709_v3 = vadd.f32 %v2369_v63, %v819_v54  ;;  %v2455_v2 = vpop.f32.mrb[8].mxu1  ;;  %v2371_v4 = vpop.f32.mrb[9].mxu0  ;;  %8830 = vmatprep.subr.bf16.mxu0 %v11379_v55  ;;  %9002 = vmatprep.subr.bf16.mxu1 %v11381_v57  ;;  %v3281_v52 = vld [vmem:[#allocation9 + $0x18c8] sm:$0xff]  ;;  %v11412_v57 = vcombine.low %v3257_v14, %v3265_v53  ;;  %v11426_v63 = vcombine.low %v3272_v56, %v3280_v49 }
 0x31d   : > { %v11713_v10 = vadd.f32 %v2455_v2, %v827_v59  ;;  %v11710_v11 = vadd.f32 %v2371_v4, %v823_v6  ;;  %v2457_v12 = vpop.f32.mrb[9].mxu1  ;;  %v2373_v13 = vpop.f32.mrb[10].mxu0  ;;  %v11429_v21 = vcombine.high %v3273_v51, %v3281_v52  ;;  %v3304_v2 = vld [vmem:[#allocation9 + $0x1980] sm:$0xff]  ;;  %v3321_v14 = vld [vmem:[#allocation9 + $0x1a08] sm:$0xff] }
 0x31e   : > { %v11714_v15 = vadd.f32 %v2457_v12, %v831_v62  ;;  %v11711_v16 = vadd.f32 %v2373_v13, %v819_v54  ;;  %v2459_v17 = vpop.f32.mrb[10].mxu1  ;;  %v2375_v18 = vpop.f32.mrb[11].mxu0  ;;  %v2468_v34 = vmax.f32 %v11709_v3, 0.0  ;;  %v3312_v4 = vld [vmem:[#allocation9 + $0x19c0] sm:$0xff]  ;;  %v3329_v53 = vld [vmem:[#allocation9 + $0x1a48] sm:$0xff] }
 0x31f   : > { %v11715_v27 = vadd.f32 %v2459_v17, %v827_v59  ;;  %v11712_v29 = vadd.f32 %v2375_v18, %v823_v6  ;;  %v2461_v32 = vpop.f32.mrb[11].mxu1  ;;  %8831 = vmatpush1.bf16.msra.mxu0 %v11378_v0  ;;  %9003 = vmatpush1.bf16.msra.mxu1 %v11380_v1  ;;  %v2470_v38 = vmax.f32 %v11713_v10, 0.0  ;;  %v2469_v39 = vmax.f32 %v11710_v11, 0.0  ;;  %v3288_v59 = vld [vmem:[#allocation9 + $0x1900] sm:$0xff] }
 0x320   : > { %v2476_v35 = vmax.f32 %v11711_v16, 0.0  ;;  %v11716_v36 = vadd.f32 %v2461_v32, %v831_v62  ;;  %8832 = vmatprep.subr.bf16.mxu0 %v11395_v5  ;;  %9004 = vmatprep.subr.bf16.mxu1 %v11397_v7  ;;  %v2471_v42 = vmax.f32 %v11714_v15, 0.0  ;;  %v11427_v6 = vcombine.high %v3272_v56, %v3280_v49  ;;  %v3297_v62 = vld [vmem:[#allocation9 + $0x1948] sm:$0xff]  ;;  %v3320_v12 = vld [vmem:[#allocation9 + $0x1a00] sm:$0xff] }
 0x321   : > { %v2478_v40 = vmax.f32 %v11715_v27, 0.0  ;;  %v2477_v41 = vmax.f32 %v11712_v29, 0.0  ;;  %v11428_v0 = vcombine.low %v3273_v51, %v3281_v52  ;;  %v11443_v1 = vcombine.high %v3288_v59, %v3296_v60  ;;  %v3305_v5 = vld [vmem:[#allocation9 + $0x1988] sm:$0xff]  ;;  %v3328_v13 = vld [vmem:[#allocation9 + $0x1a40] sm:$0xff] }
 0x322   : > { %v12495_v44 = vpack.c.bf16 %v2476_v35, %v2468_v34  ;;  %v2479_v47 = vmax.f32 %v11716_v36, 0.0  ;;  %v11445_v3 = vcombine.high %v3289_v61, %v3297_v62  ;;  %v3313_v7 = vld [vmem:[#allocation9 + $0x19c8] sm:$0xff]  ;;  %v11442_v8 = vcombine.low %v3288_v59, %v3296_v60  ;;  %v3352_v36 = vld [vmem:[#allocation9 + $0x1b00] sm:$0xff] }
 0x323   : > { %v12497_v54 = vpack.c.bf16 %v2478_v40, %v2470_v38  ;;  %v12499_v55 = vpack.c.bf16 %v2477_v41, %v2469_v39  ;;  %8833 = vmatpush1.bf16.msra.mxu0 %v11394_v19  ;;  %9005 = vmatpush1.bf16.msra.mxu1 %v11396_v25  ;;  %v11444_v9 = vcombine.low %v3289_v61, %v3297_v62  ;;  %v3336_v19 = vld [vmem:[#allocation9 + $0x1a80] sm:$0xff]  ;;  %v3337_v27 = vld [vmem:[#allocation9 + $0x1a88] sm:$0xff] }
 0x324   : > { %v12501_v58 = vpack.c.bf16 %v2479_v47, %v2471_v42  ;;  %8845 = vmatprep.subr.bf16.mxu0 %v11411_v33  ;;  %9017 = vmatprep.subr.bf16.mxu1 %v11413_v37  ;;  %v11459_v10 = vcombine.high %v3304_v2, %v3312_v4  ;;  %v11461_v11 = vcombine.high %v3305_v5, %v3313_v7  ;;  %v3344_v25 = vld [vmem:[#allocation9 + $0x1ac0] sm:$0xff]  ;;  %v3345_v29 = vld [vmem:[#allocation9 + $0x1ac8] sm:$0xff] }
 0x325   : > { %8834 = vmatprep.mubr.bf16.mxu0 %v12499_v55  ;;  %9006 = vmatprep.mubr.bf16.mxu1 %v12499_v55  ;;  %v11458_v15 = vcombine.low %v3304_v2, %v3312_v4  ;;  %v11460_v16 = vcombine.low %v3305_v5, %v3313_v7  ;;  %v11475_v17 = vcombine.high %v3320_v12, %v3328_v13  ;;  %v3360_v37 = vld [vmem:[#allocation9 + $0x1b40] sm:$0xff]  ;;  %v3353_v38 = vld [vmem:[#allocation9 + $0x1b08] sm:$0xff] }
 0x326   : > { %8835 = vmatmul.mubr.bf16.vlgmr.msra.gmra.mrb[12].mxu0 %v12495_v44  ;;  %9007 = vmatmul.mubr.bf16.vlgmr.msra.gmra.mrb[12].mxu1 %v12495_v44  ;;  %v11477_v18 = vcombine.high %v3321_v14, %v3329_v53  ;;  %v11474_v32 = vcombine.low %v3320_v12, %v3328_v13  ;;  %v11476_v33 = vcombine.low %v3321_v14, %v3329_v53  ;;  %v3361_v39 = vld [vmem:[#allocation9 + $0x1b48] sm:$0xff]  ;;  %v3368_v47 = vld [vmem:[#allocation9 + $0x1b80] sm:$0xff] }
 0x327   : > { %8846 = vmatpush1.bf16.msra.mxu0 %v11410_v48  ;;  %9018 = vmatpush1.bf16.msra.mxu1 %v11412_v57  ;;  %v11491_v34 = vcombine.high %v3336_v19, %v3344_v25  ;;  %v11493_v35 = vcombine.high %v3337_v27, %v3345_v29  ;;  %v11490_v40 = vcombine.low %v3336_v19, %v3344_v25  ;;  %v3376_v48 = vld [vmem:[#allocation9 + $0x1bc0] sm:$0xff]  ;;  %v3369_v49 = vld [vmem:[#allocation9 + $0x1b88] sm:$0xff] }
 0x328   : > { %8877 = vmatprep.mubr.bf16.mxu0 %v12501_v58  ;;  %9049 = vmatprep.mubr.bf16.mxu1 %v12501_v58  ;;  %v11492_v41 = vcombine.low %v3337_v27, %v3345_v29  ;;  %v11507_v56 = vcombine.high %v3352_v36, %v3360_v37  ;;  %v11509_v42 = vcombine.high %v3353_v38, %v3361_v39  ;;  %v3377_v51 = vld [vmem:[#allocation9 + $0x1bc8] sm:$0xff]  ;;  %v3392_v60 = vld [vmem:[#allocation9 + $0x1c40] sm:$0xff] }
 0x329   : > { %8847 = vmatprep.subr.bf16.mxu0 %v11427_v6  ;;  %9019 = vmatprep.subr.bf16.mxu1 %v11429_v21  ;;  %v11506_v52 = vcombine.low %v3352_v36, %v3360_v37  ;;  %v11508_v57 = vcombine.low %v3353_v38, %v3361_v39  ;;  %v11523_v59 = vcombine.high %v3368_v47, %v3376_v48  ;;  %v3384_v21 = vld [vmem:[#allocation9 + $0x1c00] sm:$0xff]  ;;  %v3385_v61 = vld [vmem:[#allocation9 + $0x1c08] sm:$0xff] }
 0x32a   : > { %v11525_v6 = vcombine.high %v3369_v49, %v3377_v51  ;;  %v3393_v62 = vld [vmem:[#allocation9 + $0x1c48] sm:$0xff]  ;;  %v3400_v2 = vld [vmem:[#allocation9 + $0x1c80] sm:$0xff] }
 0x32b   : > { %8848 = vmatpush1.bf16.msra.mxu0 %v11426_v63  ;;  %9020 = vmatpush1.bf16.msra.mxu1 %v11428_v0  ;;  %v11522_v63 = vcombine.low %v3368_v47, %v3376_v48  ;;  %v11524_v0 = vcombine.low %v3369_v49, %v3377_v51  ;;  %v3408_v4 = vld [vmem:[#allocation9 + $0x1cc0] sm:$0xff]  ;;  %v3401_v5 = vld [vmem:[#allocation9 + $0x1c88] sm:$0xff] }
 0x32c   : > { %8849 = vmatprep.subr.bf16.mxu0 %v11443_v1  ;;  %9021 = vmatprep.subr.bf16.mxu1 %v11445_v3  ;;  %v11539_v1 = vcombine.high %v3384_v21, %v3392_v60  ;;  %v11541_v3 = vcombine.high %v3385_v61, %v3393_v62  ;;  %v3409_v7 = vld [vmem:[#allocation9 + $0x1cc8] sm:$0xff]  ;;  %v3416_v12 = vld [vmem:[#allocation9 + $0x1d00] sm:$0xff] }
 0x32d   : > { %v3424_v13 = vld [vmem:[#allocation9 + $0x1d40] sm:$0xff]  ;;  %v3417_v14 = vld [vmem:[#allocation9 + $0x1d08] sm:$0xff] }
 0x32e   : > { %v3425_v53 = vld [vmem:[#allocation9 + $0x1d48] sm:$0xff]  ;;  %v3432_v19 = vld [vmem:[#allocation9 + $0x1d80] sm:$0xff] }
 0x32f   : > { %8850 = vmatpush1.bf16.msra.mxu0 %v11442_v8  ;;  %9022 = vmatpush1.bf16.msra.mxu1 %v11444_v9  ;;  %v11538_v8 = vcombine.low %v3384_v21, %v3392_v60  ;;  %v11540_v9 = vcombine.low %v3385_v61, %v3393_v62  ;;  %v3440_v25 = vld [vmem:[#allocation9 + $0x1dc0] sm:$0xff]  ;;  %v3433_v27 = vld [vmem:[#allocation9 + $0x1d88] sm:$0xff] }
 0x330   : > { %8851 = vmatprep.subr.bf16.mxu0 %v11459_v10  ;;  %9023 = vmatprep.subr.bf16.mxu1 %v11461_v11  ;;  %v11555_v10 = vcombine.high %v3400_v2, %v3408_v4  ;;  %v11557_v11 = vcombine.high %v3401_v5, %v3409_v7  ;;  %v3441_v29 = vld [vmem:[#allocation9 + $0x1dc8] sm:$0xff]  ;;  %v3448_v36 = vld [vmem:[#allocation9 + $0x1e00] sm:$0xff] }
 0x331   : > { %v3456_v37 = vld [vmem:[#allocation9 + $0x1e40] sm:$0xff]  ;;  %v3449_v38 = vld [vmem:[#allocation9 + $0x1e08] sm:$0xff] }
 0x332   : > { %v3457_v39 = vld [vmem:[#allocation9 + $0x1e48] sm:$0xff]  ;;  %v3464_v47 = vld [vmem:[#allocation9 + $0x1e80] sm:$0xff] }
 0x333   : > { %8852 = vmatpush1.bf16.msra.mxu0 %v11458_v15  ;;  %9024 = vmatpush1.bf16.msra.mxu1 %v11460_v16  ;;  %v11554_v15 = vcombine.low %v3400_v2, %v3408_v4  ;;  %v11556_v16 = vcombine.low %v3401_v5, %v3409_v7  ;;  %v3472_v48 = vld [vmem:[#allocation9 + $0x1ec0] sm:$0xff]  ;;  %v3465_v49 = vld [vmem:[#allocation9 + $0x1e88] sm:$0xff] }
 0x334   : > { %8853 = vmatprep.subr.bf16.mxu0 %v11475_v17  ;;  %9025 = vmatprep.subr.bf16.mxu1 %v11477_v18  ;;  %v11571_v17 = vcombine.high %v3416_v12, %v3424_v13  ;;  %v11573_v18 = vcombine.high %v3417_v14, %v3425_v53  ;;  %v3473_v51 = vld [vmem:[#allocation9 + $0x1ec8] sm:$0xff]  ;;  %v3480_v21 = vld [vmem:[#allocation9 + $0x1f00] sm:$0xff] }
 0x335   : > { %v3488_v60 = vld [vmem:[#allocation9 + $0x1f40] sm:$0xff]  ;;  %v3481_v61 = vld [vmem:[#allocation9 + $0x1f08] sm:$0xff] }
 0x336   : > { %v3489_v62 = vld [vmem:[#allocation9 + $0x1f48] sm:$0xff]  ;;  %v3496_v2 = vld [vmem:[#allocation9 + $0x1f80] sm:$0xff] }
 0x337   : > { %8854 = vmatpush1.bf16.msra.mxu0 %v11474_v32  ;;  %9026 = vmatpush1.bf16.msra.mxu1 %v11476_v33  ;;  %v11570_v32 = vcombine.low %v3416_v12, %v3424_v13  ;;  %v11572_v33 = vcombine.low %v3417_v14, %v3425_v53  ;;  %v3504_v4 = vld [vmem:[#allocation9 + $0x1fc0] sm:$0xff]  ;;  %v3497_v5 = vld [vmem:[#allocation9 + $0x1f88] sm:$0xff]  ;;  %v2490_v12 = vld [vmem:[#allocation9 + $0x10] sm:$0xff] }
 0x338   : > { %8855 = vmatprep.subr.bf16.mxu0 %v11491_v34  ;;  %9027 = vmatprep.subr.bf16.mxu1 %v11493_v35  ;;  %v11587_v34 = vcombine.high %v3432_v19, %v3440_v25  ;;  %v11589_v35 = vcombine.high %v3433_v27, %v3441_v29  ;;  %v3505_v7 = vld [vmem:[#allocation9 + $0x1fc8] sm:$0xff]  ;;  %v2498_v13 = vld [vmem:[#allocation9 + $0x50] sm:$0xff]  ;;  %v2491_v14 = vld [vmem:[#allocation9 + $0x18] sm:$0xff] }
 0x339   : > { %v2499_v53 = vld [vmem:[#allocation9 + $0x58] sm:$0xff] }
 0x33b   : > { %8856 = vmatpush1.bf16.msra.mxu0 %v11490_v40  ;;  %9028 = vmatpush1.bf16.msra.mxu1 %v11492_v41  ;;  %v11586_v40 = vcombine.low %v3432_v19, %v3440_v25  ;;  %v11588_v41 = vcombine.low %v3433_v27, %v3441_v29  ;;  %v2506_v19 = vld [vmem:[#allocation9 + $0x90] sm:$0xff]  ;;  %v2507_v27 = vld [vmem:[#allocation9 + $0x98] sm:$0xff] }
 0x33c   : > { %8857 = vmatprep.subr.bf16.mxu0 %v11507_v56  ;;  %9029 = vmatprep.subr.bf16.mxu1 %v11509_v42  ;;  %v11603_v56 = vcombine.high %v3448_v36, %v3456_v37  ;;  %v11605_v42 = vcombine.high %v3449_v38, %v3457_v39  ;;  %v2514_v25 = vld [vmem:[#allocation9 + $0xd0] sm:$0xff]  ;;  %v2515_v29 = vld [vmem:[#allocation9 + $0xd8] sm:$0xff] }
 0x33f   : > { %8858 = vmatpush1.bf16.msra.mxu0 %v11506_v52  ;;  %9030 = vmatpush1.bf16.msra.mxu1 %v11508_v57  ;;  %v11602_v52 = vcombine.low %v3448_v36, %v3456_v37  ;;  %v11604_v57 = vcombine.low %v3449_v38, %v3457_v39  ;;  %v2522_v36 = vld [vmem:[#allocation9 + $0x110] sm:$0xff]  ;;  %v2523_v38 = vld [vmem:[#allocation9 + $0x118] sm:$0xff] }
 0x340   : > { %8859 = vmatprep.subr.bf16.mxu0 %v11523_v59  ;;  %9031 = vmatprep.subr.bf16.mxu1 %v11525_v6  ;;  %v11619_v59 = vcombine.high %v3464_v47, %v3472_v48  ;;  %v11621_v6 = vcombine.high %v3465_v49, %v3473_v51  ;;  %v2530_v37 = vld [vmem:[#allocation9 + $0x150] sm:$0xff]  ;;  %v2531_v39 = vld [vmem:[#allocation9 + $0x158] sm:$0xff] }
 0x343   : > { %8860 = vmatpush1.bf16.msra.mxu0 %v11522_v63  ;;  %9032 = vmatpush1.bf16.msra.mxu1 %v11524_v0  ;;  %v11618_v63 = vcombine.low %v3464_v47, %v3472_v48  ;;  %v11620_v0 = vcombine.low %v3465_v49, %v3473_v51  ;;  %v2538_v47 = vld [vmem:[#allocation9 + $0x190] sm:$0xff]  ;;  %v2539_v49 = vld [vmem:[#allocation9 + $0x198] sm:$0xff] }
 0x344   : > { %8861 = vmatprep.subr.bf16.mxu0 %v11539_v1  ;;  %9033 = vmatprep.subr.bf16.mxu1 %v11541_v3  ;;  %v11635_v1 = vcombine.high %v3480_v21, %v3488_v60  ;;  %v11637_v3 = vcombine.high %v3481_v61, %v3489_v62  ;;  %v2546_v48 = vld [vmem:[#allocation9 + $0x1d0] sm:$0xff]  ;;  %v2547_v51 = vld [vmem:[#allocation9 + $0x1d8] sm:$0xff] }
 0x347   : > { %8862 = vmatpush1.bf16.msra.mxu0 %v11538_v8  ;;  %9034 = vmatpush1.bf16.msra.mxu1 %v11540_v9  ;;  %v11634_v8 = vcombine.low %v3480_v21, %v3488_v60  ;;  %v11636_v9 = vcombine.low %v3481_v61, %v3489_v62  ;;  %v2554_v21 = vld [vmem:[#allocation9 + $0x210] sm:$0xff]  ;;  %v2555_v61 = vld [vmem:[#allocation9 + $0x218] sm:$0xff] }
 0x348   : > { %8863 = vmatprep.subr.bf16.mxu0 %v11555_v10  ;;  %9035 = vmatprep.subr.bf16.mxu1 %v11557_v11  ;;  %v11651_v10 = vcombine.high %v3496_v2, %v3504_v4  ;;  %v11653_v11 = vcombine.high %v3497_v5, %v3505_v7  ;;  %v2562_v60 = vld [vmem:[#allocation9 + $0x250] sm:$0xff]  ;;  %v2563_v62 = vld [vmem:[#allocation9 + $0x258] sm:$0xff] }
 0x34b   : > { %8864 = vmatpush1.bf16.msra.mxu0 %v11554_v15  ;;  %9036 = vmatpush1.bf16.msra.mxu1 %v11556_v16  ;;  %v11650_v15 = vcombine.low %v3496_v2, %v3504_v4  ;;  %v11652_v16 = vcombine.low %v3497_v5, %v3505_v7  ;;  %v2570_v2 = vld [vmem:[#allocation9 + $0x290] sm:$0xff]  ;;  %v2571_v5 = vld [vmem:[#allocation9 + $0x298] sm:$0xff] }
 0x34c   : > { %8865 = vmatprep.subr.bf16.mxu0 %v11571_v17  ;;  %9037 = vmatprep.subr.bf16.mxu1 %v11573_v18  ;;  %v10647_v17 = vcombine.high %v2490_v12, %v2498_v13  ;;  %v10649_v18 = vcombine.high %v2491_v14, %v2499_v53  ;;  %v2578_v4 = vld [vmem:[#allocation9 + $0x2d0] sm:$0xff]  ;;  %v2579_v7 = vld [vmem:[#allocation9 + $0x2d8] sm:$0xff] }
 0x34f   : > { %8866 = vmatpush1.bf16.msra.mxu0 %v11570_v32  ;;  %9038 = vmatpush1.bf16.msra.mxu1 %v11572_v33  ;;  %v10646_v32 = vcombine.low %v2490_v12, %v2498_v13  ;;  %v10648_v33 = vcombine.low %v2491_v14, %v2499_v53  ;;  %v2586_v12 = vld [vmem:[#allocation9 + $0x310] sm:$0xff]  ;;  %v2587_v14 = vld [vmem:[#allocation9 + $0x318] sm:$0xff] }
 0x350   : > { %8867 = vmatprep.subr.bf16.mxu0 %v11587_v34  ;;  %9039 = vmatprep.subr.bf16.mxu1 %v11589_v35  ;;  %v10663_v34 = vcombine.high %v2506_v19, %v2514_v25  ;;  %v10665_v35 = vcombine.high %v2507_v27, %v2515_v29  ;;  %v2594_v13 = vld [vmem:[#allocation9 + $0x350] sm:$0xff]  ;;  %v2595_v53 = vld [vmem:[#allocation9 + $0x358] sm:$0xff] }
 0x353   : > { %8868 = vmatpush1.bf16.msra.mxu0 %v11586_v40  ;;  %9040 = vmatpush1.bf16.msra.mxu1 %v11588_v41  ;;  %v10662_v40 = vcombine.low %v2506_v19, %v2514_v25  ;;  %v10664_v41 = vcombine.low %v2507_v27, %v2515_v29  ;;  %v2602_v19 = vld [vmem:[#allocation9 + $0x390] sm:$0xff]  ;;  %v2603_v27 = vld [vmem:[#allocation9 + $0x398] sm:$0xff] }
 0x354   : > { %8869 = vmatprep.subr.bf16.mxu0 %v11603_v56  ;;  %9041 = vmatprep.subr.bf16.mxu1 %v11605_v42  ;;  %v10679_v56 = vcombine.high %v2522_v36, %v2530_v37  ;;  %v10681_v42 = vcombine.high %v2523_v38, %v2531_v39  ;;  %v2610_v25 = vld [vmem:[#allocation9 + $0x3d0] sm:$0xff]  ;;  %v2611_v29 = vld [vmem:[#allocation9 + $0x3d8] sm:$0xff] }
 0x357   : > { %8870 = vmatpush1.bf16.msra.mxu0 %v11602_v52  ;;  %9042 = vmatpush1.bf16.msra.mxu1 %v11604_v57  ;;  %v10678_v52 = vcombine.low %v2522_v36, %v2530_v37  ;;  %v10680_v57 = vcombine.low %v2523_v38, %v2531_v39  ;;  %v2618_v36 = vld [vmem:[#allocation9 + $0x410] sm:$0xff]  ;;  %v2619_v38 = vld [vmem:[#allocation9 + $0x418] sm:$0xff] }
 0x358   : > { %8871 = vmatprep.subr.bf16.mxu0 %v11619_v59  ;;  %9043 = vmatprep.subr.bf16.mxu1 %v11621_v6  ;;  %v10695_v59 = vcombine.high %v2538_v47, %v2546_v48  ;;  %v10697_v6 = vcombine.high %v2539_v49, %v2547_v51  ;;  %v2626_v37 = vld [vmem:[#allocation9 + $0x450] sm:$0xff]  ;;  %v2627_v39 = vld [vmem:[#allocation9 + $0x458] sm:$0xff] }
 0x35b   : > { %8872 = vmatpush1.bf16.msra.mxu0 %v11618_v63  ;;  %9044 = vmatpush1.bf16.msra.mxu1 %v11620_v0  ;;  %v10694_v63 = vcombine.low %v2538_v47, %v2546_v48  ;;  %v10696_v0 = vcombine.low %v2539_v49, %v2547_v51  ;;  %v2634_v47 = vld [vmem:[#allocation9 + $0x490] sm:$0xff]  ;;  %v2635_v49 = vld [vmem:[#allocation9 + $0x498] sm:$0xff] }
 0x35c   : > { %8873 = vmatprep.subr.bf16.mxu0 %v11635_v1  ;;  %9045 = vmatprep.subr.bf16.mxu1 %v11637_v3  ;;  %v10711_v1 = vcombine.high %v2554_v21, %v2562_v60  ;;  %v10713_v3 = vcombine.high %v2555_v61, %v2563_v62  ;;  %v2642_v48 = vld [vmem:[#allocation9 + $0x4d0] sm:$0xff]  ;;  %v2643_v51 = vld [vmem:[#allocation9 + $0x4d8] sm:$0xff] }
 0x35f   : > { %8874 = vmatpush1.bf16.msra.mxu0 %v11634_v8  ;;  %9046 = vmatpush1.bf16.msra.mxu1 %v11636_v9  ;;  %v10710_v8 = vcombine.low %v2554_v21, %v2562_v60  ;;  %v10712_v9 = vcombine.low %v2555_v61, %v2563_v62  ;;  %v2650_v21 = vld [vmem:[#allocation9 + $0x510] sm:$0xff]  ;;  %v2651_v61 = vld [vmem:[#allocation9 + $0x518] sm:$0xff] }
 0x360   : > { %8875 = vmatprep.subr.bf16.mxu0 %v11651_v10  ;;  %9047 = vmatprep.subr.bf16.mxu1 %v11653_v11  ;;  %v10727_v10 = vcombine.high %v2570_v2, %v2578_v4  ;;  %v10729_v11 = vcombine.high %v2571_v5, %v2579_v7  ;;  %v2658_v60 = vld [vmem:[#allocation9 + $0x550] sm:$0xff]  ;;  %v2659_v62 = vld [vmem:[#allocation9 + $0x558] sm:$0xff] }
 0x363   : > { %8876 = vmatpush1.bf16.msra.mxu0 %v11650_v15  ;;  %9048 = vmatpush1.bf16.msra.mxu1 %v11652_v16  ;;  %v10726_v15 = vcombine.low %v2570_v2, %v2578_v4  ;;  %v10728_v16 = vcombine.low %v2571_v5, %v2579_v7  ;;  %v2666_v2 = vld [vmem:[#allocation9 + $0x590] sm:$0xff]  ;;  %v2667_v5 = vld [vmem:[#allocation9 + $0x598] sm:$0xff] }
 0x364   : > { %9060 = vmatprep.subr.bf16.mxu0 %v10647_v17  ;;  %9232 = vmatprep.subr.bf16.mxu1 %v10649_v18  ;;  %v10743_v17 = vcombine.high %v2586_v12, %v2594_v13  ;;  %v10745_v18 = vcombine.high %v2587_v14, %v2595_v53  ;;  %v2674_v4 = vld [vmem:[#allocation9 + $0x5d0] sm:$0xff]  ;;  %v2675_v7 = vld [vmem:[#allocation9 + $0x5d8] sm:$0xff] }
 0x366   : > { %8878 = vmatmul.mubr.bf16.vlgmr.msra.gmra.mrb[12].mxu0 %v12497_v54  ;;  %9050 = vmatmul.mubr.bf16.vlgmr.msra.gmra.mrb[12].mxu1 %v12497_v54 }
 0x367   : > { %9061 = vmatpush1.bf16.msra.mxu0 %v10646_v32  ;;  %9092 = vmatprep.mubr.bf16.mxu0 %v12459_v30  ;;  %v10742_v32 = vcombine.low %v2586_v12, %v2594_v13  ;;  %v2682_v12 = vld [vmem:[#allocation9 + $0x610] sm:$0xff] }
 0x368   : > { %9233 = vmatpush1.bf16.msra.mxu1 %v10648_v33  ;;  %9264 = vmatprep.mubr.bf16.mxu1 %v12459_v30  ;;  %v10744_v33 = vcombine.low %v2587_v14, %v2595_v53  ;;  %v2690_v13 = vld [vmem:[#allocation9 + $0x650] sm:$0xff]  ;;  %v2683_v14 = vld [vmem:[#allocation9 + $0x618] sm:$0xff] }
 0x369   : > { %9062 = vmatprep.subr.bf16.mxu0 %v10663_v34  ;;  %9234 = vmatprep.subr.bf16.mxu1 %v10665_v35  ;;  %v10759_v34 = vcombine.high %v2602_v19, %v2610_v25  ;;  %v10761_v35 = vcombine.high %v2603_v27, %v2611_v29  ;;  %v2691_v53 = vld [vmem:[#allocation9 + $0x658] sm:$0xff] }
 0x36b   : > { %9063 = vmatpush1.bf16.msra.mxu0 %v10662_v40  ;;  %v10758_v40 = vcombine.low %v2602_v19, %v2610_v25  ;;  %v2698_v19 = vld [vmem:[#allocation9 + $0x690] sm:$0xff] }
 0x36c   : > { %9235 = vmatpush1.bf16.msra.mxu1 %v10664_v41  ;;  %9064 = vmatprep.subr.bf16.mxu0 %v10679_v56  ;;  %v10760_v41 = vcombine.low %v2603_v27, %v2611_v29  ;;  %v10775_v56 = vcombine.high %v2618_v36, %v2626_v37  ;;  %v2706_v25 = vld [vmem:[#allocation9 + $0x6d0] sm:$0xff]  ;;  %v2699_v27 = vld [vmem:[#allocation9 + $0x698] sm:$0xff] }
 0x36d   : > { %9236 = vmatprep.subr.bf16.mxu1 %v10681_v42  ;;  %v10777_v42 = vcombine.high %v2619_v38, %v2627_v39  ;;  %v2707_v29 = vld [vmem:[#allocation9 + $0x6d8] sm:$0xff] }
 0x36f   : > { %9065 = vmatpush1.bf16.msra.mxu0 %v10678_v52  ;;  %v10774_v52 = vcombine.low %v2618_v36, %v2626_v37  ;;  %v2714_v36 = vld [vmem:[#allocation9 + $0x710] sm:$0xff] }
 0x370   : > { %9237 = vmatpush1.bf16.msra.mxu1 %v10680_v57  ;;  %9066 = vmatprep.subr.bf16.mxu0 %v10695_v59  ;;  %v10776_v57 = vcombine.low %v2619_v38, %v2627_v39  ;;  %v10791_v59 = vcombine.high %v2634_v47, %v2642_v48  ;;  %v2722_v37 = vld [vmem:[#allocation9 + $0x750] sm:$0xff]  ;;  %v2715_v38 = vld [vmem:[#allocation9 + $0x718] sm:$0xff] }
 0x371   : > { %9238 = vmatprep.subr.bf16.mxu1 %v10697_v6  ;;  %v10793_v6 = vcombine.high %v2635_v49, %v2643_v51  ;;  %v2723_v39 = vld [vmem:[#allocation9 + $0x758] sm:$0xff] }
 0x373   : > { %9067 = vmatpush1.bf16.msra.mxu0 %v10694_v63  ;;  %v10790_v63 = vcombine.low %v2634_v47, %v2642_v48  ;;  %v2730_v47 = vld [vmem:[#allocation9 + $0x790] sm:$0xff] }
 0x374   : > { %9239 = vmatpush1.bf16.msra.mxu1 %v10696_v0  ;;  %9068 = vmatprep.subr.bf16.mxu0 %v10711_v1  ;;  %v10792_v0 = vcombine.low %v2635_v49, %v2643_v51  ;;  %v10807_v1 = vcombine.high %v2650_v21, %v2658_v60  ;;  %v2738_v48 = vld [vmem:[#allocation9 + $0x7d0] sm:$0xff]  ;;  %v2731_v49 = vld [vmem:[#allocation9 + $0x798] sm:$0xff] }
 0x375   : > { %9240 = vmatprep.subr.bf16.mxu1 %v10713_v3  ;;  %v10809_v3 = vcombine.high %v2651_v61, %v2659_v62  ;;  %v2739_v51 = vld [vmem:[#allocation9 + $0x7d8] sm:$0xff] }
 0x377   : > { %9069 = vmatpush1.bf16.msra.mxu0 %v10710_v8  ;;  %v10806_v8 = vcombine.low %v2650_v21, %v2658_v60  ;;  %v2746_v21 = vld [vmem:[#allocation9 + $0x810] sm:$0xff] }
 0x378   : > { %9241 = vmatpush1.bf16.msra.mxu1 %v10712_v9  ;;  %9070 = vmatprep.subr.bf16.mxu0 %v10727_v10  ;;  %v10808_v9 = vcombine.low %v2651_v61, %v2659_v62  ;;  %v10823_v10 = vcombine.high %v2666_v2, %v2674_v4  ;;  %v2754_v60 = vld [vmem:[#allocation9 + $0x850] sm:$0xff]  ;;  %v2747_v61 = vld [vmem:[#allocation9 + $0x818] sm:$0xff] }
 0x379   : > { %9242 = vmatprep.subr.bf16.mxu1 %v10729_v11  ;;  %v10825_v11 = vcombine.high %v2667_v5, %v2675_v7  ;;  %v2755_v62 = vld [vmem:[#allocation9 + $0x858] sm:$0xff] }
 0x37b   : > { %9071 = vmatpush1.bf16.msra.mxu0 %v10726_v15  ;;  %v10822_v15 = vcombine.low %v2666_v2, %v2674_v4  ;;  %v2762_v2 = vld [vmem:[#allocation9 + $0x890] sm:$0xff] }
 0x37c   : > { %9243 = vmatpush1.bf16.msra.mxu1 %v10728_v16  ;;  %9072 = vmatprep.subr.bf16.mxu0 %v10743_v17  ;;  %v10824_v16 = vcombine.low %v2667_v5, %v2675_v7  ;;  %v10839_v17 = vcombine.high %v2682_v12, %v2690_v13  ;;  %v2770_v4 = vld [vmem:[#allocation9 + $0x8d0] sm:$0xff]  ;;  %v10902_v5 = vcombine.low %v2746_v21, %v2754_v60  ;;  %v2763_v7 = vld [vmem:[#allocation9 + $0x898] sm:$0xff] }
 0x37d   : > { %9244 = vmatprep.subr.bf16.mxu1 %v10745_v18  ;;  %v10841_v18 = vcombine.high %v2683_v14, %v2691_v53 }
 0x37f   : > { %9073 = vmatpush1.bf16.msra.mxu0 %v10742_v32  ;;  %v10838_v32 = vcombine.low %v2682_v12, %v2690_v13  ;;  %v2786_v12 = vld [vmem:[#allocation9 + $0x950] sm:$0xff] }
 0x380   : > { %9245 = vmatpush1.bf16.msra.mxu1 %v10744_v33  ;;  %9074 = vmatprep.subr.bf16.mxu0 %v10759_v34  ;;  %v10840_v33 = vcombine.low %v2683_v14, %v2691_v53  ;;  %v10855_v34 = vcombine.high %v2698_v19, %v2706_v25  ;;  %v2779_v14 = vld [vmem:[#allocation9 + $0x918] sm:$0xff] }
 0x381   : > { %9246 = vmatprep.subr.bf16.mxu1 %v10761_v35  ;;  %v10857_v35 = vcombine.high %v2699_v27, %v2707_v29  ;;  %v2787_v53 = vld [vmem:[#allocation9 + $0x958] sm:$0xff] }
 0x383   : > { %9075 = vmatpush1.bf16.msra.mxu0 %v10758_v40  ;;  %v10854_v40 = vcombine.low %v2698_v19, %v2706_v25  ;;  %v2794_v19 = vld [vmem:[#allocation9 + $0x990] sm:$0xff] }
 0x384   : > { %9247 = vmatpush1.bf16.msra.mxu1 %v10760_v41  ;;  %9076 = vmatprep.subr.bf16.mxu0 %v10775_v56  ;;  %v10856_v41 = vcombine.low %v2699_v27, %v2707_v29  ;;  %v10871_v56 = vcombine.high %v2714_v36, %v2722_v37  ;;  %v2802_v25 = vld [vmem:[#allocation9 + $0x9d0] sm:$0xff]  ;;  %v2795_v27 = vld [vmem:[#allocation9 + $0x998] sm:$0xff] }
 0x385   : > { %9248 = vmatprep.subr.bf16.mxu1 %v10777_v42  ;;  %v10873_v42 = vcombine.high %v2715_v38, %v2723_v39  ;;  %v2803_v29 = vld [vmem:[#allocation9 + $0x9d8] sm:$0xff] }
 0x387   : > { %9077 = vmatpush1.bf16.msra.mxu0 %v10774_v52  ;;  %v10870_v52 = vcombine.low %v2714_v36, %v2722_v37  ;;  %v2810_v36 = vld [vmem:[#allocation9 + $0xa10] sm:$0xff] }
 0x388   : > { %9249 = vmatpush1.bf16.msra.mxu1 %v10776_v57  ;;  %9078 = vmatprep.subr.bf16.mxu0 %v10791_v59  ;;  %v10872_v57 = vcombine.low %v2715_v38, %v2723_v39  ;;  %v10887_v59 = vcombine.high %v2730_v47, %v2738_v48  ;;  %v2818_v37 = vld [vmem:[#allocation9 + $0xa50] sm:$0xff]  ;;  %v2811_v38 = vld [vmem:[#allocation9 + $0xa18] sm:$0xff] }
 0x389   : > { %9250 = vmatprep.subr.bf16.mxu1 %v10793_v6  ;;  %v10889_v6 = vcombine.high %v2731_v49, %v2739_v51  ;;  %v2819_v39 = vld [vmem:[#allocation9 + $0xa58] sm:$0xff] }
 0x38b   : > { %9079 = vmatpush1.bf16.msra.mxu0 %v10790_v63  ;;  %v10886_v63 = vcombine.low %v2730_v47, %v2738_v48  ;;  %v2826_v47 = vld [vmem:[#allocation9 + $0xa90] sm:$0xff] }
 0x38c   : > { %9251 = vmatpush1.bf16.msra.mxu1 %v10792_v0  ;;  %9080 = vmatprep.subr.bf16.mxu0 %v10807_v1  ;;  %v10888_v0 = vcombine.low %v2731_v49, %v2739_v51  ;;  %v10903_v1 = vcombine.high %v2746_v21, %v2754_v60  ;;  %v2834_v48 = vld [vmem:[#allocation9 + $0xad0] sm:$0xff]  ;;  %v2827_v49 = vld [vmem:[#allocation9 + $0xa98] sm:$0xff] }
 0x38d   : > { %9252 = vmatprep.subr.bf16.mxu1 %v10809_v3  ;;  %v10905_v3 = vcombine.high %v2747_v61, %v2755_v62  ;;  %v2835_v51 = vld [vmem:[#allocation9 + $0xad8] sm:$0xff]  ;;  %v2842_v21 = vld [vmem:[#allocation9 + $0xb10] sm:$0xff] }
 0x38e   : > { %v2850_v60 = vld [vmem:[#allocation9 + $0xb50] sm:$0xff] }
 0x38f   : > { %9081 = vmatpush1.bf16.msra.mxu0 %v10806_v8  ;;  %v2771_v8 = vld [vmem:[#allocation9 + $0x8d8] sm:$0xff] }
 0x390   : > { %9253 = vmatpush1.bf16.msra.mxu1 %v10808_v9  ;;  %9082 = vmatprep.subr.bf16.mxu0 %v10823_v10  ;;  %v10904_v9 = vcombine.low %v2747_v61, %v2755_v62  ;;  %v10919_v10 = vcombine.high %v2762_v2, %v2770_v4  ;;  %v10921_v13 = vcombine.high %v2763_v7, %v2771_v8  ;;  %v2843_v61 = vld [vmem:[#allocation9 + $0xb18] sm:$0xff] }
 0x391   : > { %9254 = vmatprep.subr.bf16.mxu1 %v10825_v11  ;;  %v2778_v11 = vld [vmem:[#allocation9 + $0x910] sm:$0xff]  ;;  %v2851_v62 = vld [vmem:[#allocation9 + $0xb58] sm:$0xff] }
 0x393   : > { %9083 = vmatpush1.bf16.msra.mxu0 %v10822_v15  ;;  %v10918_v15 = vcombine.low %v2762_v2, %v2770_v4  ;;  %v2858_v2 = vld [vmem:[#allocation9 + $0xb90] sm:$0xff] }
 0x394   : > { %9255 = vmatpush1.bf16.msra.mxu1 %v10824_v16  ;;  %9084 = vmatprep.subr.bf16.mxu0 %v10839_v17  ;;  %v10920_v16 = vcombine.low %v2763_v7, %v2771_v8  ;;  %v10935_v17 = vcombine.high %v2778_v11, %v2786_v12  ;;  %v2866_v4 = vld [vmem:[#allocation9 + $0xbd0] sm:$0xff]  ;;  %v2867_v7 = vld [vmem:[#allocation9 + $0xbd8] sm:$0xff]  ;;  %v10998_v8 = vcombine.low %v2842_v21, %v2850_v60 }
 0x395   : > { %9256 = vmatprep.subr.bf16.mxu1 %v10841_v18  ;;  %v10937_v18 = vcombine.high %v2779_v14, %v2787_v53 }
 0x397   : > { %9085 = vmatpush1.bf16.msra.mxu0 %v10838_v32  ;;  %v10934_v32 = vcombine.low %v2778_v11, %v2786_v12  ;;  %v2874_v12 = vld [vmem:[#allocation9 + $0xc10] sm:$0xff] }
 0x398   : > { %9257 = vmatpush1.bf16.msra.mxu1 %v10840_v33  ;;  %9086 = vmatprep.subr.bf16.mxu0 %v10855_v34  ;;  %v10936_v33 = vcombine.low %v2779_v14, %v2787_v53  ;;  %v10951_v34 = vcombine.high %v2794_v19, %v2802_v25  ;;  %v2875_v14 = vld [vmem:[#allocation9 + $0xc18] sm:$0xff] }
 0x399   : > { %9258 = vmatprep.subr.bf16.mxu1 %v10857_v35  ;;  %v10953_v35 = vcombine.high %v2795_v27, %v2803_v29  ;;  %v2883_v53 = vld [vmem:[#allocation9 + $0xc58] sm:$0xff] }
 0x39b   : > { %9087 = vmatpush1.bf16.msra.mxu0 %v10854_v40  ;;  %v10950_v40 = vcombine.low %v2794_v19, %v2802_v25  ;;  %v2890_v19 = vld [vmem:[#allocation9 + $0xc90] sm:$0xff] }
 0x39c   : > { %9259 = vmatpush1.bf16.msra.mxu1 %v10856_v41  ;;  %9088 = vmatprep.subr.bf16.mxu0 %v10871_v56  ;;  %v10952_v41 = vcombine.low %v2795_v27, %v2803_v29  ;;  %v10967_v56 = vcombine.high %v2810_v36, %v2818_v37  ;;  %v2898_v25 = vld [vmem:[#allocation9 + $0xcd0] sm:$0xff]  ;;  %v2891_v27 = vld [vmem:[#allocation9 + $0xc98] sm:$0xff] }
 0x39d   : > { %9260 = vmatprep.subr.bf16.mxu1 %v10873_v42  ;;  %v10969_v42 = vcombine.high %v2811_v38, %v2819_v39  ;;  %v2899_v29 = vld [vmem:[#allocation9 + $0xcd8] sm:$0xff] }
 0x39f   : > { %9089 = vmatpush1.bf16.msra.mxu0 %v10870_v52  ;;  %v10966_v52 = vcombine.low %v2810_v36, %v2818_v37  ;;  %v2906_v36 = vld [vmem:[#allocation9 + $0xd10] sm:$0xff] }
 0x3a0   : > { %9261 = vmatpush1.bf16.msra.mxu1 %v10872_v57  ;;  %9090 = vmatprep.subr.bf16.mxu0 %v10887_v59  ;;  %v10968_v57 = vcombine.low %v2811_v38, %v2819_v39  ;;  %v10983_v59 = vcombine.high %v2826_v47, %v2834_v48  ;;  %v2914_v37 = vld [vmem:[#allocation9 + $0xd50] sm:$0xff]  ;;  %v2907_v38 = vld [vmem:[#allocation9 + $0xd18] sm:$0xff] }
 0x3a1   : > { %9262 = vmatprep.subr.bf16.mxu1 %v10889_v6  ;;  %v10985_v6 = vcombine.high %v2827_v49, %v2835_v51  ;;  %v2915_v39 = vld [vmem:[#allocation9 + $0xd58] sm:$0xff] }
 0x3a3   : > { %9091 = vmatpush1.bf16.msra.mxu0 %v10886_v63  ;;  %v10982_v63 = vcombine.low %v2826_v47, %v2834_v48  ;;  %v2922_v47 = vld [vmem:[#allocation9 + $0xd90] sm:$0xff] }
 0x3a4   : > { %9263 = vmatpush1.bf16.msra.mxu1 %v10888_v0  ;;  %9103 = vmatprep.subr.bf16.mxu0 %v10903_v1  ;;  %v10984_v0 = vcombine.low %v2827_v49, %v2835_v51  ;;  %v10999_v1 = vcombine.high %v2842_v21, %v2850_v60  ;;  %v2930_v48 = vld [vmem:[#allocation9 + $0xdd0] sm:$0xff]  ;;  %v2923_v49 = vld [vmem:[#allocation9 + $0xd98] sm:$0xff] }
 0x3a5   : > { %9275 = vmatprep.subr.bf16.mxu1 %v10905_v3  ;;  %v11001_v3 = vcombine.high %v2843_v61, %v2851_v62  ;;  %v2931_v51 = vld [vmem:[#allocation9 + $0xdd8] sm:$0xff]  ;;  %v2938_v21 = vld [vmem:[#allocation9 + $0xe10] sm:$0xff] }
 0x3a6   : > { %9093 = vmatmul.mubr.bf16.vlgmr.msra.gmra.mrb[16].mxu0 %v12455_v20  ;;  %v2946_v60 = vld [vmem:[#allocation9 + $0xe50] sm:$0xff] }
 0x3a7   : > { %9265 = vmatmul.mubr.bf16.vlgmr.msra.gmra.mrb[16].mxu1 %v12455_v20  ;;  %9104 = vmatpush1.bf16.msra.mxu0 %v10902_v5  ;;  %v2859_v5 = vld [vmem:[#allocation9 + $0xb98] sm:$0xff] }
 0x3a8   : > { %9135 = vmatprep.mubr.bf16.mxu0 %v12461_v31  ;;  %9276 = vmatpush1.bf16.msra.mxu1 %v10904_v9  ;;  %v11000_v9 = vcombine.low %v2843_v61, %v2851_v62  ;;  %v11017_v11 = vcombine.high %v2859_v5, %v2867_v7  ;;  %v2939_v61 = vld [vmem:[#allocation9 + $0xe18] sm:$0xff] }
 0x3a9   : > { %9307 = vmatprep.mubr.bf16.mxu1 %v12461_v31  ;;  %9105 = vmatprep.subr.bf16.mxu0 %v10919_v10  ;;  %v11015_v10 = vcombine.high %v2858_v2, %v2866_v4  ;;  %v2947_v62 = vld [vmem:[#allocation9 + $0xe58] sm:$0xff] }
 0x3aa   : > { %9277 = vmatprep.subr.bf16.mxu1 %v10921_v13  ;;  %v2882_v13 = vld [vmem:[#allocation9 + $0xc50] sm:$0xff] }
 0x3ab   : > { %9106 = vmatpush1.bf16.msra.mxu0 %v10918_v15  ;;  %v11014_v15 = vcombine.low %v2858_v2, %v2866_v4  ;;  %v2954_v2 = vld [vmem:[#allocation9 + $0xe90] sm:$0xff] }
 0x3ac   : > { %9278 = vmatpush1.bf16.msra.mxu1 %v10920_v16  ;;  %9107 = vmatprep.subr.bf16.mxu0 %v10935_v17  ;;  %v11016_v16 = vcombine.low %v2859_v5, %v2867_v7  ;;  %v11031_v17 = vcombine.high %v2874_v12, %v2882_v13  ;;  %v2962_v4 = vld [vmem:[#allocation9 + $0xed0] sm:$0xff]  ;;  %v2955_v5 = vld [vmem:[#allocation9 + $0xe98] sm:$0xff] }
 0x3ad   : > { %9279 = vmatprep.subr.bf16.mxu1 %v10937_v18  ;;  %v11033_v18 = vcombine.high %v2875_v14, %v2883_v53  ;;  %v2963_v7 = vld [vmem:[#allocation9 + $0xed8] sm:$0xff] }
 0x3af   : > { %9108 = vmatpush1.bf16.msra.mxu0 %v10934_v32  ;;  %v11030_v32 = vcombine.low %v2874_v12, %v2882_v13  ;;  %v2970_v12 = vld [vmem:[#allocation9 + $0xf10] sm:$0xff] }
 0x3b0   : > { %9280 = vmatpush1.bf16.msra.mxu1 %v10936_v33  ;;  %9109 = vmatprep.subr.bf16.mxu0 %v10951_v34  ;;  %v11032_v33 = vcombine.low %v2875_v14, %v2883_v53  ;;  %v11047_v34 = vcombine.high %v2890_v19, %v2898_v25  ;;  %v2978_v13 = vld [vmem:[#allocation9 + $0xf50] sm:$0xff]  ;;  %v2971_v14 = vld [vmem:[#allocation9 + $0xf18] sm:$0xff] }
 0x3b1   : > { %9281 = vmatprep.subr.bf16.mxu1 %v10953_v35  ;;  %v11049_v35 = vcombine.high %v2891_v27, %v2899_v29  ;;  %v2979_v53 = vld [vmem:[#allocation9 + $0xf58] sm:$0xff] }
 0x3b3   : > { %9110 = vmatpush1.bf16.msra.mxu0 %v10950_v40  ;;  %v11046_v40 = vcombine.low %v2890_v19, %v2898_v25  ;;  %v2986_v19 = vld [vmem:[#allocation9 + $0xf90] sm:$0xff] }
 0x3b4   : > { %9282 = vmatpush1.bf16.msra.mxu1 %v10952_v41  ;;  %9111 = vmatprep.subr.bf16.mxu0 %v10967_v56  ;;  %v11048_v41 = vcombine.low %v2891_v27, %v2899_v29  ;;  %v11063_v56 = vcombine.high %v2906_v36, %v2914_v37  ;;  %v2994_v25 = vld [vmem:[#allocation9 + $0xfd0] sm:$0xff]  ;;  %v2987_v27 = vld [vmem:[#allocation9 + $0xf98] sm:$0xff] }
 0x3b5   : > { %9283 = vmatprep.subr.bf16.mxu1 %v10969_v42  ;;  %v11065_v42 = vcombine.high %v2907_v38, %v2915_v39  ;;  %v2995_v29 = vld [vmem:[#allocation9 + $0xfd8] sm:$0xff] }
 0x3b7   : > { %9112 = vmatpush1.bf16.msra.mxu0 %v10966_v52  ;;  %v11062_v52 = vcombine.low %v2906_v36, %v2914_v37  ;;  %v3002_v36 = vld [vmem:[#allocation9 + $0x1010] sm:$0xff] }
 0x3b8   : > { %9284 = vmatpush1.bf16.msra.mxu1 %v10968_v57  ;;  %9113 = vmatprep.subr.bf16.mxu0 %v10983_v59  ;;  %v11064_v57 = vcombine.low %v2907_v38, %v2915_v39  ;;  %v11079_v59 = vcombine.high %v2922_v47, %v2930_v48  ;;  %v3010_v37 = vld [vmem:[#allocation9 + $0x1050] sm:$0xff]  ;;  %v3003_v38 = vld [vmem:[#allocation9 + $0x1018] sm:$0xff] }
 0x3b9   : > { %9285 = vmatprep.subr.bf16.mxu1 %v10985_v6  ;;  %v11081_v6 = vcombine.high %v2923_v49, %v2931_v51  ;;  %v3011_v39 = vld [vmem:[#allocation9 + $0x1058] sm:$0xff] }
 0x3bb   : > { %9114 = vmatpush1.bf16.msra.mxu0 %v10982_v63  ;;  %v11078_v63 = vcombine.low %v2922_v47, %v2930_v48  ;;  %v3018_v47 = vld [vmem:[#allocation9 + $0x1090] sm:$0xff] }
 0x3bc   : > { %9286 = vmatpush1.bf16.msra.mxu1 %v10984_v0  ;;  %9115 = vmatprep.subr.bf16.mxu0 %v10999_v1  ;;  %v11080_v0 = vcombine.low %v2923_v49, %v2931_v51  ;;  %v11095_v1 = vcombine.high %v2938_v21, %v2946_v60  ;;  %v3026_v48 = vld [vmem:[#allocation9 + $0x10d0] sm:$0xff]  ;;  %v11158_v49 = vcombine.low %v3002_v36, %v3010_v37  ;;  %v3019_v51 = vld [vmem:[#allocation9 + $0x1098] sm:$0xff] }
 0x3bd   : > { %9287 = vmatprep.subr.bf16.mxu1 %v11001_v3  ;;  %v11097_v3 = vcombine.high %v2939_v61, %v2947_v62 }
 0x3bf   : > { %9116 = vmatpush1.bf16.msra.mxu0 %v10998_v8  ;;  %v11094_v8 = vcombine.low %v2938_v21, %v2946_v60  ;;  %v3042_v21 = vld [vmem:[#allocation9 + $0x1150] sm:$0xff] }
 0x3c0   : > { %9288 = vmatpush1.bf16.msra.mxu1 %v11000_v9  ;;  %9117 = vmatprep.subr.bf16.mxu0 %v11015_v10  ;;  %v11096_v9 = vcombine.low %v2939_v61, %v2947_v62  ;;  %v11111_v10 = vcombine.high %v2954_v2, %v2962_v4  ;;  %v3035_v61 = vld [vmem:[#allocation9 + $0x1118] sm:$0xff] }
 0x3c1   : > { %9289 = vmatprep.subr.bf16.mxu1 %v11017_v11  ;;  %v11113_v11 = vcombine.high %v2955_v5, %v2963_v7  ;;  %v3043_v62 = vld [vmem:[#allocation9 + $0x1158] sm:$0xff] }
 0x3c3   : > { %9118 = vmatpush1.bf16.msra.mxu0 %v11014_v15  ;;  %v11110_v15 = vcombine.low %v2954_v2, %v2962_v4  ;;  %v3050_v2 = vld [vmem:[#allocation9 + $0x1190] sm:$0xff] }
 0x3c4   : > { %9290 = vmatpush1.bf16.msra.mxu1 %v11016_v16  ;;  %9119 = vmatprep.subr.bf16.mxu0 %v11031_v17  ;;  %v11112_v16 = vcombine.low %v2955_v5, %v2963_v7  ;;  %v11127_v17 = vcombine.high %v2970_v12, %v2978_v13  ;;  %v3058_v4 = vld [vmem:[#allocation9 + $0x11d0] sm:$0xff]  ;;  %v3051_v5 = vld [vmem:[#allocation9 + $0x1198] sm:$0xff] }
 0x3c5   : > { %9291 = vmatprep.subr.bf16.mxu1 %v11033_v18  ;;  %v11129_v18 = vcombine.high %v2971_v14, %v2979_v53  ;;  %v3059_v7 = vld [vmem:[#allocation9 + $0x11d8] sm:$0xff] }
 0x3c7   : > { %9120 = vmatpush1.bf16.msra.mxu0 %v11030_v32  ;;  %v11126_v32 = vcombine.low %v2970_v12, %v2978_v13  ;;  %v3066_v12 = vld [vmem:[#allocation9 + $0x1210] sm:$0xff] }
 0x3c8   : > { %9292 = vmatpush1.bf16.msra.mxu1 %v11032_v33  ;;  %9121 = vmatprep.subr.bf16.mxu0 %v11047_v34  ;;  %v11128_v33 = vcombine.low %v2971_v14, %v2979_v53  ;;  %v11143_v34 = vcombine.high %v2986_v19, %v2994_v25  ;;  %v3074_v13 = vld [vmem:[#allocation9 + $0x1250] sm:$0xff]  ;;  %v3067_v14 = vld [vmem:[#allocation9 + $0x1218] sm:$0xff] }
 0x3c9   : > { %9293 = vmatprep.subr.bf16.mxu1 %v11049_v35  ;;  %v11145_v35 = vcombine.high %v2987_v27, %v2995_v29  ;;  %v3075_v53 = vld [vmem:[#allocation9 + $0x1258] sm:$0xff] }
 0x3cb   : > { %9122 = vmatpush1.bf16.msra.mxu0 %v11046_v40  ;;  %v11142_v40 = vcombine.low %v2986_v19, %v2994_v25  ;;  %v3082_v19 = vld [vmem:[#allocation9 + $0x1290] sm:$0xff] }
 0x3cc   : > { %9294 = vmatpush1.bf16.msra.mxu1 %v11048_v41  ;;  %9123 = vmatprep.subr.bf16.mxu0 %v11063_v56  ;;  %v11144_v41 = vcombine.low %v2987_v27, %v2995_v29  ;;  %v11159_v56 = vcombine.high %v3002_v36, %v3010_v37  ;;  %v3090_v25 = vld [vmem:[#allocation9 + $0x12d0] sm:$0xff]  ;;  %v3083_v27 = vld [vmem:[#allocation9 + $0x1298] sm:$0xff] }
 0x3cd   : > { %9295 = vmatprep.subr.bf16.mxu1 %v11065_v42  ;;  %v11161_v42 = vcombine.high %v3003_v38, %v3011_v39  ;;  %v3091_v29 = vld [vmem:[#allocation9 + $0x12d8] sm:$0xff]  ;;  %v3098_v36 = vld [vmem:[#allocation9 + $0x1310] sm:$0xff] }
 0x3ce   : > { %v3106_v37 = vld [vmem:[#allocation9 + $0x1350] sm:$0xff] }
 0x3cf   : > { %9124 = vmatpush1.bf16.msra.mxu0 %v11062_v52  ;;  %v3027_v52 = vld [vmem:[#allocation9 + $0x10d8] sm:$0xff] }
 0x3d0   : > { %9296 = vmatpush1.bf16.msra.mxu1 %v11064_v57  ;;  %9125 = vmatprep.subr.bf16.mxu0 %v11079_v59  ;;  %v11160_v57 = vcombine.low %v3003_v38, %v3011_v39  ;;  %v11175_v59 = vcombine.high %v3018_v47, %v3026_v48  ;;  %v11177_v60 = vcombine.high %v3019_v51, %v3027_v52  ;;  %v3099_v38 = vld [vmem:[#allocation9 + $0x1318] sm:$0xff] }
 0x3d1   : > { %9297 = vmatprep.subr.bf16.mxu1 %v11081_v6  ;;  %v3034_v6 = vld [vmem:[#allocation9 + $0x1110] sm:$0xff]  ;;  %v3107_v39 = vld [vmem:[#allocation9 + $0x1358] sm:$0xff] }
 0x3d3   : > { %9126 = vmatpush1.bf16.msra.mxu0 %v11078_v63  ;;  %v11174_v63 = vcombine.low %v3018_v47, %v3026_v48  ;;  %v3114_v47 = vld [vmem:[#allocation9 + $0x1390] sm:$0xff] }
 0x3d4   : > { %9298 = vmatpush1.bf16.msra.mxu1 %v11080_v0  ;;  %9127 = vmatprep.subr.bf16.mxu0 %v11095_v1  ;;  %v11176_v0 = vcombine.low %v3019_v51, %v3027_v52  ;;  %v11191_v1 = vcombine.high %v3034_v6, %v3042_v21  ;;  %v3122_v48 = vld [vmem:[#allocation9 + $0x13d0] sm:$0xff]  ;;  %v3123_v51 = vld [vmem:[#allocation9 + $0x13d8] sm:$0xff]  ;;  %v11254_v52 = vcombine.low %v3098_v36, %v3106_v37 }
 0x3d5   : > { %9299 = vmatprep.subr.bf16.mxu1 %v11097_v3  ;;  %v11193_v3 = vcombine.high %v3035_v61, %v3043_v62 }
 0x3d7   : > { %9128 = vmatpush1.bf16.msra.mxu0 %v11094_v8  ;;  %v11190_v8 = vcombine.low %v3034_v6, %v3042_v21  ;;  %v3130_v21 = vld [vmem:[#allocation9 + $0x1410] sm:$0xff] }
 0x3d8   : > { %9300 = vmatpush1.bf16.msra.mxu1 %v11096_v9  ;;  %9129 = vmatprep.subr.bf16.mxu0 %v11111_v10  ;;  %v11192_v9 = vcombine.low %v3035_v61, %v3043_v62  ;;  %v11207_v10 = vcombine.high %v3050_v2, %v3058_v4  ;;  %v3131_v61 = vld [vmem:[#allocation9 + $0x1418] sm:$0xff] }
 0x3d9   : > { %9301 = vmatprep.subr.bf16.mxu1 %v11113_v11  ;;  %v11209_v11 = vcombine.high %v3051_v5, %v3059_v7  ;;  %v3139_v62 = vld [vmem:[#allocation9 + $0x1458] sm:$0xff] }
 0x3db   : > { %9130 = vmatpush1.bf16.msra.mxu0 %v11110_v15  ;;  %v11206_v15 = vcombine.low %v3050_v2, %v3058_v4  ;;  %v3146_v2 = vld [vmem:[#allocation9 + $0x1490] sm:$0xff] }
 0x3dc   : > { %9302 = vmatpush1.bf16.msra.mxu1 %v11112_v16  ;;  %9131 = vmatprep.subr.bf16.mxu0 %v11127_v17  ;;  %v11208_v16 = vcombine.low %v3051_v5, %v3059_v7  ;;  %v11223_v17 = vcombine.high %v3066_v12, %v3074_v13  ;;  %v3154_v4 = vld [vmem:[#allocation9 + $0x14d0] sm:$0xff]  ;;  %v3147_v5 = vld [vmem:[#allocation9 + $0x1498] sm:$0xff] }
 0x3dd   : > { %9303 = vmatprep.subr.bf16.mxu1 %v11129_v18  ;;  %v11225_v18 = vcombine.high %v3067_v14, %v3075_v53  ;;  %v3155_v7 = vld [vmem:[#allocation9 + $0x14d8] sm:$0xff] }
 0x3df   : > { %9132 = vmatpush1.bf16.msra.mxu0 %v11126_v32  ;;  %v11222_v32 = vcombine.low %v3066_v12, %v3074_v13  ;;  %v3162_v12 = vld [vmem:[#allocation9 + $0x1510] sm:$0xff] }
 0x3e0   : > { %9304 = vmatpush1.bf16.msra.mxu1 %v11128_v33  ;;  %9133 = vmatprep.subr.bf16.mxu0 %v11143_v34  ;;  %v11224_v33 = vcombine.low %v3067_v14, %v3075_v53  ;;  %v11239_v34 = vcombine.high %v3082_v19, %v3090_v25  ;;  %v3170_v13 = vld [vmem:[#allocation9 + $0x1550] sm:$0xff]  ;;  %v3163_v14 = vld [vmem:[#allocation9 + $0x1518] sm:$0xff] }
 0x3e1   : > { %9305 = vmatprep.subr.bf16.mxu1 %v11145_v35  ;;  %v11241_v35 = vcombine.high %v3083_v27, %v3091_v29  ;;  %v3171_v53 = vld [vmem:[#allocation9 + $0x1558] sm:$0xff] }
 0x3e3   : > { %9134 = vmatpush1.bf16.msra.mxu0 %v11142_v40  ;;  %v11238_v40 = vcombine.low %v3082_v19, %v3090_v25  ;;  %v3178_v19 = vld [vmem:[#allocation9 + $0x1590] sm:$0xff] }
 0x3e4   : > { %9306 = vmatpush1.bf16.msra.mxu1 %v11144_v41  ;;  %9146 = vmatprep.subr.bf16.mxu0 %v11159_v56  ;;  %v11240_v41 = vcombine.low %v3083_v27, %v3091_v29  ;;  %v11255_v56 = vcombine.high %v3098_v36, %v3106_v37  ;;  %v3186_v25 = vld [vmem:[#allocation9 + $0x15d0] sm:$0xff]  ;;  %v3179_v27 = vld [vmem:[#allocation9 + $0x1598] sm:$0xff] }
 0x3e5   : > { %9318 = vmatprep.subr.bf16.mxu1 %v11161_v42  ;;  %v11257_v42 = vcombine.high %v3099_v38, %v3107_v39  ;;  %v3187_v29 = vld [vmem:[#allocation9 + $0x15d8] sm:$0xff]  ;;  %v3194_v36 = vld [vmem:[#allocation9 + $0x1610] sm:$0xff] }
 0x3e6   : > { %9136 = vmatmul.mubr.bf16.vlgmr.msra.gmra.mrb[16].mxu0 %v12457_v23  ;;  %v3202_v37 = vld [vmem:[#allocation9 + $0x1650] sm:$0xff] }
 0x3e7   : > { %9308 = vmatmul.mubr.bf16.vlgmr.msra.gmra.mrb[16].mxu1 %v12457_v23  ;;  %9147 = vmatpush1.bf16.msra.mxu0 %v11158_v49  ;;  %v3115_v49 = vld [vmem:[#allocation9 + $0x1398] sm:$0xff] }
 0x3e8   : > { %9178 = vmatprep.mubr.bf16.mxu0 %v12499_v55  ;;  %9319 = vmatpush1.bf16.msra.mxu1 %v11160_v57  ;;  %v11256_v57 = vcombine.low %v3099_v38, %v3107_v39  ;;  %v11273_v6 = vcombine.high %v3115_v49, %v3123_v51  ;;  %v3195_v38 = vld [vmem:[#allocation9 + $0x1618] sm:$0xff] }
 0x3e9   : > { %9350 = vmatprep.mubr.bf16.mxu1 %v12499_v55  ;;  %9148 = vmatprep.subr.bf16.mxu0 %v11175_v59  ;;  %v11271_v59 = vcombine.high %v3114_v47, %v3122_v48  ;;  %v3203_v39 = vld [vmem:[#allocation9 + $0x1658] sm:$0xff] }
 0x3ea   : > { %9320 = vmatprep.subr.bf16.mxu1 %v11177_v60  ;;  %v3138_v60 = vld [vmem:[#allocation9 + $0x1450] sm:$0xff] }
 0x3eb   : > { %9149 = vmatpush1.bf16.msra.mxu0 %v11174_v63  ;;  %v11270_v63 = vcombine.low %v3114_v47, %v3122_v48  ;;  %v3210_v47 = vld [vmem:[#allocation9 + $0x1690] sm:$0xff] }
 0x3ec   : > { %9321 = vmatpush1.bf16.msra.mxu1 %v11176_v0  ;;  %9150 = vmatprep.subr.bf16.mxu0 %v11191_v1  ;;  %v11272_v0 = vcombine.low %v3115_v49, %v3123_v51  ;;  %v11287_v1 = vcombine.high %v3130_v21, %v3138_v60  ;;  %v3218_v48 = vld [vmem:[#allocation9 + $0x16d0] sm:$0xff]  ;;  %v3211_v49 = vld [vmem:[#allocation9 + $0x1698] sm:$0xff] }
 0x3ed   : > { %9322 = vmatprep.subr.bf16.mxu1 %v11193_v3  ;;  %v11289_v3 = vcombine.high %v3131_v61, %v3139_v62  ;;  %v3219_v51 = vld [vmem:[#allocation9 + $0x16d8] sm:$0xff] }
 0x3ef   : > { %9151 = vmatpush1.bf16.msra.mxu0 %v11190_v8  ;;  %v11286_v8 = vcombine.low %v3130_v21, %v3138_v60  ;;  %v3226_v21 = vld [vmem:[#allocation9 + $0x1710] sm:$0xff] }
 0x3f0   : > { %9323 = vmatpush1.bf16.msra.mxu1 %v11192_v9  ;;  %9152 = vmatprep.subr.bf16.mxu0 %v11207_v10  ;;  %v11288_v9 = vcombine.low %v3131_v61, %v3139_v62  ;;  %v11303_v10 = vcombine.high %v3146_v2, %v3154_v4  ;;  %v3234_v60 = vld [vmem:[#allocation9 + $0x1750] sm:$0xff]  ;;  %v3227_v61 = vld [vmem:[#allocation9 + $0x1718] sm:$0xff] }
 0x3f1   : > { %9324 = vmatprep.subr.bf16.mxu1 %v11209_v11  ;;  %v11305_v11 = vcombine.high %v3147_v5, %v3155_v7  ;;  %v3235_v62 = vld [vmem:[#allocation9 + $0x1758] sm:$0xff] }
 0x3f3   : > { %9153 = vmatpush1.bf16.msra.mxu0 %v11206_v15  ;;  %v11302_v15 = vcombine.low %v3146_v2, %v3154_v4  ;;  %v3242_v2 = vld [vmem:[#allocation9 + $0x1790] sm:$0xff] }
 0x3f4   : > { %9325 = vmatpush1.bf16.msra.mxu1 %v11208_v16  ;;  %9154 = vmatprep.subr.bf16.mxu0 %v11223_v17  ;;  %v11304_v16 = vcombine.low %v3147_v5, %v3155_v7  ;;  %v11319_v17 = vcombine.high %v3162_v12, %v3170_v13  ;;  %v3250_v4 = vld [vmem:[#allocation9 + $0x17d0] sm:$0xff]  ;;  %v3243_v5 = vld [vmem:[#allocation9 + $0x1798] sm:$0xff] }
 0x3f5   : > { %9326 = vmatprep.subr.bf16.mxu1 %v11225_v18  ;;  %v11321_v18 = vcombine.high %v3163_v14, %v3171_v53  ;;  %v3251_v7 = vld [vmem:[#allocation9 + $0x17d8] sm:$0xff] }
 0x3f7   : > { %9155 = vmatpush1.bf16.msra.mxu0 %v11222_v32  ;;  %v11318_v32 = vcombine.low %v3162_v12, %v3170_v13  ;;  %v3258_v12 = vld [vmem:[#allocation9 + $0x1810] sm:$0xff] }
 0x3f8   : > { %9327 = vmatpush1.bf16.msra.mxu1 %v11224_v33  ;;  %9156 = vmatprep.subr.bf16.mxu0 %v11239_v34  ;;  %v11320_v33 = vcombine.low %v3163_v14, %v3171_v53  ;;  %v11335_v34 = vcombine.high %v3178_v19, %v3186_v25  ;;  %v3266_v13 = vld [vmem:[#allocation9 + $0x1850] sm:$0xff]  ;;  %v3259_v14 = vld [vmem:[#allocation9 + $0x1818] sm:$0xff] }
 0x3f9   : > { %9328 = vmatprep.subr.bf16.mxu1 %v11241_v35  ;;  %v11337_v35 = vcombine.high %v3179_v27, %v3187_v29  ;;  %v3267_v53 = vld [vmem:[#allocation9 + $0x1858] sm:$0xff] }
 0x3fb   : > { %9157 = vmatpush1.bf16.msra.mxu0 %v11238_v40  ;;  %v11334_v40 = vcombine.low %v3178_v19, %v3186_v25  ;;  %v3274_v19 = vld [vmem:[#allocation9 + $0x1890] sm:$0xff] }
 0x3fc   : > { %9329 = vmatpush1.bf16.msra.mxu1 %v11240_v41  ;;  %9158 = vmatprep.subr.bf16.mxu0 %v11255_v56  ;;  %v11336_v41 = vcombine.low %v3179_v27, %v3187_v29  ;;  %v11351_v56 = vcombine.high %v3194_v36, %v3202_v37  ;;  %v3282_v25 = vld [vmem:[#allocation9 + $0x18d0] sm:$0xff]  ;;  %v11414_v27 = vcombine.low %v3258_v12, %v3266_v13  ;;  %v3275_v29 = vld [vmem:[#allocation9 + $0x1898] sm:$0xff] }
 0x3fd   : > { %9330 = vmatprep.subr.bf16.mxu1 %v11257_v42  ;;  %v11353_v42 = vcombine.high %v3195_v38, %v3203_v39 }
 0x3ff   : > { %9159 = vmatpush1.bf16.msra.mxu0 %v11254_v52  ;;  %v11350_v52 = vcombine.low %v3194_v36, %v3202_v37  ;;  %v3298_v36 = vld [vmem:[#allocation9 + $0x1950] sm:$0xff] }
 0x400   : > { %9331 = vmatpush1.bf16.msra.mxu1 %v11256_v57  ;;  %9160 = vmatprep.subr.bf16.mxu0 %v11271_v59  ;;  %v11352_v57 = vcombine.low %v3195_v38, %v3203_v39  ;;  %v11367_v59 = vcombine.high %v3210_v47, %v3218_v48  ;;  %v3291_v38 = vld [vmem:[#allocation9 + $0x1918] sm:$0xff] }
 0x401   : > { %9332 = vmatprep.subr.bf16.mxu1 %v11273_v6  ;;  %v11369_v6 = vcombine.high %v3211_v49, %v3219_v51  ;;  %v3299_v39 = vld [vmem:[#allocation9 + $0x1958] sm:$0xff] }
 0x403   : > { %9161 = vmatpush1.bf16.msra.mxu0 %v11270_v63  ;;  %v11366_v63 = vcombine.low %v3210_v47, %v3218_v48  ;;  %v3306_v47 = vld [vmem:[#allocation9 + $0x1990] sm:$0xff] }
 0x404   : > { %9333 = vmatpush1.bf16.msra.mxu1 %v11272_v0  ;;  %9162 = vmatprep.subr.bf16.mxu0 %v11287_v1  ;;  %v11368_v0 = vcombine.low %v3211_v49, %v3219_v51  ;;  %v11383_v1 = vcombine.high %v3226_v21, %v3234_v60  ;;  %v3314_v48 = vld [vmem:[#allocation9 + $0x19d0] sm:$0xff]  ;;  %v3307_v49 = vld [vmem:[#allocation9 + $0x1998] sm:$0xff] }
 0x405   : > { %9334 = vmatprep.subr.bf16.mxu1 %v11289_v3  ;;  %v11385_v3 = vcombine.high %v3227_v61, %v3235_v62  ;;  %v3315_v51 = vld [vmem:[#allocation9 + $0x19d8] sm:$0xff] }
 0x407   : > { %9163 = vmatpush1.bf16.msra.mxu0 %v11286_v8  ;;  %v11382_v8 = vcombine.low %v3226_v21, %v3234_v60  ;;  %v3322_v21 = vld [vmem:[#allocation9 + $0x1a10] sm:$0xff] }
 0x408   : > { %9335 = vmatpush1.bf16.msra.mxu1 %v11288_v9  ;;  %9164 = vmatprep.subr.bf16.mxu0 %v11303_v10  ;;  %v11384_v9 = vcombine.low %v3227_v61, %v3235_v62  ;;  %v11399_v10 = vcombine.high %v3242_v2, %v3250_v4  ;;  %v3330_v60 = vld [vmem:[#allocation9 + $0x1a50] sm:$0xff]  ;;  %v3323_v61 = vld [vmem:[#allocation9 + $0x1a18] sm:$0xff] }
 0x409   : > { %9336 = vmatprep.subr.bf16.mxu1 %v11305_v11  ;;  %v11401_v11 = vcombine.high %v3243_v5, %v3251_v7  ;;  %v3331_v62 = vld [vmem:[#allocation9 + $0x1a58] sm:$0xff] }
 0x40b   : > { %9165 = vmatpush1.bf16.msra.mxu0 %v11302_v15  ;;  %v11398_v15 = vcombine.low %v3242_v2, %v3250_v4  ;;  %v3338_v2 = vld [vmem:[#allocation9 + $0x1a90] sm:$0xff] }
 0x40c   : > { %9337 = vmatpush1.bf16.msra.mxu1 %v11304_v16  ;;  %9166 = vmatprep.subr.bf16.mxu0 %v11319_v17  ;;  %v11400_v16 = vcombine.low %v3243_v5, %v3251_v7  ;;  %v11415_v17 = vcombine.high %v3258_v12, %v3266_v13  ;;  %v3346_v4 = vld [vmem:[#allocation9 + $0x1ad0] sm:$0xff]  ;;  %v3339_v5 = vld [vmem:[#allocation9 + $0x1a98] sm:$0xff] }
 0x40d   : > { %9338 = vmatprep.subr.bf16.mxu1 %v11321_v18  ;;  %v11417_v18 = vcombine.high %v3259_v14, %v3267_v53  ;;  %v3347_v7 = vld [vmem:[#allocation9 + $0x1ad8] sm:$0xff]  ;;  %v3354_v13 = vld [vmem:[#allocation9 + $0x1b10] sm:$0xff] }
 0x40e   : > { %v11497_v12 = vcombine.high %v3339_v5, %v3347_v7 }
 0x40f   : > { %9167 = vmatpush1.bf16.msra.mxu0 %v11318_v32  ;;  %v3283_v32 = vld [vmem:[#allocation9 + $0x18d8] sm:$0xff] }
 0x410   : > { %9339 = vmatpush1.bf16.msra.mxu1 %v11320_v33  ;;  %9168 = vmatprep.subr.bf16.mxu0 %v11335_v34  ;;  %v11416_v33 = vcombine.low %v3259_v14, %v3267_v53  ;;  %v11431_v34 = vcombine.high %v3274_v19, %v3282_v25  ;;  %v11433_v37 = vcombine.high %v3275_v29, %v3283_v32  ;;  %v3362_v14 = vld [vmem:[#allocation9 + $0x1b50] sm:$0xff] }
 0x411   : > { %9340 = vmatprep.subr.bf16.mxu1 %v11337_v35  ;;  %v3290_v35 = vld [vmem:[#allocation9 + $0x1910] sm:$0xff] }
 0x413   : > { %9169 = vmatpush1.bf16.msra.mxu0 %v11334_v40  ;;  %v11430_v40 = vcombine.low %v3274_v19, %v3282_v25  ;;  %v11494_v25 = vcombine.low %v3338_v2, %v3346_v4 }
 0x414   : > { %9341 = vmatpush1.bf16.msra.mxu1 %v11336_v41  ;;  %9170 = vmatprep.subr.bf16.mxu0 %v11351_v56  ;;  %v11432_v41 = vcombine.low %v3275_v29, %v3283_v32  ;;  %v11447_v56 = vcombine.high %v3290_v35, %v3298_v36  ;;  %v11496_v29 = vcombine.low %v3339_v5, %v3347_v7  ;;  %v3394_v5 = vld [vmem:[#allocation9 + $0x1c50] sm:$0xff] }
 0x415   : > { %9342 = vmatprep.subr.bf16.mxu1 %v11353_v42  ;;  %v11449_v42 = vcombine.high %v3291_v38, %v3299_v39  ;;  %v11511_v32 = vcombine.high %v3354_v13, %v3362_v14 }
 0x417   : > { %9171 = vmatpush1.bf16.msra.mxu0 %v11350_v52  ;;  %v11446_v52 = vcombine.low %v3290_v35, %v3298_v36  ;;  %v12535_v35 = vld [vmem:[#allocation9 + $0x1bd8] sm:$0xff] }
 0x418   : > { %9343 = vmatpush1.bf16.msra.mxu1 %v11352_v57  ;;  %9172 = vmatprep.subr.bf16.mxu0 %v11367_v59  ;;  %v11448_v57 = vcombine.low %v3291_v38, %v3299_v39  ;;  %v11463_v59 = vcombine.high %v3306_v47, %v3314_v48 }
 0x419   : > { %9344 = vmatprep.subr.bf16.mxu1 %v11369_v6  ;;  %v11465_v6 = vcombine.high %v3307_v49, %v3315_v51 }
 0x41b   : > { %9173 = vmatpush1.bf16.msra.mxu0 %v11366_v63  ;;  %v11462_v63 = vcombine.low %v3306_v47, %v3314_v48 }
 0x41c   : > { %9345 = vmatpush1.bf16.msra.mxu1 %v11368_v0  ;;  %9174 = vmatprep.subr.bf16.mxu0 %v11383_v1  ;;  %v11464_v0 = vcombine.low %v3307_v49, %v3315_v51  ;;  %v11479_v1 = vcombine.high %v3322_v21, %v3330_v60 }
 0x41d   : > { %9346 = vmatprep.subr.bf16.mxu1 %v11385_v3  ;;  %v11481_v3 = vcombine.high %v3323_v61, %v3331_v62 }
 0x41f   : > { %9175 = vmatpush1.bf16.msra.mxu0 %v11382_v8  ;;  %v11478_v8 = vcombine.low %v3322_v21, %v3330_v60 }
 0x420   : > { %9347 = vmatpush1.bf16.msra.mxu1 %v11384_v9  ;;  %9176 = vmatprep.subr.bf16.mxu0 %v11399_v10  ;;  %v3512_v9 = vld [vmem:[#allocation10] sm:$0xff]  ;;  %v11480_v10 = vcombine.low %v3323_v61, %v3331_v62 }
 0x421   : > { %9348 = vmatprep.subr.bf16.mxu1 %v11401_v11  ;;  %v11495_v11 = vcombine.high %v3338_v2, %v3346_v4  ;;  %v3519_v53 = vrot.slane %v3512_v9, %v12394_v22  ;;  %v3531_v19 = vrot.slane %v3512_v9, %v12405_v28  ;;  %v3386_v4 = vld [vmem:[#allocation9 + $0x1c10] sm:$0xff] }
 0x423   : > { %9177 = vmatpush1.bf16.msra.mxu0 %v11398_v15  ;;  %v3527_v15 = vrot.slane %v3512_v9, %v12401_v26 }
 0x424   : > { %9349 = vmatpush1.bf16.msra.mxu1 %v11400_v16  ;;  %9189 = vmatprep.subr.bf16.mxu0 %v11415_v17  ;;  %v3355_v16 = vld [vmem:[#allocation9 + $0x1b18] sm:$0xff] }
 0x425   : > { %9361 = vmatprep.subr.bf16.mxu1 %v11417_v18  ;;  %v3363_v17 = vld [vmem:[#allocation9 + $0x1b58] sm:$0xff]  ;;  %v3523_v18 = vrot.slane %v3512_v9, %v12397_v24 }
 0x426   : > { %9179 = vmatmul.mubr.bf16.vlgmr.msra.gmra.mrb[16].mxu0 %v12495_v44  ;;  %v11513_v38 = vcombine.high %v3355_v16, %v3363_v17  ;;  %v11512_v47 = vcombine.low %v3355_v16, %v3363_v17  ;;  %v11543_v16 = vcombine.high %v3386_v4, %v3394_v5 }
 0x427   : > { %9351 = vmatmul.mubr.bf16.vlgmr.msra.gmra.mrb[16].mxu1 %v12495_v44  ;;  %9190 = vmatpush1.bf16.msra.mxu0 %v11414_v27  ;;  %v12529_v27 = vld [vmem:[#allocation9 + $0x1b90] sm:$0xff] }
 0x428   : > { %9221 = vmatprep.mubr.bf16.mxu0 %v12501_v58  ;;  %9362 = vmatpush1.bf16.msra.mxu1 %v11416_v33  ;;  %v12531_v33 = vld [vmem:[#allocation9 + $0x1bd0] sm:$0xff] }
 0x429   : > { %9393 = vmatprep.mubr.bf16.mxu1 %v12501_v58  ;;  %9191 = vmatprep.subr.bf16.mxu0 %v11431_v34  ;;  %v12533_v34 = vld [vmem:[#allocation9 + $0x1b98] sm:$0xff]  ;;  %v11526_v9 = vcombine.low %v12529_v27, %v12531_v33 }
 0x42a   : > { %9363 = vmatprep.subr.bf16.mxu1 %v11433_v37 }
 0x42b   : > { %9192 = vmatpush1.bf16.msra.mxu0 %v11430_v40 }
 0x42c   : > { %9364 = vmatpush1.bf16.msra.mxu1 %v11432_v41  ;;  %9193 = vmatprep.subr.bf16.mxu0 %v11447_v56 }
 0x42d   : > { %9365 = vmatprep.subr.bf16.mxu1 %v11449_v42  ;;  %v11510_v42 = vcombine.low %v3354_v13, %v3362_v14 }
 0x42f   : > { %9194 = vmatpush1.bf16.msra.mxu0 %v11446_v52 }
 0x430   : > { %9366 = vmatpush1.bf16.msra.mxu1 %v11448_v57  ;;  %9195 = vmatprep.subr.bf16.mxu0 %v11463_v59  ;;  %v11527_v57 = vcombine.high %v12529_v27, %v12531_v33  ;;  %v11529_v59 = vcombine.high %v12533_v34, %v12535_v35  ;;  %v3410_v27 = vld [vmem:[#allocation9 + $0x1cd0] sm:$0xff]  ;;  %v11542_v33 = vcombine.low %v3386_v4, %v3394_v5 }
 0x431   : > { %9367 = vmatprep.subr.bf16.mxu1 %v11465_v6  ;;  %v3466_v4 = vld [vmem:[#allocation9 + $0x1e90] sm:$0xff] }
 0x432   : > { %v3474_v5 = vld [vmem:[#allocation9 + $0x1ed0] sm:$0xff] }
 0x433   : > { %9196 = vmatpush1.bf16.msra.mxu0 %v11462_v63 }
 0x434   : > { %9368 = vmatpush1.bf16.msra.mxu1 %v11464_v0  ;;  %9197 = vmatprep.subr.bf16.mxu0 %v11479_v1 }
 0x435   : > { %9369 = vmatprep.subr.bf16.mxu1 %v11481_v3 }
 0x437   : > { %9198 = vmatpush1.bf16.msra.mxu0 %v11478_v8 }
 0x438   : > { %9370 = vmatpush1.bf16.msra.mxu1 %v11480_v10  ;;  %9199 = vmatprep.subr.bf16.mxu0 %v11495_v11  ;;  %v3387_v10 = vld [vmem:[#allocation9 + $0x1c18] sm:$0xff] }
 0x439   : > { %v8879_v36 = vpop.f32.mrb[12].mxu0  ;;  %v9051_v37 = vpop.f32.mrb[12].mxu1  ;;  %9371 = vmatprep.subr.bf16.mxu1 %v11497_v12  ;;  %v3395_v11 = vld [vmem:[#allocation9 + $0x1c58] sm:$0xff] }
 0x43a   : > { %v11717_v39 = vadd.f32 %v8879_v36, %v3519_v53  ;;  %v11721_v40 = vadd.f32 %v9051_v37, %v3527_v15  ;;  %v8881_v41 = vpop.f32.mrb[13].mxu0  ;;  %v9053_v56 = vpop.f32.mrb[13].mxu1  ;;  %v11544_v36 = vcombine.low %v3387_v10, %v3395_v11 }
 0x43b   : > { %v11718_v48 = vadd.f32 %v8881_v41, %v3523_v18  ;;  %v11722_v49 = vadd.f32 %v9053_v56, %v3531_v19  ;;  %v8883_v51 = vpop.f32.mrb[14].mxu0  ;;  %v9055_v52 = vpop.f32.mrb[14].mxu1  ;;  %9200 = vmatpush1.bf16.msra.mxu0 %v11494_v25  ;;  %v3402_v25 = vld [vmem:[#allocation9 + $0x1c90] sm:$0xff] }
 0x43c   : > { %v10092_v6 = vmax.f32 %v11717_v39, 0.0  ;;  %v10094_v21 = vmax.f32 %v11721_v40, 0.0  ;;  %v11719_v60 = vadd.f32 %v8883_v51, %v3519_v53  ;;  %v11723_v61 = vadd.f32 %v9055_v52, %v3527_v15  ;;  %9372 = vmatpush1.bf16.msra.mxu1 %v11496_v29  ;;  %v8885_v62 = vpop.f32.mrb[15].mxu0  ;;  %v9057_v63 = vpop.f32.mrb[15].mxu1  ;;  %9201 = vmatprep.subr.bf16.mxu0 %v11511_v32  ;;  %v3403_v29 = vld [vmem:[#allocation9 + $0x1c98] sm:$0xff] }
 0x43d   : > { %v10093_v0 = vmax.f32 %v11718_v48, 0.0  ;;  %v10095_v1 = vmax.f32 %v11722_v49, 0.0  ;;  %v11720_v3 = vadd.f32 %v8885_v62, %v3523_v18  ;;  %v11724_v2 = vadd.f32 %v9057_v63, %v3531_v19  ;;  %9373 = vmatprep.subr.bf16.mxu1 %v11513_v38  ;;  %v3411_v32 = vld [vmem:[#allocation9 + $0x1cd8] sm:$0xff]  ;;  %v3426_v38 = vld [vmem:[#allocation9 + $0x1d50] sm:$0xff] }
 0x43e   : > { %v10108_v7 = vmax.f32 %v11719_v60, 0.0  ;;  %v10110_v8 = vmax.f32 %v11723_v61, 0.0  ;;  %v11528_v15 = vcombine.low %v12533_v34, %v12535_v35  ;;  %v11545_v19 = vcombine.high %v3387_v10, %v3395_v11  ;;  %v3418_v35 = vld [vmem:[#allocation9 + $0x1d10] sm:$0xff]  ;;  %v3419_v39 = vld [vmem:[#allocation9 + $0x1d18] sm:$0xff] }
 0x43f   : > { %v11685_v12 = vpack.c.bf16 %v10093_v0, %v10092_v6  ;;  %v11686_v13 = vpack.c.bf16 %v10095_v1, %v10094_v21  ;;  %v10109_v14 = vmax.f32 %v11720_v3, 0.0  ;;  %v10111_v53 = vmax.f32 %v11724_v2, 0.0  ;;  %9202 = vmatpush1.bf16.msra.mxu0 %v11510_v42  ;;  %v3427_v40 = vld [vmem:[#allocation9 + $0x1d58] sm:$0xff]  ;;  %v3434_v48 = vld [vmem:[#allocation9 + $0x1d90] sm:$0xff] }
 0x440   : > { %9374 = vmatpush1.bf16.msra.mxu1 %v11512_v47  ;;  %9203 = vmatprep.subr.bf16.mxu0 %v11527_v57  ;;  %v11559_v37 = vcombine.high %v3402_v25, %v3410_v27  ;;  %v11561_v34 = vcombine.high %v3403_v29, %v3411_v32  ;;  %v11558_v41 = vcombine.low %v3402_v25, %v3410_v27  ;;  %v3442_v49 = vld [vmem:[#allocation9 + $0x1dd0] sm:$0xff]  ;;  %v3435_v51 = vld [vmem:[#allocation9 + $0x1d98] sm:$0xff] }
 0x441   : > { %10220 = vst [vmem:[%s12545_s30] sm:$0xff] %v11685_v12  ;;  %10221 = vst [vmem:[%s12545_s30 + $0x8] sm:$0xff] %v11686_v13  ;;  %v11693_v17 = vpack.c.bf16 %v10109_v14, %v10108_v7  ;;  %v11694_v18 = vpack.c.bf16 %v10111_v53, %v10110_v8  ;;  %9375 = vmatprep.subr.bf16.mxu1 %v11529_v59  ;;  %v11560_v56 = vcombine.low %v3403_v29, %v3411_v32  ;;  %v3443_v52 = vld [vmem:[#allocation9 + $0x1dd8] sm:$0xff]  ;;  %v3450_v60 = vld [vmem:[#allocation9 + $0x1e10] sm:$0xff] }
 0x442   : > { %v11575_v42 = vcombine.high %v3418_v35, %v3426_v38  ;;  %v11577_v47 = vcombine.high %v3419_v39, %v3427_v40  ;;  %v11574_v57 = vcombine.low %v3418_v35, %v3426_v38  ;;  %v11576_v59 = vcombine.low %v3419_v39, %v3427_v40  ;;  %v3458_v61 = vld [vmem:[#allocation9 + $0x1e50] sm:$0xff]  ;;  %v3451_v62 = vld [vmem:[#allocation9 + $0x1e18] sm:$0xff]  ;;  %v2492_v35 = vld [vmem:[#allocation9 + $0x20] sm:$0xff] }
 0x443   : > { %10228 = vst [vmem:[%s12545_s30 + $0x40] sm:$0xff] %v11693_v17  ;;  %10229 = vst [vmem:[%s12545_s30 + $0x48] sm:$0xff] %v11694_v18  ;;  %9204 = vmatpush1.bf16.msra.mxu0 %v11526_v9  ;;  %v11591_v6 = vcombine.high %v3434_v48, %v3442_v49  ;;  %v11593_v21 = vcombine.high %v3435_v51, %v3443_v52  ;;  %v3459_v63 = vld [vmem:[#allocation9 + $0x1e58] sm:$0xff]  ;;  %v11590_v0 = vcombine.low %v3434_v48, %v3442_v49  ;;  %v3482_v13 = vld [vmem:[#allocation9 + $0x1f10] sm:$0xff] }
 0x444   : > { %9376 = vmatpush1.bf16.msra.mxu1 %v11528_v15  ;;  %9205 = vmatprep.subr.bf16.mxu0 %v11543_v16  ;;  %v11592_v1 = vcombine.low %v3435_v51, %v3443_v52  ;;  %v11607_v3 = vcombine.high %v3450_v60, %v3458_v61  ;;  %v11609_v2 = vcombine.high %v3451_v62, %v3459_v63  ;;  %v3467_v7 = vld [vmem:[#allocation9 + $0x1e98] sm:$0xff]  ;;  %v3490_v14 = vld [vmem:[#allocation9 + $0x1f50] sm:$0xff]  ;;  %v2500_v38 = vld [vmem:[#allocation9 + $0x60] sm:$0xff] }
 0x445   : > { %9377 = vmatprep.subr.bf16.mxu1 %v11545_v19  ;;  %v3475_v8 = vld [vmem:[#allocation9 + $0x1ed8] sm:$0xff]  ;;  %v11606_v9 = vcombine.low %v3450_v60, %v3458_v61  ;;  %v11608_v10 = vcombine.low %v3451_v62, %v3459_v63  ;;  %v11623_v11 = vcombine.high %v3466_v4, %v3474_v5  ;;  %v11622_v16 = vcombine.low %v3466_v4, %v3474_v5  ;;  %v3498_v25 = vld [vmem:[#allocation9 + $0x1f90] sm:$0xff]  ;;  %v2493_v39 = vld [vmem:[#allocation9 + $0x28] sm:$0xff] }
 0x446   : > { %v11625_v12 = vcombine.high %v3467_v7, %v3475_v8  ;;  %v3483_v53 = vld [vmem:[#allocation9 + $0x1f18] sm:$0xff]  ;;  %v11624_v17 = vcombine.low %v3467_v7, %v3475_v8  ;;  %v11639_v18 = vcombine.high %v3482_v13, %v3490_v14  ;;  %v3506_v27 = vld [vmem:[#allocation9 + $0x1fd0] sm:$0xff]  ;;  %v2501_v40 = vld [vmem:[#allocation9 + $0x68] sm:$0xff]  ;;  %v10650_v51 = vcombine.low %v2492_v35, %v2500_v38 }
 0x447   : > { %9206 = vmatpush1.bf16.msra.mxu0 %v11542_v33  ;;  %v3491_v15 = vld [vmem:[#allocation9 + $0x1f58] sm:$0xff]  ;;  %v11638_v33 = vcombine.low %v3482_v13, %v3490_v14  ;;  %v2508_v48 = vld [vmem:[#allocation9 + $0xa0] sm:$0xff]  ;;  %v2509_v52 = vld [vmem:[#allocation9 + $0xa8] sm:$0xff] }
 0x448   : > { %9378 = vmatpush1.bf16.msra.mxu1 %v11544_v36  ;;  %9207 = vmatprep.subr.bf16.mxu0 %v11559_v37  ;;  %v11641_v19 = vcombine.high %v3483_v53, %v3491_v15  ;;  %v3499_v29 = vld [vmem:[#allocation9 + $0x1f98] sm:$0xff]  ;;  %v11640_v36 = vcombine.low %v3483_v53, %v3491_v15  ;;  %v11655_v37 = vcombine.high %v3498_v25, %v3506_v27  ;;  %v2516_v49 = vld [vmem:[#allocation9 + $0xe0] sm:$0xff]  ;;  %v2525_v62 = vld [vmem:[#allocation9 + $0x128] sm:$0xff] }
 0x449   : > { %9379 = vmatprep.subr.bf16.mxu1 %v11561_v34  ;;  %v3507_v32 = vld [vmem:[#allocation9 + $0x1fd8] sm:$0xff]  ;;  %v2532_v60 = vld [vmem:[#allocation9 + $0x160] sm:$0xff]  ;;  %v2533_v63 = vld [vmem:[#allocation9 + $0x168] sm:$0xff] }
 0x44a   : > { %v11657_v34 = vcombine.high %v3499_v29, %v3507_v32  ;;  %v2540_v4 = vld [vmem:[#allocation9 + $0x1a0] sm:$0xff]  ;;  %v2541_v7 = vld [vmem:[#allocation9 + $0x1a8] sm:$0xff] }
 0x44b   : > { %9208 = vmatpush1.bf16.msra.mxu0 %v11558_v41  ;;  %v11654_v41 = vcombine.low %v3498_v25, %v3506_v27  ;;  %v2548_v5 = vld [vmem:[#allocation9 + $0x1e0] sm:$0xff]  ;;  %v2549_v8 = vld [vmem:[#allocation9 + $0x1e8] sm:$0xff] }
 0x44c   : > { %9380 = vmatpush1.bf16.msra.mxu1 %v11560_v56  ;;  %9209 = vmatprep.subr.bf16.mxu0 %v11575_v42  ;;  %v11656_v56 = vcombine.low %v3499_v29, %v3507_v32  ;;  %v10651_v42 = vcombine.high %v2492_v35, %v2500_v38  ;;  %v2556_v13 = vld [vmem:[#allocation9 + $0x220] sm:$0xff]  ;;  %v2557_v53 = vld [vmem:[#allocation9 + $0x228] sm:$0xff] }
 0x44d   : > { %9381 = vmatprep.subr.bf16.mxu1 %v11577_v47  ;;  %v10653_v47 = vcombine.high %v2493_v39, %v2501_v40  ;;  %v2564_v14 = vld [vmem:[#allocation9 + $0x260] sm:$0xff]  ;;  %v2565_v15 = vld [vmem:[#allocation9 + $0x268] sm:$0xff] }
 0x44e   : > { %v2572_v25 = vld [vmem:[#allocation9 + $0x2a0] sm:$0xff]  ;;  %v2573_v29 = vld [vmem:[#allocation9 + $0x2a8] sm:$0xff] }
 0x44f   : > { %9210 = vmatpush1.bf16.msra.mxu0 %v11574_v57  ;;  %v2517_v57 = vld [vmem:[#allocation9 + $0xe8] sm:$0xff]  ;;  %v2580_v27 = vld [vmem:[#allocation9 + $0x2e0] sm:$0xff] }
 0x450   : > { %9382 = vmatpush1.bf16.msra.mxu1 %v11576_v59  ;;  %9211 = vmatprep.subr.bf16.mxu0 %v11591_v6  ;;  %v10652_v59 = vcombine.low %v2493_v39, %v2501_v40  ;;  %v10667_v6 = vcombine.high %v2508_v48, %v2516_v49  ;;  %v10669_v61 = vcombine.high %v2509_v52, %v2517_v57  ;;  %v2581_v32 = vld [vmem:[#allocation9 + $0x2e8] sm:$0xff]  ;;  %v2588_v35 = vld [vmem:[#allocation9 + $0x320] sm:$0xff] }
 0x451   : > { %9383 = vmatprep.subr.bf16.mxu1 %v11593_v21  ;;  %v2524_v21 = vld [vmem:[#allocation9 + $0x120] sm:$0xff]  ;;  %v2589_v39 = vld [vmem:[#allocation9 + $0x328] sm:$0xff] }
 0x452   : > { %v2596_v38 = vld [vmem:[#allocation9 + $0x360] sm:$0xff]  ;;  %v2597_v40 = vld [vmem:[#allocation9 + $0x368] sm:$0xff] }
 0x453   : > { %9212 = vmatpush1.bf16.msra.mxu0 %v11590_v0  ;;  %v10666_v0 = vcombine.low %v2508_v48, %v2516_v49  ;;  %v2604_v48 = vld [vmem:[#allocation9 + $0x3a0] sm:$0xff] }
 0x454   : > { %9384 = vmatpush1.bf16.msra.mxu1 %v11592_v1  ;;  %9213 = vmatprep.subr.bf16.mxu0 %v11607_v3  ;;  %v10668_v1 = vcombine.low %v2509_v52, %v2517_v57  ;;  %v10683_v3 = vcombine.high %v2524_v21, %v2532_v60  ;;  %v2612_v49 = vld [vmem:[#allocation9 + $0x3e0] sm:$0xff]  ;;  %v2613_v52 = vld [vmem:[#allocation9 + $0x3e8] sm:$0xff]  ;;  %v10746_v57 = vcombine.low %v2588_v35, %v2596_v38 }
 0x455   : > { %9385 = vmatprep.subr.bf16.mxu1 %v11609_v2  ;;  %v10685_v2 = vcombine.high %v2525_v62, %v2533_v63 }
 0x457   : > { %9214 = vmatpush1.bf16.msra.mxu0 %v11606_v9  ;;  %v10682_v9 = vcombine.low %v2524_v21, %v2532_v60  ;;  %v2620_v60 = vld [vmem:[#allocation9 + $0x420] sm:$0xff] }
 0x458   : > { %9386 = vmatpush1.bf16.msra.mxu1 %v11608_v10  ;;  %9215 = vmatprep.subr.bf16.mxu0 %v11623_v11  ;;  %v10684_v10 = vcombine.low %v2525_v62, %v2533_v63  ;;  %v10699_v11 = vcombine.high %v2540_v4, %v2548_v5  ;;  %v2621_v62 = vld [vmem:[#allocation9 + $0x428] sm:$0xff] }
 0x459   : > { %9387 = vmatprep.subr.bf16.mxu1 %v11625_v12  ;;  %v10701_v12 = vcombine.high %v2541_v7, %v2549_v8  ;;  %v2629_v63 = vld [vmem:[#allocation9 + $0x468] sm:$0xff] }
 0x45b   : > { %9216 = vmatpush1.bf16.msra.mxu0 %v11622_v16  ;;  %v10698_v16 = vcombine.low %v2540_v4, %v2548_v5  ;;  %v2636_v4 = vld [vmem:[#allocation9 + $0x4a0] sm:$0xff] }
 0x45c   : > { %9388 = vmatpush1.bf16.msra.mxu1 %v11624_v17  ;;  %9217 = vmatprep.subr.bf16.mxu0 %v11639_v18  ;;  %v10700_v17 = vcombine.low %v2541_v7, %v2549_v8  ;;  %v10715_v18 = vcombine.high %v2556_v13, %v2564_v14  ;;  %v2644_v5 = vld [vmem:[#allocation9 + $0x4e0] sm:$0xff]  ;;  %v2637_v7 = vld [vmem:[#allocation9 + $0x4a8] sm:$0xff] }
 0x45d   : > { %9389 = vmatprep.subr.bf16.mxu1 %v11641_v19  ;;  %v10717_v19 = vcombine.high %v2557_v53, %v2565_v15  ;;  %v2645_v8 = vld [vmem:[#allocation9 + $0x4e8] sm:$0xff] }
 0x45f   : > { %9218 = vmatpush1.bf16.msra.mxu0 %v11638_v33  ;;  %v10714_v33 = vcombine.low %v2556_v13, %v2564_v14  ;;  %v2652_v13 = vld [vmem:[#allocation9 + $0x520] sm:$0xff] }
 0x460   : > { %9390 = vmatpush1.bf16.msra.mxu1 %v11640_v36  ;;  %9219 = vmatprep.subr.bf16.mxu0 %v11655_v37  ;;  %v10716_v36 = vcombine.low %v2557_v53, %v2565_v15  ;;  %v10731_v37 = vcombine.high %v2572_v25, %v2580_v27  ;;  %v2660_v14 = vld [vmem:[#allocation9 + $0x560] sm:$0xff]  ;;  %v2653_v53 = vld [vmem:[#allocation9 + $0x528] sm:$0xff] }
 0x461   : > { %9391 = vmatprep.subr.bf16.mxu1 %v11657_v34  ;;  %v10733_v34 = vcombine.high %v2573_v29, %v2581_v32  ;;  %v2661_v15 = vld [vmem:[#allocation9 + $0x568] sm:$0xff] }
 0x463   : > { %9220 = vmatpush1.bf16.msra.mxu0 %v11654_v41  ;;  %v10730_v41 = vcombine.low %v2572_v25, %v2580_v27  ;;  %v2668_v25 = vld [vmem:[#allocation9 + $0x5a0] sm:$0xff] }
 0x464   : > { %9392 = vmatpush1.bf16.msra.mxu1 %v11656_v56  ;;  %9404 = vmatprep.subr.bf16.mxu0 %v10651_v42  ;;  %v10732_v56 = vcombine.low %v2573_v29, %v2581_v32  ;;  %v10747_v42 = vcombine.high %v2588_v35, %v2596_v38  ;;  %v2676_v27 = vld [vmem:[#allocation9 + $0x5e0] sm:$0xff]  ;;  %v2669_v29 = vld [vmem:[#allocation9 + $0x5a8] sm:$0xff] }
 0x465   : > { %9576 = vmatprep.subr.bf16.mxu1 %v10653_v47  ;;  %v10749_v47 = vcombine.high %v2589_v39, %v2597_v40  ;;  %v2677_v32 = vld [vmem:[#allocation9 + $0x5e8] sm:$0xff]  ;;  %v2684_v35 = vld [vmem:[#allocation9 + $0x620] sm:$0xff] }
 0x466   : > { %9222 = vmatmul.mubr.bf16.vlgmr.msra.gmra.mrb[16].mxu0 %v12497_v54  ;;  %v2692_v38 = vld [vmem:[#allocation9 + $0x660] sm:$0xff] }
 0x467   : > { %9394 = vmatmul.mubr.bf16.vlgmr.msra.gmra.mrb[16].mxu1 %v12497_v54  ;;  %9405 = vmatpush1.bf16.msra.mxu0 %v10650_v51  ;;  %v2605_v51 = vld [vmem:[#allocation9 + $0x3a8] sm:$0xff] }
 0x468   : > { %9436 = vmatprep.mubr.bf16.mxu0 %v12459_v30  ;;  %9577 = vmatpush1.bf16.msra.mxu1 %v10652_v59  ;;  %v10748_v59 = vcombine.low %v2589_v39, %v2597_v40  ;;  %v10765_v21 = vcombine.high %v2605_v51, %v2613_v52  ;;  %v2685_v39 = vld [vmem:[#allocation9 + $0x628] sm:$0xff] }
 0x469   : > { %9608 = vmatprep.mubr.bf16.mxu1 %v12459_v30  ;;  %9406 = vmatprep.subr.bf16.mxu0 %v10667_v6  ;;  %v10763_v6 = vcombine.high %v2604_v48, %v2612_v49  ;;  %v2693_v40 = vld [vmem:[#allocation9 + $0x668] sm:$0xff] }
 0x46a   : > { %9578 = vmatprep.subr.bf16.mxu1 %v10669_v61  ;;  %v2628_v61 = vld [vmem:[#allocation9 + $0x460] sm:$0xff] }
 0x46b   : > { %9407 = vmatpush1.bf16.msra.mxu0 %v10666_v0  ;;  %v10762_v0 = vcombine.low %v2604_v48, %v2612_v49  ;;  %v2700_v48 = vld [vmem:[#allocation9 + $0x6a0] sm:$0xff] }
 0x46c   : > { %9579 = vmatpush1.bf16.msra.mxu1 %v10668_v1  ;;  %9408 = vmatprep.subr.bf16.mxu0 %v10683_v3  ;;  %v10764_v1 = vcombine.low %v2605_v51, %v2613_v52  ;;  %v10779_v3 = vcombine.high %v2620_v60, %v2628_v61  ;;  %v2708_v49 = vld [vmem:[#allocation9 + $0x6e0] sm:$0xff]  ;;  %v2701_v51 = vld [vmem:[#allocation9 + $0x6a8] sm:$0xff] }
 0x46d   : > { %9580 = vmatprep.subr.bf16.mxu1 %v10685_v2  ;;  %v10781_v2 = vcombine.high %v2621_v62, %v2629_v63  ;;  %v2709_v52 = vld [vmem:[#allocation9 + $0x6e8] sm:$0xff] }
 0x46f   : > { %9409 = vmatpush1.bf16.msra.mxu0 %v10682_v9  ;;  %v10778_v9 = vcombine.low %v2620_v60, %v2628_v61  ;;  %v2716_v60 = vld [vmem:[#allocation9 + $0x720] sm:$0xff] }
 0x470   : > { %9581 = vmatpush1.bf16.msra.mxu1 %v10684_v10  ;;  %9410 = vmatprep.subr.bf16.mxu0 %v10699_v11  ;;  %v10780_v10 = vcombine.low %v2621_v62, %v2629_v63  ;;  %v10795_v11 = vcombine.high %v2636_v4, %v2644_v5  ;;  %v2724_v61 = vld [vmem:[#allocation9 + $0x760] sm:$0xff]  ;;  %v2717_v62 = vld [vmem:[#allocation9 + $0x728] sm:$0xff] }
 0x471   : > { %9582 = vmatprep.subr.bf16.mxu1 %v10701_v12  ;;  %v10797_v12 = vcombine.high %v2637_v7, %v2645_v8  ;;  %v2725_v63 = vld [vmem:[#allocation9 + $0x768] sm:$0xff] }
 0x473   : > { %9411 = vmatpush1.bf16.msra.mxu0 %v10698_v16  ;;  %v10794_v16 = vcombine.low %v2636_v4, %v2644_v5  ;;  %v2732_v4 = vld [vmem:[#allocation9 + $0x7a0] sm:$0xff] }
 0x474   : > { %9583 = vmatpush1.bf16.msra.mxu1 %v10700_v17  ;;  %9412 = vmatprep.subr.bf16.mxu0 %v10715_v18  ;;  %v10796_v17 = vcombine.low %v2637_v7, %v2645_v8  ;;  %v10811_v18 = vcombine.high %v2652_v13, %v2660_v14  ;;  %v2740_v5 = vld [vmem:[#allocation9 + $0x7e0] sm:$0xff]  ;;  %v2733_v7 = vld [vmem:[#allocation9 + $0x7a8] sm:$0xff] }
 0x475   : > { %9584 = vmatprep.subr.bf16.mxu1 %v10717_v19  ;;  %v10813_v19 = vcombine.high %v2653_v53, %v2661_v15  ;;  %v2741_v8 = vld [vmem:[#allocation9 + $0x7e8] sm:$0xff] }
 0x477   : > { %9413 = vmatpush1.bf16.msra.mxu0 %v10714_v33  ;;  %v10810_v33 = vcombine.low %v2652_v13, %v2660_v14  ;;  %v2748_v13 = vld [vmem:[#allocation9 + $0x820] sm:$0xff] }
 0x478   : > { %9585 = vmatpush1.bf16.msra.mxu1 %v10716_v36  ;;  %9414 = vmatprep.subr.bf16.mxu0 %v10731_v37  ;;  %v10812_v36 = vcombine.low %v2653_v53, %v2661_v15  ;;  %v10827_v37 = vcombine.high %v2668_v25, %v2676_v27  ;;  %v2756_v14 = vld [vmem:[#allocation9 + $0x860] sm:$0xff]  ;;  %v2749_v53 = vld [vmem:[#allocation9 + $0x828] sm:$0xff] }
 0x479   : > { %9586 = vmatprep.subr.bf16.mxu1 %v10733_v34  ;;  %v10829_v34 = vcombine.high %v2669_v29, %v2677_v32  ;;  %v2757_v15 = vld [vmem:[#allocation9 + $0x868] sm:$0xff] }
 0x47b   : > { %9415 = vmatpush1.bf16.msra.mxu0 %v10730_v41  ;;  %v10826_v41 = vcombine.low %v2668_v25, %v2676_v27  ;;  %v2764_v25 = vld [vmem:[#allocation9 + $0x8a0] sm:$0xff] }
 0x47c   : > { %9587 = vmatpush1.bf16.msra.mxu1 %v10732_v56  ;;  %9416 = vmatprep.subr.bf16.mxu0 %v10747_v42  ;;  %v10828_v56 = vcombine.low %v2669_v29, %v2677_v32  ;;  %v10843_v42 = vcombine.high %v2684_v35, %v2692_v38  ;;  %v2772_v27 = vld [vmem:[#allocation9 + $0x8e0] sm:$0xff]  ;;  %v10906_v29 = vcombine.low %v2748_v13, %v2756_v14  ;;  %v2765_v32 = vld [vmem:[#allocation9 + $0x8a8] sm:$0xff] }
 0x47d   : > { %9588 = vmatprep.subr.bf16.mxu1 %v10749_v47  ;;  %v10845_v47 = vcombine.high %v2685_v39, %v2693_v40 }
 0x47f   : > { %9417 = vmatpush1.bf16.msra.mxu0 %v10746_v57  ;;  %v10842_v57 = vcombine.low %v2684_v35, %v2692_v38  ;;  %v2788_v35 = vld [vmem:[#allocation9 + $0x960] sm:$0xff] }
 0x480   : > { %9589 = vmatpush1.bf16.msra.mxu1 %v10748_v59  ;;  %9418 = vmatprep.subr.bf16.mxu0 %v10763_v6  ;;  %v10844_v59 = vcombine.low %v2685_v39, %v2693_v40  ;;  %v10859_v6 = vcombine.high %v2700_v48, %v2708_v49  ;;  %v2781_v39 = vld [vmem:[#allocation9 + $0x928] sm:$0xff] }
 0x481   : > { %9590 = vmatprep.subr.bf16.mxu1 %v10765_v21  ;;  %v10861_v21 = vcombine.high %v2701_v51, %v2709_v52  ;;  %v2789_v40 = vld [vmem:[#allocation9 + $0x968] sm:$0xff] }
 0x483   : > { %9419 = vmatpush1.bf16.msra.mxu0 %v10762_v0  ;;  %v10858_v0 = vcombine.low %v2700_v48, %v2708_v49  ;;  %v2796_v48 = vld [vmem:[#allocation9 + $0x9a0] sm:$0xff] }
 0x484   : > { %9591 = vmatpush1.bf16.msra.mxu1 %v10764_v1  ;;  %9420 = vmatprep.subr.bf16.mxu0 %v10779_v3  ;;  %v10860_v1 = vcombine.low %v2701_v51, %v2709_v52  ;;  %v10875_v3 = vcombine.high %v2716_v60, %v2724_v61  ;;  %v2804_v49 = vld [vmem:[#allocation9 + $0x9e0] sm:$0xff]  ;;  %v2797_v51 = vld [vmem:[#allocation9 + $0x9a8] sm:$0xff] }
 0x485   : > { %9592 = vmatprep.subr.bf16.mxu1 %v10781_v2  ;;  %v10877_v2 = vcombine.high %v2717_v62, %v2725_v63  ;;  %v2805_v52 = vld [vmem:[#allocation9 + $0x9e8] sm:$0xff] }
 0x487   : > { %9421 = vmatpush1.bf16.msra.mxu0 %v10778_v9  ;;  %v10874_v9 = vcombine.low %v2716_v60, %v2724_v61  ;;  %v2812_v60 = vld [vmem:[#allocation9 + $0xa20] sm:$0xff] }
 0x488   : > { %9593 = vmatpush1.bf16.msra.mxu1 %v10780_v10  ;;  %9422 = vmatprep.subr.bf16.mxu0 %v10795_v11  ;;  %v10876_v10 = vcombine.low %v2717_v62, %v2725_v63  ;;  %v10891_v11 = vcombine.high %v2732_v4, %v2740_v5  ;;  %v2820_v61 = vld [vmem:[#allocation9 + $0xa60] sm:$0xff]  ;;  %v2813_v62 = vld [vmem:[#allocation9 + $0xa28] sm:$0xff] }
 0x489   : > { %9594 = vmatprep.subr.bf16.mxu1 %v10797_v12  ;;  %v10893_v12 = vcombine.high %v2733_v7, %v2741_v8  ;;  %v2821_v63 = vld [vmem:[#allocation9 + $0xa68] sm:$0xff] }
 0x48b   : > { %9423 = vmatpush1.bf16.msra.mxu0 %v10794_v16  ;;  %v10890_v16 = vcombine.low %v2732_v4, %v2740_v5  ;;  %v2828_v4 = vld [vmem:[#allocation9 + $0xaa0] sm:$0xff] }
 0x48c   : > { %9595 = vmatpush1.bf16.msra.mxu1 %v10796_v17  ;;  %9424 = vmatprep.subr.bf16.mxu0 %v10811_v18  ;;  %v10892_v17 = vcombine.low %v2733_v7, %v2741_v8  ;;  %v10907_v18 = vcombine.high %v2748_v13, %v2756_v14  ;;  %v2836_v5 = vld [vmem:[#allocation9 + $0xae0] sm:$0xff]  ;;  %v2829_v7 = vld [vmem:[#allocation9 + $0xaa8] sm:$0xff] }
 0x48d   : > { %9596 = vmatprep.subr.bf16.mxu1 %v10813_v19  ;;  %v10909_v19 = vcombine.high %v2749_v53, %v2757_v15  ;;  %v2837_v8 = vld [vmem:[#allocation9 + $0xae8] sm:$0xff]  ;;  %v2844_v13 = vld [vmem:[#allocation9 + $0xb20] sm:$0xff] }
 0x48e   : > { %v2852_v14 = vld [vmem:[#allocation9 + $0xb60] sm:$0xff] }
 0x48f   : > { %9425 = vmatpush1.bf16.msra.mxu0 %v10810_v33  ;;  %v2773_v33 = vld [vmem:[#allocation9 + $0x8e8] sm:$0xff] }
 0x490   : > { %9597 = vmatpush1.bf16.msra.mxu1 %v10812_v36  ;;  %9426 = vmatprep.subr.bf16.mxu0 %v10827_v37  ;;  %v10908_v36 = vcombine.low %v2749_v53, %v2757_v15  ;;  %v10923_v37 = vcombine.high %v2764_v25, %v2772_v27  ;;  %v10925_v38 = vcombine.high %v2765_v32, %v2773_v33  ;;  %v2845_v53 = vld [vmem:[#allocation9 + $0xb28] sm:$0xff] }
 0x491   : > { %9598 = vmatprep.subr.bf16.mxu1 %v10829_v34  ;;  %v2780_v34 = vld [vmem:[#allocation9 + $0x920] sm:$0xff]  ;;  %v2853_v15 = vld [vmem:[#allocation9 + $0xb68] sm:$0xff] }
 0x493   : > { %9427 = vmatpush1.bf16.msra.mxu0 %v10826_v41  ;;  %v10922_v41 = vcombine.low %v2764_v25, %v2772_v27  ;;  %v2860_v25 = vld [vmem:[#allocation9 + $0xba0] sm:$0xff] }
 0x494   : > { %9599 = vmatpush1.bf16.msra.mxu1 %v10828_v56  ;;  %9428 = vmatprep.subr.bf16.mxu0 %v10843_v42  ;;  %v10924_v56 = vcombine.low %v2765_v32, %v2773_v33  ;;  %v10939_v42 = vcombine.high %v2780_v34, %v2788_v35  ;;  %v2868_v27 = vld [vmem:[#allocation9 + $0xbe0] sm:$0xff]  ;;  %v2869_v32 = vld [vmem:[#allocation9 + $0xbe8] sm:$0xff]  ;;  %v11002_v33 = vcombine.low %v2844_v13, %v2852_v14 }
 0x495   : > { %9600 = vmatprep.subr.bf16.mxu1 %v10845_v47  ;;  %v10941_v47 = vcombine.high %v2781_v39, %v2789_v40 }
 0x497   : > { %9429 = vmatpush1.bf16.msra.mxu0 %v10842_v57  ;;  %v10938_v57 = vcombine.low %v2780_v34, %v2788_v35  ;;  %v2876_v35 = vld [vmem:[#allocation9 + $0xc20] sm:$0xff] }
 0x498   : > { %9601 = vmatpush1.bf16.msra.mxu1 %v10844_v59  ;;  %9430 = vmatprep.subr.bf16.mxu0 %v10859_v6  ;;  %v10940_v59 = vcombine.low %v2781_v39, %v2789_v40  ;;  %v10955_v6 = vcombine.high %v2796_v48, %v2804_v49  ;;  %v2877_v39 = vld [vmem:[#allocation9 + $0xc28] sm:$0xff] }
 0x499   : > { %9602 = vmatprep.subr.bf16.mxu1 %v10861_v21  ;;  %v10957_v21 = vcombine.high %v2797_v51, %v2805_v52  ;;  %v2885_v40 = vld [vmem:[#allocation9 + $0xc68] sm:$0xff] }
 0x49b   : > { %9431 = vmatpush1.bf16.msra.mxu0 %v10858_v0  ;;  %v10954_v0 = vcombine.low %v2796_v48, %v2804_v49  ;;  %v2892_v48 = vld [vmem:[#allocation9 + $0xca0] sm:$0xff] }
 0x49c   : > { %9603 = vmatpush1.bf16.msra.mxu1 %v10860_v1  ;;  %9432 = vmatprep.subr.bf16.mxu0 %v10875_v3  ;;  %v10956_v1 = vcombine.low %v2797_v51, %v2805_v52  ;;  %v10971_v3 = vcombine.high %v2812_v60, %v2820_v61  ;;  %v2900_v49 = vld [vmem:[#allocation9 + $0xce0] sm:$0xff]  ;;  %v2893_v51 = vld [vmem:[#allocation9 + $0xca8] sm:$0xff] }
 0x49d   : > { %9604 = vmatprep.subr.bf16.mxu1 %v10877_v2  ;;  %v10973_v2 = vcombine.high %v2813_v62, %v2821_v63  ;;  %v2901_v52 = vld [vmem:[#allocation9 + $0xce8] sm:$0xff] }
 0x49f   : > { %9433 = vmatpush1.bf16.msra.mxu0 %v10874_v9  ;;  %v10970_v9 = vcombine.low %v2812_v60, %v2820_v61  ;;  %v2908_v60 = vld [vmem:[#allocation9 + $0xd20] sm:$0xff] }
 0x4a0   : > { %9605 = vmatpush1.bf16.msra.mxu1 %v10876_v10  ;;  %9434 = vmatprep.subr.bf16.mxu0 %v10891_v11  ;;  %v10972_v10 = vcombine.low %v2813_v62, %v2821_v63  ;;  %v10987_v11 = vcombine.high %v2828_v4, %v2836_v5  ;;  %v2916_v61 = vld [vmem:[#allocation9 + $0xd60] sm:$0xff]  ;;  %v2909_v62 = vld [vmem:[#allocation9 + $0xd28] sm:$0xff] }
 0x4a1   : > { %9606 = vmatprep.subr.bf16.mxu1 %v10893_v12  ;;  %v10989_v12 = vcombine.high %v2829_v7, %v2837_v8  ;;  %v2917_v63 = vld [vmem:[#allocation9 + $0xd68] sm:$0xff] }
 0x4a3   : > { %9435 = vmatpush1.bf16.msra.mxu0 %v10890_v16  ;;  %v10986_v16 = vcombine.low %v2828_v4, %v2836_v5  ;;  %v2924_v4 = vld [vmem:[#allocation9 + $0xda0] sm:$0xff] }
 0x4a4   : > { %9607 = vmatpush1.bf16.msra.mxu1 %v10892_v17  ;;  %9447 = vmatprep.subr.bf16.mxu0 %v10907_v18  ;;  %v10988_v17 = vcombine.low %v2829_v7, %v2837_v8  ;;  %v11003_v18 = vcombine.high %v2844_v13, %v2852_v14  ;;  %v2932_v5 = vld [vmem:[#allocation9 + $0xde0] sm:$0xff]  ;;  %v2925_v7 = vld [vmem:[#allocation9 + $0xda8] sm:$0xff] }
 0x4a5   : > { %9619 = vmatprep.subr.bf16.mxu1 %v10909_v19  ;;  %v11005_v19 = vcombine.high %v2845_v53, %v2853_v15  ;;  %v2933_v8 = vld [vmem:[#allocation9 + $0xde8] sm:$0xff]  ;;  %v2940_v13 = vld [vmem:[#allocation9 + $0xe20] sm:$0xff] }
 0x4a6   : > { %9437 = vmatmul.mubr.bf16.vlgmr.msra.gmra.mrb[20].mxu0 %v12455_v20  ;;  %v2948_v14 = vld [vmem:[#allocation9 + $0xe60] sm:$0xff] }
 0x4a7   : > { %9609 = vmatmul.mubr.bf16.vlgmr.msra.gmra.mrb[20].mxu1 %v12455_v20  ;;  %9448 = vmatpush1.bf16.msra.mxu0 %v10906_v29  ;;  %v2861_v29 = vld [vmem:[#allocation9 + $0xba8] sm:$0xff] }
 0x4a8   : > { %9479 = vmatprep.mubr.bf16.mxu0 %v12461_v31  ;;  %9620 = vmatpush1.bf16.msra.mxu1 %v10908_v36  ;;  %v11004_v36 = vcombine.low %v2845_v53, %v2853_v15  ;;  %v11021_v34 = vcombine.high %v2861_v29, %v2869_v32  ;;  %v2941_v53 = vld [vmem:[#allocation9 + $0xe28] sm:$0xff] }
 0x4a9   : > { %9651 = vmatprep.mubr.bf16.mxu1 %v12461_v31  ;;  %9449 = vmatprep.subr.bf16.mxu0 %v10923_v37  ;;  %v11019_v37 = vcombine.high %v2860_v25, %v2868_v27  ;;  %v2949_v15 = vld [vmem:[#allocation9 + $0xe68] sm:$0xff] }
 0x4aa   : > { %9621 = vmatprep.subr.bf16.mxu1 %v10925_v38  ;;  %v2884_v38 = vld [vmem:[#allocation9 + $0xc60] sm:$0xff] }
 0x4ab   : > { %9450 = vmatpush1.bf16.msra.mxu0 %v10922_v41  ;;  %v11018_v41 = vcombine.low %v2860_v25, %v2868_v27  ;;  %v2956_v25 = vld [vmem:[#allocation9 + $0xea0] sm:$0xff] }
 0x4ac   : > { %9622 = vmatpush1.bf16.msra.mxu1 %v10924_v56  ;;  %9451 = vmatprep.subr.bf16.mxu0 %v10939_v42  ;;  %v11020_v56 = vcombine.low %v2861_v29, %v2869_v32  ;;  %v11035_v42 = vcombine.high %v2876_v35, %v2884_v38  ;;  %v2964_v27 = vld [vmem:[#allocation9 + $0xee0] sm:$0xff]  ;;  %v2957_v29 = vld [vmem:[#allocation9 + $0xea8] sm:$0xff] }
 0x4ad   : > { %9623 = vmatprep.subr.bf16.mxu1 %v10941_v47  ;;  %v11037_v47 = vcombine.high %v2877_v39, %v2885_v40  ;;  %v2965_v32 = vld [vmem:[#allocation9 + $0xee8] sm:$0xff] }
 0x4af   : > { %9452 = vmatpush1.bf16.msra.mxu0 %v10938_v57  ;;  %v11034_v57 = vcombine.low %v2876_v35, %v2884_v38  ;;  %v2972_v35 = vld [vmem:[#allocation9 + $0xf20] sm:$0xff] }
 0x4b0   : > { %9624 = vmatpush1.bf16.msra.mxu1 %v10940_v59  ;;  %9453 = vmatprep.subr.bf16.mxu0 %v10955_v6  ;;  %v11036_v59 = vcombine.low %v2877_v39, %v2885_v40  ;;  %v11051_v6 = vcombine.high %v2892_v48, %v2900_v49  ;;  %v2980_v38 = vld [vmem:[#allocation9 + $0xf60] sm:$0xff]  ;;  %v2973_v39 = vld [vmem:[#allocation9 + $0xf28] sm:$0xff] }
 0x4b1   : > { %9625 = vmatprep.subr.bf16.mxu1 %v10957_v21  ;;  %v11053_v21 = vcombine.high %v2893_v51, %v2901_v52  ;;  %v2981_v40 = vld [vmem:[#allocation9 + $0xf68] sm:$0xff] }
 0x4b3   : > { %9454 = vmatpush1.bf16.msra.mxu0 %v10954_v0  ;;  %v11050_v0 = vcombine.low %v2892_v48, %v2900_v49  ;;  %v2988_v48 = vld [vmem:[#allocation9 + $0xfa0] sm:$0xff] }
 0x4b4   : > { %9626 = vmatpush1.bf16.msra.mxu1 %v10956_v1  ;;  %9455 = vmatprep.subr.bf16.mxu0 %v10971_v3  ;;  %v11052_v1 = vcombine.low %v2893_v51, %v2901_v52  ;;  %v11067_v3 = vcombine.high %v2908_v60, %v2916_v61  ;;  %v2996_v49 = vld [vmem:[#allocation9 + $0xfe0] sm:$0xff]  ;;  %v2989_v51 = vld [vmem:[#allocation9 + $0xfa8] sm:$0xff] }
 0x4b5   : > { %9627 = vmatprep.subr.bf16.mxu1 %v10973_v2  ;;  %v11069_v2 = vcombine.high %v2909_v62, %v2917_v63  ;;  %v2997_v52 = vld [vmem:[#allocation9 + $0xfe8] sm:$0xff] }
 0x4b7   : > { %9456 = vmatpush1.bf16.msra.mxu0 %v10970_v9  ;;  %v11066_v9 = vcombine.low %v2908_v60, %v2916_v61  ;;  %v3004_v60 = vld [vmem:[#allocation9 + $0x1020] sm:$0xff] }
 0x4b8   : > { %9628 = vmatpush1.bf16.msra.mxu1 %v10972_v10  ;;  %9457 = vmatprep.subr.bf16.mxu0 %v10987_v11  ;;  %v11068_v10 = vcombine.low %v2909_v62, %v2917_v63  ;;  %v11083_v11 = vcombine.high %v2924_v4, %v2932_v5  ;;  %v3012_v61 = vld [vmem:[#allocation9 + $0x1060] sm:$0xff]  ;;  %v3005_v62 = vld [vmem:[#allocation9 + $0x1028] sm:$0xff] }
 0x4b9   : > { %9629 = vmatprep.subr.bf16.mxu1 %v10989_v12  ;;  %v11085_v12 = vcombine.high %v2925_v7, %v2933_v8  ;;  %v3013_v63 = vld [vmem:[#allocation9 + $0x1068] sm:$0xff] }
 0x4bb   : > { %9458 = vmatpush1.bf16.msra.mxu0 %v10986_v16  ;;  %v11082_v16 = vcombine.low %v2924_v4, %v2932_v5  ;;  %v3020_v4 = vld [vmem:[#allocation9 + $0x10a0] sm:$0xff] }
 0x4bc   : > { %9630 = vmatpush1.bf16.msra.mxu1 %v10988_v17  ;;  %9459 = vmatprep.subr.bf16.mxu0 %v11003_v18  ;;  %v11084_v17 = vcombine.low %v2925_v7, %v2933_v8  ;;  %v11099_v18 = vcombine.high %v2940_v13, %v2948_v14  ;;  %v3028_v5 = vld [vmem:[#allocation9 + $0x10e0] sm:$0xff]  ;;  %v11162_v7 = vcombine.low %v3004_v60, %v3012_v61  ;;  %v3021_v8 = vld [vmem:[#allocation9 + $0x10a8] sm:$0xff] }
 0x4bd   : > { %9631 = vmatprep.subr.bf16.mxu1 %v11005_v19  ;;  %v11101_v19 = vcombine.high %v2941_v53, %v2949_v15 }
 0x4bf   : > { %9460 = vmatpush1.bf16.msra.mxu0 %v11002_v33  ;;  %v11098_v33 = vcombine.low %v2940_v13, %v2948_v14  ;;  %v3044_v13 = vld [vmem:[#allocation9 + $0x1160] sm:$0xff] }
 0x4c0   : > { %9632 = vmatpush1.bf16.msra.mxu1 %v11004_v36  ;;  %9461 = vmatprep.subr.bf16.mxu0 %v11019_v37  ;;  %v11100_v36 = vcombine.low %v2941_v53, %v2949_v15  ;;  %v11115_v37 = vcombine.high %v2956_v25, %v2964_v27  ;;  %v3037_v53 = vld [vmem:[#allocation9 + $0x1128] sm:$0xff] }
 0x4c1   : > { %9633 = vmatprep.subr.bf16.mxu1 %v11021_v34  ;;  %v11117_v34 = vcombine.high %v2957_v29, %v2965_v32  ;;  %v3045_v15 = vld [vmem:[#allocation9 + $0x1168] sm:$0xff] }
 0x4c3   : > { %9462 = vmatpush1.bf16.msra.mxu0 %v11018_v41  ;;  %v11114_v41 = vcombine.low %v2956_v25, %v2964_v27  ;;  %v3052_v25 = vld [vmem:[#allocation9 + $0x11a0] sm:$0xff] }
 0x4c4   : > { %9634 = vmatpush1.bf16.msra.mxu1 %v11020_v56  ;;  %9463 = vmatprep.subr.bf16.mxu0 %v11035_v42  ;;  %v11116_v56 = vcombine.low %v2957_v29, %v2965_v32  ;;  %v11131_v42 = vcombine.high %v2972_v35, %v2980_v38  ;;  %v3060_v27 = vld [vmem:[#allocation9 + $0x11e0] sm:$0xff]  ;;  %v3053_v29 = vld [vmem:[#allocation9 + $0x11a8] sm:$0xff] }
 0x4c5   : > { %9635 = vmatprep.subr.bf16.mxu1 %v11037_v47  ;;  %v11133_v47 = vcombine.high %v2973_v39, %v2981_v40  ;;  %v3061_v32 = vld [vmem:[#allocation9 + $0x11e8] sm:$0xff] }
 0x4c7   : > { %9464 = vmatpush1.bf16.msra.mxu0 %v11034_v57  ;;  %v11130_v57 = vcombine.low %v2972_v35, %v2980_v38  ;;  %v3068_v35 = vld [vmem:[#allocation9 + $0x1220] sm:$0xff] }
 0x4c8   : > { %9636 = vmatpush1.bf16.msra.mxu1 %v11036_v59  ;;  %9465 = vmatprep.subr.bf16.mxu0 %v11051_v6  ;;  %v11132_v59 = vcombine.low %v2973_v39, %v2981_v40  ;;  %v11147_v6 = vcombine.high %v2988_v48, %v2996_v49  ;;  %v3076_v38 = vld [vmem:[#allocation9 + $0x1260] sm:$0xff]  ;;  %v3069_v39 = vld [vmem:[#allocation9 + $0x1228] sm:$0xff] }
 0x4c9   : > { %9637 = vmatprep.subr.bf16.mxu1 %v11053_v21  ;;  %v11149_v21 = vcombine.high %v2989_v51, %v2997_v52  ;;  %v3077_v40 = vld [vmem:[#allocation9 + $0x1268] sm:$0xff] }
 0x4cb   : > { %9466 = vmatpush1.bf16.msra.mxu0 %v11050_v0  ;;  %v11146_v0 = vcombine.low %v2988_v48, %v2996_v49  ;;  %v3084_v48 = vld [vmem:[#allocation9 + $0x12a0] sm:$0xff] }
 0x4cc   : > { %9638 = vmatpush1.bf16.msra.mxu1 %v11052_v1  ;;  %9467 = vmatprep.subr.bf16.mxu0 %v11067_v3  ;;  %v11148_v1 = vcombine.low %v2989_v51, %v2997_v52  ;;  %v11163_v3 = vcombine.high %v3004_v60, %v3012_v61  ;;  %v3092_v49 = vld [vmem:[#allocation9 + $0x12e0] sm:$0xff]  ;;  %v3085_v51 = vld [vmem:[#allocation9 + $0x12a8] sm:$0xff] }
 0x4cd   : > { %9639 = vmatprep.subr.bf16.mxu1 %v11069_v2  ;;  %v11165_v2 = vcombine.high %v3005_v62, %v3013_v63  ;;  %v3093_v52 = vld [vmem:[#allocation9 + $0x12e8] sm:$0xff]  ;;  %v3100_v60 = vld [vmem:[#allocation9 + $0x1320] sm:$0xff] }
 0x4ce   : > { %v3108_v61 = vld [vmem:[#allocation9 + $0x1360] sm:$0xff] }
 0x4cf   : > { %9468 = vmatpush1.bf16.msra.mxu0 %v11066_v9  ;;  %v3029_v9 = vld [vmem:[#allocation9 + $0x10e8] sm:$0xff] }
 0x4d0   : > { %9640 = vmatpush1.bf16.msra.mxu1 %v11068_v10  ;;  %9469 = vmatprep.subr.bf16.mxu0 %v11083_v11  ;;  %v11164_v10 = vcombine.low %v3005_v62, %v3013_v63  ;;  %v11179_v11 = vcombine.high %v3020_v4, %v3028_v5  ;;  %v11181_v14 = vcombine.high %v3021_v8, %v3029_v9  ;;  %v3101_v62 = vld [vmem:[#allocation9 + $0x1328] sm:$0xff] }
 0x4d1   : > { %9641 = vmatprep.subr.bf16.mxu1 %v11085_v12  ;;  %v3036_v12 = vld [vmem:[#allocation9 + $0x1120] sm:$0xff]  ;;  %v3109_v63 = vld [vmem:[#allocation9 + $0x1368] sm:$0xff] }
 0x4d3   : > { %9470 = vmatpush1.bf16.msra.mxu0 %v11082_v16  ;;  %v11178_v16 = vcombine.low %v3020_v4, %v3028_v5  ;;  %v3116_v4 = vld [vmem:[#allocation9 + $0x13a0] sm:$0xff] }
 0x4d4   : > { %9642 = vmatpush1.bf16.msra.mxu1 %v11084_v17  ;;  %9471 = vmatprep.subr.bf16.mxu0 %v11099_v18  ;;  %v11180_v17 = vcombine.low %v3021_v8, %v3029_v9  ;;  %v11195_v18 = vcombine.high %v3036_v12, %v3044_v13  ;;  %v3124_v5 = vld [vmem:[#allocation9 + $0x13e0] sm:$0xff]  ;;  %v3125_v8 = vld [vmem:[#allocation9 + $0x13e8] sm:$0xff]  ;;  %v11258_v9 = vcombine.low %v3100_v60, %v3108_v61 }
 0x4d5   : > { %9643 = vmatprep.subr.bf16.mxu1 %v11101_v19  ;;  %v11197_v19 = vcombine.high %v3037_v53, %v3045_v15 }
 0x4d7   : > { %9472 = vmatpush1.bf16.msra.mxu0 %v11098_v33  ;;  %v11194_v33 = vcombine.low %v3036_v12, %v3044_v13  ;;  %v3132_v13 = vld [vmem:[#allocation9 + $0x1420] sm:$0xff] }
 0x4d8   : > { %9644 = vmatpush1.bf16.msra.mxu1 %v11100_v36  ;;  %9473 = vmatprep.subr.bf16.mxu0 %v11115_v37  ;;  %v11196_v36 = vcombine.low %v3037_v53, %v3045_v15  ;;  %v11211_v37 = vcombine.high %v3052_v25, %v3060_v27  ;;  %v3133_v53 = vld [vmem:[#allocation9 + $0x1428] sm:$0xff] }
 0x4d9   : > { %9645 = vmatprep.subr.bf16.mxu1 %v11117_v34  ;;  %v11213_v34 = vcombine.high %v3053_v29, %v3061_v32  ;;  %v3141_v15 = vld [vmem:[#allocation9 + $0x1468] sm:$0xff] }
 0x4db   : > { %9474 = vmatpush1.bf16.msra.mxu0 %v11114_v41  ;;  %v11210_v41 = vcombine.low %v3052_v25, %v3060_v27  ;;  %v3148_v25 = vld [vmem:[#allocation9 + $0x14a0] sm:$0xff] }
 0x4dc   : > { %9646 = vmatpush1.bf16.msra.mxu1 %v11116_v56  ;;  %9475 = vmatprep.subr.bf16.mxu0 %v11131_v42  ;;  %v11212_v56 = vcombine.low %v3053_v29, %v3061_v32  ;;  %v11227_v42 = vcombine.high %v3068_v35, %v3076_v38  ;;  %v3156_v27 = vld [vmem:[#allocation9 + $0x14e0] sm:$0xff]  ;;  %v3149_v29 = vld [vmem:[#allocation9 + $0x14a8] sm:$0xff] }
 0x4dd   : > { %9647 = vmatprep.subr.bf16.mxu1 %v11133_v47  ;;  %v11229_v47 = vcombine.high %v3069_v39, %v3077_v40  ;;  %v3157_v32 = vld [vmem:[#allocation9 + $0x14e8] sm:$0xff] }
 0x4df   : > { %9476 = vmatpush1.bf16.msra.mxu0 %v11130_v57  ;;  %v11226_v57 = vcombine.low %v3068_v35, %v3076_v38  ;;  %v3164_v35 = vld [vmem:[#allocation9 + $0x1520] sm:$0xff] }
 0x4e0   : > { %9648 = vmatpush1.bf16.msra.mxu1 %v11132_v59  ;;  %9477 = vmatprep.subr.bf16.mxu0 %v11147_v6  ;;  %v11228_v59 = vcombine.low %v3069_v39, %v3077_v40  ;;  %v11243_v6 = vcombine.high %v3084_v48, %v3092_v49  ;;  %v3172_v38 = vld [vmem:[#allocation9 + $0x1560] sm:$0xff]  ;;  %v3165_v39 = vld [vmem:[#allocation9 + $0x1528] sm:$0xff] }
 0x4e1   : > { %9649 = vmatprep.subr.bf16.mxu1 %v11149_v21  ;;  %v11245_v21 = vcombine.high %v3085_v51, %v3093_v52  ;;  %v3173_v40 = vld [vmem:[#allocation9 + $0x1568] sm:$0xff] }
 0x4e3   : > { %9478 = vmatpush1.bf16.msra.mxu0 %v11146_v0  ;;  %v11242_v0 = vcombine.low %v3084_v48, %v3092_v49  ;;  %v3180_v48 = vld [vmem:[#allocation9 + $0x15a0] sm:$0xff] }
 0x4e4   : > { %9650 = vmatpush1.bf16.msra.mxu1 %v11148_v1  ;;  %9490 = vmatprep.subr.bf16.mxu0 %v11163_v3  ;;  %v11244_v1 = vcombine.low %v3085_v51, %v3093_v52  ;;  %v11259_v3 = vcombine.high %v3100_v60, %v3108_v61  ;;  %v3188_v49 = vld [vmem:[#allocation9 + $0x15e0] sm:$0xff]  ;;  %v3181_v51 = vld [vmem:[#allocation9 + $0x15a8] sm:$0xff] }
 0x4e5   : > { %9662 = vmatprep.subr.bf16.mxu1 %v11165_v2  ;;  %v11261_v2 = vcombine.high %v3101_v62, %v3109_v63  ;;  %v3189_v52 = vld [vmem:[#allocation9 + $0x15e8] sm:$0xff]  ;;  %v3196_v60 = vld [vmem:[#allocation9 + $0x1620] sm:$0xff] }
 0x4e6   : > { %9480 = vmatmul.mubr.bf16.vlgmr.msra.gmra.mrb[20].mxu0 %v12457_v23  ;;  %v3204_v61 = vld [vmem:[#allocation9 + $0x1660] sm:$0xff] }
 0x4e7   : > { %9652 = vmatmul.mubr.bf16.vlgmr.msra.gmra.mrb[20].mxu1 %v12457_v23  ;;  %9491 = vmatpush1.bf16.msra.mxu0 %v11162_v7  ;;  %v3117_v7 = vld [vmem:[#allocation9 + $0x13a8] sm:$0xff] }
 0x4e8   : > { %9522 = vmatprep.mubr.bf16.mxu0 %v12499_v55  ;;  %9663 = vmatpush1.bf16.msra.mxu1 %v11164_v10  ;;  %v11260_v10 = vcombine.low %v3101_v62, %v3109_v63  ;;  %v11277_v12 = vcombine.high %v3117_v7, %v3125_v8  ;;  %v3197_v62 = vld [vmem:[#allocation9 + $0x1628] sm:$0xff] }
 0x4e9   : > { %9694 = vmatprep.mubr.bf16.mxu1 %v12499_v55  ;;  %9492 = vmatprep.subr.bf16.mxu0 %v11179_v11  ;;  %v11275_v11 = vcombine.high %v3116_v4, %v3124_v5  ;;  %v3205_v63 = vld [vmem:[#allocation9 + $0x1668] sm:$0xff] }
 0x4ea   : > { %9664 = vmatprep.subr.bf16.mxu1 %v11181_v14  ;;  %v3140_v14 = vld [vmem:[#allocation9 + $0x1460] sm:$0xff] }
 0x4eb   : > { %9493 = vmatpush1.bf16.msra.mxu0 %v11178_v16  ;;  %v11274_v16 = vcombine.low %v3116_v4, %v3124_v5  ;;  %v3212_v4 = vld [vmem:[#allocation9 + $0x16a0] sm:$0xff] }
 0x4ec   : > { %9665 = vmatpush1.bf16.msra.mxu1 %v11180_v17  ;;  %9494 = vmatprep.subr.bf16.mxu0 %v11195_v18  ;;  %v11276_v17 = vcombine.low %v3117_v7, %v3125_v8  ;;  %v11291_v18 = vcombine.high %v3132_v13, %v3140_v14  ;;  %v3220_v5 = vld [vmem:[#allocation9 + $0x16e0] sm:$0xff]  ;;  %v3213_v7 = vld [vmem:[#allocation9 + $0x16a8] sm:$0xff] }
 0x4ed   : > { %9666 = vmatprep.subr.bf16.mxu1 %v11197_v19  ;;  %v11293_v19 = vcombine.high %v3133_v53, %v3141_v15  ;;  %v3221_v8 = vld [vmem:[#allocation9 + $0x16e8] sm:$0xff] }
 0x4ef   : > { %9495 = vmatpush1.bf16.msra.mxu0 %v11194_v33  ;;  %v11290_v33 = vcombine.low %v3132_v13, %v3140_v14  ;;  %v3228_v13 = vld [vmem:[#allocation9 + $0x1720] sm:$0xff] }
 0x4f0   : > { %9667 = vmatpush1.bf16.msra.mxu1 %v11196_v36  ;;  %9496 = vmatprep.subr.bf16.mxu0 %v11211_v37  ;;  %v11292_v36 = vcombine.low %v3133_v53, %v3141_v15  ;;  %v11307_v37 = vcombine.high %v3148_v25, %v3156_v27  ;;  %v3236_v14 = vld [vmem:[#allocation9 + $0x1760] sm:$0xff]  ;;  %v3229_v53 = vld [vmem:[#allocation9 + $0x1728] sm:$0xff] }
 0x4f1   : > { %9668 = vmatprep.subr.bf16.mxu1 %v11213_v34  ;;  %v11309_v34 = vcombine.high %v3149_v29, %v3157_v32  ;;  %v3237_v15 = vld [vmem:[#allocation9 + $0x1768] sm:$0xff] }
 0x4f3   : > { %9497 = vmatpush1.bf16.msra.mxu0 %v11210_v41  ;;  %v11306_v41 = vcombine.low %v3148_v25, %v3156_v27  ;;  %v3244_v25 = vld [vmem:[#allocation9 + $0x17a0] sm:$0xff] }
 0x4f4   : > { %9669 = vmatpush1.bf16.msra.mxu1 %v11212_v56  ;;  %9498 = vmatprep.subr.bf16.mxu0 %v11227_v42  ;;  %v11308_v56 = vcombine.low %v3149_v29, %v3157_v32  ;;  %v11323_v42 = vcombine.high %v3164_v35, %v3172_v38  ;;  %v3252_v27 = vld [vmem:[#allocation9 + $0x17e0] sm:$0xff]  ;;  %v3245_v29 = vld [vmem:[#allocation9 + $0x17a8] sm:$0xff] }
 0x4f5   : > { %9670 = vmatprep.subr.bf16.mxu1 %v11229_v47  ;;  %v11325_v47 = vcombine.high %v3165_v39, %v3173_v40  ;;  %v3253_v32 = vld [vmem:[#allocation9 + $0x17e8] sm:$0xff] }
 0x4f7   : > { %9499 = vmatpush1.bf16.msra.mxu0 %v11226_v57  ;;  %v11322_v57 = vcombine.low %v3164_v35, %v3172_v38  ;;  %v3260_v35 = vld [vmem:[#allocation9 + $0x1820] sm:$0xff] }
 0x4f8   : > { %9671 = vmatpush1.bf16.msra.mxu1 %v11228_v59  ;;  %9500 = vmatprep.subr.bf16.mxu0 %v11243_v6  ;;  %v11324_v59 = vcombine.low %v3165_v39, %v3173_v40  ;;  %v11339_v6 = vcombine.high %v3180_v48, %v3188_v49  ;;  %v3268_v38 = vld [vmem:[#allocation9 + $0x1860] sm:$0xff]  ;;  %v3261_v39 = vld [vmem:[#allocation9 + $0x1828] sm:$0xff] }
 0x4f9   : > { %9672 = vmatprep.subr.bf16.mxu1 %v11245_v21  ;;  %v11341_v21 = vcombine.high %v3181_v51, %v3189_v52  ;;  %v3269_v40 = vld [vmem:[#allocation9 + $0x1868] sm:$0xff] }
 0x4fb   : > { %9501 = vmatpush1.bf16.msra.mxu0 %v11242_v0  ;;  %v11338_v0 = vcombine.low %v3180_v48, %v3188_v49  ;;  %v3276_v48 = vld [vmem:[#allocation9 + $0x18a0] sm:$0xff] }
 0x4fc   : > { %9673 = vmatpush1.bf16.msra.mxu1 %v11244_v1  ;;  %9502 = vmatprep.subr.bf16.mxu0 %v11259_v3  ;;  %v11340_v1 = vcombine.low %v3181_v51, %v3189_v52  ;;  %v11355_v3 = vcombine.high %v3196_v60, %v3204_v61  ;;  %v3284_v49 = vld [vmem:[#allocation9 + $0x18e0] sm:$0xff]  ;;  %v11418_v51 = vcombine.low %v3260_v35, %v3268_v38  ;;  %v3277_v52 = vld [vmem:[#allocation9 + $0x18a8] sm:$0xff] }
 0x4fd   : > { %9674 = vmatprep.subr.bf16.mxu1 %v11261_v2  ;;  %v11357_v2 = vcombine.high %v3197_v62, %v3205_v63 }
 0x4ff   : > { %9503 = vmatpush1.bf16.msra.mxu0 %v11258_v9  ;;  %v11354_v9 = vcombine.low %v3196_v60, %v3204_v61  ;;  %v3300_v60 = vld [vmem:[#allocation9 + $0x1960] sm:$0xff] }
 0x500   : > { %9675 = vmatpush1.bf16.msra.mxu1 %v11260_v10  ;;  %9504 = vmatprep.subr.bf16.mxu0 %v11275_v11  ;;  %v11356_v10 = vcombine.low %v3197_v62, %v3205_v63  ;;  %v11371_v11 = vcombine.high %v3212_v4, %v3220_v5  ;;  %v3293_v62 = vld [vmem:[#allocation9 + $0x1928] sm:$0xff] }
 0x501   : > { %9676 = vmatprep.subr.bf16.mxu1 %v11277_v12  ;;  %v11373_v12 = vcombine.high %v3213_v7, %v3221_v8  ;;  %v3301_v63 = vld [vmem:[#allocation9 + $0x1968] sm:$0xff] }
 0x503   : > { %9505 = vmatpush1.bf16.msra.mxu0 %v11274_v16  ;;  %v11370_v16 = vcombine.low %v3212_v4, %v3220_v5  ;;  %v3308_v4 = vld [vmem:[#allocation9 + $0x19a0] sm:$0xff] }
 0x504   : > { %9677 = vmatpush1.bf16.msra.mxu1 %v11276_v17  ;;  %9506 = vmatprep.subr.bf16.mxu0 %v11291_v18  ;;  %v11372_v17 = vcombine.low %v3213_v7, %v3221_v8  ;;  %v11387_v18 = vcombine.high %v3228_v13, %v3236_v14  ;;  %v3316_v5 = vld [vmem:[#allocation9 + $0x19e0] sm:$0xff]  ;;  %v3309_v7 = vld [vmem:[#allocation9 + $0x19a8] sm:$0xff] }
 0x505   : > { %9678 = vmatprep.subr.bf16.mxu1 %v11293_v19  ;;  %v11389_v19 = vcombine.high %v3229_v53, %v3237_v15  ;;  %v3317_v8 = vld [vmem:[#allocation9 + $0x19e8] sm:$0xff] }
 0x507   : > { %9507 = vmatpush1.bf16.msra.mxu0 %v11290_v33  ;;  %v11386_v33 = vcombine.low %v3228_v13, %v3236_v14  ;;  %v3324_v13 = vld [vmem:[#allocation9 + $0x1a20] sm:$0xff] }
 0x508   : > { %9679 = vmatpush1.bf16.msra.mxu1 %v11292_v36  ;;  %9508 = vmatprep.subr.bf16.mxu0 %v11307_v37  ;;  %v11388_v36 = vcombine.low %v3229_v53, %v3237_v15  ;;  %v11403_v37 = vcombine.high %v3244_v25, %v3252_v27  ;;  %v3332_v14 = vld [vmem:[#allocation9 + $0x1a60] sm:$0xff]  ;;  %v3325_v53 = vld [vmem:[#allocation9 + $0x1a28] sm:$0xff] }
 0x509   : > { %9680 = vmatprep.subr.bf16.mxu1 %v11309_v34  ;;  %v11405_v34 = vcombine.high %v3245_v29, %v3253_v32  ;;  %v3333_v15 = vld [vmem:[#allocation9 + $0x1a68] sm:$0xff] }
 0x50b   : > { %9509 = vmatpush1.bf16.msra.mxu0 %v11306_v41  ;;  %v11402_v41 = vcombine.low %v3244_v25, %v3252_v27  ;;  %v3340_v25 = vld [vmem:[#allocation9 + $0x1aa0] sm:$0xff] }
 0x50c   : > { %9681 = vmatpush1.bf16.msra.mxu1 %v11308_v56  ;;  %9510 = vmatprep.subr.bf16.mxu0 %v11323_v42  ;;  %v11404_v56 = vcombine.low %v3245_v29, %v3253_v32  ;;  %v11419_v42 = vcombine.high %v3260_v35, %v3268_v38  ;;  %v3348_v27 = vld [vmem:[#allocation9 + $0x1ae0] sm:$0xff]  ;;  %v3341_v29 = vld [vmem:[#allocation9 + $0x1aa8] sm:$0xff] }
 0x50d   : > { %9682 = vmatprep.subr.bf16.mxu1 %v11325_v47  ;;  %v11421_v47 = vcombine.high %v3261_v39, %v3269_v40  ;;  %v3349_v32 = vld [vmem:[#allocation9 + $0x1ae8] sm:$0xff]  ;;  %v3356_v35 = vld [vmem:[#allocation9 + $0x1b20] sm:$0xff] }
 0x50e   : > { %v3364_v38 = vld [vmem:[#allocation9 + $0x1b60] sm:$0xff] }
 0x50f   : > { %9511 = vmatpush1.bf16.msra.mxu0 %v11322_v57  ;;  %v3285_v57 = vld [vmem:[#allocation9 + $0x18e8] sm:$0xff] }
 0x510   : > { %9683 = vmatpush1.bf16.msra.mxu1 %v11324_v59  ;;  %9512 = vmatprep.subr.bf16.mxu0 %v11339_v6  ;;  %v11420_v59 = vcombine.low %v3261_v39, %v3269_v40  ;;  %v11435_v6 = vcombine.high %v3276_v48, %v3284_v49  ;;  %v11437_v61 = vcombine.high %v3277_v52, %v3285_v57  ;;  %v11949_v39 = vld [vmem:[#allocation10] sm:$0xff] }
 0x511   : > { %9684 = vmatprep.subr.bf16.mxu1 %v11341_v21  ;;  %v3292_v21 = vld [vmem:[#allocation9 + $0x1920] sm:$0xff]  ;;  %v3535_v40 = vrot.slane %v11949_v39, %v12476_v43 }
 0x513   : > { %9513 = vmatpush1.bf16.msra.mxu0 %v11338_v0  ;;  %v11434_v0 = vcombine.low %v3276_v48, %v3284_v49  ;;  %v11498_v48 = vcombine.low %v3340_v25, %v3348_v27  ;;  %v3547_v49 = vrot.slane %v11949_v39, %v12485_v50 }
 0x514   : > { %9685 = vmatpush1.bf16.msra.mxu1 %v11340_v1  ;;  %9514 = vmatprep.subr.bf16.mxu0 %v11355_v3  ;;  %v11436_v1 = vcombine.low %v3277_v52, %v3285_v57  ;;  %v11451_v3 = vcombine.high %v3292_v21, %v3300_v60  ;;  %v11515_v52 = vcombine.high %v3356_v35, %v3364_v38  ;;  %v3372_v57 = vld [vmem:[#allocation9 + $0x1ba0] sm:$0xff] }
 0x515   : > { %9686 = vmatprep.subr.bf16.mxu1 %v11357_v2  ;;  %v11453_v2 = vcombine.high %v3293_v62, %v3301_v63 }
 0x517   : > { %9515 = vmatpush1.bf16.msra.mxu0 %v11354_v9  ;;  %v11450_v9 = vcombine.low %v3292_v21, %v3300_v60  ;;  %v3373_v60 = vld [vmem:[#allocation9 + $0x1ba8] sm:$0xff] }
 0x518   : > { %9687 = vmatpush1.bf16.msra.mxu1 %v11356_v10  ;;  %9516 = vmatprep.subr.bf16.mxu0 %v11371_v11  ;;  %v11452_v10 = vcombine.low %v3293_v62, %v3301_v63  ;;  %v11467_v11 = vcombine.high %v3308_v4, %v3316_v5 }
 0x519   : > { %9688 = vmatprep.subr.bf16.mxu1 %v11373_v12  ;;  %v11469_v12 = vcombine.high %v3309_v7, %v3317_v8 }
 0x51b   : > { %9517 = vmatpush1.bf16.msra.mxu0 %v11370_v16  ;;  %v11466_v16 = vcombine.low %v3308_v4, %v3316_v5 }
 0x51c   : > { %9689 = vmatpush1.bf16.msra.mxu1 %v11372_v17  ;;  %9518 = vmatprep.subr.bf16.mxu0 %v11387_v18  ;;  %v11468_v17 = vcombine.low %v3309_v7, %v3317_v8  ;;  %v11483_v18 = vcombine.high %v3324_v13, %v3332_v14 }
 0x51d   : > { %9690 = vmatprep.subr.bf16.mxu1 %v11389_v19  ;;  %v11485_v19 = vcombine.high %v3325_v53, %v3333_v15 }
 0x51f   : > { %9519 = vmatpush1.bf16.msra.mxu0 %v11386_v33  ;;  %v11482_v33 = vcombine.low %v3324_v13, %v3332_v14 }
 0x520   : > { %9691 = vmatpush1.bf16.msra.mxu1 %v11388_v36  ;;  %9520 = vmatprep.subr.bf16.mxu0 %v11403_v37  ;;  %v11484_v36 = vcombine.low %v3325_v53, %v3333_v15  ;;  %v11499_v37 = vcombine.high %v3340_v25, %v3348_v27  ;;  %v3396_v25 = vld [vmem:[#allocation9 + $0x1c60] sm:$0xff] }
 0x521   : > { %9692 = vmatprep.subr.bf16.mxu1 %v11405_v34  ;;  %v11501_v34 = vcombine.high %v3341_v29, %v3349_v32 }
 0x523   : > { %9521 = vmatpush1.bf16.msra.mxu0 %v11402_v41  ;;  %v3357_v41 = vld [vmem:[#allocation9 + $0x1b28] sm:$0xff] }
 0x524   : > { %9693 = vmatpush1.bf16.msra.mxu1 %v11404_v56  ;;  %9533 = vmatprep.subr.bf16.mxu0 %v11419_v42  ;;  %v3365_v56 = vld [vmem:[#allocation9 + $0x1b68] sm:$0xff]  ;;  %v3543_v42 = vrot.slane %v11949_v39, %v12479_v45 }
 0x525   : > { %9705 = vmatprep.subr.bf16.mxu1 %v11421_v47  ;;  %v3539_v47 = vrot.slane %v11949_v39, %v12482_v46  ;;  %v11517_v21 = vcombine.high %v3357_v41, %v3365_v56  ;;  %v11516_v7 = vcombine.low %v3357_v41, %v3365_v56 }
 0x526   : > { %9523 = vmatmul.mubr.bf16.vlgmr.msra.gmra.mrb[20].mxu0 %v12495_v44 }
 0x527   : > { %9695 = vmatmul.mubr.bf16.vlgmr.msra.gmra.mrb[20].mxu1 %v12495_v44  ;;  %9534 = vmatpush1.bf16.msra.mxu0 %v11418_v51  ;;  %v11500_v51 = vcombine.low %v3341_v29, %v3349_v32 }
 0x528   : > { %9565 = vmatprep.mubr.bf16.mxu0 %v12501_v58  ;;  %9706 = vmatpush1.bf16.msra.mxu1 %v11420_v59  ;;  %v3380_v59 = vld [vmem:[#allocation9 + $0x1be0] sm:$0xff] }
 0x529   : > { %9737 = vmatprep.mubr.bf16.mxu1 %v12501_v58  ;;  %9535 = vmatprep.subr.bf16.mxu0 %v11435_v6  ;;  %v11531_v8 = vcombine.high %v3372_v57, %v3380_v59 }
 0x52a   : > { %9707 = vmatprep.subr.bf16.mxu1 %v11437_v61  ;;  %v3381_v61 = vld [vmem:[#allocation9 + $0x1be8] sm:$0xff] }
 0x52b   : > { %9536 = vmatpush1.bf16.msra.mxu0 %v11434_v0  ;;  %v11533_v14 = vcombine.high %v3373_v60, %v3381_v61  ;;  %v11532_v41 = vcombine.low %v3373_v60, %v3381_v61  ;;  %v3420_v61 = vld [vmem:[#allocation9 + $0x1d20] sm:$0xff] }
 0x52c   : > { %9708 = vmatpush1.bf16.msra.mxu1 %v11436_v1  ;;  %9537 = vmatprep.subr.bf16.mxu0 %v11451_v3  ;;  %v11514_v1 = vcombine.low %v3356_v35, %v3364_v38  ;;  %v11530_v38 = vcombine.low %v3372_v57, %v3380_v59 }
 0x52d   : > { %9709 = vmatprep.subr.bf16.mxu1 %v11453_v2 }
 0x52f   : > { %9538 = vmatpush1.bf16.msra.mxu0 %v11450_v9 }
 0x530   : > { %9710 = vmatpush1.bf16.msra.mxu1 %v11452_v10  ;;  %9539 = vmatprep.subr.bf16.mxu0 %v11467_v11 }
 0x531   : > { %9711 = vmatprep.subr.bf16.mxu1 %v11469_v12 }
 0x533   : > { %9540 = vmatpush1.bf16.msra.mxu0 %v11466_v16 }
 0x534   : > { %9712 = vmatpush1.bf16.msra.mxu1 %v11468_v17  ;;  %9541 = vmatprep.subr.bf16.mxu0 %v11483_v18 }
 0x535   : > { %9713 = vmatprep.subr.bf16.mxu1 %v11485_v19  ;;  %v3388_v19 = vld [vmem:[#allocation9 + $0x1c20] sm:$0xff] }
 0x536   : > { %v11547_v56 = vcombine.high %v3388_v19, %v3396_v25  ;;  %v11546_v57 = vcombine.low %v3388_v19, %v3396_v25 }
 0x537   : > { %9542 = vmatpush1.bf16.msra.mxu0 %v11482_v33  ;;  %v3389_v33 = vld [vmem:[#allocation9 + $0x1c28] sm:$0xff] }
 0x538   : > { %9714 = vmatpush1.bf16.msra.mxu1 %v11484_v36  ;;  %9543 = vmatprep.subr.bf16.mxu0 %v11499_v37  ;;  %v3397_v36 = vld [vmem:[#allocation9 + $0x1c68] sm:$0xff] }
 0x539   : > { %v9223_v6 = vpop.f32.mrb[16].mxu0  ;;  %9715 = vmatprep.subr.bf16.mxu1 %v11501_v34  ;;  %v11548_v59 = vcombine.low %v3389_v33, %v3397_v36 }
 0x53a   : > { %v11725_v62 = vadd.f32 %v9223_v6, %v3535_v40  ;;  %v9395_v63 = vpop.f32.mrb[16].mxu1  ;;  %v9225_v0 = vpop.f32.mrb[17].mxu0  ;;  %v3413_v6 = vld [vmem:[#allocation9 + $0x1ce8] sm:$0xff] }
 0x53b   : > { %v11729_v3 = vadd.f32 %v9395_v63, %v3543_v42  ;;  %v11726_v2 = vadd.f32 %v9225_v0, %v3539_v47  ;;  %v9397_v4 = vpop.f32.mrb[17].mxu1  ;;  %v9227_v5 = vpop.f32.mrb[18].mxu0  ;;  %9544 = vmatpush1.bf16.msra.mxu0 %v11498_v48  ;;  %v3404_v48 = vld [vmem:[#allocation9 + $0x1ca0] sm:$0xff]  ;;  %v3421_v63 = vld [vmem:[#allocation9 + $0x1d28] sm:$0xff] }
 0x53c   : > { %v10096_v9 = vmax.f32 %v11725_v62, 0.0  ;;  %v11730_v10 = vadd.f32 %v9397_v4, %v3547_v49  ;;  %v11727_v11 = vadd.f32 %v9227_v5, %v3535_v40  ;;  %v9399_v12 = vpop.f32.mrb[18].mxu1  ;;  %9716 = vmatpush1.bf16.msra.mxu1 %v11500_v51  ;;  %v9229_v13 = vpop.f32.mrb[19].mxu0  ;;  %9545 = vmatprep.subr.bf16.mxu0 %v11515_v52  ;;  %v3405_v52 = vld [vmem:[#allocation9 + $0x1ca8] sm:$0xff]  ;;  %v3428_v62 = vld [vmem:[#allocation9 + $0x1d60] sm:$0xff] }
 0x53d   : > { %v10098_v53 = vmax.f32 %v11729_v3, 0.0  ;;  %v10097_v15 = vmax.f32 %v11726_v2, 0.0  ;;  %v11731_v16 = vadd.f32 %v9399_v12, %v3543_v42  ;;  %v11728_v17 = vadd.f32 %v9229_v13, %v3539_v47  ;;  %v9401_v18 = vpop.f32.mrb[19].mxu1  ;;  %9717 = vmatprep.subr.bf16.mxu1 %v11517_v21  ;;  %v3429_v0 = vld [vmem:[#allocation9 + $0x1d68] sm:$0xff]  ;;  %v3436_v5 = vld [vmem:[#allocation9 + $0x1da0] sm:$0xff] }
 0x53e   : > { %v10099_v27 = vmax.f32 %v11730_v10, 0.0  ;;  %v10112_v29 = vmax.f32 %v11727_v11, 0.0  ;;  %v11732_v32 = vadd.f32 %v9401_v18, %v3547_v49  ;;  %v11549_v47 = vcombine.high %v3389_v33, %v3397_v36  ;;  %v3412_v49 = vld [vmem:[#allocation9 + $0x1ce0] sm:$0xff]  ;;  %v3477_v33 = vld [vmem:[#allocation9 + $0x1ee8] sm:$0xff] }
 0x53f   : > { %v11687_v37 = vpack.c.bf16 %v10097_v15, %v10096_v9  ;;  %v10114_v34 = vmax.f32 %v11731_v16, 0.0  ;;  %v10113_v35 = vmax.f32 %v11728_v17, 0.0  ;;  %9546 = vmatpush1.bf16.msra.mxu0 %v11514_v1  ;;  %v11563_v21 = vcombine.high %v3404_v48, %v3412_v49  ;;  %v3445_v9 = vld [vmem:[#allocation9 + $0x1de8] sm:$0xff] }
 0x540   : > { %v11688_v39 = vpack.c.bf16 %v10099_v27, %v10098_v53  ;;  %v10115_v40 = vmax.f32 %v11732_v32, 0.0  ;;  %9718 = vmatpush1.bf16.msra.mxu1 %v11516_v7  ;;  %9547 = vmatprep.subr.bf16.mxu0 %v11531_v8  ;;  %v11565_v60 = vcombine.high %v3405_v52, %v3413_v6  ;;  %v11562_v1 = vcombine.low %v3404_v48, %v3412_v49  ;;  %v3444_v7 = vld [vmem:[#allocation9 + $0x1de0] sm:$0xff]  ;;  %v3437_v8 = vld [vmem:[#allocation9 + $0x1da8] sm:$0xff] }
 0x541   : > { %10222 = vst [vmem:[%s12545_s30 + $0x10] sm:$0xff] %v11687_v37  ;;  %v11695_v42 = vpack.c.bf16 %v10113_v35, %v10112_v29  ;;  %9719 = vmatprep.subr.bf16.mxu1 %v11533_v14  ;;  %v11564_v3 = vcombine.low %v3405_v52, %v3413_v6  ;;  %v11579_v2 = vcombine.high %v3420_v61, %v3428_v62  ;;  %v3452_v14 = vld [vmem:[#allocation9 + $0x1e20] sm:$0xff]  ;;  %v3453_v15 = vld [vmem:[#allocation9 + $0x1e28] sm:$0xff] }
 0x542   : > { %10223 = vst [vmem:[%s12545_s30 + $0x18] sm:$0xff] %v11688_v39  ;;  %v11696_v51 = vpack.c.bf16 %v10115_v40, %v10114_v34  ;;  %v11581_v4 = vcombine.high %v3421_v63, %v3429_v0  ;;  %v11578_v10 = vcombine.low %v3420_v61, %v3428_v62  ;;  %v11580_v11 = vcombine.low %v3421_v63, %v3429_v0  ;;  %v3460_v53 = vld [vmem:[#allocation9 + $0x1e60] sm:$0xff]  ;;  %v3461_v16 = vld [vmem:[#allocation9 + $0x1e68] sm:$0xff]  ;;  %v2494_v61 = vld [vmem:[#allocation9 + $0x30] sm:$0xff] }
 0x543   : > { %10230 = vst [vmem:[%s12545_s30 + $0x50] sm:$0xff] %v11695_v42  ;;  %9548 = vmatpush1.bf16.msra.mxu0 %v11530_v38  ;;  %v11595_v12 = vcombine.high %v3436_v5, %v3444_v7  ;;  %v11597_v13 = vcombine.high %v3437_v8, %v3445_v9  ;;  %v11594_v17 = vcombine.low %v3436_v5, %v3444_v7  ;;  %v3468_v27 = vld [vmem:[#allocation9 + $0x1ea0] sm:$0xff]  ;;  %v3469_v32 = vld [vmem:[#allocation9 + $0x1ea8] sm:$0xff]  ;;  %v2502_v62 = vld [vmem:[#allocation9 + $0x70] sm:$0xff] }
 0x544   : > { %10231 = vst [vmem:[%s12545_s30 + $0x58] sm:$0xff] %v11696_v51  ;;  %9720 = vmatpush1.bf16.msra.mxu1 %v11532_v41  ;;  %9549 = vmatprep.subr.bf16.mxu0 %v11547_v56  ;;  %v11596_v18 = vcombine.low %v3437_v8, %v3445_v9  ;;  %v11611_v19 = vcombine.high %v3452_v14, %v3460_v53  ;;  %v3476_v29 = vld [vmem:[#allocation9 + $0x1ee0] sm:$0xff]  ;;  %v3485_v40 = vld [vmem:[#allocation9 + $0x1f28] sm:$0xff]  ;;  %v2495_v63 = vld [vmem:[#allocation9 + $0x38] sm:$0xff] }
 0x545   : > { %9721 = vmatprep.subr.bf16.mxu1 %v11549_v47  ;;  %v11613_v25 = vcombine.high %v3453_v15, %v3461_v16  ;;  %v11610_v36 = vcombine.low %v3452_v14, %v3460_v53  ;;  %v11612_v37 = vcombine.low %v3453_v15, %v3461_v16  ;;  %v11627_v34 = vcombine.high %v3468_v27, %v3476_v29  ;;  %v3484_v38 = vld [vmem:[#allocation9 + $0x1f20] sm:$0xff]  ;;  %v3493_v41 = vld [vmem:[#allocation9 + $0x1f68] sm:$0xff]  ;;  %v2503_v0 = vld [vmem:[#allocation9 + $0x78] sm:$0xff] }
 0x546   : > { %v11629_v35 = vcombine.high %v3469_v32, %v3477_v33  ;;  %v3492_v39 = vld [vmem:[#allocation9 + $0x1f60] sm:$0xff]  ;;  %v11626_v56 = vcombine.low %v3468_v27, %v3476_v29  ;;  %v11628_v42 = vcombine.low %v3469_v32, %v3477_v33  ;;  %v11645_v48 = vcombine.high %v3485_v40, %v3493_v41  ;;  %v3501_v52 = vld [vmem:[#allocation9 + $0x1fa8] sm:$0xff]  ;;  %v2510_v5 = vld [vmem:[#allocation9 + $0xb0] sm:$0xff] }
 0x547   : > { %9550 = vmatpush1.bf16.msra.mxu0 %v11546_v57  ;;  %v11643_v47 = vcombine.high %v3484_v38, %v3492_v39  ;;  %v3500_v49 = vld [vmem:[#allocation9 + $0x1fa0] sm:$0xff]  ;;  %v3509_v6 = vld [vmem:[#allocation9 + $0x1fe8] sm:$0xff]  ;;  %v11642_v57 = vcombine.low %v3484_v38, %v3492_v39  ;;  %v2518_v7 = vld [vmem:[#allocation9 + $0xf0] sm:$0xff]  ;;  %v10654_v8 = vcombine.low %v2494_v61, %v2502_v62 }
 0x548   : > { %9722 = vmatpush1.bf16.msra.mxu1 %v11548_v59  ;;  %9551 = vmatprep.subr.bf16.mxu0 %v11563_v21  ;;  %v3508_v51 = vld [vmem:[#allocation9 + $0x1fe0] sm:$0xff]  ;;  %v11644_v59 = vcombine.low %v3485_v40, %v3493_v41  ;;  %v2511_v9 = vld [vmem:[#allocation9 + $0xb8] sm:$0xff]  ;;  %v2534_v14 = vld [vmem:[#allocation9 + $0x170] sm:$0xff] }
 0x549   : > { %9723 = vmatprep.subr.bf16.mxu1 %v11565_v60  ;;  %v11659_v21 = vcombine.high %v3500_v49, %v3508_v51  ;;  %v11661_v60 = vcombine.high %v3501_v52, %v3509_v6  ;;  %v2527_v15 = vld [vmem:[#allocation9 + $0x138] sm:$0xff]  ;;  %v2542_v27 = vld [vmem:[#allocation9 + $0x1b0] sm:$0xff] }
 0x54a   : > { %v2535_v16 = vld [vmem:[#allocation9 + $0x178] sm:$0xff]  ;;  %v2550_v29 = vld [vmem:[#allocation9 + $0x1f0] sm:$0xff] }
 0x54b   : > { %9552 = vmatpush1.bf16.msra.mxu0 %v11562_v1  ;;  %v11658_v1 = vcombine.low %v3500_v49, %v3508_v51  ;;  %v2543_v32 = vld [vmem:[#allocation9 + $0x1b8] sm:$0xff]  ;;  %v2558_v38 = vld [vmem:[#allocation9 + $0x230] sm:$0xff] }
 0x54c   : > { %9724 = vmatpush1.bf16.msra.mxu1 %v11564_v3  ;;  %9553 = vmatprep.subr.bf16.mxu0 %v11579_v2  ;;  %v11660_v3 = vcombine.low %v3501_v52, %v3509_v6  ;;  %v10655_v2 = vcombine.high %v2494_v61, %v2502_v62  ;;  %v2551_v33 = vld [vmem:[#allocation9 + $0x1f8] sm:$0xff]  ;;  %v2566_v39 = vld [vmem:[#allocation9 + $0x270] sm:$0xff] }
 0x54d   : > { %9725 = vmatprep.subr.bf16.mxu1 %v11581_v4  ;;  %v10657_v4 = vcombine.high %v2495_v63, %v2503_v0  ;;  %v2559_v40 = vld [vmem:[#allocation9 + $0x238] sm:$0xff]  ;;  %v2582_v49 = vld [vmem:[#allocation9 + $0x2f0] sm:$0xff]  ;;  %v10718_v6 = vcombine.low %v2558_v38, %v2566_v39 }
 0x54e   : > { %v2567_v41 = vld [vmem:[#allocation9 + $0x278] sm:$0xff]  ;;  %v2598_v61 = vld [vmem:[#allocation9 + $0x370] sm:$0xff] }
 0x54f   : > { %9554 = vmatpush1.bf16.msra.mxu0 %v11578_v10  ;;  %v2519_v10 = vld [vmem:[#allocation9 + $0xf8] sm:$0xff] }
 0x550   : > { %9726 = vmatpush1.bf16.msra.mxu1 %v11580_v11  ;;  %9555 = vmatprep.subr.bf16.mxu0 %v11595_v12  ;;  %v10656_v11 = vcombine.low %v2495_v63, %v2503_v0  ;;  %v10671_v12 = vcombine.high %v2510_v5, %v2518_v7  ;;  %v10673_v53 = vcombine.high %v2511_v9, %v2519_v10  ;;  %v2575_v51 = vld [vmem:[#allocation9 + $0x2b8] sm:$0xff] }
 0x551   : > { %9727 = vmatprep.subr.bf16.mxu1 %v11597_v13  ;;  %v2526_v13 = vld [vmem:[#allocation9 + $0x130] sm:$0xff]  ;;  %v2583_v52 = vld [vmem:[#allocation9 + $0x2f8] sm:$0xff] }
 0x552   : > { %v2591_v62 = vld [vmem:[#allocation9 + $0x338] sm:$0xff] }
 0x553   : > { %9556 = vmatpush1.bf16.msra.mxu0 %v11594_v17  ;;  %v10670_v17 = vcombine.low %v2510_v5, %v2518_v7  ;;  %v2599_v63 = vld [vmem:[#allocation9 + $0x378] sm:$0xff]  ;;  %v2614_v5 = vld [vmem:[#allocation9 + $0x3f0] sm:$0xff] }
 0x554   : > { %9728 = vmatpush1.bf16.msra.mxu1 %v11596_v18  ;;  %9557 = vmatprep.subr.bf16.mxu0 %v11611_v19  ;;  %v10672_v18 = vcombine.low %v2511_v9, %v2519_v10  ;;  %v10687_v19 = vcombine.high %v2526_v13, %v2534_v14  ;;  %v2607_v7 = vld [vmem:[#allocation9 + $0x3b8] sm:$0xff]  ;;  %v10752_v10 = vcombine.low %v2591_v62, %v2599_v63 }
 0x555   : > { %9729 = vmatprep.subr.bf16.mxu1 %v11613_v25  ;;  %v10689_v25 = vcombine.high %v2527_v15, %v2535_v16 }
 0x557   : > { %9558 = vmatpush1.bf16.msra.mxu0 %v11610_v36  ;;  %v10686_v36 = vcombine.low %v2526_v13, %v2534_v14  ;;  %v2622_v13 = vld [vmem:[#allocation9 + $0x430] sm:$0xff] }
 0x558   : > { %9730 = vmatpush1.bf16.msra.mxu1 %v11612_v37  ;;  %9559 = vmatprep.subr.bf16.mxu0 %v11627_v34  ;;  %v10688_v37 = vcombine.low %v2527_v15, %v2535_v16  ;;  %v10703_v34 = vcombine.high %v2542_v27, %v2550_v29  ;;  %v2630_v14 = vld [vmem:[#allocation9 + $0x470] sm:$0xff]  ;;  %v2631_v15 = vld [vmem:[#allocation9 + $0x478] sm:$0xff] }
 0x559   : > { %9731 = vmatprep.subr.bf16.mxu1 %v11629_v35  ;;  %v10705_v35 = vcombine.high %v2543_v32, %v2551_v33 }
 0x55b   : > { %9560 = vmatpush1.bf16.msra.mxu0 %v11626_v56  ;;  %v10704_v56 = vcombine.low %v2543_v32, %v2551_v33  ;;  %v2647_v32 = vld [vmem:[#allocation9 + $0x4f8] sm:$0xff]  ;;  %v10782_v33 = vcombine.low %v2622_v13, %v2630_v14 }
 0x55c   : > { %9732 = vmatpush1.bf16.msra.mxu1 %v11628_v42  ;;  %9561 = vmatprep.subr.bf16.mxu0 %v11643_v47  ;;  %v10719_v42 = vcombine.high %v2558_v38, %v2566_v39  ;;  %v10721_v47 = vcombine.high %v2559_v40, %v2567_v41  ;;  %v2662_v38 = vld [vmem:[#allocation9 + $0x570] sm:$0xff]  ;;  %v2655_v39 = vld [vmem:[#allocation9 + $0x538] sm:$0xff] }
 0x55d   : > { %9733 = vmatprep.subr.bf16.mxu1 %v11645_v48  ;;  %v2574_v48 = vld [vmem:[#allocation9 + $0x2b0] sm:$0xff] }
 0x55e   : > { %v10734_v0 = vcombine.low %v2574_v48, %v2582_v49 }
 0x55f   : > { %9562 = vmatpush1.bf16.msra.mxu0 %v11642_v57  ;;  %v10720_v57 = vcombine.low %v2559_v40, %v2567_v41  ;;  %v2663_v40 = vld [vmem:[#allocation9 + $0x578] sm:$0xff] }
 0x560   : > { %9734 = vmatpush1.bf16.msra.mxu1 %v11644_v59  ;;  %9563 = vmatprep.subr.bf16.mxu0 %v11659_v21  ;;  %v10735_v59 = vcombine.high %v2574_v48, %v2582_v49  ;;  %v10737_v21 = vcombine.high %v2575_v51, %v2583_v52  ;;  %v2678_v48 = vld [vmem:[#allocation9 + $0x5f0] sm:$0xff]  ;;  %v2671_v49 = vld [vmem:[#allocation9 + $0x5b8] sm:$0xff] }
 0x561   : > { %9735 = vmatprep.subr.bf16.mxu1 %v11661_v60  ;;  %v2590_v60 = vld [vmem:[#allocation9 + $0x330] sm:$0xff] }
 0x562   : > { %v10750_v9 = vcombine.low %v2590_v60, %v2598_v61 }
 0x563   : > { %9564 = vmatpush1.bf16.msra.mxu0 %v11658_v1  ;;  %v10736_v1 = vcombine.low %v2575_v51, %v2583_v52  ;;  %v2679_v51 = vld [vmem:[#allocation9 + $0x5f8] sm:$0xff] }
 0x564   : > { %9736 = vmatpush1.bf16.msra.mxu1 %v11660_v3  ;;  %9748 = vmatprep.subr.bf16.mxu0 %v10655_v2  ;;  %v10751_v3 = vcombine.high %v2590_v60, %v2598_v61  ;;  %v10753_v2 = vcombine.high %v2591_v62, %v2599_v63  ;;  %v2694_v60 = vld [vmem:[#allocation9 + $0x670] sm:$0xff]  ;;  %v2687_v61 = vld [vmem:[#allocation9 + $0x638] sm:$0xff] }
 0x565   : > { %9920 = vmatprep.subr.bf16.mxu1 %v10657_v4  ;;  %v2606_v4 = vld [vmem:[#allocation9 + $0x3b0] sm:$0xff]  ;;  %v2695_v62 = vld [vmem:[#allocation9 + $0x678] sm:$0xff] }
 0x566   : > { %9566 = vmatmul.mubr.bf16.vlgmr.msra.gmra.mrb[20].mxu0 %v12497_v54  ;;  %v10766_v16 = vcombine.low %v2606_v4, %v2614_v5 }
 0x567   : > { %9738 = vmatmul.mubr.bf16.vlgmr.msra.gmra.mrb[20].mxu1 %v12497_v54  ;;  %9749 = vmatpush1.bf16.msra.mxu0 %v10654_v8  ;;  %v2615_v8 = vld [vmem:[#allocation9 + $0x3f8] sm:$0xff] }
 0x568   : > { %9780 = vmatprep.mubr.bf16.mxu0 %v12459_v30  ;;  %9921 = vmatpush1.bf16.msra.mxu1 %v10656_v11  ;;  %v10767_v11 = vcombine.high %v2606_v4, %v2614_v5  ;;  %v2710_v4 = vld [vmem:[#allocation9 + $0x6f0] sm:$0xff]  ;;  %v2703_v5 = vld [vmem:[#allocation9 + $0x6b8] sm:$0xff] }
 0x569   : > { %9952 = vmatprep.mubr.bf16.mxu1 %v12459_v30  ;;  %9750 = vmatprep.subr.bf16.mxu0 %v10671_v12  ;;  %v10702_v30 = vcombine.low %v2542_v27, %v2550_v29  ;;  %v10769_v12 = vcombine.high %v2607_v7, %v2615_v8  ;;  %v2646_v27 = vld [vmem:[#allocation9 + $0x4f0] sm:$0xff]  ;;  %v2639_v29 = vld [vmem:[#allocation9 + $0x4b8] sm:$0xff] }
 0x56a   : > { %9922 = vmatprep.subr.bf16.mxu1 %v10673_v53  ;;  %v2623_v53 = vld [vmem:[#allocation9 + $0x438] sm:$0xff] }
 0x56b   : > { %9751 = vmatpush1.bf16.msra.mxu0 %v10670_v17  ;;  %v10768_v17 = vcombine.low %v2607_v7, %v2615_v8  ;;  %v2711_v7 = vld [vmem:[#allocation9 + $0x6f8] sm:$0xff] }
 0x56c   : > { %9923 = vmatpush1.bf16.msra.mxu1 %v10672_v18  ;;  %9752 = vmatprep.subr.bf16.mxu0 %v10687_v19  ;;  %v10783_v18 = vcombine.high %v2622_v13, %v2630_v14  ;;  %v10785_v19 = vcombine.high %v2623_v53, %v2631_v15  ;;  %v2726_v13 = vld [vmem:[#allocation9 + $0x770] sm:$0xff]  ;;  %v2719_v14 = vld [vmem:[#allocation9 + $0x738] sm:$0xff] }
 0x56d   : > { %9924 = vmatprep.subr.bf16.mxu1 %v10689_v25  ;;  %v2638_v25 = vld [vmem:[#allocation9 + $0x4b0] sm:$0xff] }
 0x56e   : > { %v10798_v41 = vcombine.low %v2638_v25, %v2646_v27 }
 0x56f   : > { %9753 = vmatpush1.bf16.msra.mxu0 %v10686_v36  ;;  %v10784_v36 = vcombine.low %v2623_v53, %v2631_v15  ;;  %v2727_v53 = vld [vmem:[#allocation9 + $0x778] sm:$0xff] }
 0x570   : > { %9925 = vmatpush1.bf16.msra.mxu1 %v10688_v37  ;;  %9754 = vmatprep.subr.bf16.mxu0 %v10703_v34  ;;  %v10799_v37 = vcombine.high %v2638_v25, %v2646_v27  ;;  %v10801_v34 = vcombine.high %v2639_v29, %v2647_v32  ;;  %v2742_v25 = vld [vmem:[#allocation9 + $0x7f0] sm:$0xff]  ;;  %v2735_v27 = vld [vmem:[#allocation9 + $0x7b8] sm:$0xff] }
 0x571   : > { %9926 = vmatprep.subr.bf16.mxu1 %v10705_v35  ;;  %v2654_v35 = vld [vmem:[#allocation9 + $0x530] sm:$0xff] }
 0x572   : > { %v10814_v52 = vcombine.low %v2654_v35, %v2662_v38 }
 0x573   : > { %9755 = vmatpush1.bf16.msra.mxu0 %v10702_v30  ;;  %v10800_v30 = vcombine.low %v2639_v29, %v2647_v32  ;;  %v2743_v29 = vld [vmem:[#allocation9 + $0x7f8] sm:$0xff] }
 0x574   : > { %9927 = vmatpush1.bf16.msra.mxu1 %v10704_v56  ;;  %9756 = vmatprep.subr.bf16.mxu0 %v10719_v42  ;;  %v10815_v56 = vcombine.high %v2654_v35, %v2662_v38  ;;  %v10817_v42 = vcombine.high %v2655_v39, %v2663_v40  ;;  %v2758_v35 = vld [vmem:[#allocation9 + $0x870] sm:$0xff]  ;;  %v2751_v38 = vld [vmem:[#allocation9 + $0x838] sm:$0xff] }
 0x575   : > { %9928 = vmatprep.subr.bf16.mxu1 %v10721_v47  ;;  %v2670_v47 = vld [vmem:[#allocation9 + $0x5b0] sm:$0xff] }
 0x576   : > { %v10830_v63 = vcombine.low %v2670_v47, %v2678_v48 }
 0x577   : > { %9757 = vmatpush1.bf16.msra.mxu0 %v10718_v6  ;;  %v10816_v6 = vcombine.low %v2655_v39, %v2663_v40  ;;  %v2759_v39 = vld [vmem:[#allocation9 + $0x878] sm:$0xff] }
 0x578   : > { %9929 = vmatpush1.bf16.msra.mxu1 %v10720_v57  ;;  %9758 = vmatprep.subr.bf16.mxu0 %v10735_v59  ;;  %v10831_v57 = vcombine.high %v2670_v47, %v2678_v48  ;;  %v10833_v59 = vcombine.high %v2671_v49, %v2679_v51  ;;  %v2774_v47 = vld [vmem:[#allocation9 + $0x8f0] sm:$0xff] }
 0x579   : > { %9930 = vmatprep.subr.bf16.mxu1 %v10737_v21  ;;  %v2686_v21 = vld [vmem:[#allocation9 + $0x630] sm:$0xff] }
 0x57a   : > { %v10846_v8 = vcombine.low %v2686_v21, %v2694_v60 }
 0x57b   : > { %9759 = vmatpush1.bf16.msra.mxu0 %v10734_v0  ;;  %v10832_v0 = vcombine.low %v2671_v49, %v2679_v51  ;;  %v2767_v49 = vld [vmem:[#allocation9 + $0x8b8] sm:$0xff] }
 0x57c   : > { %9931 = vmatpush1.bf16.msra.mxu1 %v10736_v1  ;;  %9760 = vmatprep.subr.bf16.mxu0 %v10751_v3  ;;  %v10847_v1 = vcombine.high %v2686_v21, %v2694_v60  ;;  %v10849_v3 = vcombine.high %v2687_v61, %v2695_v62  ;;  %v2775_v51 = vld [vmem:[#allocation9 + $0x8f8] sm:$0xff] }
 0x57d   : > { %9932 = vmatprep.subr.bf16.mxu1 %v10753_v2  ;;  %v2702_v2 = vld [vmem:[#allocation9 + $0x6b0] sm:$0xff]  ;;  %v10929_v21 = vcombine.high %v2767_v49, %v2775_v51  ;;  %v2783_v60 = vld [vmem:[#allocation9 + $0x938] sm:$0xff] }
 0x57e   : > { %v10862_v15 = vcombine.low %v2702_v2, %v2710_v4 }
 0x57f   : > { %9761 = vmatpush1.bf16.msra.mxu0 %v10750_v9  ;;  %v10848_v9 = vcombine.low %v2687_v61, %v2695_v62  ;;  %v2791_v61 = vld [vmem:[#allocation9 + $0x978] sm:$0xff] }
 0x580   : > { %9933 = vmatpush1.bf16.msra.mxu1 %v10752_v10  ;;  %9762 = vmatprep.subr.bf16.mxu0 %v10767_v11  ;;  %v10863_v10 = vcombine.high %v2702_v2, %v2710_v4  ;;  %v10865_v11 = vcombine.high %v2703_v5, %v2711_v7  ;;  %v2806_v2 = vld [vmem:[#allocation9 + $0x9f0] sm:$0xff]  ;;  %v2799_v4 = vld [vmem:[#allocation9 + $0x9b8] sm:$0xff] }
 0x581   : > { %9934 = vmatprep.subr.bf16.mxu1 %v10769_v12  ;;  %v2718_v12 = vld [vmem:[#allocation9 + $0x730] sm:$0xff] }
 0x582   : > { %v10878_v32 = vcombine.low %v2718_v12, %v2726_v13 }
 0x583   : > { %9763 = vmatpush1.bf16.msra.mxu0 %v10766_v16  ;;  %v10864_v16 = vcombine.low %v2703_v5, %v2711_v7  ;;  %v2807_v5 = vld [vmem:[#allocation9 + $0x9f8] sm:$0xff] }
 0x584   : > { %9935 = vmatpush1.bf16.msra.mxu1 %v10768_v17  ;;  %9764 = vmatprep.subr.bf16.mxu0 %v10783_v18  ;;  %v10879_v17 = vcombine.high %v2718_v12, %v2726_v13  ;;  %v10881_v18 = vcombine.high %v2719_v14, %v2727_v53  ;;  %v2815_v12 = vld [vmem:[#allocation9 + $0xa38] sm:$0xff] }
 0x585   : > { %9936 = vmatprep.subr.bf16.mxu1 %v10785_v19  ;;  %v2734_v19 = vld [vmem:[#allocation9 + $0x7b0] sm:$0xff]  ;;  %v2823_v13 = vld [vmem:[#allocation9 + $0xa78] sm:$0xff] }
 0x586   : > { %v10894_v40 = vcombine.low %v2734_v19, %v2742_v25 }
 0x587   : > { %9765 = vmatpush1.bf16.msra.mxu0 %v10782_v33  ;;  %v10880_v33 = vcombine.low %v2719_v14, %v2727_v53  ;;  %v10960_v14 = vcombine.low %v2799_v4, %v2807_v5 }
 0x588   : > { %9937 = vmatpush1.bf16.msra.mxu1 %v10784_v36  ;;  %9766 = vmatprep.subr.bf16.mxu0 %v10799_v37  ;;  %v10895_v36 = vcombine.high %v2734_v19, %v2742_v25  ;;  %v10897_v37 = vcombine.high %v2735_v27, %v2743_v29  ;;  %v2839_v19 = vld [vmem:[#allocation9 + $0xaf8] sm:$0xff] }
 0x589   : > { %9938 = vmatprep.subr.bf16.mxu1 %v10801_v34  ;;  %v2750_v34 = vld [vmem:[#allocation9 + $0x830] sm:$0xff] }
 0x58a   : > { %v10910_v48 = vcombine.low %v2750_v34, %v2758_v35 }
 0x58b   : > { %9767 = vmatpush1.bf16.msra.mxu0 %v10798_v41  ;;  %v10896_v41 = vcombine.low %v2735_v27, %v2743_v29  ;;  %v10976_v27 = vcombine.low %v2815_v12, %v2823_v13 }
 0x58c   : > { %9939 = vmatpush1.bf16.msra.mxu1 %v10800_v30  ;;  %9768 = vmatprep.subr.bf16.mxu0 %v10815_v56  ;;  %v10911_v30 = vcombine.high %v2750_v34, %v2758_v35  ;;  %v10913_v56 = vcombine.high %v2751_v38, %v2759_v39  ;;  %v2855_v34 = vld [vmem:[#allocation9 + $0xb78] sm:$0xff] }
 0x58d   : > { %9940 = vmatprep.subr.bf16.mxu1 %v10817_v42  ;;  %v2766_v42 = vld [vmem:[#allocation9 + $0x8b0] sm:$0xff] }
 0x58e   : > { %v10926_v62 = vcombine.low %v2766_v42, %v2774_v47 }
 0x58f   : > { %9769 = vmatpush1.bf16.msra.mxu0 %v10814_v52  ;;  %v10912_v52 = vcombine.low %v2751_v38, %v2759_v39 }
 0x590   : > { %9941 = vmatpush1.bf16.msra.mxu1 %v10816_v6  ;;  %9770 = vmatprep.subr.bf16.mxu0 %v10831_v57  ;;  %v10927_v6 = vcombine.high %v2766_v42, %v2774_v47  ;;  %v2782_v57 = vld [vmem:[#allocation9 + $0x930] sm:$0xff]  ;;  %v2871_v42 = vld [vmem:[#allocation9 + $0xbf8] sm:$0xff] }
 0x591   : > { %9942 = vmatprep.subr.bf16.mxu1 %v10833_v59  ;;  %v2790_v59 = vld [vmem:[#allocation9 + $0x970] sm:$0xff] }
 0x592   : > { %v10942_v7 = vcombine.low %v2782_v57, %v2790_v59 }
 0x593   : > { %9771 = vmatpush1.bf16.msra.mxu0 %v10830_v63  ;;  %v10928_v63 = vcombine.low %v2767_v49, %v2775_v51 }
 0x594   : > { %9943 = vmatpush1.bf16.msra.mxu1 %v10832_v0  ;;  %9772 = vmatprep.subr.bf16.mxu0 %v10847_v1  ;;  %v10943_v0 = vcombine.high %v2782_v57, %v2790_v59  ;;  %v10945_v1 = vcombine.high %v2783_v60, %v2791_v61  ;;  %v2879_v57 = vld [vmem:[#allocation9 + $0xc38] sm:$0xff] }
 0x595   : > { %9944 = vmatprep.subr.bf16.mxu1 %v10849_v3  ;;  %v2798_v3 = vld [vmem:[#allocation9 + $0x9b0] sm:$0xff]  ;;  %v2887_v59 = vld [vmem:[#allocation9 + $0xc78] sm:$0xff] }
 0x597   : > { %9773 = vmatpush1.bf16.msra.mxu0 %v10846_v8  ;;  %v10959_v8 = vcombine.high %v2798_v3, %v2806_v2 }
 0x598   : > { %9945 = vmatpush1.bf16.msra.mxu1 %v10848_v9  ;;  %9774 = vmatprep.subr.bf16.mxu0 %v10863_v10  ;;  %v10961_v9 = vcombine.high %v2799_v4, %v2807_v5  ;;  %v2814_v10 = vld [vmem:[#allocation9 + $0xa30] sm:$0xff]  ;;  %v11040_v4 = vcombine.low %v2879_v57, %v2887_v59 }
 0x599   : > { %9946 = vmatprep.subr.bf16.mxu1 %v10865_v11  ;;  %v2822_v11 = vld [vmem:[#allocation9 + $0xa70] sm:$0xff] }
 0x59a   : > { %v10975_v53 = vcombine.high %v2814_v10, %v2822_v11  ;;  %v10974_v25 = vcombine.low %v2814_v10, %v2822_v11  ;;  %v2919_v10 = vld [vmem:[#allocation9 + $0xd78] sm:$0xff] }
 0x59b   : > { %9775 = vmatpush1.bf16.msra.mxu0 %v10862_v15  ;;  %v10977_v15 = vcombine.high %v2815_v12, %v2823_v13 }
 0x59c   : > { %9947 = vmatpush1.bf16.msra.mxu1 %v10864_v16  ;;  %9776 = vmatprep.subr.bf16.mxu0 %v10879_v17  ;;  %v2830_v16 = vld [vmem:[#allocation9 + $0xab0] sm:$0xff] }
 0x59d   : > { %9948 = vmatprep.subr.bf16.mxu1 %v10881_v18  ;;  %v2838_v17 = vld [vmem:[#allocation9 + $0xaf0] sm:$0xff]  ;;  %v2831_v18 = vld [vmem:[#allocation9 + $0xab8] sm:$0xff] }
 0x59e   : > { %v10991_v29 = vcombine.high %v2830_v16, %v2838_v17  ;;  %v10990_v35 = vcombine.low %v2830_v16, %v2838_v17  ;;  %v10992_v38 = vcombine.low %v2831_v18, %v2839_v19  ;;  %v2935_v16 = vld [vmem:[#allocation9 + $0xdf8] sm:$0xff] }
 0x59f   : > { %9777 = vmatpush1.bf16.msra.mxu0 %v10878_v32  ;;  %v10993_v32 = vcombine.high %v2831_v18, %v2839_v19 }
 0x5a0   : > { %9949 = vmatpush1.bf16.msra.mxu1 %v10880_v33  ;;  %9778 = vmatprep.subr.bf16.mxu0 %v10895_v36  ;;  %v2846_v33 = vld [vmem:[#allocation9 + $0xb30] sm:$0xff] }
 0x5a1   : > { %9950 = vmatprep.subr.bf16.mxu1 %v10897_v37  ;;  %v2854_v36 = vld [vmem:[#allocation9 + $0xb70] sm:$0xff]  ;;  %v2847_v37 = vld [vmem:[#allocation9 + $0xb38] sm:$0xff] }
 0x5a2   : > { %v11007_v39 = vcombine.high %v2846_v33, %v2854_v36  ;;  %v11006_v47 = vcombine.low %v2846_v33, %v2854_v36  ;;  %v2951_v33 = vld [vmem:[#allocation9 + $0xe78] sm:$0xff] }
 0x5a3   : > { %9779 = vmatpush1.bf16.msra.mxu0 %v10894_v40  ;;  %v11009_v40 = vcombine.high %v2847_v37, %v2855_v34 }
 0x5a4   : > { %9951 = vmatpush1.bf16.msra.mxu1 %v10896_v41  ;;  %9791 = vmatprep.subr.bf16.mxu0 %v10911_v30  ;;  %v2862_v41 = vld [vmem:[#allocation9 + $0xbb0] sm:$0xff] }
 0x5a5   : > { %9963 = vmatprep.subr.bf16.mxu1 %v10913_v56  ;;  %v2870_v30 = vld [vmem:[#allocation9 + $0xbf0] sm:$0xff]  ;;  %v2863_v56 = vld [vmem:[#allocation9 + $0xbb8] sm:$0xff] }
 0x5a6   : > { %9781 = vmatmul.mubr.bf16.vlgmr.msra.gmra.mrb[24].mxu0 %v12455_v20  ;;  %v11023_v49 = vcombine.high %v2862_v41, %v2870_v30  ;;  %v11025_v51 = vcombine.high %v2863_v56, %v2871_v42 }
 0x5a7   : > { %9953 = vmatmul.mubr.bf16.vlgmr.msra.gmra.mrb[24].mxu1 %v12455_v20  ;;  %9792 = vmatpush1.bf16.msra.mxu0 %v10910_v48  ;;  %v10944_v20 = vcombine.low %v2783_v60, %v2791_v61  ;;  %v11008_v48 = vcombine.low %v2847_v37, %v2855_v34  ;;  %v11024_v60 = vcombine.low %v2863_v56, %v2871_v42 }
 0x5a8   : > { %9823 = vmatprep.mubr.bf16.mxu0 %v12461_v31  ;;  %9964 = vmatpush1.bf16.msra.mxu1 %v10912_v52  ;;  %v2878_v52 = vld [vmem:[#allocation9 + $0xc30] sm:$0xff] }
 0x5a9   : > { %9995 = vmatprep.mubr.bf16.mxu1 %v12461_v31  ;;  %9793 = vmatprep.subr.bf16.mxu0 %v10927_v6  ;;  %v10958_v31 = vcombine.low %v2798_v3, %v2806_v2  ;;  %v2886_v6 = vld [vmem:[#allocation9 + $0xc70] sm:$0xff]  ;;  %v2903_v3 = vld [vmem:[#allocation9 + $0xcf8] sm:$0xff] }
 0x5aa   : > { %9965 = vmatprep.subr.bf16.mxu1 %v10929_v21  ;;  %v11022_v21 = vcombine.low %v2862_v41, %v2870_v30  ;;  %v11039_v61 = vcombine.high %v2878_v52, %v2886_v6  ;;  %v11038_v2 = vcombine.low %v2878_v52, %v2886_v6  ;;  %v2967_v41 = vld [vmem:[#allocation9 + $0xef8] sm:$0xff] }
 0x5ab   : > { %9794 = vmatpush1.bf16.msra.mxu0 %v10926_v62  ;;  %v11041_v62 = vcombine.high %v2879_v57, %v2887_v59  ;;  %v2983_v52 = vld [vmem:[#allocation9 + $0xf78] sm:$0xff] }
 0x5ac   : > { %9966 = vmatpush1.bf16.msra.mxu1 %v10928_v63  ;;  %9795 = vmatprep.subr.bf16.mxu0 %v10943_v0  ;;  %v2894_v63 = vld [vmem:[#allocation9 + $0xcb0] sm:$0xff] }
 0x5ad   : > { %9967 = vmatprep.subr.bf16.mxu1 %v10945_v1  ;;  %v2902_v0 = vld [vmem:[#allocation9 + $0xcf0] sm:$0xff]  ;;  %v2895_v1 = vld [vmem:[#allocation9 + $0xcb8] sm:$0xff] }
 0x5ae   : > { %v11055_v5 = vcombine.high %v2894_v63, %v2902_v0  ;;  %v11054_v11 = vcombine.low %v2894_v63, %v2902_v0  ;;  %v11056_v12 = vcombine.low %v2895_v1, %v2903_v3  ;;  %v2999_v63 = vld [vmem:[#allocation9 + $0xff8] sm:$0xff] }
 0x5af   : > { %9796 = vmatpush1.bf16.msra.mxu0 %v10942_v7  ;;  %v11057_v7 = vcombine.high %v2895_v1, %v2903_v3 }
 0x5b0   : > { %9968 = vmatpush1.bf16.msra.mxu1 %v10944_v20  ;;  %9797 = vmatprep.subr.bf16.mxu0 %v10959_v8  ;;  %v2910_v20 = vld [vmem:[#allocation9 + $0xd30] sm:$0xff] }
 0x5b1   : > { %9969 = vmatprep.subr.bf16.mxu1 %v10961_v9  ;;  %v2918_v8 = vld [vmem:[#allocation9 + $0xd70] sm:$0xff]  ;;  %v2911_v9 = vld [vmem:[#allocation9 + $0xd38] sm:$0xff] }
 0x5b2   : > { %v11071_v13 = vcombine.high %v2910_v20, %v2918_v8  ;;  %v11070_v17 = vcombine.low %v2910_v20, %v2918_v8  ;;  %v11072_v18 = vcombine.low %v2911_v9, %v2919_v10  ;;  %v3015_v20 = vld [vmem:[#allocation9 + $0x1078] sm:$0xff] }
 0x5b3   : > { %9798 = vmatpush1.bf16.msra.mxu0 %v10958_v31  ;;  %v11073_v31 = vcombine.high %v2911_v9, %v2919_v10 }
 0x5b4   : > { %9970 = vmatpush1.bf16.msra.mxu1 %v10960_v14  ;;  %9799 = vmatprep.subr.bf16.mxu0 %v10975_v53  ;;  %v2926_v14 = vld [vmem:[#allocation9 + $0xdb0] sm:$0xff] }
 0x5b5   : > { %9971 = vmatprep.subr.bf16.mxu1 %v10977_v15  ;;  %v2934_v53 = vld [vmem:[#allocation9 + $0xdf0] sm:$0xff]  ;;  %v2927_v15 = vld [vmem:[#allocation9 + $0xdb8] sm:$0xff] }
 0x5b6   : > { %v11087_v19 = vcombine.high %v2926_v14, %v2934_v53  ;;  %v11086_v36 = vcombine.low %v2926_v14, %v2934_v53  ;;  %v11088_v37 = vcombine.low %v2927_v15, %v2935_v16  ;;  %v3023_v14 = vld [vmem:[#allocation9 + $0x10b8] sm:$0xff] }
 0x5b7   : > { %9800 = vmatpush1.bf16.msra.mxu0 %v10974_v25  ;;  %v11089_v25 = vcombine.high %v2927_v15, %v2935_v16  ;;  %v3031_v53 = vld [vmem:[#allocation9 + $0x10f8] sm:$0xff] }
 0x5b8   : > { %9972 = vmatpush1.bf16.msra.mxu1 %v10976_v27  ;;  %9801 = vmatprep.subr.bf16.mxu0 %v10991_v29  ;;  %v2942_v27 = vld [vmem:[#allocation9 + $0xe30] sm:$0xff] }
 0x5b9   : > { %9973 = vmatprep.subr.bf16.mxu1 %v10993_v32  ;;  %v2950_v29 = vld [vmem:[#allocation9 + $0xe70] sm:$0xff]  ;;  %v2943_v32 = vld [vmem:[#allocation9 + $0xe38] sm:$0xff] }
 0x5ba   : > { %v11103_v34 = vcombine.high %v2942_v27, %v2950_v29  ;;  %v11102_v30 = vcombine.low %v2942_v27, %v2950_v29  ;;  %v11104_v56 = vcombine.low %v2943_v32, %v2951_v33  ;;  %v3047_v27 = vld [vmem:[#allocation9 + $0x1178] sm:$0xff] }
 0x5bb   : > { %9802 = vmatpush1.bf16.msra.mxu0 %v10990_v35  ;;  %v11105_v35 = vcombine.high %v2943_v32, %v2951_v33  ;;  %v11184_v32 = vcombine.low %v3023_v14, %v3031_v53 }
 0x5bc   : > { %9974 = vmatpush1.bf16.msra.mxu1 %v10992_v38  ;;  %9803 = vmatprep.subr.bf16.mxu0 %v11007_v39  ;;  %v2958_v38 = vld [vmem:[#allocation9 + $0xeb0] sm:$0xff] }
 0x5bd   : > { %9975 = vmatprep.subr.bf16.mxu1 %v11009_v40  ;;  %v2966_v39 = vld [vmem:[#allocation9 + $0xef0] sm:$0xff]  ;;  %v2959_v40 = vld [vmem:[#allocation9 + $0xeb8] sm:$0xff] }
 0x5be   : > { %v11119_v42 = vcombine.high %v2958_v38, %v2966_v39  ;;  %v11118_v6 = vcombine.low %v2958_v38, %v2966_v39  ;;  %v11120_v57 = vcombine.low %v2959_v40, %v2967_v41  ;;  %v3063_v38 = vld [vmem:[#allocation9 + $0x11f8] sm:$0xff] }
 0x5bf   : > { %9804 = vmatpush1.bf16.msra.mxu0 %v11006_v47  ;;  %v11121_v47 = vcombine.high %v2959_v40, %v2967_v41 }
 0x5c0   : > { %9976 = vmatpush1.bf16.msra.mxu1 %v11008_v48  ;;  %9805 = vmatprep.subr.bf16.mxu0 %v11023_v49  ;;  %v2974_v48 = vld [vmem:[#allocation9 + $0xf30] sm:$0xff] }
 0x5c1   : > { %9977 = vmatprep.subr.bf16.mxu1 %v11025_v51  ;;  %v2982_v49 = vld [vmem:[#allocation9 + $0xf70] sm:$0xff]  ;;  %v2975_v51 = vld [vmem:[#allocation9 + $0xf38] sm:$0xff] }
 0x5c2   : > { %v11135_v59 = vcombine.high %v2974_v48, %v2982_v49  ;;  %v11134_v0 = vcombine.low %v2974_v48, %v2982_v49  ;;  %v11136_v1 = vcombine.low %v2975_v51, %v2983_v52 }
 0x5c3   : > { %9806 = vmatpush1.bf16.msra.mxu0 %v11022_v21  ;;  %v11137_v21 = vcombine.high %v2975_v51, %v2983_v52  ;;  %v3086_v52 = vld [vmem:[#allocation9 + $0x12b0] sm:$0xff] }
 0x5c4   : > { %9978 = vmatpush1.bf16.msra.mxu1 %v11024_v60  ;;  %9807 = vmatprep.subr.bf16.mxu0 %v11039_v61  ;;  %v2990_v60 = vld [vmem:[#allocation9 + $0xfb0] sm:$0xff] }
 0x5c5   : > { %9979 = vmatprep.subr.bf16.mxu1 %v11041_v62  ;;  %v2998_v61 = vld [vmem:[#allocation9 + $0xff0] sm:$0xff]  ;;  %v2991_v62 = vld [vmem:[#allocation9 + $0xfb8] sm:$0xff] }
 0x5c6   : > { %v11151_v3 = vcombine.high %v2990_v60, %v2998_v61  ;;  %v11150_v8 = vcombine.low %v2990_v60, %v2998_v61  ;;  %v11152_v9 = vcombine.low %v2991_v62, %v2999_v63 }
 0x5c7   : > { %9808 = vmatpush1.bf16.msra.mxu0 %v11038_v2  ;;  %v11153_v2 = vcombine.high %v2991_v62, %v2999_v63  ;;  %v3102_v63 = vld [vmem:[#allocation9 + $0x1330] sm:$0xff] }
 0x5c8   : > { %9980 = vmatpush1.bf16.msra.mxu1 %v11040_v4  ;;  %9809 = vmatprep.subr.bf16.mxu0 %v11055_v5  ;;  %v3006_v4 = vld [vmem:[#allocation9 + $0x1030] sm:$0xff] }
 0x5c9   : > { %9981 = vmatprep.subr.bf16.mxu1 %v11057_v7  ;;  %v3014_v5 = vld [vmem:[#allocation9 + $0x1070] sm:$0xff]  ;;  %v3007_v7 = vld [vmem:[#allocation9 + $0x1038] sm:$0xff] }
 0x5ca   : > { %v11167_v10 = vcombine.high %v3006_v4, %v3014_v5  ;;  %v11168_v15 = vcombine.low %v3007_v7, %v3015_v20 }
 0x5cb   : > { %9810 = vmatpush1.bf16.msra.mxu0 %v11054_v11  ;;  %v11169_v11 = vcombine.high %v3007_v7, %v3015_v20  ;;  %v3118_v20 = vld [vmem:[#allocation9 + $0x13b0] sm:$0xff] }
 0x5cc   : > { %9982 = vmatpush1.bf16.msra.mxu1 %v11056_v12  ;;  %9811 = vmatprep.subr.bf16.mxu0 %v11071_v13  ;;  %v3022_v12 = vld [vmem:[#allocation9 + $0x10b0] sm:$0xff] }
 0x5cd   : > { %9983 = vmatprep.subr.bf16.mxu1 %v11073_v31  ;;  %v3030_v13 = vld [vmem:[#allocation9 + $0x10f0] sm:$0xff]  ;;  %v11166_v31 = vcombine.low %v3006_v4, %v3014_v5 }
 0x5ce   : > { %v11183_v16 = vcombine.high %v3022_v12, %v3030_v13  ;;  %v11182_v29 = vcombine.low %v3022_v12, %v3030_v13 }
 0x5cf   : > { %9812 = vmatpush1.bf16.msra.mxu0 %v11070_v17  ;;  %v3038_v17 = vld [vmem:[#allocation9 + $0x1130] sm:$0xff] }
 0x5d0   : > { %9984 = vmatpush1.bf16.msra.mxu1 %v11072_v18  ;;  %9813 = vmatprep.subr.bf16.mxu0 %v11087_v19  ;;  %v3046_v18 = vld [vmem:[#allocation9 + $0x1170] sm:$0xff]  ;;  %v11185_v19 = vcombine.high %v3023_v14, %v3031_v53 }
 0x5d1   : > { %9985 = vmatprep.subr.bf16.mxu1 %v11089_v25  ;;  %v3039_v25 = vld [vmem:[#allocation9 + $0x1138] sm:$0xff]  ;;  %v11199_v33 = vcombine.high %v3038_v17, %v3046_v18  ;;  %v11198_v39 = vcombine.low %v3038_v17, %v3046_v18  ;;  %v3134_v14 = vld [vmem:[#allocation9 + $0x1430] sm:$0xff] }
 0x5d2   : > { %v3142_v53 = vld [vmem:[#allocation9 + $0x1470] sm:$0xff] }
 0x5d3   : > { %9814 = vmatpush1.bf16.msra.mxu0 %v11086_v36  ;;  %v11201_v36 = vcombine.high %v3039_v25, %v3047_v27 }
 0x5d4   : > { %9986 = vmatpush1.bf16.msra.mxu1 %v11088_v37  ;;  %9815 = vmatprep.subr.bf16.mxu0 %v11103_v34  ;;  %v3054_v37 = vld [vmem:[#allocation9 + $0x11b0] sm:$0xff] }
 0x5d5   : > { %9987 = vmatprep.subr.bf16.mxu1 %v11105_v35  ;;  %v3062_v34 = vld [vmem:[#allocation9 + $0x11f0] sm:$0xff]  ;;  %v3055_v35 = vld [vmem:[#allocation9 + $0x11b8] sm:$0xff] }
 0x5d6   : > { %v11215_v40 = vcombine.high %v3054_v37, %v3062_v34  ;;  %v11217_v41 = vcombine.high %v3055_v35, %v3063_v38  ;;  %v11216_v48 = vcombine.low %v3055_v35, %v3063_v38  ;;  %v3166_v38 = vld [vmem:[#allocation9 + $0x1530] sm:$0xff] }
 0x5d7   : > { %9816 = vmatpush1.bf16.msra.mxu0 %v11102_v30  ;;  %v3070_v30 = vld [vmem:[#allocation9 + $0x1230] sm:$0xff] }
 0x5d8   : > { %9988 = vmatpush1.bf16.msra.mxu1 %v11104_v56  ;;  %9817 = vmatprep.subr.bf16.mxu0 %v11119_v42  ;;  %v3078_v56 = vld [vmem:[#allocation9 + $0x1270] sm:$0xff]  ;;  %v3071_v42 = vld [vmem:[#allocation9 + $0x1238] sm:$0xff] }
 0x5d9   : > { %9989 = vmatprep.subr.bf16.mxu1 %v11121_v47  ;;  %v3079_v47 = vld [vmem:[#allocation9 + $0x1278] sm:$0xff]  ;;  %v11231_v49 = vcombine.high %v3070_v30, %v3078_v56 }
 0x5da   : > { %v11233_v51 = vcombine.high %v3071_v42, %v3079_v47  ;;  %v11232_v60 = vcombine.low %v3071_v42, %v3079_v47  ;;  %v3182_v47 = vld [vmem:[#allocation9 + $0x15b0] sm:$0xff] }
 0x5db   : > { %9818 = vmatpush1.bf16.msra.mxu0 %v11118_v6  ;;  %v3094_v6 = vld [vmem:[#allocation9 + $0x12f0] sm:$0xff] }
 0x5dc   : > { %9990 = vmatpush1.bf16.msra.mxu1 %v11120_v57  ;;  %9819 = vmatprep.subr.bf16.mxu0 %v11135_v59  ;;  %v3087_v57 = vld [vmem:[#allocation9 + $0x12b8] sm:$0xff]  ;;  %v11247_v61 = vcombine.high %v3086_v52, %v3094_v6 }
 0x5dd   : > { %9991 = vmatprep.subr.bf16.mxu1 %v11137_v21  ;;  %v3095_v59 = vld [vmem:[#allocation9 + $0x12f8] sm:$0xff]  ;;  %v11230_v21 = vcombine.low %v3070_v30, %v3078_v56 }
 0x5de   : > { %v11249_v62 = vcombine.high %v3087_v57, %v3095_v59  ;;  %v11248_v4 = vcombine.low %v3087_v57, %v3095_v59  ;;  %v3198_v59 = vld [vmem:[#allocation9 + $0x1630] sm:$0xff] }
 0x5df   : > { %9820 = vmatpush1.bf16.msra.mxu0 %v11134_v0  ;;  %v3110_v0 = vld [vmem:[#allocation9 + $0x1370] sm:$0xff] }
 0x5e0   : > { %9992 = vmatpush1.bf16.msra.mxu1 %v11136_v1  ;;  %9821 = vmatprep.subr.bf16.mxu0 %v11151_v3  ;;  %v3103_v1 = vld [vmem:[#allocation9 + $0x1338] sm:$0xff]  ;;  %v11263_v5 = vcombine.high %v3102_v63, %v3110_v0 }
 0x5e1   : > { %9993 = vmatprep.subr.bf16.mxu1 %v11153_v2  ;;  %v3111_v3 = vld [vmem:[#allocation9 + $0x1378] sm:$0xff]  ;;  %v11246_v2 = vcombine.low %v3086_v52, %v3094_v6 }
 0x5e2   : > { %v11265_v7 = vcombine.high %v3103_v1, %v3111_v3  ;;  %v11264_v12 = vcombine.low %v3103_v1, %v3111_v3  ;;  %v3214_v3 = vld [vmem:[#allocation9 + $0x16b0] sm:$0xff] }
 0x5e3   : > { %9822 = vmatpush1.bf16.msra.mxu0 %v11150_v8  ;;  %v3126_v8 = vld [vmem:[#allocation9 + $0x13f0] sm:$0xff] }
 0x5e4   : > { %9994 = vmatpush1.bf16.msra.mxu1 %v11152_v9  ;;  %9834 = vmatprep.subr.bf16.mxu0 %v11167_v10  ;;  %v3119_v9 = vld [vmem:[#allocation9 + $0x13b8] sm:$0xff]  ;;  %v11279_v13 = vcombine.high %v3118_v20, %v3126_v8  ;;  %v11278_v17 = vcombine.low %v3118_v20, %v3126_v8 }
 0x5e5   : > { %10006 = vmatprep.subr.bf16.mxu1 %v11169_v11  ;;  %v3127_v10 = vld [vmem:[#allocation9 + $0x13f8] sm:$0xff]  ;;  %v11262_v11 = vcombine.low %v3102_v63, %v3110_v0 }
 0x5e6   : > { %9824 = vmatmul.mubr.bf16.vlgmr.msra.gmra.mrb[24].mxu0 %v12457_v23  ;;  %v11280_v18 = vcombine.low %v3119_v9, %v3127_v10 }
 0x5e7   : > { %9996 = vmatmul.mubr.bf16.vlgmr.msra.gmra.mrb[24].mxu1 %v12457_v23  ;;  %9835 = vmatpush1.bf16.msra.mxu0 %v11166_v31  ;;  %v11200_v23 = vcombine.low %v3039_v25, %v3047_v27  ;;  %v11281_v31 = vcombine.high %v3119_v9, %v3127_v10  ;;  %v3150_v27 = vld [vmem:[#allocation9 + $0x14b0] sm:$0xff] }
 0x5e8   : > { %9866 = vmatprep.mubr.bf16.mxu0 %v12499_v55  ;;  %10007 = vmatpush1.bf16.msra.mxu1 %v11168_v15  ;;  %v3135_v15 = vld [vmem:[#allocation9 + $0x1438] sm:$0xff]  ;;  %v3230_v10 = vld [vmem:[#allocation9 + $0x1730] sm:$0xff] }
 0x5e9   : > { %10038 = vmatprep.mubr.bf16.mxu1 %v12499_v55  ;;  %9836 = vmatprep.subr.bf16.mxu0 %v11183_v16  ;;  %v11214_v55 = vcombine.low %v3054_v37, %v3062_v34  ;;  %v3143_v16 = vld [vmem:[#allocation9 + $0x1478] sm:$0xff] }
 0x5ea   : > { %10008 = vmatprep.subr.bf16.mxu1 %v11185_v19  ;;  %v11295_v19 = vcombine.high %v3134_v14, %v3142_v53  ;;  %v11297_v25 = vcombine.high %v3135_v15, %v3143_v16  ;;  %v11296_v37 = vcombine.low %v3135_v15, %v3143_v16  ;;  %v3246_v16 = vld [vmem:[#allocation9 + $0x17b0] sm:$0xff] }
 0x5eb   : > { %9837 = vmatpush1.bf16.msra.mxu0 %v11182_v29  ;;  %v3158_v29 = vld [vmem:[#allocation9 + $0x14f0] sm:$0xff] }
 0x5ec   : > { %10009 = vmatpush1.bf16.msra.mxu1 %v11184_v32  ;;  %9838 = vmatprep.subr.bf16.mxu0 %v11199_v33  ;;  %v3151_v32 = vld [vmem:[#allocation9 + $0x14b8] sm:$0xff]  ;;  %v11311_v34 = vcombine.high %v3150_v27, %v3158_v29 }
 0x5ed   : > { %10010 = vmatprep.subr.bf16.mxu1 %v11201_v36  ;;  %v3159_v33 = vld [vmem:[#allocation9 + $0x14f8] sm:$0xff]  ;;  %v11294_v36 = vcombine.low %v3134_v14, %v3142_v53 }
 0x5ee   : > { %v11313_v35 = vcombine.high %v3151_v32, %v3159_v33  ;;  %v11312_v30 = vcombine.low %v3151_v32, %v3159_v33  ;;  %v3262_v33 = vld [vmem:[#allocation9 + $0x1830] sm:$0xff] }
 0x5ef   : > { %9839 = vmatpush1.bf16.msra.mxu0 %v11198_v39  ;;  %v3174_v39 = vld [vmem:[#allocation9 + $0x1570] sm:$0xff] }
 0x5f0   : > { %10011 = vmatpush1.bf16.msra.mxu1 %v11200_v23  ;;  %9840 = vmatprep.subr.bf16.mxu0 %v11215_v40  ;;  %v3167_v23 = vld [vmem:[#allocation9 + $0x1538] sm:$0xff]  ;;  %v11327_v56 = vcombine.high %v3166_v38, %v3174_v39 }
 0x5f1   : > { %10012 = vmatprep.subr.bf16.mxu1 %v11217_v41  ;;  %v3175_v40 = vld [vmem:[#allocation9 + $0x1578] sm:$0xff]  ;;  %v11310_v41 = vcombine.low %v3150_v27, %v3158_v29 }
 0x5f2   : > { %v11329_v42 = vcombine.high %v3167_v23, %v3175_v40  ;;  %v11328_v52 = vcombine.low %v3167_v23, %v3175_v40  ;;  %v3278_v40 = vld [vmem:[#allocation9 + $0x18b0] sm:$0xff] }
 0x5f3   : > { %9841 = vmatpush1.bf16.msra.mxu0 %v11214_v55  ;;  %v3190_v55 = vld [vmem:[#allocation9 + $0x15f0] sm:$0xff] }
 0x5f4   : > { %10013 = vmatpush1.bf16.msra.mxu1 %v11216_v48  ;;  %9842 = vmatprep.subr.bf16.mxu0 %v11231_v49  ;;  %v3183_v48 = vld [vmem:[#allocation9 + $0x15b8] sm:$0xff]  ;;  %v11343_v6 = vcombine.high %v3182_v47, %v3190_v55 }
 0x5f5   : > { %10014 = vmatprep.subr.bf16.mxu1 %v11233_v51  ;;  %v3191_v49 = vld [vmem:[#allocation9 + $0x15f8] sm:$0xff]  ;;  %v11326_v51 = vcombine.low %v3166_v38, %v3174_v39 }
 0x5f6   : > { %v11345_v57 = vcombine.high %v3183_v48, %v3191_v49  ;;  %v11344_v63 = vcombine.low %v3183_v48, %v3191_v49  ;;  %v3294_v48 = vld [vmem:[#allocation9 + $0x1930] sm:$0xff] }
 0x5f7   : > { %9843 = vmatpush1.bf16.msra.mxu0 %v11230_v21  ;;  %v3206_v21 = vld [vmem:[#allocation9 + $0x1670] sm:$0xff] }
 0x5f8   : > { %10015 = vmatpush1.bf16.msra.mxu1 %v11232_v60  ;;  %9844 = vmatprep.subr.bf16.mxu0 %v11247_v61  ;;  %v3199_v60 = vld [vmem:[#allocation9 + $0x1638] sm:$0xff]  ;;  %v11359_v0 = vcombine.high %v3198_v59, %v3206_v21  ;;  %v3302_v49 = vld [vmem:[#allocation9 + $0x1970] sm:$0xff] }
 0x5f9   : > { %10016 = vmatprep.subr.bf16.mxu1 %v11249_v62  ;;  %v3207_v61 = vld [vmem:[#allocation9 + $0x1678] sm:$0xff]  ;;  %v11342_v62 = vcombine.low %v3182_v47, %v3190_v55 }
 0x5fa   : > { %v11361_v1 = vcombine.high %v3199_v60, %v3207_v61  ;;  %v11360_v20 = vcombine.low %v3199_v60, %v3207_v61  ;;  %v3310_v61 = vld [vmem:[#allocation9 + $0x19b0] sm:$0xff] }
 0x5fb   : > { %9845 = vmatpush1.bf16.msra.mxu0 %v11246_v2  ;;  %v3222_v2 = vld [vmem:[#allocation9 + $0x16f0] sm:$0xff] }
 0x5fc   : > { %10017 = vmatpush1.bf16.msra.mxu1 %v11248_v4  ;;  %9846 = vmatprep.subr.bf16.mxu0 %v11263_v5  ;;  %v3215_v4 = vld [vmem:[#allocation9 + $0x16b8] sm:$0xff]  ;;  %v11375_v8 = vcombine.high %v3214_v3, %v3222_v2 }
 0x5fd   : > { %10018 = vmatprep.subr.bf16.mxu1 %v11265_v7  ;;  %v3223_v5 = vld [vmem:[#allocation9 + $0x16f8] sm:$0xff]  ;;  %v11358_v7 = vcombine.low %v3198_v59, %v3206_v21  ;;  %v11455_v21 = vcombine.high %v3294_v48, %v3302_v49 }
 0x5fe   : > { %v11377_v9 = vcombine.high %v3215_v4, %v3223_v5  ;;  %v11376_v14 = vcombine.low %v3215_v4, %v3223_v5  ;;  %v3326_v4 = vld [vmem:[#allocation9 + $0x1a30] sm:$0xff] }
 0x5ff   : > { %9847 = vmatpush1.bf16.msra.mxu0 %v11262_v11  ;;  %v3238_v11 = vld [vmem:[#allocation9 + $0x1770] sm:$0xff] }
 0x600   : > { %10019 = vmatpush1.bf16.msra.mxu1 %v11264_v12  ;;  %9848 = vmatprep.subr.bf16.mxu0 %v11279_v13  ;;  %v3231_v12 = vld [vmem:[#allocation9 + $0x1738] sm:$0xff]  ;;  %v11391_v53 = vcombine.high %v3230_v10, %v3238_v11  ;;  %v3334_v5 = vld [vmem:[#allocation9 + $0x1a70] sm:$0xff] }
 0x601   : > { %10020 = vmatprep.subr.bf16.mxu1 %v11281_v31  ;;  %v3239_v13 = vld [vmem:[#allocation9 + $0x1778] sm:$0xff]  ;;  %v11374_v31 = vcombine.low %v3214_v3, %v3222_v2 }
 0x602   : > { %v11393_v15 = vcombine.high %v3231_v12, %v3239_v13  ;;  %v11392_v27 = vcombine.low %v3231_v12, %v3239_v13  ;;  %v3350_v12 = vld [vmem:[#allocation9 + $0x1af0] sm:$0xff]  ;;  %v3343_v13 = vld [vmem:[#allocation9 + $0x1ab8] sm:$0xff] }
 0x603   : > { %9849 = vmatpush1.bf16.msra.mxu0 %v11278_v17  ;;  %v3254_v17 = vld [vmem:[#allocation9 + $0x17f0] sm:$0xff] }
 0x604   : > { %10021 = vmatpush1.bf16.msra.mxu1 %v11280_v18  ;;  %9850 = vmatprep.subr.bf16.mxu0 %v11295_v19  ;;  %v3247_v18 = vld [vmem:[#allocation9 + $0x17b8] sm:$0xff]  ;;  %v11407_v29 = vcombine.high %v3246_v16, %v3254_v17 }
 0x605   : > { %10022 = vmatprep.subr.bf16.mxu1 %v11297_v25  ;;  %v3255_v19 = vld [vmem:[#allocation9 + $0x17f8] sm:$0xff]  ;;  %v11390_v25 = vcombine.low %v3230_v10, %v3238_v11  ;;  %v3342_v11 = vld [vmem:[#allocation9 + $0x1ab0] sm:$0xff] }
 0x606   : > { %v11409_v32 = vcombine.high %v3247_v18, %v3255_v19  ;;  %v11408_v38 = vcombine.low %v3247_v18, %v3255_v19  ;;  %v3358_v18 = vld [vmem:[#allocation9 + $0x1b30] sm:$0xff] }
 0x607   : > { %9851 = vmatpush1.bf16.msra.mxu0 %v11294_v36  ;;  %v3270_v36 = vld [vmem:[#allocation9 + $0x1870] sm:$0xff] }
 0x608   : > { %10023 = vmatpush1.bf16.msra.mxu1 %v11296_v37  ;;  %9852 = vmatprep.subr.bf16.mxu0 %v11311_v34  ;;  %v3263_v37 = vld [vmem:[#allocation9 + $0x1838] sm:$0xff]  ;;  %v11423_v39 = vcombine.high %v3262_v33, %v3270_v36  ;;  %v3366_v19 = vld [vmem:[#allocation9 + $0x1b70] sm:$0xff] }
 0x609   : > { %10024 = vmatprep.subr.bf16.mxu1 %v11313_v35  ;;  %v3271_v34 = vld [vmem:[#allocation9 + $0x1878] sm:$0xff]  ;;  %v11406_v35 = vcombine.low %v3246_v16, %v3254_v17  ;;  %v11503_v16 = vcombine.high %v3342_v11, %v3350_v12 }
 0x60a   : > { %v11425_v23 = vcombine.high %v3263_v37, %v3271_v34  ;;  %v11424_v47 = vcombine.low %v3263_v37, %v3271_v34 }
 0x60b   : > { %9853 = vmatpush1.bf16.msra.mxu0 %v11310_v41  ;;  %v3286_v41 = vld [vmem:[#allocation9 + $0x18f0] sm:$0xff] }
 0x60c   : > { %10025 = vmatpush1.bf16.msra.mxu1 %v11312_v30  ;;  %9854 = vmatprep.subr.bf16.mxu0 %v11327_v56  ;;  %v11422_v30 = vcombine.low %v3262_v33, %v3270_v36  ;;  %v3279_v56 = vld [vmem:[#allocation9 + $0x18b8] sm:$0xff]  ;;  %v11439_v55 = vcombine.high %v3278_v40, %v3286_v41  ;;  %v11502_v36 = vcombine.low %v3342_v11, %v3350_v12 }
 0x60d   : > { %10026 = vmatprep.subr.bf16.mxu1 %v11329_v42  ;;  %v3287_v42 = vld [vmem:[#allocation9 + $0x18f8] sm:$0xff] }
 0x60e   : > { %v11440_v59 = vcombine.low %v3279_v56, %v3287_v42 }
 0x60f   : > { %9855 = vmatpush1.bf16.msra.mxu0 %v11326_v51  ;;  %v11441_v51 = vcombine.high %v3279_v56, %v3287_v42  ;;  %v11518_v42 = vcombine.low %v3358_v18, %v3366_v19 }
 0x610   : > { %10027 = vmatpush1.bf16.msra.mxu1 %v11328_v52  ;;  %9856 = vmatprep.subr.bf16.mxu0 %v11343_v6  ;;  %v3295_v52 = vld [vmem:[#allocation9 + $0x1938] sm:$0xff] }
 0x611   : > { %10028 = vmatprep.subr.bf16.mxu1 %v11345_v57  ;;  %v3303_v6 = vld [vmem:[#allocation9 + $0x1978] sm:$0xff]  ;;  %v11438_v57 = vcombine.low %v3278_v40, %v3286_v41 }
 0x612   : > { %v11457_v60 = vcombine.high %v3295_v52, %v3303_v6  ;;  %v3375_v40 = vld [vmem:[#allocation9 + $0x1bb8] sm:$0xff] }
 0x613   : > { %9857 = vmatpush1.bf16.msra.mxu0 %v11342_v62  ;;  %v3318_v62 = vld [vmem:[#allocation9 + $0x19f0] sm:$0xff]  ;;  %v3383_v41 = vld [vmem:[#allocation9 + $0x1bf8] sm:$0xff] }
 0x614   : > { %10029 = vmatpush1.bf16.msra.mxu1 %v11344_v63  ;;  %9858 = vmatprep.subr.bf16.mxu0 %v11359_v0  ;;  %v3311_v63 = vld [vmem:[#allocation9 + $0x19b8] sm:$0xff]  ;;  %v11471_v3 = vcombine.high %v3310_v61, %v3318_v62  ;;  %v11536_v12 = vcombine.low %v3375_v40, %v3383_v41 }
 0x615   : > { %10030 = vmatprep.subr.bf16.mxu1 %v11361_v1  ;;  %v3319_v0 = vld [vmem:[#allocation9 + $0x19f8] sm:$0xff]  ;;  %v11454_v1 = vcombine.low %v3294_v48, %v3302_v49 }
 0x616   : > { %v11473_v2 = vcombine.high %v3311_v63, %v3319_v0 }
 0x617   : > { %9859 = vmatpush1.bf16.msra.mxu0 %v11358_v7  ;;  %v3327_v7 = vld [vmem:[#allocation9 + $0x1a38] sm:$0xff] }
 0x618   : > { %10031 = vmatpush1.bf16.msra.mxu1 %v11360_v20  ;;  %9860 = vmatprep.subr.bf16.mxu0 %v11375_v8  ;;  %v3335_v20 = vld [vmem:[#allocation9 + $0x1a78] sm:$0xff]  ;;  %v11472_v8 = vcombine.low %v3311_v63, %v3319_v0 }
 0x619   : > { %10032 = vmatprep.subr.bf16.mxu1 %v11377_v9  ;;  %v11487_v9 = vcombine.high %v3326_v4, %v3334_v5  ;;  %v11489_v10 = vcombine.high %v3327_v7, %v3335_v20 }
 0x61b   : > { %9861 = vmatpush1.bf16.msra.mxu0 %v11374_v31  ;;  %v3351_v31 = vld [vmem:[#allocation9 + $0x1af8] sm:$0xff] }
 0x61c   : > { %10033 = vmatpush1.bf16.msra.mxu1 %v11376_v14  ;;  %9862 = vmatprep.subr.bf16.mxu0 %v11391_v53  ;;  %v11486_v14 = vcombine.low %v3326_v4, %v3334_v5  ;;  %v12595_v53 = vld [vmem:[#allocation10 + $0x8] sm:$0xff]  ;;  %v11505_v17 = vcombine.high %v3343_v13, %v3351_v31  ;;  %v11504_v34 = vcombine.low %v3343_v13, %v3351_v31  ;;  %v3391_v5 = vld [vmem:[#allocation9 + $0x1c38] sm:$0xff] }
 0x61d   : > { %10034 = vmatprep.subr.bf16.mxu1 %v11393_v15  ;;  %v11488_v15 = vcombine.low %v3327_v7, %v3335_v20  ;;  %v3555_v33 = vrot.slane %v12595_v53, %v12397_v24  ;;  %v3563_v37 = vrot.slane %v12595_v53, %v12405_v28  ;;  %v3399_v7 = vld [vmem:[#allocation9 + $0x1c78] sm:$0xff] }
 0x61f   : > { %9863 = vmatpush1.bf16.msra.mxu0 %v11390_v25  ;;  %v3551_v25 = vrot.slane %v12595_v53, %v12394_v22 }
 0x620   : > { %10035 = vmatpush1.bf16.msra.mxu1 %v11392_v27  ;;  %9864 = vmatprep.subr.bf16.mxu0 %v11407_v29  ;;  %v3359_v27 = vld [vmem:[#allocation9 + $0x1b38] sm:$0xff] }
 0x621   : > { %10036 = vmatprep.subr.bf16.mxu1 %v11409_v32  ;;  %v3367_v29 = vld [vmem:[#allocation9 + $0x1b78] sm:$0xff]  ;;  %v3559_v32 = vrot.slane %v12595_v53, %v12401_v26 }
 0x622   : > { %v11520_v28 = vcombine.low %v3359_v27, %v3367_v29 }
 0x623   : > { %9865 = vmatpush1.bf16.msra.mxu0 %v11406_v35  ;;  %v11519_v35 = vcombine.high %v3358_v18, %v3366_v19  ;;  %v3407_v18 = vld [vmem:[#allocation9 + $0x1cb8] sm:$0xff] }
 0x624   : > { %10037 = vmatpush1.bf16.msra.mxu1 %v11408_v38  ;;  %9877 = vmatprep.subr.bf16.mxu0 %v11423_v39  ;;  %v3374_v38 = vld [vmem:[#allocation9 + $0x1bb0] sm:$0xff]  ;;  %v3415_v19 = vld [vmem:[#allocation9 + $0x1cf8] sm:$0xff] }
 0x625   : > { %10049 = vmatprep.subr.bf16.mxu1 %v11425_v23  ;;  %v3382_v39 = vld [vmem:[#allocation9 + $0x1bf0] sm:$0xff]  ;;  %v11521_v23 = vcombine.high %v3359_v27, %v3367_v29  ;;  %v11552_v27 = vcombine.low %v3391_v5, %v3399_v7 }
 0x626   : > { %9867 = vmatmul.mubr.bf16.vlgmr.msra.gmra.mrb[24].mxu0 %v12495_v44  ;;  %v11535_v49 = vcombine.high %v3374_v38, %v3382_v39 }
 0x627   : > { %10039 = vmatmul.mubr.bf16.vlgmr.msra.gmra.mrb[24].mxu1 %v12495_v44  ;;  %9878 = vmatpush1.bf16.msra.mxu0 %v11422_v30  ;;  %v11456_v44 = vcombine.low %v3295_v52, %v3303_v6 }
 0x628   : > { %9909 = vmatprep.mubr.bf16.mxu0 %v12501_v58  ;;  %10050 = vmatpush1.bf16.msra.mxu1 %v11424_v47 }
 0x629   : > { %10081 = vmatprep.mubr.bf16.mxu1 %v12501_v58  ;;  %9879 = vmatprep.subr.bf16.mxu0 %v11439_v55  ;;  %v11470_v58 = vcombine.low %v3310_v61, %v3318_v62 }
 0x62a   : > { %10051 = vmatprep.subr.bf16.mxu1 %v11441_v51 }
 0x62b   : > { %9880 = vmatpush1.bf16.msra.mxu0 %v11438_v57 }
 0x62c   : > { %10052 = vmatpush1.bf16.msra.mxu1 %v11440_v59  ;;  %9881 = vmatprep.subr.bf16.mxu0 %v11455_v21  ;;  %v11537_v21 = vcombine.high %v3375_v40, %v3383_v41  ;;  %v3446_v40 = vld [vmem:[#allocation9 + $0x1df0] sm:$0xff]  ;;  %v3439_v41 = vld [vmem:[#allocation9 + $0x1db8] sm:$0xff] }
 0x62d   : > { %10053 = vmatprep.subr.bf16.mxu1 %v11457_v60 }
 0x62f   : > { %9882 = vmatpush1.bf16.msra.mxu0 %v11454_v1  ;;  %v3390_v1 = vld [vmem:[#allocation9 + $0x1c30] sm:$0xff] }
 0x630   : > { %10054 = vmatpush1.bf16.msra.mxu1 %v11456_v44  ;;  %9883 = vmatprep.subr.bf16.mxu0 %v11471_v3  ;;  %v3398_v44 = vld [vmem:[#allocation9 + $0x1c70] sm:$0xff] }
 0x631   : > { %10055 = vmatprep.subr.bf16.mxu1 %v11473_v2  ;;  %v11551_v13 = vcombine.high %v3390_v1, %v3398_v44 }
 0x633   : > { %9884 = vmatpush1.bf16.msra.mxu0 %v11470_v58 }
 0x634   : > { %10056 = vmatpush1.bf16.msra.mxu1 %v11472_v8  ;;  %9885 = vmatprep.subr.bf16.mxu0 %v11487_v9  ;;  %v11534_v9 = vcombine.low %v3374_v38, %v3382_v39  ;;  %v11568_v38 = vcombine.low %v3407_v18, %v3415_v19 }
 0x635   : > { %10057 = vmatprep.subr.bf16.mxu1 %v11489_v10 }
 0x637   : > { %9886 = vmatpush1.bf16.msra.mxu0 %v11486_v14  ;;  %v11553_v14 = vcombine.high %v3391_v5, %v3399_v7 }
 0x638   : > { %10058 = vmatpush1.bf16.msra.mxu1 %v11488_v15  ;;  %9887 = vmatprep.subr.bf16.mxu0 %v11503_v16  ;;  %v3406_v15 = vld [vmem:[#allocation9 + $0x1cb0] sm:$0xff] }
 0x639   : > { %v9567_v22 = vpop.f32.mrb[20].mxu0  ;;  %10059 = vmatprep.subr.bf16.mxu1 %v11505_v17  ;;  %v3414_v16 = vld [vmem:[#allocation9 + $0x1cf0] sm:$0xff] }
 0x63a   : > { %v11733_v30 = vadd.f32 %v9567_v22, %v3551_v25  ;;  %v9739_v26 = vpop.f32.mrb[20].mxu1  ;;  %v9569_v56 = vpop.f32.mrb[21].mxu0  ;;  %v11567_v29 = vcombine.high %v3406_v15, %v3414_v16 }
 0x63b   : > { %v11737_v24 = vadd.f32 %v9739_v26, %v3559_v32  ;;  %v11734_v47 = vadd.f32 %v9569_v56, %v3555_v33  ;;  %v9741_v55 = vpop.f32.mrb[21].mxu1  ;;  %v9571_v48 = vpop.f32.mrb[22].mxu0  ;;  %9888 = vmatpush1.bf16.msra.mxu0 %v11502_v36  ;;  %v3430_v36 = vld [vmem:[#allocation9 + $0x1d70] sm:$0xff] }
 0x63c   : > { %v10100_v51 = vmax.f32 %v11733_v30, 0.0  ;;  %v11738_v52 = vadd.f32 %v9741_v55, %v3563_v37  ;;  %v11735_v6 = vadd.f32 %v9571_v48, %v3551_v25  ;;  %v9743_v57 = vpop.f32.mrb[22].mxu1  ;;  %10060 = vmatpush1.bf16.msra.mxu1 %v11504_v34  ;;  %v9573_v59 = vpop.f32.mrb[23].mxu0  ;;  %9889 = vmatprep.subr.bf16.mxu0 %v11519_v35  ;;  %v11550_v25 = vcombine.low %v3390_v1, %v3398_v44  ;;  %v3431_v34 = vld [vmem:[#allocation9 + $0x1d78] sm:$0xff]  ;;  %v3462_v55 = vld [vmem:[#allocation9 + $0x1e70] sm:$0xff] }
 0x63d   : > { %v10102_v60 = vmax.f32 %v11737_v24, 0.0  ;;  %v10101_v61 = vmax.f32 %v11734_v47, 0.0  ;;  %v11739_v62 = vadd.f32 %v9743_v57, %v3559_v32  ;;  %v11736_v63 = vadd.f32 %v9573_v59, %v3555_v33  ;;  %v9745_v0 = vpop.f32.mrb[23].mxu1  ;;  %10061 = vmatprep.subr.bf16.mxu1 %v11521_v23  ;;  %v3422_v33 = vld [vmem:[#allocation9 + $0x1d30] sm:$0xff]  ;;  %v3447_v30 = vld [vmem:[#allocation9 + $0x1df8] sm:$0xff] }
 0x63e   : > { %v10103_v3 = vmax.f32 %v11738_v52, 0.0  ;;  %v10116_v2 = vmax.f32 %v11735_v6, 0.0  ;;  %v11740_v4 = vadd.f32 %v9745_v0, %v3563_v37  ;;  %v11569_v32 = vcombine.high %v3407_v18, %v3415_v19  ;;  %v3423_v37 = vld [vmem:[#allocation9 + $0x1d38] sm:$0xff]  ;;  %v3438_v23 = vld [vmem:[#allocation9 + $0x1db0] sm:$0xff] }
 0x63f   : > { %v11689_v20 = vpack.c.bf16 %v10101_v61, %v10100_v51  ;;  %v10118_v58 = vmax.f32 %v11739_v62, 0.0  ;;  %v10117_v8 = vmax.f32 %v11736_v63, 0.0  ;;  %9890 = vmatpush1.bf16.msra.mxu0 %v11518_v42  ;;  %v11566_v35 = vcombine.low %v3406_v15, %v3414_v16  ;;  %v3454_v47 = vld [vmem:[#allocation9 + $0x1e30] sm:$0xff]  ;;  %v3455_v48 = vld [vmem:[#allocation9 + $0x1e38] sm:$0xff] }
 0x640   : > { %v11690_v10 = vpack.c.bf16 %v10103_v3, %v10102_v60  ;;  %v10119_v11 = vmax.f32 %v11740_v4, 0.0  ;;  %10062 = vmatpush1.bf16.msra.mxu1 %v11520_v28  ;;  %9891 = vmatprep.subr.bf16.mxu0 %v11535_v49  ;;  %v11583_v39 = vcombine.high %v3422_v33, %v3430_v36  ;;  %v11585_v22 = vcombine.high %v3423_v37, %v3431_v34  ;;  %v3463_v28 = vld [vmem:[#allocation9 + $0x1e78] sm:$0xff]  ;;  %v3470_v57 = vld [vmem:[#allocation9 + $0x1eb0] sm:$0xff] }
 0x641   : > { %10224 = vst [vmem:[%s12545_s30 + $0x20] sm:$0xff] %v11689_v20  ;;  %v11697_v31 = vpack.c.bf16 %v10117_v8, %v10116_v2  ;;  %10063 = vmatprep.subr.bf16.mxu1 %v11537_v21  ;;  %v11582_v26 = vcombine.low %v3422_v33, %v3430_v36  ;;  %v11584_v56 = vcombine.low %v3423_v37, %v3431_v34  ;;  %v3478_v59 = vld [vmem:[#allocation9 + $0x1ef0] sm:$0xff]  ;;  %v3471_v21 = vld [vmem:[#allocation9 + $0x1eb8] sm:$0xff] }
 0x642   : > { %10225 = vst [vmem:[%s12545_s30 + $0x28] sm:$0xff] %v11690_v10  ;;  %v11698_v17 = vpack.c.bf16 %v10119_v11, %v10118_v58  ;;  %v11599_v42 = vcombine.high %v3438_v23, %v3446_v40  ;;  %v11601_v24 = vcombine.high %v3439_v41, %v3447_v30  ;;  %v11598_v49 = vcombine.low %v3438_v23, %v3446_v40  ;;  %v3479_v60 = vld [vmem:[#allocation9 + $0x1ef8] sm:$0xff]  ;;  %v3486_v1 = vld [vmem:[#allocation9 + $0x1f30] sm:$0xff] }
 0x643   : > { %10232 = vst [vmem:[%s12545_s30 + $0x60] sm:$0xff] %v11697_v31  ;;  %9892 = vmatpush1.bf16.msra.mxu0 %v11534_v9  ;;  %v11600_v51 = vcombine.low %v3439_v41, %v3447_v30  ;;  %v11615_v52 = vcombine.high %v3454_v47, %v3462_v55  ;;  %v11617_v6 = vcombine.high %v3455_v48, %v3463_v28  ;;  %v3494_v44 = vld [vmem:[#allocation9 + $0x1f70] sm:$0xff]  ;;  %v3487_v3 = vld [vmem:[#allocation9 + $0x1f38] sm:$0xff] }
 0x644   : > { %10233 = vst [vmem:[%s12545_s30 + $0x68] sm:$0xff] %v11698_v17  ;;  %10064 = vmatpush1.bf16.msra.mxu1 %v11536_v12  ;;  %9893 = vmatprep.subr.bf16.mxu0 %v11551_v13  ;;  %v11614_v61 = vcombine.low %v3454_v47, %v3462_v55  ;;  %v11616_v62 = vcombine.low %v3455_v48, %v3463_v28  ;;  %v3495_v2 = vld [vmem:[#allocation9 + $0x1f78] sm:$0xff]  ;;  %v3502_v58 = vld [vmem:[#allocation9 + $0x1fb0] sm:$0xff] }
 0x645   : > { %10065 = vmatprep.subr.bf16.mxu1 %v11553_v14  ;;  %v11631_v63 = vcombine.high %v3470_v57, %v3478_v59  ;;  %v11633_v0 = vcombine.high %v3471_v21, %v3479_v60  ;;  %v11630_v4 = vcombine.low %v3470_v57, %v3478_v59  ;;  %v11632_v5 = vcombine.low %v3471_v21, %v3479_v60  ;;  %v3510_v8 = vld [vmem:[#allocation9 + $0x1ff0] sm:$0xff]  ;;  %v3503_v9 = vld [vmem:[#allocation9 + $0x1fb8] sm:$0xff] }
 0x646   : > { %v11647_v7 = vcombine.high %v3486_v1, %v3494_v44  ;;  %v11649_v20 = vcombine.high %v3487_v3, %v3495_v2  ;;  %v3511_v10 = vld [vmem:[#allocation9 + $0x1ff8] sm:$0xff]  ;;  %v11646_v11 = vcombine.low %v3486_v1, %v3494_v44  ;;  %v11648_v12 = vcombine.low %v3487_v3, %v3495_v2 }
 0x647   : > { %9894 = vmatpush1.bf16.msra.mxu0 %v11550_v25  ;;  %v11663_v13 = vcombine.high %v3502_v58, %v3510_v8  ;;  %v11665_v31 = vcombine.high %v3503_v9, %v3511_v10  ;;  %v11662_v14 = vcombine.low %v3502_v58, %v3510_v8  ;;  %v11664_v15 = vcombine.low %v3503_v9, %v3511_v10 }
 0x648   : > { %10066 = vmatpush1.bf16.msra.mxu1 %v11552_v27  ;;  %9895 = vmatprep.subr.bf16.mxu0 %v11567_v29  ;;  %v3567_v16 = vrot.slane %v12595_v53, %v12476_v43  ;;  %v3575_v17 = vrot.slane %v12595_v53, %v12479_v45  ;;  %v3571_v18 = vrot.slane %v12595_v53, %v12482_v46 }
 0x649   : > { %10067 = vmatprep.subr.bf16.mxu1 %v11569_v32  ;;  %v3579_v19 = vrot.slane %v12595_v53, %v12485_v50 }
 0x64b   : > { %9896 = vmatpush1.bf16.msra.mxu0 %v11566_v35 }
 0x64c   : > { %10068 = vmatpush1.bf16.msra.mxu1 %v11568_v38  ;;  %9897 = vmatprep.subr.bf16.mxu0 %v11583_v39 }
 0x64d   : > { %10069 = vmatprep.subr.bf16.mxu1 %v11585_v22 }
 0x64f   : > { %9898 = vmatpush1.bf16.msra.mxu0 %v11582_v26 }
 0x650   : > { %10070 = vmatpush1.bf16.msra.mxu1 %v11584_v56  ;;  %9899 = vmatprep.subr.bf16.mxu0 %v11599_v42 }
 0x651   : > { %10071 = vmatprep.subr.bf16.mxu1 %v11601_v24 }
 0x653   : > { %9900 = vmatpush1.bf16.msra.mxu0 %v11598_v49 }
 0x654   : > { %10072 = vmatpush1.bf16.msra.mxu1 %v11600_v51  ;;  %9901 = vmatprep.subr.bf16.mxu0 %v11615_v52 }
 0x655   : > { %10073 = vmatprep.subr.bf16.mxu1 %v11617_v6 }
 0x657   : > { %9902 = vmatpush1.bf16.msra.mxu0 %v11614_v61 }
 0x658   : > { %10074 = vmatpush1.bf16.msra.mxu1 %v11616_v62  ;;  %9903 = vmatprep.subr.bf16.mxu0 %v11631_v63 }
 0x659   : > { %10075 = vmatprep.subr.bf16.mxu1 %v11633_v0 }
 0x65b   : > { %9904 = vmatpush1.bf16.msra.mxu0 %v11630_v4 }
 0x65c   : > { %10076 = vmatpush1.bf16.msra.mxu1 %v11632_v5  ;;  %9905 = vmatprep.subr.bf16.mxu0 %v11647_v7 }
 0x65d   : > { %10077 = vmatprep.subr.bf16.mxu1 %v11649_v20 }
 0x65f   : > { %9906 = vmatpush1.bf16.msra.mxu0 %v11646_v11 }
 0x660   : > { %10078 = vmatpush1.bf16.msra.mxu1 %v11648_v12  ;;  %9907 = vmatprep.subr.bf16.mxu0 %v11663_v13 }
 0x661   : > { %10079 = vmatprep.subr.bf16.mxu1 %v11665_v31 }
 0x663   : > { %9908 = vmatpush1.bf16.msra.mxu0 %v11662_v14 }
 0x664   : > { %10080 = vmatpush1.bf16.msra.mxu1 %v11664_v15 }
 0x666   : > { %9910 = vmatmul.mubr.bf16.vlgmr.msra.gmra.mrb[24].mxu0 %v12497_v54 }
 0x667   : > { %10082 = vmatmul.mubr.bf16.vlgmr.msra.gmra.mrb[24].mxu1 %v12497_v54 }
 0x739   : > { %v9911_v25 = vpop.f32.mrb[24].mxu0 }
 0x73a   : > { %v11741_v27 = vadd.f32 %v9911_v25, %v3567_v16  ;;  %v10083_v29 = vpop.f32.mrb[24].mxu1  ;;  %v9913_v32 = vpop.f32.mrb[25].mxu0 }
 0x73b   : > { %v11745_v33 = vadd.f32 %v10083_v29, %v3575_v17  ;;  %v11742_v36 = vadd.f32 %v9913_v32, %v3571_v18  ;;  %v10085_v37 = vpop.f32.mrb[25].mxu1  ;;  %v9915_v54 = vpop.f32.mrb[26].mxu0 }
 0x73c   : > { %v10104_v34 = vmax.f32 %v11741_v27, 0.0  ;;  %v11746_v35 = vadd.f32 %v10085_v37, %v3579_v19  ;;  %v11743_v43 = vadd.f32 %v9915_v54, %v3567_v16  ;;  %v10087_v38 = vpop.f32.mrb[26].mxu1  ;;  %v9917_v45 = vpop.f32.mrb[27].mxu0 }
 0x73d   : > { %v10106_v39 = vmax.f32 %v11745_v33, 0.0  ;;  %v10105_v46 = vmax.f32 %v11742_v36, 0.0  ;;  %v11747_v22 = vadd.f32 %v10087_v38, %v3575_v17  ;;  %v11744_v50 = vadd.f32 %v9917_v45, %v3571_v18  ;;  %v10089_v53 = vpop.f32.mrb[27].mxu1 }
 0x73e   : > { %v10107_v23 = vmax.f32 %v11746_v35, 0.0  ;;  %v10120_v40 = vmax.f32 %v11743_v43, 0.0  ;;  %v11748_v41 = vadd.f32 %v10089_v53, %v3579_v19 }
 0x73f   : > { %v11691_v30 = vpack.c.bf16 %v10105_v46, %v10104_v34  ;;  %v10122_v26 = vmax.f32 %v11747_v22, 0.0  ;;  %v10121_v56 = vmax.f32 %v11744_v50, 0.0 }
 0x740   : > { %v11692_v42 = vpack.c.bf16 %v10107_v23, %v10106_v39  ;;  %v10123_v24 = vmax.f32 %v11748_v41, 0.0 }
 0x741   : > { %10226 = vst [vmem:[%s12545_s30 + $0x30] sm:$0xff] %v11691_v30  ;;  %v11699_v47 = vpack.c.bf16 %v10121_v56, %v10120_v40 }
 0x742   : > { %10227 = vst [vmem:[%s12545_s30 + $0x38] sm:$0xff] %v11692_v42  ;;  %v11700_v55 = vpack.c.bf16 %v10123_v24, %v10122_v26 }
 0x743   : > { %10234 = vst [vmem:[%s12545_s30 + $0x70] sm:$0xff] %v11699_v47 }
 0x744   : > { %10235 = vst [vmem:[%s12545_s30 + $0x78] sm:$0xff] %v11700_v55 }
 0x745 PF: > { %s21_s24 = sadd.s32 1, %s12140_s24  }
 0x746   : > { %p18_p7 = scmp.ge.s32.totalorder %s21_s24, 4  }
 0x748   :  { %20 = sbr.rel (!%p18_p7) target bundleno = 4 (0x4), region = 103 }
 0x74f   :  { %10260 = vsyncpa [#allocation3], 1 }
 0x750   :  { %10262 = vsyncpa [#allocation3 + $0x1], 1 }
 0x751   :  { %10263 = vsyncpa [#allocation5], 1 }
 0x752   :  { %10264 = vsyncpa [#allocation8], 1 }
 0x753   :  { %10265 = vsyncpa [#allocation11], 1 }

</bundles_post_ra>
